<compile_context>
chip_gen: v5e
topology: v5e:2x2
jax: 0.10.0
libtpu: 0.0.40
codegen_flags: <defaults>
</compile_context>

<pallas_src>
import functools

import jax
import jax.numpy as jnp
from jax.experimental import pallas as pl
from jax.experimental.pallas import tpu as pltpu


# ----------------------------- Pallas kernel -----------------------------

def _make_conv_bn_kernel(n_src, n_mul):
    """Builds a kernel for a fused (multi-source concat) 3x3 conv + BN, with an
    optional elementwise-multiply epilogue.

    Ref order: xcol_0..xcol_{n_src-1}, w_0..w_{n_src-1}, scale, bias,
               mul_0..mul_{n_mul-1}, out.

      xcol_i : (9*Cin_i, Ntile)  bf16   im2col-packed source i (tap-major K)
      w_i    : (Cout, 9*Cin_i)   bf16   weight slice for source i
      scale  : (Cout, 1)         f32    gamma / sqrt(var + eps)
      bias   : (Cout, 1)         f32    beta - mean * scale
      mul_j  : (Cout, Ntile)     f32    elementwise epilogue operands
      out    : (Cout, Ntile)     f32    lane-dense (Ntile multiple of 128)
    """
    def kernel(*refs):
        xcol_refs = refs[0:n_src]
        w_refs = refs[n_src:2 * n_src]
        scale_ref = refs[2 * n_src]
        bias_ref = refs[2 * n_src + 1]
        mul_refs = refs[2 * n_src + 2:2 * n_src + 2 + n_mul]
        o_ref = refs[2 * n_src + 2 + n_mul]

        acc = jnp.dot(w_refs[0][...], xcol_refs[0][...],
                      preferred_element_type=jnp.float32)
        for i in range(1, n_src):
            acc = acc + jnp.dot(w_refs[i][...], xcol_refs[i][...],
                                preferred_element_type=jnp.float32)
        out = acc * scale_ref[...] + bias_ref[...]
        for m in mul_refs:
            out = out * m[...]
        o_ref[...] = out

    return kernel


# ----------------------------- packing glue -----------------------------

def _im2col(x_cbhw):
    """(C, B, H, W) f32 -> (9*C, B*H*W) bf16, tap-major / channel-minor rows."""
    C, B, H, W = x_cbhw.shape
    xp = jnp.pad(x_cbhw, ((0, 0), (0, 0), (1, 1), (1, 1)))
    cols = [xp[:, :, dy:dy + H, dx:dx + W].reshape(C, B * H * W)
            for dy in range(3) for dx in range(3)]
    return jnp.concatenate(cols, axis=0).astype(jnp.bfloat16)


def _pack_weight(w_full, off, ci):
    """Slice channels [off, off+ci) of a (3,3,Cin_total,Cout) weight and pack
    to (Cout, 9*ci) bf16 with the same tap-major K ordering as _im2col."""
    cout = w_full.shape[-1]
    w = w_full[:, :, off:off + ci, :]                      # (3, 3, ci, Cout)
    w = jnp.transpose(w, (3, 0, 1, 2)).reshape(cout, 9 * ci)
    return w.astype(jnp.bfloat16)


# ----------------------------- conv wrapper -----------------------------

def conv3x3_bn(sources, p, mul_operands=()):
    """Fused 3x3 conv (pad=1, no bias) + eval-mode BN (+ optional mul epilogue).

    sources      : list of (Ci, B, H, W) f32 tensors (implicit channel concat)
    p            : {'w': (3,3,sum Ci,Cout), 'scale': (Cout,), 'bias': (Cout,)}
    mul_operands : tuple of (Cout, B, H, W) f32 tensors multiplied after BN
    returns      : (Cout, B, H, W) f32
    """
    sources = list(sources)
    B, H, W = sources[0].shape[1:]
    N = B * H * W
    Cout = p['scale'].shape[0]

    # lane-dense N tiles; split in two when possible so v7x can use both TCs
    tile_n = 256 if (N > 256 and N % 256 == 0) else N
    n_tiles = N // tile_n

    xcols, ws = [], []
    off = 0
    for s in sources:
        ci = s.shape[0]
        xcols.append(_im2col(s))
        ws.append(_pack_weight(p['w'], off, ci))
        off += ci

    scale = p['scale'].reshape(Cout, 1).astype(jnp.float32)
    bias = p['bias'].reshape(Cout, 1).astype(jnp.float32)
    muls = [m.reshape(Cout, N).astype(jnp.float32) for m in mul_operands]

    n_src, n_mul = len(sources), len(muls)
    kernel = _make_conv_bn_kernel(n_src, n_mul)

    in_specs = (
        [pl.BlockSpec((9 * s.shape[0], tile_n), lambda n: (0, n))
         for s in sources]
        + [pl.BlockSpec((Cout, 9 * s.shape[0]), lambda n: (0, 0))
           for s in sources]
        + [pl.BlockSpec((Cout, 1), lambda n: (0, 0))] * 2
        + [pl.BlockSpec((Cout, tile_n), lambda n: (0, n))] * n_mul
    )

    out = pl.pallas_call(
        kernel,
        out_shape=jax.ShapeDtypeStruct((Cout, N), jnp.float32),
        grid=(n_tiles,),
        in_specs=in_specs,
        out_specs=pl.BlockSpec((Cout, tile_n), lambda n: (0, n)),
        compiler_params=pltpu.CompilerParams(
            dimension_semantics=("parallel",)),
    )(*xcols, *ws, scale, bias, *muls)
    return out.reshape(Cout, B, H, W)


# ----------------------------- plain-JAX glue -----------------------------

def _upsample_matrix(n_in, n_out):
    """Interpolation matrix for bilinear upsample, align_corners=True."""
    if n_in == 1:
        return jnp.ones((n_out, 1), jnp.float32)
    src = jnp.arange(n_out, dtype=jnp.float32) * (n_in - 1) / (n_out - 1)
    i0 = jnp.clip(jnp.floor(src).astype(jnp.int32), 0, n_in - 2)
    frac = src - i0.astype(jnp.float32)
    m = jnp.zeros((n_out, n_in), jnp.float32)
    rows = jnp.arange(n_out)
    m = m.at[rows, i0].add(1.0 - frac)
    m = m.at[rows, i0 + 1].add(frac)
    return m


def upsample2x_bilinear(x_cbhw):
    """nn.Upsample(scale_factor=2, mode='bilinear', align_corners=True) on
    (C, B, H, W)."""
    C, B, H, W = x_cbhw.shape
    mh = _upsample_matrix(H, 2 * H)
    mw = _upsample_matrix(W, 2 * W)
    y = jnp.einsum('oh,cbhw->cbow', mh, x_cbhw)
    y = jnp.einsum('pw,cbhw->cbhp', mw, y)
    return y


# ----------------------------- parameters -----------------------------

def _init_conv_bn(key, cin, cout, eps=1e-5):
    kw, kg, kb, km, kv = jax.random.split(key, 5)
    fan_in = 9 * cin
    w = jax.random.normal(kw, (3, 3, cin, cout), jnp.float32) / jnp.sqrt(fan_in)
    gamma = jax.random.uniform(kg, (cout,), jnp.float32, 0.5, 1.5)
    beta = 0.1 * jax.random.normal(kb, (cout,), jnp.float32)
    mean = 0.1 * jax.random.normal(km, (cout,), jnp.float32)
    var = jax.random.uniform(kv, (cout,), jnp.float32, 0.5, 1.5)
    scale = gamma / jnp.sqrt(var + eps)
    bias = beta - mean * scale
    return {'w': w, 'scale': scale, 'bias': bias}


def init_cfm_params(key, channel):
    # Only the layers that reach the outputs; conv_upsample1/2/3, conv_concat2,
    # ca and sa never affect the returned tensors in CFM.forward.
    dims = {
        'conv_upsample4': (channel, channel),
        'conv_upsample5': (2 * channel, 2 * channel),
        'conv_change':    (channel, 2 * channel),
        'conv_concat3':   (4 * channel, 4 * channel),
        'conv_concat4':   (5 * channel, 5 * channel),
        'conv4':          (5 * channel, channel),
        'transconv':      (2 * channel, channel),
    }
    keys = jax.random.split(key, len(dims))
    return {name: _init_conv_bn(k, cin, cout)
            for k, (name, (cin, cout)) in zip(keys, dims.items())}


# ----------------------------- CFM forward -----------------------------

def cfm_forward(params, x1, x2, x3, t1, t2):
    # NCHW -> (C, B, H, W) working layout (spatial*batch flattened last, lane-dense).
    cf = lambda v: jnp.transpose(v, (1, 0, 2, 3))
    x1, x2, x3, t1, t2 = (cf(v) for v in (x1, x2, x3, t1, t2))

    # NOTE: the first assignments of x2_1 / x3_1 in the PyTorch forward are
    # immediately overwritten (dead code) and cannot affect the outputs.
    up_x1 = upsample2x_bilinear(x1)                     # (C, B, 8, 8)
    up_x2 = upsample2x_bilinear(x2)                     # (C, B, 16, 16)

    cu4_a = conv3x3_bn([up_x1], params['conv_upsample4'])   # (C, B, 8, 8)
    cu4_b = conv3x3_bn([up_x2], params['conv_upsample4'])   # (C, B, 16, 16)

    # x2_1 = cat(t2, cu4_a); upsample commutes with the channel concat, so the
    # concat is fused into conv_upsample5 as two sources.
    cu5 = conv3x3_bn([upsample2x_bilinear(t2), upsample2x_bilinear(cu4_a)],
                     params['conv_upsample5'])              # (2C, B, 16, 16)

    # x3_1 is reused (mul epilogue + transconv), so materialize the concat once.
    x3_1 = jnp.concatenate([t1, cu4_b], axis=0)             # (2C, B, 16, 16)

    # x3_2 = cu5 * x3_1 * conv_change(x3), fused as the conv_change epilogue.
    x3_2 = conv3x3_bn([x3], params['conv_change'],
                      mul_operands=(cu5, x3_1))             # (2C, B, 16, 16)

    cc3 = conv3x3_bn([x3_2, cu5], params['conv_concat3'])   # (4C, B, 16, 16)
    cc4 = conv3x3_bn([cc3, x3], params['conv_concat4'])     # (5C, B, 16, 16)
    out_x3_2 = conv3x3_bn([cc4], params['conv4'])           # (C, B, 16, 16)
    out_x3_1 = conv3x3_bn([x3_1], params['transconv'])      # (C, B, 16, 16)

    to_nchw = lambda v: jnp.transpose(v, (1, 0, 2, 3))
    return to_nchw(out_x3_2), to_nchw(out_x3_1)


# ----------------------------- main -----------------------------

if __name__ == "__main__":
    key = jax.random.PRNGKey(0)
    kp, k1, k2, k3, k4, k5 = jax.random.split(key, 6)

    B, C = 2, 16
    params = init_cfm_params(kp, C)

    # Shapes implied by the forward: x1 is the coarsest map, x2 = 2x, x3 = 4x;
    # t2 matches upsample(x1), t1 matches upsample(x2). All float32.
    x1 = jax.random.normal(k1, (B, C, 4, 4), jnp.float32)
    x2 = jax.random.normal(k2, (B, C, 8, 8), jnp.float32)
    x3 = jax.random.normal(k3, (B, C, 16, 16), jnp.float32)
    t1 = jax.random.normal(k4, (B, C, 16, 16), jnp.float32)
    t2 = jax.random.normal(k5, (B, C, 8, 8), jnp.float32)

    fwd = jax.jit(functools.partial(cfm_forward, params))
    out_x3_2, out_x3_1 = fwd(x1, x2, x3, t1, t2)
    jax.block_until_ready((out_x3_2, out_x3_1))

    assert out_x3_2.shape == (B, C, 16, 16), out_x3_2.shape
    assert out_x3_1.shape == (B, C, 16, 16), out_x3_1.shape
    assert jnp.all(jnp.isfinite(out_x3_2)) and jnp.all(jnp.isfinite(out_x3_1))
    print("KERNEL_OK")
</pallas_src>

<mosaic_0001>
module attributes {stable_mosaic.version = 11 : i64} {
  func.func @kernel(%arg0: i32, %arg1: memref<144x256xbf16, #tpu.memory_space<vmem>>, %arg2: memref<16x144xbf16, #tpu.memory_space<vmem>>, %arg3: memref<16x1xf32, #tpu.memory_space<vmem>>, %arg4: memref<16x1xf32, #tpu.memory_space<vmem>>, %arg5: memref<16x256xf32, #tpu.memory_space<vmem>>) attributes {dimension_semantics = [#tpu.dimension_semantics<parallel>], iteration_bounds = array<i64: 2>, scalar_prefetch = 0 : i64, scratch_operands = 0 : i64, tpu.core_type = #tpu.core_type<tc>, window_params = [{transform_indices = @transform_0, window_bounds = array<i64: 144, 256>}, {pipeline_mode = #tpu.pipeline_mode<synchronous>, transform_indices = @transform_1, window_bounds = array<i64: 16, 144>}, {pipeline_mode = #tpu.pipeline_mode<synchronous>, transform_indices = @transform_2, window_bounds = array<i64: 16, 1>}, {pipeline_mode = #tpu.pipeline_mode<synchronous>, transform_indices = @transform_3, window_bounds = array<i64: 16, 1>}, {transform_indices = @transform_4, window_bounds = array<i64: 16, 256>}]} {
    %c0 = arith.constant 0 : index
    %c0_0 = arith.constant 0 : index
    %0 = vector.load %arg2[%c0, %c0_0] : memref<16x144xbf16, #tpu.memory_space<vmem>>, vector<16x144xbf16>
    %c0_1 = arith.constant 0 : index
    %c0_2 = arith.constant 0 : index
    %1 = vector.load %arg1[%c0_1, %c0_2] : memref<144x256xbf16, #tpu.memory_space<vmem>>, vector<144x256xbf16>
    %cst = arith.constant dense<0.000000e+00> : vector<16x256xf32>
    %2 = tpu.matmul %0, %1, %cst {dimension_numbers = #tpu.dot_dimension_numbers<[1], [0], [0], [1], [0, 0, 1, 1], [], []>} : vector<16x144xbf16>, vector<144x256xbf16>, vector<16x256xf32> -> vector<16x256xf32>
    %c0_3 = arith.constant 0 : index
    %c0_4 = arith.constant 0 : index
    %3 = vector.load %arg3[%c0_3, %c0_4] : memref<16x1xf32, #tpu.memory_space<vmem>>, vector<16x1xf32>
    %4 = vector.broadcast %3 : vector<16x1xf32> to vector<16x256xf32>
    %5 = arith.mulf %2, %4 : vector<16x256xf32>
    %c0_5 = arith.constant 0 : index
    %c0_6 = arith.constant 0 : index
    %6 = vector.load %arg4[%c0_5, %c0_6] : memref<16x1xf32, #tpu.memory_space<vmem>>, vector<16x1xf32>
    %7 = vector.broadcast %6 : vector<16x1xf32> to vector<16x256xf32>
    %8 = arith.addf %5, %7 : vector<16x256xf32>
    %c0_7 = arith.constant 0 : index
    %c0_8 = arith.constant 0 : index
    %9 = vector.load %arg5[%c0_7, %c0_8] : memref<16x256xf32, #tpu.memory_space<vmem>>, vector<16x256xf32>
    tpu.vector_store %arg5[%c0_7, %c0_8], %8 {strides = array<i32>} : memref<16x256xf32, #tpu.memory_space<vmem>>, vector<16x256xf32>,
    return
  }
  func.func @transform_0(%arg0: i32) -> (i32, i32) {
    %c0_i32 = arith.constant 0 : i32
    %c0_i32_0 = arith.constant 0 : i32
    return %c0_i32, %arg0 : i32, i32
  }
  func.func @transform_1(%arg0: i32) -> (i32, i32) {
    %c0_i32 = arith.constant 0 : i32
    %c0_i32_0 = arith.constant 0 : i32
    %c0_i32_1 = arith.constant 0 : i32
    return %c0_i32, %c0_i32_0 : i32, i32
  }
  func.func @transform_2(%arg0: i32) -> (i32, i32) {
    %c0_i32 = arith.constant 0 : i32
    %c0_i32_0 = arith.constant 0 : i32
    %c0_i32_1 = arith.constant 0 : i32
    return %c0_i32, %c0_i32_0 : i32, i32
  }
  func.func @transform_3(%arg0: i32) -> (i32, i32) {
    %c0_i32 = arith.constant 0 : i32
    %c0_i32_0 = arith.constant 0 : i32
    %c0_i32_1 = arith.constant 0 : i32
    return %c0_i32, %c0_i32_0 : i32, i32
  }
  func.func @transform_4(%arg0: i32) -> (i32, i32) {
    %c0_i32 = arith.constant 0 : i32
    %c0_i32_0 = arith.constant 0 : i32
    return %c0_i32, %arg0 : i32, i32
  }
}

module attributes {stable_mosaic.version = 11 : i64} {
  func.func @kernel(%arg0: i32, %arg1: memref<288x256xbf16, #tpu.memory_space<vmem>>, %arg2: memref<16x288xbf16, #tpu.memory_space<vmem>>, %arg3: memref<16x1xf32, #tpu.memory_space<vmem>>, %arg4: memref<16x1xf32, #tpu.memory_space<vmem>>, %arg5: memref<16x256xf32, #tpu.memory_space<vmem>>) attributes {dimension_semantics = [#tpu.dimension_semantics<parallel>], iteration_bounds = array<i64: 2>, scalar_prefetch = 0 : i64, scratch_operands = 0 : i64, tpu.core_type = #tpu.core_type<tc>, window_params = [{transform_indices = @transform_0, window_bounds = array<i64: 288, 256>}, {pipeline_mode = #tpu.pipeline_mode<synchronous>, transform_indices = @transform_1, window_bounds = array<i64: 16, 288>}, {pipeline_mode = #tpu.pipeline_mode<synchronous>, transform_indices = @transform_2, window_bounds = array<i64: 16, 1>}, {pipeline_mode = #tpu.pipeline_mode<synchronous>, transform_indices = @transform_3, window_bounds = array<i64: 16, 1>}, {transform_indices = @transform_4, window_bounds = array<i64: 16, 256>}]} {
    %c0 = arith.constant 0 : index
    %c0_0 = arith.constant 0 : index
    %0 = vector.load %arg2[%c0, %c0_0] : memref<16x288xbf16, #tpu.memory_space<vmem>>, vector<16x288xbf16>
    %c0_1 = arith.constant 0 : index
    %c0_2 = arith.constant 0 : index
    %1 = vector.load %arg1[%c0_1, %c0_2] : memref<288x256xbf16, #tpu.memory_space<vmem>>, vector<288x256xbf16>
    %cst = arith.constant dense<0.000000e+00> : vector<16x256xf32>
    %2 = tpu.matmul %0, %1, %cst {dimension_numbers = #tpu.dot_dimension_numbers<[1], [0], [0], [1], [0, 0, 1, 1], [], []>} : vector<16x288xbf16>, vector<288x256xbf16>, vector<16x256xf32> -> vector<16x256xf32>
    %c0_3 = arith.constant 0 : index
    %c0_4 = arith.constant 0 : index
    %3 = vector.load %arg3[%c0_3, %c0_4] : memref<16x1xf32, #tpu.memory_space<vmem>>, vector<16x1xf32>
    %4 = vector.broadcast %3 : vector<16x1xf32> to vector<16x256xf32>
    %5 = arith.mulf %2, %4 : vector<16x256xf32>
    %c0_5 = arith.constant 0 : index
    %c0_6 = arith.constant 0 : index
    %6 = vector.load %arg4[%c0_5, %c0_6] : memref<16x1xf32, #tpu.memory_space<vmem>>, vector<16x1xf32>
    %7 = vector.broadcast %6 : vector<16x1xf32> to vector<16x256xf32>
    %8 = arith.addf %5, %7 : vector<16x256xf32>
    %c0_7 = arith.constant 0 : index
    %c0_8 = arith.constant 0 : index
    %9 = vector.load %arg5[%c0_7, %c0_8] : memref<16x256xf32, #tpu.memory_space<vmem>>, vector<16x256xf32>
    tpu.vector_store %arg5[%c0_7, %c0_8], %8 {strides = array<i32>} : memref<16x256xf32, #tpu.memory_space<vmem>>, vector<16x256xf32>,
    return
  }
  func.func @transform_0(%arg0: i32) -> (i32, i32) {
    %c0_i32 = arith.constant 0 : i32
    %c0_i32_0 = arith.constant 0 : i32
    return %c0_i32, %arg0 : i32, i32
  }
  func.func @transform_1(%arg0: i32) -> (i32, i32) {
    %c0_i32 = arith.constant 0 : i32
    %c0_i32_0 = arith.constant 0 : i32
    %c0_i32_1 = arith.constant 0 : i32
    return %c0_i32, %c0_i32_0 : i32, i32
  }
  func.func @transform_2(%arg0: i32) -> (i32, i32) {
    %c0_i32 = arith.constant 0 : i32
    %c0_i32_0 = arith.constant 0 : i32
    %c0_i32_1 = arith.constant 0 : i32
    return %c0_i32, %c0_i32_0 : i32, i32
  }
  func.func @transform_3(%arg0: i32) -> (i32, i32) {
    %c0_i32 = arith.constant 0 : i32
    %c0_i32_0 = arith.constant 0 : i32
    %c0_i32_1 = arith.constant 0 : i32
    return %c0_i32, %c0_i32_0 : i32, i32
  }
  func.func @transform_4(%arg0: i32) -> (i32, i32) {
    %c0_i32 = arith.constant 0 : i32
    %c0_i32_0 = arith.constant 0 : i32
    return %c0_i32, %arg0 : i32, i32
  }
}

module attributes {stable_mosaic.version = 11 : i64} {
  func.func @kernel(%arg0: i32, %arg1: memref<144x128xbf16, #tpu.memory_space<vmem>>, %arg2: memref<16x144xbf16, #tpu.memory_space<vmem>>, %arg3: memref<16x1xf32, #tpu.memory_space<vmem>>, %arg4: memref<16x1xf32, #tpu.memory_space<vmem>>, %arg5: memref<16x128xf32, #tpu.memory_space<vmem>>) attributes {dimension_semantics = [#tpu.dimension_semantics<parallel>], iteration_bounds = array<i64: 1>, scalar_prefetch = 0 : i64, scratch_operands = 0 : i64, tpu.core_type = #tpu.core_type<tc>, window_params = [{transform_indices = @transform_0, window_bounds = array<i64: 144, 128>}, {pipeline_mode = #tpu.pipeline_mode<synchronous>, transform_indices = @transform_1, window_bounds = array<i64: 16, 144>}, {pipeline_mode = #tpu.pipeline_mode<synchronous>, transform_indices = @transform_2, window_bounds = array<i64: 16, 1>}, {pipeline_mode = #tpu.pipeline_mode<synchronous>, transform_indices = @transform_3, window_bounds = array<i64: 16, 1>}, {transform_indices = @transform_4, window_bounds = array<i64: 16, 128>}]} {
    %c0 = arith.constant 0 : index
    %c0_0 = arith.constant 0 : index
    %0 = vector.load %arg2[%c0, %c0_0] : memref<16x144xbf16, #tpu.memory_space<vmem>>, vector<16x144xbf16>
    %c0_1 = arith.constant 0 : index
    %c0_2 = arith.constant 0 : index
    %1 = vector.load %arg1[%c0_1, %c0_2] : memref<144x128xbf16, #tpu.memory_space<vmem>>, vector<144x128xbf16>
    %cst = arith.constant dense<0.000000e+00> : vector<16x128xf32>
    %2 = tpu.matmul %0, %1, %cst {dimension_numbers = #tpu.dot_dimension_numbers<[1], [0], [0], [1], [0, 0, 1, 1], [], []>} : vector<16x144xbf16>, vector<144x128xbf16>, vector<16x128xf32> -> vector<16x128xf32>
    %c0_3 = arith.constant 0 : index
    %c0_4 = arith.constant 0 : index
    %3 = vector.load %arg3[%c0_3, %c0_4] : memref<16x1xf32, #tpu.memory_space<vmem>>, vector<16x1xf32>
    %4 = vector.broadcast %3 : vector<16x1xf32> to vector<16x128xf32>
    %5 = arith.mulf %2, %4 : vector<16x128xf32>
    %c0_5 = arith.constant 0 : index
    %c0_6 = arith.constant 0 : index
    %6 = vector.load %arg4[%c0_5, %c0_6] : memref<16x1xf32, #tpu.memory_space<vmem>>, vector<16x1xf32>
    %7 = vector.broadcast %6 : vector<16x1xf32> to vector<16x128xf32>
    %8 = arith.addf %5, %7 : vector<16x128xf32>
    %c0_7 = arith.constant 0 : index
    %c0_8 = arith.constant 0 : index
    %9 = vector.load %arg5[%c0_7, %c0_8] : memref<16x128xf32, #tpu.memory_space<vmem>>, vector<16x128xf32>
    tpu.vector_store %arg5[%c0_7, %c0_8], %8 {strides = array<i32>} : memref<16x128xf32, #tpu.memory_space<vmem>>, vector<16x128xf32>,
    return
  }
  func.func @transform_0(%arg0: i32) -> (i32, i32) {
    %c0_i32 = arith.constant 0 : i32
    %c0_i32_0 = arith.constant 0 : i32
    return %c0_i32, %arg0 : i32, i32
  }
  func.func @transform_1(%arg0: i32) -> (i32, i32) {
    %c0_i32 = arith.constant 0 : i32
    %c0_i32_0 = arith.constant 0 : i32
    %c0_i32_1 = arith.constant 0 : i32
    return %c0_i32, %c0_i32_0 : i32, i32
  }
  func.func @transform_2(%arg0: i32) -> (i32, i32) {
    %c0_i32 = arith.constant 0 : i32
    %c0_i32_0 = arith.constant 0 : i32
    %c0_i32_1 = arith.constant 0 : i32
    return %c0_i32, %c0_i32_0 : i32, i32
  }
  func.func @transform_3(%arg0: i32) -> (i32, i32) {
    %c0_i32 = arith.constant 0 : i32
    %c0_i32_0 = arith.constant 0 : i32
    %c0_i32_1 = arith.constant 0 : i32
    return %c0_i32, %c0_i32_0 : i32, i32
  }
  func.func @transform_4(%arg0: i32) -> (i32, i32) {
    %c0_i32 = arith.constant 0 : i32
    %c0_i32_0 = arith.constant 0 : i32
    return %c0_i32, %arg0 : i32, i32
  }
}

module attributes {stable_mosaic.version = 11 : i64} {
  func.func @kernel(%arg0: i32, %arg1: memref<144x256xbf16, #tpu.memory_space<vmem>>, %arg2: memref<144x256xbf16, #tpu.memory_space<vmem>>, %arg3: memref<32x144xbf16, #tpu.memory_space<vmem>>, %arg4: memref<32x144xbf16, #tpu.memory_space<vmem>>, %arg5: memref<32x1xf32, #tpu.memory_space<vmem>>, %arg6: memref<32x1xf32, #tpu.memory_space<vmem>>, %arg7: memref<32x256xf32, #tpu.memory_space<vmem>>) attributes {dimension_semantics = [#tpu.dimension_semantics<parallel>], iteration_bounds = array<i64: 2>, scalar_prefetch = 0 : i64, scratch_operands = 0 : i64, tpu.core_type = #tpu.core_type<tc>, window_params = [{transform_indices = @transform_0, window_bounds = array<i64: 144, 256>}, {transform_indices = @transform_1, window_bounds = array<i64: 144, 256>}, {pipeline_mode = #tpu.pipeline_mode<synchronous>, transform_indices = @transform_2, window_bounds = array<i64: 32, 144>}, {pipeline_mode = #tpu.pipeline_mode<synchronous>, transform_indices = @transform_3, window_bounds = array<i64: 32, 144>}, {pipeline_mode = #tpu.pipeline_mode<synchronous>, transform_indices = @transform_4, window_bounds = array<i64: 32, 1>}, {pipeline_mode = #tpu.pipeline_mode<synchronous>, transform_indices = @transform_5, window_bounds = array<i64: 32, 1>}, {transform_indices = @transform_6, window_bounds = array<i64: 32, 256>}]} {
    %c0 = arith.constant 0 : index
    %c0_0 = arith.constant 0 : index
    %0 = vector.load %arg3[%c0, %c0_0] : memref<32x144xbf16, #tpu.memory_space<vmem>>, vector<32x144xbf16>
    %c0_1 = arith.constant 0 : index
    %c0_2 = arith.constant 0 : index
    %1 = vector.load %arg1[%c0_1, %c0_2] : memref<144x256xbf16, #tpu.memory_space<vmem>>, vector<144x256xbf16>
    %cst = arith.constant dense<0.000000e+00> : vector<32x256xf32>
    %2 = tpu.matmul %0, %1, %cst {dimension_numbers = #tpu.dot_dimension_numbers<[1], [0], [0], [1], [0, 0, 1, 1], [], []>} : vector<32x144xbf16>, vector<144x256xbf16>, vector<32x256xf32> -> vector<32x256xf32>
    %c0_3 = arith.constant 0 : index
    %c0_4 = arith.constant 0 : index
    %3 = vector.load %arg4[%c0_3, %c0_4] : memref<32x144xbf16, #tpu.memory_space<vmem>>, vector<32x144xbf16>
    %c0_5 = arith.constant 0 : index
    %c0_6 = arith.constant 0 : index
    %4 = vector.load %arg2[%c0_5, %c0_6] : memref<144x256xbf16, #tpu.memory_space<vmem>>, vector<144x256xbf16>
    %cst_7 = arith.constant dense<0.000000e+00> : vector<32x256xf32>
    %5 = tpu.matmul %3, %4, %cst_7 {dimension_numbers = #tpu.dot_dimension_numbers<[1], [0], [0], [1], [0, 0, 1, 1], [], []>} : vector<32x144xbf16>, vector<144x256xbf16>, vector<32x256xf32> -> vector<32x256xf32>
    %6 = arith.addf %2, %5 : vector<32x256xf32>
    %c0_8 = arith.constant 0 : index
    %c0_9 = arith.constant 0 : index
    %7 = vector.load %arg5[%c0_8, %c0_9] : memref<32x1xf32, #tpu.memory_space<vmem>>, vector<32x1xf32>
    %8 = vector.broadcast %7 : vector<32x1xf32> to vector<32x256xf32>
    %9 = arith.mulf %6, %8 : vector<32x256xf32>
    %c0_10 = arith.constant 0 : index
    %c0_11 = arith.constant 0 : index
    %10 = vector.load %arg6[%c0_10, %c0_11] : memref<32x1xf32, #tpu.memory_space<vmem>>, vector<32x1xf32>
    %11 = vector.broadcast %10 : vector<32x1xf32> to vector<32x256xf32>
    %12 = arith.addf %9, %11 : vector<32x256xf32>
    %c0_12 = arith.constant 0 : index
    %c0_13 = arith.constant 0 : index
    %13 = vector.load %arg7[%c0_12, %c0_13] : memref<32x256xf32, #tpu.memory_space<vmem>>, vector<32x256xf32>
    tpu.vector_store %arg7[%c0_12, %c0_13], %12 {strides = array<i32>} : memref<32x256xf32, #tpu.memory_space<vmem>>, vector<32x256xf32>,
    return
  }
  func.func @transform_0(%arg0: i32) -> (i32, i32) {
    %c0_i32 = arith.constant 0 : i32
    %c0_i32_0 = arith.constant 0 : i32
    return %c0_i32, %arg0 : i32, i32
  }
  func.func @transform_1(%arg0: i32) -> (i32, i32) {
    %c0_i32 = arith.constant 0 : i32
    %c0_i32_0 = arith.constant 0 : i32
    return %c0_i32, %arg0 : i32, i32
  }
  func.func @transform_2(%arg0: i32) -> (i32, i32) {
    %c0_i32 = arith.constant 0 : i32
    %c0_i32_0 = arith.constant 0 : i32
    %c0_i32_1 = arith.constant 0 : i32
    return %c0_i32, %c0_i32_0 : i32, i32
  }
  func.func @transform_3(%arg0: i32) -> (i32, i32) {
    %c0_i32 = arith.constant 0 : i32
    %c0_i32_0 = arith.constant 0 : i32
    %c0_i32_1 = arith.constant 0 : i32
    return %c0_i32, %c0_i32_0 : i32, i32
  }
  func.func @transform_4(%arg0: i32) -> (i32, i32) {
    %c0_i32 = arith.constant 0 : i32
    %c0_i32_0 = arith.constant 0 : i32
    %c0_i32_1 = arith.constant 0 : i32
    return %c0_i32, %c0_i32_0 : i32, i32
  }
  func.func @transform_5(%arg0: i32) -> (i32, i32) {
    %c0_i32 = arith.constant 0 : i32
    %c0_i32_0 = arith.constant 0 : i32
    %c0_i32_1 = arith.constant 0 : i32
    return %c0_i32, %c0_i32_0 : i32, i32
  }
  func.func @transform_6(%arg0: i32) -> (i32, i32) {
    %c0_i32 = arith.constant 0 : i32
    %c0_i32_0 = arith.constant 0 : i32
    return %c0_i32, %arg0 : i32, i32
  }
}

module attributes {stable_mosaic.version = 11 : i64} {
  func.func @kernel(%arg0: i32, %arg1: memref<144x256xbf16, #tpu.memory_space<vmem>>, %arg2: memref<32x144xbf16, #tpu.memory_space<vmem>>, %arg3: memref<32x1xf32, #tpu.memory_space<vmem>>, %arg4: memref<32x1xf32, #tpu.memory_space<vmem>>, %arg5: memref<32x256xf32, #tpu.memory_space<vmem>>, %arg6: memref<32x256xf32, #tpu.memory_space<vmem>>, %arg7: memref<32x256xf32, #tpu.memory_space<vmem>>) attributes {dimension_semantics = [#tpu.dimension_semantics<parallel>], iteration_bounds = array<i64: 2>, scalar_prefetch = 0 : i64, scratch_operands = 0 : i64, tpu.core_type = #tpu.core_type<tc>, window_params = [{transform_indices = @transform_0, window_bounds = array<i64: 144, 256>}, {pipeline_mode = #tpu.pipeline_mode<synchronous>, transform_indices = @transform_1, window_bounds = array<i64: 32, 144>}, {pipeline_mode = #tpu.pipeline_mode<synchronous>, transform_indices = @transform_2, window_bounds = array<i64: 32, 1>}, {pipeline_mode = #tpu.pipeline_mode<synchronous>, transform_indices = @transform_3, window_bounds = array<i64: 32, 1>}, {transform_indices = @transform_4, window_bounds = array<i64: 32, 256>}, {transform_indices = @transform_5, window_bounds = array<i64: 32, 256>}, {transform_indices = @transform_6, window_bounds = array<i64: 32, 256>}]} {
    %c0 = arith.constant 0 : index
    %c0_0 = arith.constant 0 : index
    %0 = vector.load %arg2[%c0, %c0_0] : memref<32x144xbf16, #tpu.memory_space<vmem>>, vector<32x144xbf16>
    %c0_1 = arith.constant 0 : index
    %c0_2 = arith.constant 0 : index
    %1 = vector.load %arg1[%c0_1, %c0_2] : memref<144x256xbf16, #tpu.memory_space<vmem>>, vector<144x256xbf16>
    %cst = arith.constant dense<0.000000e+00> : vector<32x256xf32>
    %2 = tpu.matmul %0, %1, %cst {dimension_numbers = #tpu.dot_dimension_numbers<[1], [0], [0], [1], [0, 0, 1, 1], [], []>} : vector<32x144xbf16>, vector<144x256xbf16>, vector<32x256xf32> -> vector<32x256xf32>
    %c0_3 = arith.constant 0 : index
    %c0_4 = arith.constant 0 : index
    %3 = vector.load %arg3[%c0_3, %c0_4] : memref<32x1xf32, #tpu.memory_space<vmem>>, vector<32x1xf32>
    %4 = vector.broadcast %3 : vector<32x1xf32> to vector<32x256xf32>
    %5 = arith.mulf %2, %4 : vector<32x256xf32>
    %c0_5 = arith.constant 0 : index
    %c0_6 = arith.constant 0 : index
    %6 = vector.load %arg4[%c0_5, %c0_6] : memref<32x1xf32, #tpu.memory_space<vmem>>, vector<32x1xf32>
    %7 = vector.broadcast %6 : vector<32x1xf32> to vector<32x256xf32>
    %8 = arith.addf %5, %7 : vector<32x256xf32>
    %c0_7 = arith.constant 0 : index
    %c0_8 = arith.constant 0 : index
    %9 = vector.load %arg5[%c0_7, %c0_8] : memref<32x256xf32, #tpu.memory_space<vmem>>, vector<32x256xf32>
    %10 = arith.mulf %8, %9 : vector<32x256xf32>
    %c0_9 = arith.constant 0 : index
    %c0_10 = arith.constant 0 : index
    %11 = vector.load %arg6[%c0_9, %c0_10] : memref<32x256xf32, #tpu.memory_space<vmem>>, vector<32x256xf32>
    %12 = arith.mulf %10, %11 : vector<32x256xf32>
    %c0_11 = arith.constant 0 : index
    %c0_12 = arith.constant 0 : index
    %13 = vector.load %arg7[%c0_11, %c0_12] : memref<32x256xf32, #tpu.memory_space<vmem>>, vector<32x256xf32>
    tpu.vector_store %arg7[%c0_11, %c0_12], %12 {strides = array<i32>} : memref<32x256xf32, #tpu.memory_space<vmem>>, vector<32x256xf32>,
    return
  }
  func.func @transform_0(%arg0: i32) -> (i32, i32) {
    %c0_i32 = arith.constant 0 : i32
    %c0_i32_0 = arith.constant 0 : i32
    return %c0_i32, %arg0 : i32, i32
  }
  func.func @transform_1(%arg0: i32) -> (i32, i32) {
    %c0_i32 = arith.constant 0 : i32
    %c0_i32_0 = arith.constant 0 : i32
    %c0_i32_1 = arith.constant 0 : i32
    return %c0_i32, %c0_i32_0 : i32, i32
  }
  func.func @transform_2(%arg0: i32) -> (i32, i32) {
    %c0_i32 = arith.constant 0 : i32
    %c0_i32_0 = arith.constant 0 : i32
    %c0_i32_1 = arith.constant 0 : i32
    return %c0_i32, %c0_i32_0 : i32, i32
  }
  func.func @transform_3(%arg0: i32) -> (i32, i32) {
    %c0_i32 = arith.constant 0 : i32
    %c0_i32_0 = arith.constant 0 : i32
    %c0_i32_1 = arith.constant 0 : i32
    return %c0_i32, %c0_i32_0 : i32, i32
  }
  func.func @transform_4(%arg0: i32) -> (i32, i32) {
    %c0_i32 = arith.constant 0 : i32
    %c0_i32_0 = arith.constant 0 : i32
    return %c0_i32, %arg0 : i32, i32
  }
  func.func @transform_5(%arg0: i32) -> (i32, i32) {
    %c0_i32 = arith.constant 0 : i32
    %c0_i32_0 = arith.constant 0 : i32
    return %c0_i32, %arg0 : i32, i32
  }
  func.func @transform_6(%arg0: i32) -> (i32, i32) {
    %c0_i32 = arith.constant 0 : i32
    %c0_i32_0 = arith.constant 0 : i32
    return %c0_i32, %arg0 : i32, i32
  }
}

module attributes {stable_mosaic.version = 11 : i64} {
  func.func @kernel(%arg0: i32, %arg1: memref<288x256xbf16, #tpu.memory_space<vmem>>, %arg2: memref<288x256xbf16, #tpu.memory_space<vmem>>, %arg3: memref<64x288xbf16, #tpu.memory_space<vmem>>, %arg4: memref<64x288xbf16, #tpu.memory_space<vmem>>, %arg5: memref<64x1xf32, #tpu.memory_space<vmem>>, %arg6: memref<64x1xf32, #tpu.memory_space<vmem>>, %arg7: memref<64x256xf32, #tpu.memory_space<vmem>>) attributes {dimension_semantics = [#tpu.dimension_semantics<parallel>], iteration_bounds = array<i64: 2>, scalar_prefetch = 0 : i64, scratch_operands = 0 : i64, tpu.core_type = #tpu.core_type<tc>, window_params = [{transform_indices = @transform_0, window_bounds = array<i64: 288, 256>}, {transform_indices = @transform_1, window_bounds = array<i64: 288, 256>}, {pipeline_mode = #tpu.pipeline_mode<synchronous>, transform_indices = @transform_2, window_bounds = array<i64: 64, 288>}, {pipeline_mode = #tpu.pipeline_mode<synchronous>, transform_indices = @transform_3, window_bounds = array<i64: 64, 288>}, {pipeline_mode = #tpu.pipeline_mode<synchronous>, transform_indices = @transform_4, window_bounds = array<i64: 64, 1>}, {pipeline_mode = #tpu.pipeline_mode<synchronous>, transform_indices = @transform_5, window_bounds = array<i64: 64, 1>}, {transform_indices = @transform_6, window_bounds = array<i64: 64, 256>}]} {
    %c0 = arith.constant 0 : index
    %c0_0 = arith.constant 0 : index
    %0 = vector.load %arg3[%c0, %c0_0] : memref<64x288xbf16, #tpu.memory_space<vmem>>, vector<64x288xbf16>
    %c0_1 = arith.constant 0 : index
    %c0_2 = arith.constant 0 : index
    %1 = vector.load %arg1[%c0_1, %c0_2] : memref<288x256xbf16, #tpu.memory_space<vmem>>, vector<288x256xbf16>
    %cst = arith.constant dense<0.000000e+00> : vector<64x256xf32>
    %2 = tpu.matmul %0, %1, %cst {dimension_numbers = #tpu.dot_dimension_numbers<[1], [0], [0], [1], [0, 0, 1, 1], [], []>} : vector<64x288xbf16>, vector<288x256xbf16>, vector<64x256xf32> -> vector<64x256xf32>
    %c0_3 = arith.constant 0 : index
    %c0_4 = arith.constant 0 : index
    %3 = vector.load %arg4[%c0_3, %c0_4] : memref<64x288xbf16, #tpu.memory_space<vmem>>, vector<64x288xbf16>
    %c0_5 = arith.constant 0 : index
    %c0_6 = arith.constant 0 : index
    %4 = vector.load %arg2[%c0_5, %c0_6] : memref<288x256xbf16, #tpu.memory_space<vmem>>, vector<288x256xbf16>
    %cst_7 = arith.constant dense<0.000000e+00> : vector<64x256xf32>
    %5 = tpu.matmul %3, %4, %cst_7 {dimension_numbers = #tpu.dot_dimension_numbers<[1], [0], [0], [1], [0, 0, 1, 1], [], []>} : vector<64x288xbf16>, vector<288x256xbf16>, vector<64x256xf32> -> vector<64x256xf32>
    %6 = arith.addf %2, %5 : vector<64x256xf32>
    %c0_8 = arith.constant 0 : index
    %c0_9 = arith.constant 0 : index
    %7 = vector.load %arg5[%c0_8, %c0_9] : memref<64x1xf32, #tpu.memory_space<vmem>>, vector<64x1xf32>
    %8 = vector.broadcast %7 : vector<64x1xf32> to vector<64x256xf32>
    %9 = arith.mulf %6, %8 : vector<64x256xf32>
    %c0_10 = arith.constant 0 : index
    %c0_11 = arith.constant 0 : index
    %10 = vector.load %arg6[%c0_10, %c0_11] : memref<64x1xf32, #tpu.memory_space<vmem>>, vector<64x1xf32>
    %11 = vector.broadcast %10 : vector<64x1xf32> to vector<64x256xf32>
    %12 = arith.addf %9, %11 : vector<64x256xf32>
    %c0_12 = arith.constant 0 : index
    %c0_13 = arith.constant 0 : index
    %13 = vector.load %arg7[%c0_12, %c0_13] : memref<64x256xf32, #tpu.memory_space<vmem>>, vector<64x256xf32>
    tpu.vector_store %arg7[%c0_12, %c0_13], %12 {strides = array<i32>} : memref<64x256xf32, #tpu.memory_space<vmem>>, vector<64x256xf32>,
    return
  }
  func.func @transform_0(%arg0: i32) -> (i32, i32) {
    %c0_i32 = arith.constant 0 : i32
    %c0_i32_0 = arith.constant 0 : i32
    return %c0_i32, %arg0 : i32, i32
  }
  func.func @transform_1(%arg0: i32) -> (i32, i32) {
    %c0_i32 = arith.constant 0 : i32
    %c0_i32_0 = arith.constant 0 : i32
    return %c0_i32, %arg0 : i32, i32
  }
  func.func @transform_2(%arg0: i32) -> (i32, i32) {
    %c0_i32 = arith.constant 0 : i32
    %c0_i32_0 = arith.constant 0 : i32
    %c0_i32_1 = arith.constant 0 : i32
    return %c0_i32, %c0_i32_0 : i32, i32
  }
  func.func @transform_3(%arg0: i32) -> (i32, i32) {
    %c0_i32 = arith.constant 0 : i32
    %c0_i32_0 = arith.constant 0 : i32
    %c0_i32_1 = arith.constant 0 : i32
    return %c0_i32, %c0_i32_0 : i32, i32
  }
  func.func @transform_4(%arg0: i32) -> (i32, i32) {
    %c0_i32 = arith.constant 0 : i32
    %c0_i32_0 = arith.constant 0 : i32
    %c0_i32_1 = arith.constant 0 : i32
    return %c0_i32, %c0_i32_0 : i32, i32
  }
  func.func @transform_5(%arg0: i32) -> (i32, i32) {
    %c0_i32 = arith.constant 0 : i32
    %c0_i32_0 = arith.constant 0 : i32
    %c0_i32_1 = arith.constant 0 : i32
    return %c0_i32, %c0_i32_0 : i32, i32
  }
  func.func @transform_6(%arg0: i32) -> (i32, i32) {
    %c0_i32 = arith.constant 0 : i32
    %c0_i32_0 = arith.constant 0 : i32
    return %c0_i32, %arg0 : i32, i32
  }
}

module attributes {stable_mosaic.version = 11 : i64} {
  func.func @kernel(%arg0: i32, %arg1: memref<576x256xbf16, #tpu.memory_space<vmem>>, %arg2: memref<144x256xbf16, #tpu.memory_space<vmem>>, %arg3: memref<80x576xbf16, #tpu.memory_space<vmem>>, %arg4: memref<80x144xbf16, #tpu.memory_space<vmem>>, %arg5: memref<80x1xf32, #tpu.memory_space<vmem>>, %arg6: memref<80x1xf32, #tpu.memory_space<vmem>>, %arg7: memref<80x256xf32, #tpu.memory_space<vmem>>) attributes {dimension_semantics = [#tpu.dimension_semantics<parallel>], iteration_bounds = array<i64: 2>, scalar_prefetch = 0 : i64, scratch_operands = 0 : i64, tpu.core_type = #tpu.core_type<tc>, window_params = [{transform_indices = @transform_0, window_bounds = array<i64: 576, 256>}, {transform_indices = @transform_1, window_bounds = array<i64: 144, 256>}, {pipeline_mode = #tpu.pipeline_mode<synchronous>, transform_indices = @transform_2, window_bounds = array<i64: 80, 576>}, {pipeline_mode = #tpu.pipeline_mode<synchronous>, transform_indices = @transform_3, window_bounds = array<i64: 80, 144>}, {pipeline_mode = #tpu.pipeline_mode<synchronous>, transform_indices = @transform_4, window_bounds = array<i64: 80, 1>}, {pipeline_mode = #tpu.pipeline_mode<synchronous>, transform_indices = @transform_5, window_bounds = array<i64: 80, 1>}, {transform_indices = @transform_6, window_bounds = array<i64: 80, 256>}]} {
    %c0 = arith.constant 0 : index
    %c0_0 = arith.constant 0 : index
    %0 = vector.load %arg3[%c0, %c0_0] : memref<80x576xbf16, #tpu.memory_space<vmem>>, vector<80x576xbf16>
    %c0_1 = arith.constant 0 : index
    %c0_2 = arith.constant 0 : index
    %1 = vector.load %arg1[%c0_1, %c0_2] : memref<576x256xbf16, #tpu.memory_space<vmem>>, vector<576x256xbf16>
    %cst = arith.constant dense<0.000000e+00> : vector<80x256xf32>
    %2 = tpu.matmul %0, %1, %cst {dimension_numbers = #tpu.dot_dimension_numbers<[1], [0], [0], [1], [0, 0, 1, 1], [], []>} : vector<80x576xbf16>, vector<576x256xbf16>, vector<80x256xf32> -> vector<80x256xf32>
    %c0_3 = arith.constant 0 : index
    %c0_4 = arith.constant 0 : index
    %3 = vector.load %arg4[%c0_3, %c0_4] : memref<80x144xbf16, #tpu.memory_space<vmem>>, vector<80x144xbf16>
    %c0_5 = arith.constant 0 : index
    %c0_6 = arith.constant 0 : index
    %4 = vector.load %arg2[%c0_5, %c0_6] : memref<144x256xbf16, #tpu.memory_space<vmem>>, vector<144x256xbf16>
    %cst_7 = arith.constant dense<0.000000e+00> : vector<80x256xf32>
    %5 = tpu.matmul %3, %4, %cst_7 {dimension_numbers = #tpu.dot_dimension_numbers<[1], [0], [0], [1], [0, 0, 1, 1], [], []>} : vector<80x144xbf16>, vector<144x256xbf16>, vector<80x256xf32> -> vector<80x256xf32>
    %6 = arith.addf %2, %5 : vector<80x256xf32>
    %c0_8 = arith.constant 0 : index
    %c0_9 = arith.constant 0 : index
    %7 = vector.load %arg5[%c0_8, %c0_9] : memref<80x1xf32, #tpu.memory_space<vmem>>, vector<80x1xf32>
    %8 = vector.broadcast %7 : vector<80x1xf32> to vector<80x256xf32>
    %9 = arith.mulf %6, %8 : vector<80x256xf32>
    %c0_10 = arith.constant 0 : index
    %c0_11 = arith.constant 0 : index
    %10 = vector.load %arg6[%c0_10, %c0_11] : memref<80x1xf32, #tpu.memory_space<vmem>>, vector<80x1xf32>
    %11 = vector.broadcast %10 : vector<80x1xf32> to vector<80x256xf32>
    %12 = arith.addf %9, %11 : vector<80x256xf32>
    %c0_12 = arith.constant 0 : index
    %c0_13 = arith.constant 0 : index
    %13 = vector.load %arg7[%c0_12, %c0_13] : memref<80x256xf32, #tpu.memory_space<vmem>>, vector<80x256xf32>
    tpu.vector_store %arg7[%c0_12, %c0_13], %12 {strides = array<i32>} : memref<80x256xf32, #tpu.memory_space<vmem>>, vector<80x256xf32>,
    return
  }
  func.func @transform_0(%arg0: i32) -> (i32, i32) {
    %c0_i32 = arith.constant 0 : i32
    %c0_i32_0 = arith.constant 0 : i32
    return %c0_i32, %arg0 : i32, i32
  }
  func.func @transform_1(%arg0: i32) -> (i32, i32) {
    %c0_i32 = arith.constant 0 : i32
    %c0_i32_0 = arith.constant 0 : i32
    return %c0_i32, %arg0 : i32, i32
  }
  func.func @transform_2(%arg0: i32) -> (i32, i32) {
    %c0_i32 = arith.constant 0 : i32
    %c0_i32_0 = arith.constant 0 : i32
    %c0_i32_1 = arith.constant 0 : i32
    return %c0_i32, %c0_i32_0 : i32, i32
  }
  func.func @transform_3(%arg0: i32) -> (i32, i32) {
    %c0_i32 = arith.constant 0 : i32
    %c0_i32_0 = arith.constant 0 : i32
    %c0_i32_1 = arith.constant 0 : i32
    return %c0_i32, %c0_i32_0 : i32, i32
  }
  func.func @transform_4(%arg0: i32) -> (i32, i32) {
    %c0_i32 = arith.constant 0 : i32
    %c0_i32_0 = arith.constant 0 : i32
    %c0_i32_1 = arith.constant 0 : i32
    return %c0_i32, %c0_i32_0 : i32, i32
  }
  func.func @transform_5(%arg0: i32) -> (i32, i32) {
    %c0_i32 = arith.constant 0 : i32
    %c0_i32_0 = arith.constant 0 : i32
    %c0_i32_1 = arith.constant 0 : i32
    return %c0_i32, %c0_i32_0 : i32, i32
  }
  func.func @transform_6(%arg0: i32) -> (i32, i32) {
    %c0_i32 = arith.constant 0 : i32
    %c0_i32_0 = arith.constant 0 : i32
    return %c0_i32, %arg0 : i32, i32
  }
}

module attributes {stable_mosaic.version = 11 : i64} {
  func.func @kernel(%arg0: i32, %arg1: memref<720x256xbf16, #tpu.memory_space<vmem>>, %arg2: memref<16x720xbf16, #tpu.memory_space<vmem>>, %arg3: memref<16x1xf32, #tpu.memory_space<vmem>>, %arg4: memref<16x1xf32, #tpu.memory_space<vmem>>, %arg5: memref<16x256xf32, #tpu.memory_space<vmem>>) attributes {dimension_semantics = [#tpu.dimension_semantics<parallel>], iteration_bounds = array<i64: 2>, scalar_prefetch = 0 : i64, scratch_operands = 0 : i64, tpu.core_type = #tpu.core_type<tc>, window_params = [{transform_indices = @transform_0, window_bounds = array<i64: 720, 256>}, {pipeline_mode = #tpu.pipeline_mode<synchronous>, transform_indices = @transform_1, window_bounds = array<i64: 16, 720>}, {pipeline_mode = #tpu.pipeline_mode<synchronous>, transform_indices = @transform_2, window_bounds = array<i64: 16, 1>}, {pipeline_mode = #tpu.pipeline_mode<synchronous>, transform_indices = @transform_3, window_bounds = array<i64: 16, 1>}, {transform_indices = @transform_4, window_bounds = array<i64: 16, 256>}]} {
    %c0 = arith.constant 0 : index
    %c0_0 = arith.constant 0 : index
    %0 = vector.load %arg2[%c0, %c0_0] : memref<16x720xbf16, #tpu.memory_space<vmem>>, vector<16x720xbf16>
    %c0_1 = arith.constant 0 : index
    %c0_2 = arith.constant 0 : index
    %1 = vector.load %arg1[%c0_1, %c0_2] : memref<720x256xbf16, #tpu.memory_space<vmem>>, vector<720x256xbf16>
    %cst = arith.constant dense<0.000000e+00> : vector<16x256xf32>
    %2 = tpu.matmul %0, %1, %cst {dimension_numbers = #tpu.dot_dimension_numbers<[1], [0], [0], [1], [0, 0, 1, 1], [], []>} : vector<16x720xbf16>, vector<720x256xbf16>, vector<16x256xf32> -> vector<16x256xf32>
    %c0_3 = arith.constant 0 : index
    %c0_4 = arith.constant 0 : index
    %3 = vector.load %arg3[%c0_3, %c0_4] : memref<16x1xf32, #tpu.memory_space<vmem>>, vector<16x1xf32>
    %4 = vector.broadcast %3 : vector<16x1xf32> to vector<16x256xf32>
    %5 = arith.mulf %2, %4 : vector<16x256xf32>
    %c0_5 = arith.constant 0 : index
    %c0_6 = arith.constant 0 : index
    %6 = vector.load %arg4[%c0_5, %c0_6] : memref<16x1xf32, #tpu.memory_space<vmem>>, vector<16x1xf32>
    %7 = vector.broadcast %6 : vector<16x1xf32> to vector<16x256xf32>
    %8 = arith.addf %5, %7 : vector<16x256xf32>
    %c0_7 = arith.constant 0 : index
    %c0_8 = arith.constant 0 : index
    %9 = vector.load %arg5[%c0_7, %c0_8] : memref<16x256xf32, #tpu.memory_space<vmem>>, vector<16x256xf32>
    tpu.vector_store %arg5[%c0_7, %c0_8], %8 {strides = array<i32>} : memref<16x256xf32, #tpu.memory_space<vmem>>, vector<16x256xf32>,
    return
  }
  func.func @transform_0(%arg0: i32) -> (i32, i32) {
    %c0_i32 = arith.constant 0 : i32
    %c0_i32_0 = arith.constant 0 : i32
    return %c0_i32, %arg0 : i32, i32
  }
  func.func @transform_1(%arg0: i32) -> (i32, i32) {
    %c0_i32 = arith.constant 0 : i32
    %c0_i32_0 = arith.constant 0 : i32
    %c0_i32_1 = arith.constant 0 : i32
    return %c0_i32, %c0_i32_0 : i32, i32
  }
  func.func @transform_2(%arg0: i32) -> (i32, i32) {
    %c0_i32 = arith.constant 0 : i32
    %c0_i32_0 = arith.constant 0 : i32
    %c0_i32_1 = arith.constant 0 : i32
    return %c0_i32, %c0_i32_0 : i32, i32
  }
  func.func @transform_3(%arg0: i32) -> (i32, i32) {
    %c0_i32 = arith.constant 0 : i32
    %c0_i32_0 = arith.constant 0 : i32
    %c0_i32_1 = arith.constant 0 : i32
    return %c0_i32, %c0_i32_0 : i32, i32
  }
  func.func @transform_4(%arg0: i32) -> (i32, i32) {
    %c0_i32 = arith.constant 0 : i32
    %c0_i32_0 = arith.constant 0 : i32
    return %c0_i32, %arg0 : i32, i32
  }
}

</mosaic_0001>

<bundles_post_ra>
// kernel: cfm_forward.9
= control target key start
LH: loop header
LB: loop body
LE: loop exit
PB: predicated region body
PF: predicated region fallthrough
CT: control target
= control target key end

     0   :  { %s799_s15 = smov 0   ;;  %s801_s16 = smov 0   ;;  %s967_s0 = inlined_call_operand.vmem [shape: bf16[144,512], index: 0, kind: input, shape index: {}]   ;;  %s968_s1 = inlined_call_operand.vmem [shape: bf16[16,144], index: 1, kind: input, shape index: {}]   ;;  %s969_s2 = inlined_call_operand.vmem [shape: f32[16,1], index: 2, kind: input, shape index: {}]   ;;  %s970_s3 = inlined_call_operand.vmem [shape: f32[16,1], index: 3, kind: input, shape index: {}]   ;;  %s971_s4 = inlined_call_operand.vmem [shape: f32[16,512], index: 4, kind: output, shape index: {}]  }
   0x1   :  { %s803_s17 = smov 0  }
   0x2 LB: > { %s603_s18 = sadd.s32 4294967295, %s771_s17   ;;  %s816_s19 = sadd.s32 1, %s771_s17   ;;  %s771_s17 = sphi %s803_s17, %s975_s17   ;;  %s767_s16 = sphi %s801_s16, %s974_s16   ;;  %s763_s15 = sphi %s799_s15, %s973_s15  }
   0x3   : > { %s18_s20 = ssub.s32 %s771_s17, %s816_s19  ;;  %s21_s21 = sadd.s32 1, %s767_s16 }
   0x4   : > { %p19_p0 = scmp.eq.s32.totalorder %s18_s20, 0  ;;  %p28_p1 = scmp.ne.s32.totalorder %s767_s16, %s763_s15 }
   0x5   : > { %p29_p2 = scmp.eq.s32.totalorder %s771_s17, 0  ;;  %p121_p3 = scmp.eq.s32.totalorder %s603_s18, 1 }
   0x6   : > { %s827_s22 = scalar_select %p19_p0, %s767_s16, %s21_s21  }
   0x7   : > { %p30_p4 = por %p29_p2, %p28_p1  ;;  %p829_p5 = por %p121_p3, %p28_p1 }
   0x8   : > { %p606_p6 = scmp.ge.s32.totalorder %s771_s17, 2 }
   0xa   : > { %152 = sbr.rel (%p606_p6) target bundleno = 37 (0x25), region = 28 }
   0xf   : > { %155 = sbr.rel (!%p30_p4) target bundleno = 37 (0x25), region = 32  ;;  %s157_s24 = sand.u32 (%p30_p4), 1, %s767_s16  }
  0x10   : > { %s698_s25 = sshll.u32 (%p30_p4), %s771_s17, 3  ;;  %s720_s26 = smul.u32 (%p30_p4), 144, %s157_s24 }
  0x11   : > { %s839_s29 = scalar_lea.vmem (%p30_p4), %s967_s0, %s698_s25 }
  0x12   : > { %v225_v0 = vld [vmem:[%s839_s29] sm:$0xff] (%p30_p4)  ;;  %v227_v1 = vld [vmem:[%s839_s29 + $0x10] sm:$0xff] (%p30_p4)  ;;  %s844_s30 = scalar_lea.vmem (%p30_p4), [#allocation2], %s720_s26 }
  0x13   : > { %v229_v2 = vld [vmem:[%s839_s29 + $0x20] sm:$0xff] (%p30_p4)  ;;  %226 = vst [vmem:[%s844_s30] sm:$0xff] (%p30_p4), %v225_v0  ;;  %v231_v3 = vld [vmem:[%s839_s29 + $0x30] sm:$0xff] (%p30_p4) }
  0x14   : > { %228 = vst [vmem:[%s844_s30 + $0x8] sm:$0xff] %v227_v1  ;;  %v233_v4 = vld [vmem:[%s839_s29 + $0x40] sm:$0xff]  ;;  %v235_v5 = vld [vmem:[%s839_s29 + $0x50] sm:$0xff] }
  0x15   : > { %230 = vst [vmem:[%s844_s30 + $0x10] sm:$0xff] %v229_v2  ;;  %v237_v6 = vld [vmem:[%s839_s29 + $0x60] sm:$0xff]  ;;  %v239_v7 = vld [vmem:[%s839_s29 + $0x70] sm:$0xff] }
  0x16   : > { %232 = vst [vmem:[%s844_s30 + $0x18] sm:$0xff] %v231_v3  ;;  %v241_v8 = vld [vmem:[%s839_s29 + $0x80] sm:$0xff]  ;;  %v243_v9 = vld [vmem:[%s839_s29 + $0x90] sm:$0xff] }
  0x17   : > { %234 = vst [vmem:[%s844_s30 + $0x20] sm:$0xff] %v233_v4  ;;  %v245_v10 = vld [vmem:[%s839_s29 + $0xa0] sm:$0xff]  ;;  %v247_v11 = vld [vmem:[%s839_s29 + $0xb0] sm:$0xff] }
  0x18   : > { %236 = vst [vmem:[%s844_s30 + $0x28] sm:$0xff] %v235_v5  ;;  %v249_v12 = vld [vmem:[%s839_s29 + $0xc0] sm:$0xff]  ;;  %v251_v13 = vld [vmem:[%s839_s29 + $0xd0] sm:$0xff] }
  0x19   : > { %238 = vst [vmem:[%s844_s30 + $0x30] sm:$0xff] %v237_v6  ;;  %v253_v14 = vld [vmem:[%s839_s29 + $0xe0] sm:$0xff]  ;;  %v255_v15 = vld [vmem:[%s839_s29 + $0xf0] sm:$0xff] }
  0x1a   : > { %240 = vst [vmem:[%s844_s30 + $0x38] sm:$0xff] %v239_v7  ;;  %v257_v16 = vld [vmem:[%s839_s29 + $0x100] sm:$0xff]  ;;  %v259_v17 = vld [vmem:[%s839_s29 + $0x110] sm:$0xff] }
  0x1b   : > { %242 = vst [vmem:[%s844_s30 + $0x40] sm:$0xff] %v241_v8 }
  0x1c   : > { %244 = vst [vmem:[%s844_s30 + $0x48] sm:$0xff] %v243_v9 }
  0x1d   : > { %246 = vst [vmem:[%s844_s30 + $0x50] sm:$0xff] %v245_v10 }
  0x1e   : > { %248 = vst [vmem:[%s844_s30 + $0x58] sm:$0xff] %v247_v11 }
  0x1f   : > { %250 = vst [vmem:[%s844_s30 + $0x60] sm:$0xff] %v249_v12 }
  0x20   : > { %252 = vst [vmem:[%s844_s30 + $0x68] sm:$0xff] %v251_v13 }
  0x21   : > { %254 = vst [vmem:[%s844_s30 + $0x70] sm:$0xff] %v253_v14 }
  0x22   : > { %256 = vst [vmem:[%s844_s30 + $0x78] sm:$0xff] %v255_v15 }
  0x23   : > { %258 = vst [vmem:[%s844_s30 + $0x80] sm:$0xff] %v257_v16 }
  0x24   : > { %260 = vst [vmem:[%s844_s30 + $0x88] sm:$0xff] %v259_v17 }
  0x25 PF: > { %p609_p7 = scmp.ge.s32.totalorder %s771_s17, 1  ;;  %p265_p8 = scmp.lt.s32.totalorder %s771_s17, 3 }
  0x27   : > { %p266_p9 = pnand %p609_p7, %p265_p8 }
  0x28   : > { %s272_s5 = sand.u32 (!%p266_p9), 1, %s763_s15  }
  0x29   : > { %269 = sbr.rel (%p266_p9) target bundleno = 236 (0xec), region = 70 }
  0x2a   : > { %s721_s6 = smul.u32 (!%p266_p9), 144, %s272_s5 }
  0x2c   : > { %s884_s7 = scalar_lea.vmem (!%p266_p9), [#allocation2], %s721_s6  ;;  %s610_s6 = sshll.u32 (!%p266_p9), %s272_s5, 5 }
  0x2e   : > { %v677_v18 = vld [vmem:[%s884_s7 + $0x70] sm:$0xf]  ;;  %v716_v19 = vld [vmem:[%s884_s7 + $0x74] sm:$0xf0]  ;;  %v715_v20 = vld [vmem:[%s884_s7 + $0x74] sm:$0xf] }
  0x2f   : > { %v678_v21 = vor.u32 %v716_v19, %v677_v18  ;;  %v679_v22 = vld [vmem:[%s884_s7 + $0x78] sm:$0xf0]  ;;  %v669_v23 = vld [vmem:[%s884_s7 + $0x60] sm:$0xf]  ;;  %v714_v24 = vld [vmem:[%s884_s7 + $0x64] sm:$0xf0] }
  0x30   : > { %v682_v25 = vor.u32 %v715_v20, %v679_v22  ;;  %v713_v26 = vld [vmem:[%s884_s7 + $0x64] sm:$0xf]  ;;  %v671_v27 = vld [vmem:[%s884_s7 + $0x68] sm:$0xf0]  ;;  %v670_v28 = vor.u32 %v714_v24, %v669_v23  ;;  %v661_v30 = vld [vmem:[%s884_s7 + $0x50] sm:$0xf] }
  0x31   : > { %422 = vmatpush.bf16.msra.mxu0 %v678_v21  ;;  %v674_v29 = vor.u32 %v713_v26, %v671_v27  ;;  %v712_v31 = vld [vmem:[%s884_s7 + $0x54] sm:$0xf0]  ;;  %v711_v32 = vld [vmem:[%s884_s7 + $0x54] sm:$0xf]  ;;  %v663_v33 = vld [vmem:[%s884_s7 + $0x58] sm:$0xf0] }
  0x32   : > { %450 = vmatpush.bf16.msra.mxu2 %v682_v25  ;;  %v662_v34 = vor.u32 %v712_v31, %v661_v30  ;;  %v653_v35 = vld [vmem:[%s884_s7 + $0x40] sm:$0xf]  ;;  %v699_v36 = vld [vmem:[%s968_s1 + $0x4] sm:$0xf]  ;;  %v615_v37 = vld [vmem:[%s968_s1 + $0x8] sm:$0xf0]  ;;  %v666_v38 = vor.u32 %v711_v32, %v663_v33 }
  0x33   : > { %v710_v39 = vld [vmem:[%s884_s7 + $0x44] sm:$0xf0]  ;;  %v717_v40 = vld [vmem:[%s884_s7 + $0x84] sm:$0xf]  ;;  %v687_v41 = vld [vmem:[%s884_s7 + $0x88] sm:$0xf0]  ;;  %v618_v45 = vor.u32 %v699_v36, %v615_v37 }
  0x34   : > { %v709_v42 = vld [vmem:[%s884_s7 + $0x44] sm:$0xf]  ;;  %v655_v43 = vld [vmem:[%s884_s7 + $0x48] sm:$0xf0]  ;;  %v690_v44 = vor.u32 %v717_v40, %v687_v41  ;;  %v685_v46 = vld [vmem:[%s884_s7 + $0x80] sm:$0xf]  ;;  %v654_v48 = vor.u32 %v710_v39, %v653_v35 }
  0x35   : > { %423 = vmatpush.bf16.msra.mxu0 %v670_v28  ;;  %v718_v47 = vld [vmem:[%s884_s7 + $0x84] sm:$0xf0]  ;;  %vm418_vm0 = vcmask 130048   ;;  %v658_v50 = vor.u32 %v709_v42, %v655_v43  ;;  %v645_v51 = vld [vmem:[%s884_s7 + $0x30] sm:$0xf]  ;;  %v773_v56 = vmov 0  }
  0x36   : > { %451 = vmatpush.bf16.msra.mxu2 %v674_v29  ;;  %471 = vmatpush.bf16.msra.mxu3 %v690_v44  ;;  %v686_v49 = vor.u32 %v718_v47, %v685_v46  ;;  %v708_v52 = vld [vmem:[%s884_s7 + $0x34] sm:$0xf0]  ;;  %v478_v53 = vld [vmem:[%s969_s2] sm:$0xff]  ;;  %v647_v55 = vld [vmem:[%s884_s7 + $0x38] sm:$0xf0]  ;;  %s719_s15 = sshll.u32 (%p829_p5), %s603_s18, 4 }
  0x37   : > { %v707_v54 = vld [vmem:[%s884_s7 + $0x34] sm:$0xf]  ;;  %747 = vset.pattern.permute.xlu0 %v773_v56  ;;  %v646_v58 = vor.u32 %v708_v52, %v645_v51  ;;  %748 = vset.pattern.permute.xlu1 %v773_v56  ;;  %v637_v60 = vld [vmem:[%s884_s7 + $0x20] sm:$0xf]  ;;  %v706_v61 = vld [vmem:[%s884_s7 + $0x24] sm:$0xf0]  ;;  %s523_s9 = scalar_lea.vmem (%p829_p5), %s971_s4, %s719_s15 }
  0x38   : > { %443 = vmatpush.bf16.msra.mxu1 %v686_v49  ;;  %482 = vperm.xlu0 %747, %v478_v53   ;;  %v494_v57 = vld [vmem:[%s970_s3] sm:$0xff]  ;;  %v650_v59 = vor.u32 %v707_v54, %v647_v55  ;;  %v639_v63 = vld [vmem:[%s884_s7 + $0x28] sm:$0xf0]  ;;  %v638_v0 = vor.u32 %v706_v61, %v637_v60  ;;  %v704_v4 = vld [vmem:[%s884_s7 + $0x14] sm:$0xf0] }
  0x39   : > { %424 = vmatpush.bf16.msra.mxu0 %v662_v34  ;;  %692 = vmatmul.msk.bf16.vlgmr.msra.gmra.mxu3 %vm418_vm0, %v618_v45  ;;  %v705_v62 = vld [vmem:[%s884_s7 + $0x24] sm:$0xf]  ;;  %v479_v1 = vld [vmem:[%s969_s2 + $0x8] sm:$0xff]  ;;  %v629_v3 = vld [vmem:[%s884_s7 + $0x10] sm:$0xf] }
  0x3a   : > { %452 = vmatpush.bf16.msra.mxu2 %v666_v38  ;;  %498 = vperm.xlu1 %748, %v494_v57   ;;  %v642_v2 = vor.u32 %v705_v62, %v639_v63  ;;  %v703_v5 = vld [vmem:[%s884_s7 + $0x14] sm:$0xf]  ;;  %v631_v6 = vld [vmem:[%s884_s7 + $0x18] sm:$0xf0]  ;;  %v630_v8 = vor.u32 %v704_v4, %v629_v3  ;;  %v621_v10 = vld [vmem:[%s884_s7] sm:$0xf] }
  0x3b   : > { %691 = vmatmul.msk.bf16.vlgmr.msra.gmra.mxu1 %vm418_vm0, %v618_v45  ;;  %v495_v7 = vld [vmem:[%s970_s3 + $0x8] sm:$0xff]  ;;  %v634_v9 = vor.u32 %v703_v5, %v631_v6  ;;  %v701_v12 = vld [vmem:[%s884_s7 + $0x4] sm:$0xf]  ;;  %v613_v15 = vld [vmem:[%s968_s1] sm:$0xf] }
  0x3c   : > { %v702_v11 = vld [vmem:[%s884_s7 + $0x4] sm:$0xf0]  ;;  %v623_v13 = vld [vmem:[%s884_s7 + $0x8] sm:$0xf0]  ;;  %s295_s7 = scalar_lea.vmem [#allocation3], %s610_s6 }
  0x3d   : > { %425 = vmatpush.bf16.msra.mxu0 %v654_v48  ;;  %v622_v14 = vor.u32 %v702_v11, %v621_v10  ;;  %v700_v16 = vld [vmem:[%s968_s1 + $0x4] sm:$0xf0]  ;;  %v626_v17 = vor.u32 %v701_v12, %v623_v13 }
  0x3e   : > { %453 = vmatpush.bf16.msra.mxu2 %v658_v50  ;;  %v614_v18 = vor.u32 %v700_v16, %v613_v15 }
  0x40   : > { %487 = vperm.xlu0 %747, %v479_v1  }
  0x41   : > { %426 = vmatpush.bf16.msra.mxu0 %v646_v58 }
  0x42   : > { %454 = vmatpush.bf16.msra.mxu2 %v650_v59  ;;  %503 = vperm.xlu1 %748, %v495_v7  }
  0x45   : > { %427 = vmatpush.bf16.msra.mxu0 %v638_v0 }
  0x46   : > { %455 = vmatpush.bf16.msra.mxu2 %v642_v2 }
  0x49   : > { %428 = vmatpush.bf16.msra.mxu0 %v630_v8 }
  0x4a   : > { %456 = vmatpush.bf16.msra.mxu2 %v634_v9 }
  0x4d   : > { %429 = vmatpush.bf16.msra.mxu0 %v622_v14 }
  0x4e   : > { %457 = vmatpush.bf16.msra.mxu2 %v626_v17 }
  0x50   : > { %430 = vmatmul.bf16.vlgmr.msra.gmra.mxu0 %v614_v18 }
  0x51   : > { %458 = vmatmul.bf16.vlgmr.msra.gmra.mxu2 %v614_v18 }
  0xaa   : > { %v483_v20 = vpop.permute.xlu0 %482 }
  0xac   : > { %v499_v23 = vpop.permute.xlu1 %498 }
  0xb2   : > { %v488_v33 = vpop.permute.xlu0 %487 }
  0xb4   : > { %v504_v36 = vpop.permute.xlu1 %503 }
  0xb8   : > { %v445_v19 = vpop.f32.mrf.mxu1 }
  0xbc   : > { %v473_v25 = vpop.f32.mrf.mxu3 }
  0xc0   : > { %v447_v28 = vpop.f32.mrf.mxu1 }
  0xc4   : > { %v475_v38 = vpop.f32.mrf.mxu3 }
  0xcd   : > { %v431_v21 = vpop.f32.mrf.mxu0 }
  0xce   : > { %v446_v22 = vadd.f32 %v445_v19, %v431_v21 }
  0xd0   : > { %v490_v24 = vmul.f32 %v483_v20, %v446_v22 }
  0xd2   : > { %v506_v26 = vadd.f32 %v499_v23, %v490_v24 }
  0xd4   : > { %510 = vst [vmem:[%s295_s7] sm:$0xff] %v506_v26  ;;  %v459_v27 = vpop.f32.mrf.mxu2 }
  0xd5   : > { %v474_v29 = vadd.f32 %v473_v25, %v459_v27  ;;  %v433_v30 = vpop.f32.mrf.mxu0 }
  0xd6   : > { %v448_v31 = vadd.f32 %v447_v28, %v433_v30 }
  0xd7   : > { %v491_v32 = vmul.f32 %v483_v20, %v474_v29 }
  0xd8   : > { %v492_v34 = vmul.f32 %v488_v33, %v448_v31 }
  0xd9   : > { %v507_v35 = vadd.f32 %v499_v23, %v491_v32 }
  0xda   : > { %v508_v37 = vadd.f32 %v504_v36, %v492_v34 }
  0xdb   : > { %511 = vst [vmem:[%s295_s7 + $0x8] sm:$0xff] %v507_v35  ;;  %v536_v43 = vld [vmem:[%s295_s7] sm:$0xff] (%p829_p5) }
  0xdc   : > { %512 = vst [vmem:[%s295_s7 + $0x10] sm:$0xff] %v508_v37  ;;  %v461_v39 = vpop.f32.mrf.mxu2 }
  0xdd   : > { %v476_v40 = vadd.f32 %v475_v38, %v461_v39  ;;  %537 = vst [vmem:[%s523_s9] sm:$0xff] (%p829_p5), %v536_v43 }
  0xdf   : > { %v493_v41 = vmul.f32 %v488_v33, %v476_v40  ;;  %520 = sbr.rel (!%p829_p5) target bundleno = 236 (0xec), region = 78 }
  0xe1   : > { %v509_v42 = vadd.f32 %v504_v36, %v493_v41 }
  0xe2   : > { %v538_v44 = vld [vmem:[%s295_s7 + $0x8] sm:$0xff] (%p829_p5) }
  0xe3   : > { %513 = vst [vmem:[%s295_s7 + $0x18] sm:$0xff] %v509_v42  ;;  %v540_v45 = vld [vmem:[%s295_s7 + $0x10] sm:$0xff] (%p829_p5) }
  0xe4   : > { %539 = vst [vmem:[%s523_s9 + $0x8] sm:$0xff] %v538_v44 }
  0xe5   : > { %541 = vst [vmem:[%s523_s9 + $0x20] sm:$0xff] %v540_v45 }
  0xea   : > { %v542_v46 = vld [vmem:[%s295_s7 + $0x18] sm:$0xff] }
  0xeb   : > { %543 = vst [vmem:[%s523_s9 + $0x28] sm:$0xff] %v542_v46 }
  0xec PF: > { %p11_p10 = scmp.ge.s32.totalorder %s816_s19, 4   ;;  %s973_s15 = smov %s767_s16 }
  0xed   : > { %s974_s16 = smov %s827_s22  ;;  %s975_s17 = smov %s816_s19 }
  0xee   :  { %13 = sbr.rel (!%p11_p10) target bundleno = 2 (0x2), region = 132 }

// kernel: cfm_forward.15
= control target key start
LH: loop header
LB: loop body
LE: loop exit
PB: predicated region body
PF: predicated region fallthrough
CT: control target
= control target key end

     0   :  { %s1110_s15 = smov 0   ;;  %s1112_s16 = smov 0   ;;  %s1370_s0 = inlined_call_operand.vmem [shape: bf16[288,512], index: 0, kind: input, shape index: {}]   ;;  %s1371_s1 = inlined_call_operand.vmem [shape: bf16[16,288], index: 1, kind: input, shape index: {}]   ;;  %s1372_s2 = inlined_call_operand.vmem [shape: f32[16,1], index: 2, kind: input, shape index: {}]   ;;  %s1373_s3 = inlined_call_operand.vmem [shape: f32[16,1], index: 3, kind: input, shape index: {}]   ;;  %s1374_s4 = inlined_call_operand.vmem [shape: f32[16,512], index: 4, kind: output, shape index: {}]  }
   0x1   :  { %s1114_s17 = smov 0  }
   0x2 LB: > { %s819_s18 = sadd.s32 4294967295, %s1082_s17   ;;  %s1127_s19 = sadd.s32 1, %s1082_s17   ;;  %s1082_s17 = sphi %s1114_s17, %s1378_s17   ;;  %s1078_s16 = sphi %s1112_s16, %s1377_s16   ;;  %s1074_s15 = sphi %s1110_s15, %s1376_s15  }
   0x3   : > { %s18_s20 = ssub.s32 %s1082_s17, %s1127_s19  ;;  %s21_s21 = sadd.s32 1, %s1078_s16 }
   0x4   : > { %p19_p0 = scmp.eq.s32.totalorder %s18_s20, 0  ;;  %p28_p1 = scmp.ne.s32.totalorder %s1078_s16, %s1074_s15 }
   0x5   : > { %p29_p2 = scmp.eq.s32.totalorder %s1082_s17, 0  ;;  %p121_p3 = scmp.eq.s32.totalorder %s819_s18, 1 }
   0x6   : > { %s1138_s22 = scalar_select %p19_p0, %s1078_s16, %s21_s21  }
   0x7   : > { %p30_p4 = por %p29_p2, %p28_p1  ;;  %p1140_p5 = por %p121_p3, %p28_p1 }
   0x8   : > { %p822_p6 = scmp.ge.s32.totalorder %s1082_s17, 2 }
   0xa   : > { %152 = sbr.rel (%p822_p6) target bundleno = 55 (0x37), region = 28 }
   0xf   : > { %155 = sbr.rel (!%p30_p4) target bundleno = 55 (0x37), region = 32  ;;  %s157_s24 = sand.u32 (%p30_p4), 1, %s1078_s16  }
  0x10   : > { %s990_s25 = sshll.u32 (%p30_p4), %s1082_s17, 3  ;;  %s1031_s26 = smul.u32 (%p30_p4), 288, %s157_s24 }
  0x11   : > { %s1150_s29 = scalar_lea.vmem (%p30_p4), %s1370_s0, %s990_s25 }
  0x12   : > { %v261_v0 = vld [vmem:[%s1150_s29] sm:$0xff] (%p30_p4)  ;;  %v263_v1 = vld [vmem:[%s1150_s29 + $0x10] sm:$0xff] (%p30_p4)  ;;  %s1155_s30 = scalar_lea.vmem (%p30_p4), [#allocation2], %s1031_s26 }
  0x13   : > { %v265_v2 = vld [vmem:[%s1150_s29 + $0x20] sm:$0xff] (%p30_p4)  ;;  %262 = vst [vmem:[%s1155_s30] sm:$0xff] (%p30_p4), %v261_v0  ;;  %v267_v3 = vld [vmem:[%s1150_s29 + $0x30] sm:$0xff] (%p30_p4) }
  0x14   : > { %264 = vst [vmem:[%s1155_s30 + $0x8] sm:$0xff] %v263_v1  ;;  %v269_v4 = vld [vmem:[%s1150_s29 + $0x40] sm:$0xff]  ;;  %v271_v5 = vld [vmem:[%s1150_s29 + $0x50] sm:$0xff] }
  0x15   : > { %266 = vst [vmem:[%s1155_s30 + $0x10] sm:$0xff] %v265_v2  ;;  %v273_v6 = vld [vmem:[%s1150_s29 + $0x60] sm:$0xff]  ;;  %v275_v7 = vld [vmem:[%s1150_s29 + $0x70] sm:$0xff] }
  0x16   : > { %268 = vst [vmem:[%s1155_s30 + $0x18] sm:$0xff] %v267_v3  ;;  %v277_v8 = vld [vmem:[%s1150_s29 + $0x80] sm:$0xff]  ;;  %v279_v9 = vld [vmem:[%s1150_s29 + $0x90] sm:$0xff] }
  0x17   : > { %270 = vst [vmem:[%s1155_s30 + $0x20] sm:$0xff] %v269_v4  ;;  %v281_v10 = vld [vmem:[%s1150_s29 + $0xa0] sm:$0xff]  ;;  %v283_v11 = vld [vmem:[%s1150_s29 + $0xb0] sm:$0xff] }
  0x18   : > { %272 = vst [vmem:[%s1155_s30 + $0x28] sm:$0xff] %v271_v5  ;;  %v285_v12 = vld [vmem:[%s1150_s29 + $0xc0] sm:$0xff]  ;;  %v287_v13 = vld [vmem:[%s1150_s29 + $0xd0] sm:$0xff] }
  0x19   : > { %274 = vst [vmem:[%s1155_s30 + $0x30] sm:$0xff] %v273_v6  ;;  %v289_v14 = vld [vmem:[%s1150_s29 + $0xe0] sm:$0xff]  ;;  %v291_v15 = vld [vmem:[%s1150_s29 + $0xf0] sm:$0xff] }
  0x1a   : > { %276 = vst [vmem:[%s1155_s30 + $0x38] sm:$0xff] %v275_v7  ;;  %v293_v16 = vld [vmem:[%s1150_s29 + $0x100] sm:$0xff]  ;;  %v295_v17 = vld [vmem:[%s1150_s29 + $0x110] sm:$0xff] }
  0x1b   : > { %278 = vst [vmem:[%s1155_s30 + $0x40] sm:$0xff] %v277_v8  ;;  %v297_v18 = vld [vmem:[%s1150_s29 + $0x120] sm:$0xff]  ;;  %v299_v19 = vld [vmem:[%s1150_s29 + $0x130] sm:$0xff] }
  0x1c   : > { %280 = vst [vmem:[%s1155_s30 + $0x48] sm:$0xff] %v279_v9  ;;  %v301_v20 = vld [vmem:[%s1150_s29 + $0x140] sm:$0xff]  ;;  %v303_v21 = vld [vmem:[%s1150_s29 + $0x150] sm:$0xff] }
  0x1d   : > { %282 = vst [vmem:[%s1155_s30 + $0x50] sm:$0xff] %v281_v10  ;;  %v305_v22 = vld [vmem:[%s1150_s29 + $0x160] sm:$0xff]  ;;  %v307_v23 = vld [vmem:[%s1150_s29 + $0x170] sm:$0xff] }
  0x1e   : > { %284 = vst [vmem:[%s1155_s30 + $0x58] sm:$0xff] %v283_v11  ;;  %v309_v24 = vld [vmem:[%s1150_s29 + $0x180] sm:$0xff]  ;;  %v311_v25 = vld [vmem:[%s1150_s29 + $0x190] sm:$0xff] }
  0x1f   : > { %286 = vst [vmem:[%s1155_s30 + $0x60] sm:$0xff] %v285_v12  ;;  %v313_v26 = vld [vmem:[%s1150_s29 + $0x1a0] sm:$0xff]  ;;  %v315_v27 = vld [vmem:[%s1150_s29 + $0x1b0] sm:$0xff] }
  0x20   : > { %288 = vst [vmem:[%s1155_s30 + $0x68] sm:$0xff] %v287_v13  ;;  %v317_v28 = vld [vmem:[%s1150_s29 + $0x1c0] sm:$0xff]  ;;  %v319_v29 = vld [vmem:[%s1150_s29 + $0x1d0] sm:$0xff] }
  0x21   : > { %290 = vst [vmem:[%s1155_s30 + $0x70] sm:$0xff] %v289_v14  ;;  %v321_v30 = vld [vmem:[%s1150_s29 + $0x1e0] sm:$0xff]  ;;  %v323_v31 = vld [vmem:[%s1150_s29 + $0x1f0] sm:$0xff] }
  0x22   : > { %292 = vst [vmem:[%s1155_s30 + $0x78] sm:$0xff] %v291_v15  ;;  %v325_v32 = vld [vmem:[%s1150_s29 + $0x200] sm:$0xff]  ;;  %v327_v33 = vld [vmem:[%s1150_s29 + $0x210] sm:$0xff] }
  0x23   : > { %294 = vst [vmem:[%s1155_s30 + $0x80] sm:$0xff] %v293_v16  ;;  %v329_v34 = vld [vmem:[%s1150_s29 + $0x220] sm:$0xff]  ;;  %v331_v35 = vld [vmem:[%s1150_s29 + $0x230] sm:$0xff] }
  0x24   : > { %296 = vst [vmem:[%s1155_s30 + $0x88] sm:$0xff] %v295_v17 }
  0x25   : > { %298 = vst [vmem:[%s1155_s30 + $0x90] sm:$0xff] %v297_v18 }
  0x26   : > { %300 = vst [vmem:[%s1155_s30 + $0x98] sm:$0xff] %v299_v19 }
  0x27   : > { %302 = vst [vmem:[%s1155_s30 + $0xa0] sm:$0xff] %v301_v20 }
  0x28   : > { %304 = vst [vmem:[%s1155_s30 + $0xa8] sm:$0xff] %v303_v21 }
  0x29   : > { %306 = vst [vmem:[%s1155_s30 + $0xb0] sm:$0xff] %v305_v22 }
  0x2a   : > { %308 = vst [vmem:[%s1155_s30 + $0xb8] sm:$0xff] %v307_v23 }
  0x2b   : > { %310 = vst [vmem:[%s1155_s30 + $0xc0] sm:$0xff] %v309_v24 }
  0x2c   : > { %312 = vst [vmem:[%s1155_s30 + $0xc8] sm:$0xff] %v311_v25 }
  0x2d   : > { %314 = vst [vmem:[%s1155_s30 + $0xd0] sm:$0xff] %v313_v26 }
  0x2e   : > { %316 = vst [vmem:[%s1155_s30 + $0xd8] sm:$0xff] %v315_v27 }
  0x2f   : > { %318 = vst [vmem:[%s1155_s30 + $0xe0] sm:$0xff] %v317_v28 }
  0x30   : > { %320 = vst [vmem:[%s1155_s30 + $0xe8] sm:$0xff] %v319_v29 }
  0x31   : > { %322 = vst [vmem:[%s1155_s30 + $0xf0] sm:$0xff] %v321_v30 }
  0x32   : > { %324 = vst [vmem:[%s1155_s30 + $0xf8] sm:$0xff] %v323_v31 }
  0x33   : > { %326 = vst [vmem:[%s1155_s30 + $0x100] sm:$0xff] %v325_v32 }
  0x34   : > { %328 = vst [vmem:[%s1155_s30 + $0x108] sm:$0xff] %v327_v33 }
  0x35   : > { %330 = vst [vmem:[%s1155_s30 + $0x110] sm:$0xff] %v329_v34 }
  0x36   : > { %332 = vst [vmem:[%s1155_s30 + $0x118] sm:$0xff] %v331_v35 }
  0x37 PF: > { %p825_p7 = scmp.ge.s32.totalorder %s1082_s17, 1  ;;  %p337_p8 = scmp.lt.s32.totalorder %s1082_s17, 3 }
  0x39   : > { %p338_p9 = pnand %p825_p7, %p337_p8 }
  0x3a   : > { %s344_s5 = sand.u32 (!%p338_p9), 1, %s1074_s15  }
  0x3b   : > { %341 = sbr.rel (%p338_p9) target bundleno = 265 (0x109), region = 70 }
  0x3c   : > { %s1032_s6 = smul.u32 (!%p338_p9), 288, %s344_s5 }
  0x3e   : > { %s1231_s7 = scalar_lea.vmem (!%p338_p9), [#allocation2], %s1032_s6 }
  0x40   : > { %v897_v36 = vld [vmem:[%s1231_s7 + $0x70] sm:$0xf]  ;;  %v1009_v37 = vld [vmem:[%s1231_s7 + $0x74] sm:$0xf0]  ;;  %vm606_vm0 = vcmask 261120   ;;  %s1030_s15 = sshll.u32 (%p1140_p5), %s819_s18, 4 }
  0x41   : > { %v961_v38 = vld [vmem:[%s1231_s7 + $0xf0] sm:$0xf]  ;;  %v898_v39 = vor.u32 %v1009_v37, %v897_v36  ;;  %v1025_v40 = vld [vmem:[%s1231_s7 + $0xf4] sm:$0xf0]  ;;  %v1008_v45 = vld [vmem:[%s1231_s7 + $0x74] sm:$0xf]  ;;  %s739_s13 = scalar_lea.vmem (%p1140_p5), %s1374_s4, %s1030_s15 }
  0x42   : > { %v977_v41 = vld [vmem:[%s1231_s7 + $0x110] sm:$0xf]  ;;  %v1029_v42 = vld [vmem:[%s1231_s7 + $0x114] sm:$0xf0]  ;;  %v962_v43 = vor.u32 %v1025_v40, %v961_v38  ;;  %v899_v46 = vld [vmem:[%s1231_s7 + $0x78] sm:$0xf0] }
  0x43   : > { %v978_v44 = vor.u32 %v1029_v42, %v977_v41  ;;  %v889_v47 = vld [vmem:[%s1231_s7 + $0x60] sm:$0xf]  ;;  %v837_v48 = vld [vmem:[%s1371_s1 + $0x8] sm:$0xf]  ;;  %v993_v49 = vld [vmem:[%s1371_s1 + $0x10] sm:$0xf0]  ;;  %610 = vmatpush.bf16.msra.mxu0 %v898_v39  ;;  %v902_v50 = vor.u32 %v1008_v45, %v899_v46 }
  0x44   : > { %v1007_v51 = vld [vmem:[%s1231_s7 + $0x64] sm:$0xf0]  ;;  %v953_v52 = vld [vmem:[%s1231_s7 + $0xe0] sm:$0xf]  ;;  %624 = vmatpush.bf16.msra.mxu1 %v962_v43  ;;  %v1006_v58 = vld [vmem:[%s1231_s7 + $0x64] sm:$0xf]  ;;  %v1263_v8 = vor.u32 %v993_v49, %v837_v48 }
  0x45   : > { %v1023_v53 = vld [vmem:[%s1231_s7 + $0xe4] sm:$0xf0]  ;;  %644 = vmatpush.bf16.msra.mxu2 %v978_v44  ;;  %v890_v54 = vor.u32 %v1007_v51, %v889_v47  ;;  %v969_v56 = vld [vmem:[%s1231_s7 + $0x100] sm:$0xf]  ;;  %652 = vmatpush.bf16.msra.mxu3 %v902_v50  ;;  %v891_v60 = vld [vmem:[%s1231_s7 + $0x68] sm:$0xf0] }
  0x46   : > { %v954_v55 = vor.u32 %v1023_v53, %v953_v52  ;;  %v1027_v57 = vld [vmem:[%s1231_s7 + $0x104] sm:$0xf0]  ;;  %v1024_v61 = vld [vmem:[%s1231_s7 + $0xf4] sm:$0xf]  ;;  %v963_v62 = vld [vmem:[%s1231_s7 + $0xf8] sm:$0xf0]  ;;  %v894_v63 = vor.u32 %v1006_v58, %v891_v60 }
  0x47   : > { %v970_v59 = vor.u32 %v1027_v57, %v969_v56  ;;  %v966_v0 = vor.u32 %v1024_v61, %v963_v62  ;;  %v881_v1 = vld [vmem:[%s1231_s7 + $0x50] sm:$0xf]  ;;  %v1005_v2 = vld [vmem:[%s1231_s7 + $0x54] sm:$0xf0]  ;;  %611 = vmatpush.bf16.msra.mxu0 %v890_v54  ;;  %v1004_v6 = vld [vmem:[%s1231_s7 + $0x54] sm:$0xf] }
  0x48   : > { %v945_v3 = vld [vmem:[%s1231_s7 + $0xd0] sm:$0xf]  ;;  %v882_v4 = vor.u32 %v1005_v2, %v881_v1  ;;  %v1021_v5 = vld [vmem:[%s1231_s7 + $0xd4] sm:$0xf0]  ;;  %v883_v7 = vld [vmem:[%s1231_s7 + $0x58] sm:$0xf0]  ;;  %625 = vmatpush.bf16.msra.mxu1 %v954_v55 }
  0x49   : > { %645 = vmatpush.bf16.msra.mxu2 %v970_v59  ;;  %v946_v9 = vor.u32 %v1021_v5, %v945_v3  ;;  %v1022_v10 = vld [vmem:[%s1231_s7 + $0xe4] sm:$0xf]  ;;  %v955_v11 = vld [vmem:[%s1231_s7 + $0xe8] sm:$0xf0]  ;;  %v873_v12 = vld [vmem:[%s1231_s7 + $0x40] sm:$0xf]  ;;  %653 = vmatpush.bf16.msra.mxu3 %v894_v63  ;;  %v886_v13 = vor.u32 %v1004_v6, %v883_v7 }
  0x4a   : > { %v958_v14 = vor.u32 %v1022_v10, %v955_v11  ;;  %v1003_v15 = vld [vmem:[%s1231_s7 + $0x44] sm:$0xf0]  ;;  %v937_v16 = vld [vmem:[%s1231_s7 + $0xc0] sm:$0xf]  ;;  %v1002_v18 = vld [vmem:[%s1231_s7 + $0x44] sm:$0xf] }
  0x4b   : > { %v1019_v17 = vld [vmem:[%s1231_s7 + $0xc4] sm:$0xf0]  ;;  %v875_v19 = vld [vmem:[%s1231_s7 + $0x48] sm:$0xf0]  ;;  %v1020_v20 = vld [vmem:[%s1231_s7 + $0xd4] sm:$0xf]  ;;  %612 = vmatpush.bf16.msra.mxu0 %v882_v4  ;;  %v874_v21 = vor.u32 %v1003_v15, %v873_v12 }
  0x4c   : > { %v947_v22 = vld [vmem:[%s1231_s7 + $0xd8] sm:$0xf0]  ;;  %983 = vmatmul.msk.bf16.vlgmr.msra.gmra.mxu2 %vm606_vm0, %v1263_v8  ;;  %626 = vmatpush.bf16.msra.mxu1 %v946_v9  ;;  %v938_v23 = vor.u32 %v1019_v17, %v937_v16  ;;  %v865_v24 = vld [vmem:[%s1231_s7 + $0x30] sm:$0xf]  ;;  %v1001_v25 = vld [vmem:[%s1231_s7 + $0x34] sm:$0xf0]  ;;  %v878_v26 = vor.u32 %v1002_v18, %v875_v19 }
  0x4d   : > { %666 = vmatpush.bf16.msrb.mxu2 %v966_v0  ;;  %654 = vmatpush.bf16.msra.mxu3 %v886_v13  ;;  %v950_v27 = vor.u32 %v1020_v20, %v947_v22  ;;  %v929_v28 = vld [vmem:[%s1231_s7 + $0xb0] sm:$0xf]  ;;  %v1017_v29 = vld [vmem:[%s1231_s7 + $0xb4] sm:$0xf0]  ;;  %v1000_v30 = vld [vmem:[%s1231_s7 + $0x34] sm:$0xf]  ;;  %v866_v34 = vor.u32 %v1001_v25, %v865_v24 }
  0x4e   : > { %v867_v31 = vld [vmem:[%s1231_s7 + $0x38] sm:$0xf0]  ;;  %v1018_v32 = vld [vmem:[%s1231_s7 + $0xc4] sm:$0xf]  ;;  %v939_v33 = vld [vmem:[%s1231_s7 + $0xc8] sm:$0xf0]  ;;  %v930_v35 = vor.u32 %v1017_v29, %v929_v28 }
  0x4f   : > { %613 = vmatpush.bf16.msra.mxu0 %v874_v21  ;;  %v857_v36 = vld [vmem:[%s1231_s7 + $0x20] sm:$0xf]  ;;  %v999_v37 = vld [vmem:[%s1231_s7 + $0x24] sm:$0xf0]  ;;  %v870_v38 = vor.u32 %v1000_v30, %v867_v31  ;;  %v942_v39 = vor.u32 %v1018_v32, %v939_v33  ;;  %v998_v42 = vld [vmem:[%s1231_s7 + $0x24] sm:$0xf] }
  0x50   : > { %627 = vmatpush.bf16.msra.mxu1 %v938_v23  ;;  %v921_v40 = vld [vmem:[%s1231_s7 + $0xa0] sm:$0xf]  ;;  %v1015_v41 = vld [vmem:[%s1231_s7 + $0xa4] sm:$0xf0]  ;;  %v859_v43 = vld [vmem:[%s1231_s7 + $0x28] sm:$0xf0]  ;;  %v858_v46 = vor.u32 %v999_v37, %v857_v36 }
  0x51   : > { %667 = vmatpush.bf16.msrb.mxu2 %v958_v14  ;;  %655 = vmatpush.bf16.msra.mxu3 %v878_v26  ;;  %v1016_v44 = vld [vmem:[%s1231_s7 + $0xb4] sm:$0xf]  ;;  %v931_v45 = vld [vmem:[%s1231_s7 + $0xb8] sm:$0xf0]  ;;  %v922_v47 = vor.u32 %v1015_v41, %v921_v40  ;;  %v849_v48 = vld [vmem:[%s1231_s7 + $0x10] sm:$0xf]  ;;  %v862_v50 = vor.u32 %v998_v42, %v859_v43 }
  0x52   : > { %v997_v49 = vld [vmem:[%s1231_s7 + $0x14] sm:$0xf0]  ;;  %v934_v51 = vor.u32 %v1016_v44, %v931_v45  ;;  %v913_v52 = vld [vmem:[%s1231_s7 + $0x90] sm:$0xf]  ;;  %v996_v54 = vld [vmem:[%s1231_s7 + $0x14] sm:$0xf] }
  0x53   : > { %614 = vmatpush.bf16.msra.mxu0 %v866_v34  ;;  %v1013_v53 = vld [vmem:[%s1231_s7 + $0x94] sm:$0xf0]  ;;  %v851_v55 = vld [vmem:[%s1231_s7 + $0x18] sm:$0xf0]  ;;  %v1014_v56 = vld [vmem:[%s1231_s7 + $0xa4] sm:$0xf]  ;;  %v850_v58 = vor.u32 %v997_v49, %v849_v48 }
  0x54   : > { %628 = vmatpush.bf16.msra.mxu1 %v930_v35  ;;  %v923_v57 = vld [vmem:[%s1231_s7 + $0xa8] sm:$0xf0]  ;;  %v841_v59 = vld [vmem:[%s1231_s7] sm:$0xf]  ;;  %v995_v60 = vld [vmem:[%s1231_s7 + $0x4] sm:$0xf0]  ;;  %v914_v62 = vor.u32 %v1013_v53, %v913_v52  ;;  %v854_v2 = vor.u32 %v996_v54, %v851_v55 }
  0x55   : > { %668 = vmatpush.bf16.msrb.mxu2 %v950_v27  ;;  %656 = vmatpush.bf16.msra.mxu3 %v870_v38  ;;  %v905_v61 = vld [vmem:[%s1231_s7 + $0x80] sm:$0xf]  ;;  %v1011_v63 = vld [vmem:[%s1231_s7 + $0x84] sm:$0xf0]  ;;  %v994_v0 = vld [vmem:[%s1231_s7 + $0x4] sm:$0xf]  ;;  %v926_v3 = vor.u32 %v1014_v56, %v923_v57  ;;  %v842_v12 = vor.u32 %v995_v60, %v841_v59 }
  0x56   : > { %v1028_v1 = vld [vmem:[%s1231_s7 + $0x114] sm:$0xf]  ;;  %v979_v4 = vld [vmem:[%s1231_s7 + $0x118] sm:$0xf0]  ;;  %v694_v5 = vld [vmem:[%s1372_s2] sm:$0xff]  ;;  %v1084_v11 = vmov 0   ;;  %v906_v15 = vor.u32 %v1011_v63, %v905_v61 }
  0x57   : > { %615 = vmatpush.bf16.msra.mxu0 %v858_v46  ;;  %v710_v6 = vld [vmem:[%s1373_s3] sm:$0xff]  ;;  %v843_v7 = vld [vmem:[%s1231_s7 + $0x8] sm:$0xf0]  ;;  %v1012_v9 = vld [vmem:[%s1231_s7 + $0x94] sm:$0xf]  ;;  %1058 = vset.pattern.permute.xlu0 %v1084_v11  ;;  %v982_v18 = vor.u32 %v1028_v1, %v979_v4 }
  0x58   : > { %629 = vmatpush.bf16.msra.mxu1 %v922_v47  ;;  %v915_v10 = vld [vmem:[%s1231_s7 + $0x98] sm:$0xf0]  ;;  %1059 = vset.pattern.permute.xlu1 %v1084_v11  ;;  %v829_v13 = vld [vmem:[%s1371_s1] sm:$0xf]  ;;  %v992_v14 = vld [vmem:[%s1371_s1 + $0x8] sm:$0xf0]  ;;  %v846_v19 = vor.u32 %v994_v0, %v843_v7 }
  0x59   : > { %669 = vmatpush.bf16.msrb.mxu2 %v942_v39  ;;  %657 = vmatpush.bf16.msra.mxu3 %v862_v50  ;;  %v991_v16 = vld [vmem:[%s1371_s1 + $0x4] sm:$0xf]  ;;  %v831_v17 = vld [vmem:[%s1371_s1 + $0xc] sm:$0xf0]  ;;  %v918_v20 = vor.u32 %v1012_v9, %v915_v10  ;;  %v971_v22 = vld [vmem:[%s1231_s7 + $0x108] sm:$0xf0]  ;;  %v830_v23 = vor.u32 %v992_v14, %v829_v13 }
  0x5a   : > { %698 = vperm.xlu0 %1058, %v694_v5   ;;  %714 = vperm.xlu1 %1059, %v710_v6   ;;  %v1026_v21 = vld [vmem:[%s1231_s7 + $0x104] sm:$0xf]  ;;  %v907_v25 = vld [vmem:[%s1231_s7 + $0x88] sm:$0xf0]  ;;  %v834_v26 = vor.u32 %v991_v16, %v831_v17 }
  0x5b   : > { %616 = vmatpush.bf16.msra.mxu0 %v850_v58  ;;  %v1010_v24 = vld [vmem:[%s1231_s7 + $0x84] sm:$0xf]  ;;  %v974_v27 = vor.u32 %v1026_v21, %v971_v22  ;;  %v695_v28 = vld [vmem:[%s1372_s2 + $0x8] sm:$0xff]  ;;  %s826_s7 = sshll.u32 %s344_s5, 5 }
  0x5c   : > { %630 = vmatpush.bf16.msra.mxu1 %v914_v62  ;;  %v910_v29 = vor.u32 %v1010_v24, %v907_v25  ;;  %v711_v30 = vld [vmem:[%s1373_s3 + $0x8] sm:$0xff]  ;;  %s1343_s11 = scalar_lea.vmem [#allocation3], %s826_s7 }
  0x5d   : > { %670 = vmatpush.bf16.msrb.mxu2 %v934_v51  ;;  %658 = vmatpush.bf16.msra.mxu3 %v854_v2 }
  0x5f   : > { %617 = vmatpush.bf16.msra.mxu0 %v842_v12 }
  0x60   : > { %631 = vmatpush.bf16.msra.mxu1 %v906_v15 }
  0x61   : > { %671 = vmatpush.bf16.msrb.mxu2 %v926_v3  ;;  %659 = vmatpush.bf16.msra.mxu3 %v846_v19 }
  0x62   : > { %618 = vmatmul.bf16.vlgmr.msra.gmra.mxu0 %v830_v23  ;;  %703 = vperm.xlu0 %1058, %v695_v28  }
  0x63   : > { %686 = vmatpush.bf16.msrb.mxu0 %v982_v18  ;;  %632 = vmatmul.bf16.vlgmr.msra.gmra.mxu1 %v834_v26 }
  0x64   : > { %660 = vmatmul.bf16.vlgmr.msra.gmra.mxu3 %v830_v23  ;;  %719 = vperm.xlu1 %1059, %v711_v30  }
  0x65   : > { %672 = vmatpush.bf16.msrb.mxu2 %v918_v20 }
  0x67   : > { %687 = vmatpush.bf16.msrb.mxu0 %v974_v27 }
  0x69   : > { %673 = vmatpush.bf16.msrb.mxu2 %v910_v29 }
  0x6c   : > { %674 = vmatmul.bf16.vlgmr.msrb.gmra.mxu2 %v834_v26 }
  0x72   : > { %984 = vmatmul.msk.bf16.vlgmr.msrb.gmra.mxu0 %vm606_vm0, %v1263_v8 }
  0xcc   : > { %v699_v34 = vpop.permute.xlu0 %698  ;;  %v715_v36 = vpop.permute.xlu1 %714 }
  0xcf   : > { %v647_v31 = vpop.f32.mrf.mxu2 }
  0xd4   : > { %v704_v43 = vpop.permute.xlu0 %703 }
  0xd6   : > { %v720_v48 = vpop.permute.xlu1 %719 }
  0xd7   : > { %v649_v37 = vpop.f32.mrf.mxu2 }
  0xdf   : > { %v619_v32 = vpop.f32.mrf.mxu0 }
  0xe0   : > { %v633_v33 = vpop.f32.mrf.mxu1 }
  0xe1   : > { %v634_v35 = vadd.f32 %v633_v33, %v619_v32 }
  0xe3   : > { %v648_v38 = vadd.f32 %v647_v31, %v634_v35 }
  0xe5   : > { %v706_v39 = vmul.f32 %v699_v34, %v648_v38 }
  0xe7   : > { %v722_v40 = vadd.f32 %v715_v36, %v706_v39  ;;  %v621_v41 = vpop.f32.mrf.mxu0  ;;  %v661_v44 = vpop.f32.mrf.mxu3 }
  0xe8   : > { %v635_v42 = vpop.f32.mrf.mxu1 }
  0xe9   : > { %726 = vst [vmem:[%s1343_s11] sm:$0xff] %v722_v40  ;;  %v636_v8 = vadd.f32 %v635_v42, %v621_v41 }
  0xeb   : > { %v650_v46 = vadd.f32 %v649_v37, %v636_v8 }
  0xed   : > { %v708_v49 = vmul.f32 %v704_v43, %v650_v46 }
  0xef   : > { %v675_v45 = vpop.f32.mrf.mxu2  ;;  %v724_v50 = vadd.f32 %v720_v48, %v708_v49  ;;  %v689_v51 = vpop.f32.mrf.mxu0 }
  0xf0   : > { %v676_v47 = vadd.f32 %v675_v45, %v661_v44  ;;  %v663_v56 = vpop.f32.mrf.mxu3  ;;  %v752_v62 = vld [vmem:[%s1343_s11] sm:$0xff] (%p1140_p5) }
  0xf1   : > { %728 = vst [vmem:[%s1343_s11 + $0x10] sm:$0xff] %v724_v50 }
  0xf2   : > { %v690_v52 = vadd.f32 %v689_v51, %v676_v47  ;;  %753 = vst [vmem:[%s739_s13] sm:$0xff] (%p1140_p5), %v752_v62 }
  0xf4   : > { %v707_v53 = vmul.f32 %v699_v34, %v690_v52 }
  0xf6   : > { %v723_v55 = vadd.f32 %v715_v36, %v707_v53 }
  0xf7   : > { %v677_v54 = vpop.f32.mrf.mxu2  ;;  %v691_v58 = vpop.f32.mrf.mxu0 }
  0xf8   : > { %727 = vst [vmem:[%s1343_s11 + $0x8] sm:$0xff] %v723_v55  ;;  %v678_v57 = vadd.f32 %v677_v54, %v663_v56  ;;  %v756_v0 = vld [vmem:[%s1343_s11 + $0x10] sm:$0xff] (%p1140_p5) }
  0xf9   : > { %757 = vst [vmem:[%s739_s13 + $0x20] sm:$0xff] (%p1140_p5), %v756_v0 }
  0xfa   : > { %v692_v59 = vadd.f32 %v691_v58, %v678_v57 }
  0xfc   : > { %v709_v60 = vmul.f32 %v704_v43, %v692_v59  ;;  %736 = sbr.rel (!%p1140_p5) target bundleno = 265 (0x109), region = 78 }
  0xfe   : > { %v725_v61 = vadd.f32 %v720_v48, %v709_v60 }
  0xff   : > { %v754_v63 = vld [vmem:[%s1343_s11 + $0x8] sm:$0xff] (%p1140_p5) }
 0x100   : > { %729 = vst [vmem:[%s1343_s11 + $0x18] sm:$0xff] %v725_v61 }
 0x101   : > { %755 = vst [vmem:[%s739_s13 + $0x8] sm:$0xff] %v754_v63 }
 0x107   : > { %v758_v1 = vld [vmem:[%s1343_s11 + $0x18] sm:$0xff] }
 0x108   : > { %759 = vst [vmem:[%s739_s13 + $0x28] sm:$0xff] %v758_v1 }
 0x109 PF: > { %p11_p10 = scmp.ge.s32.totalorder %s1127_s19, 4   ;;  %s1376_s15 = smov %s1078_s16 }
 0x10a   : > { %s1377_s16 = smov %s1138_s22  ;;  %s1378_s17 = smov %s1127_s19 }
 0x10b   :  { %13 = sbr.rel (!%p11_p10) target bundleno = 2 (0x2), region = 132 }

// kernel: cfm_forward.8
= control target key start
LH: loop header
LB: loop body
LE: loop exit
PB: predicated region body
PF: predicated region fallthrough
CT: control target
= control target key end

     0   :  { %v226_v5 = vmov 0   ;;  %vm101_vm0 = vcmask 130048   ;;  %s309_s0 = inlined_call_operand.vmem [shape: bf16[144,128], index: 0, kind: input, shape index: {}]   ;;  %s310_s1 = inlined_call_operand.vmem [shape: bf16[16,144], index: 1, kind: input, shape index: {}]   ;;  %s311_s2 = inlined_call_operand.vmem [shape: f32[16,1], index: 2, kind: input, shape index: {}]   ;;  %s312_s3 = inlined_call_operand.vmem [shape: f32[16,1], index: 3, kind: input, shape index: {}]   ;;  %s313_s4 = inlined_call_operand.vmem [shape: f32[16,128], index: 4, kind: output, shape index: {}]  }
   0x1   :  { %v221_v0 = vld [vmem:[%s309_s0 + $0x38] sm:$0xff]  ;;  %v220_v1 = vld [vmem:[%s309_s0 + $0x30] sm:$0xff]  ;;  %v222_v2 = vld [vmem:[%s309_s0 + $0x40] sm:$0xff]  ;;  %224 = vset.pattern.permute.xlu0 %v226_v5  ;;  %225 = vset.pattern.permute.xlu1 %v226_v5 }
   0x2   :  { %105 = vmatpush.bf16.msra.mxu0 %v221_v0  ;;  %v212_v3 = vld [vmem:[%s310_s1 + $0x4] sm:$0xf]  ;;  %v171_v4 = vld [vmem:[%s310_s1 + $0x8] sm:$0xf0]  ;;  %126 = vmatpush.bf16.msra.mxu1 %v222_v2  ;;  %v217_v13 = vld [vmem:[%s309_s0 + $0x18] sm:$0xff] }
   0x3   :  { %v174_v6 = vor.u32 %v212_v3, %v171_v4  ;;  %v133_v7 = vld [vmem:[%s311_s2] sm:$0xff]  ;;  %v219_v9 = vld [vmem:[%s309_s0 + $0x28] sm:$0xff]  ;;  %v216_v14 = vld [vmem:[%s309_s0 + $0x10] sm:$0xff] }
   0x4   :  { %v147_v8 = vld [vmem:[%s312_s3] sm:$0xff]  ;;  %137 = vperm.xlu0 %224, %v133_v7   ;;  %v134_v11 = vld [vmem:[%s311_s2 + $0x8] sm:$0xff] }
   0x5   :  { %151 = vperm.xlu1 %225, %v147_v8   ;;  %211 = vmatmul.msk.bf16.vlgmr.msra.gmra.mxu1 %vm101_vm0, %v174_v6  ;;  %v218_v10 = vld [vmem:[%s309_s0 + $0x20] sm:$0xff]  ;;  %v148_v12 = vld [vmem:[%s312_s3 + $0x8] sm:$0xff] }
   0x6   :  { %106 = vmatpush.bf16.msra.mxu0 %v220_v1  ;;  %v215_v15 = vld [vmem:[%s309_s0 + $0x8] sm:$0xff]  ;;  %v214_v16 = vld [vmem:[%s309_s0] sm:$0xff] }
   0x7   :  { %v169_v17 = vld [vmem:[%s310_s1] sm:$0xf]  ;;  %v213_v18 = vld [vmem:[%s310_s1 + $0x4] sm:$0xf0] }
   0x8   :  { %v170_v19 = vor.u32 %v213_v18, %v169_v17 }
   0xa   :  { %107 = vmatpush.bf16.msra.mxu0 %v219_v9 }
   0xc   :  { %142 = vperm.xlu0 %224, %v134_v11  }
   0xd   :  { %156 = vperm.xlu1 %225, %v148_v12  }
   0xe   :  { %108 = vmatpush.bf16.msra.mxu0 %v218_v10 }
  0x12   :  { %109 = vmatpush.bf16.msra.mxu0 %v217_v13 }
  0x16   :  { %110 = vmatpush.bf16.msra.mxu0 %v216_v14 }
  0x1a   :  { %111 = vmatpush.bf16.msra.mxu0 %v215_v15 }
  0x1e   :  { %112 = vmatpush.bf16.msra.mxu0 %v214_v16 }
  0x21   :  { %113 = vmatmul.bf16.vlgmr.msra.gmra.mxu0 %v170_v19 }
  0x76   :  { %v138_v21 = vpop.permute.xlu0 %137 }
  0x77   :  { %v152_v24 = vpop.permute.xlu1 %151 }
  0x7e   :  { %v143_v30 = vpop.permute.xlu0 %142 }
  0x7f   :  { %v157_v32 = vpop.permute.xlu1 %156 }
  0x82   :  { %v128_v20 = vpop.f32.mrf.mxu1 }
  0x8a   :  { %v130_v27 = vpop.f32.mrf.mxu1 }
  0x9e   :  { %v114_v22 = vpop.f32.mrf.mxu0 }
  0x9f   :  { %v129_v23 = vadd.f32 %v128_v20, %v114_v22 }
  0xa1   :  { %v145_v25 = vmul.f32 %v138_v21, %v129_v23 }
  0xa3   :  { %v159_v26 = vadd.f32 %v152_v24, %v145_v25 }
  0xa5   :  { %161 = vst [vmem:[%s313_s4] sm:$0xff] %v159_v26 }
  0xa6   :  { %v116_v28 = vpop.f32.mrf.mxu0 }
  0xa7   :  { %v131_v29 = vadd.f32 %v130_v27, %v116_v28 }
  0xa9   :  { %v146_v31 = vmul.f32 %v143_v30, %v131_v29 }
  0xab   :  { %v160_v33 = vadd.f32 %v157_v32, %v146_v31 }
  0xad   :  { %162 = vst [vmem:[%s313_s4 + $0x8] sm:$0xff] %v160_v33 }

// kernel: cfm_forward.10
= control target key start
LH: loop header
LB: loop body
LE: loop exit
PB: predicated region body
PF: predicated region fallthrough
CT: control target
= control target key end

     0   :  { %s1436_s21 = smov 0   ;;  %s1438_s22 = smov 0   ;;  %s1773_s0 = inlined_call_operand.vmem [shape: bf16[144,512], index: 0, kind: input, shape index: {}]   ;;  %s1774_s1 = inlined_call_operand.vmem [shape: bf16[144,512], index: 1, kind: input, shape index: {}]   ;;  %s1775_s2 = inlined_call_operand.vmem [shape: bf16[32,144], index: 2, kind: input, shape index: {}]   ;;  %s1776_s3 = inlined_call_operand.vmem [shape: bf16[32,144], index: 3, kind: input, shape index: {}]   ;;  %s1777_s4 = inlined_call_operand.vmem [shape: f32[32,1], index: 4, kind: input, shape index: {}]   ;;  %s1778_s5 = inlined_call_operand.vmem [shape: f32[32,1], index: 5, kind: input, shape index: {}]   ;;  %s1779_s6 = inlined_call_operand.vmem [shape: f32[32,512], index: 6, kind: output, shape index: {}]  }
   0x1   :  { %s1440_s23 = smov 0  }
   0x2 LB: > { %s1090_s24 = sadd.s32 4294967295, %s1398_s23   ;;  %s1453_s25 = sadd.s32 1, %s1398_s23   ;;  %s1398_s23 = sphi %s1440_s23, %s1784_s23   ;;  %s1394_s22 = sphi %s1438_s22, %s1783_s22   ;;  %s1390_s21 = sphi %s1436_s21, %s1782_s21  }
   0x3   : > { %s20_s26 = ssub.s32 %s1398_s23, %s1453_s25  ;;  %s23_s27 = sadd.s32 1, %s1394_s22 }
   0x4   : > { %p21_p0 = scmp.eq.s32.totalorder %s20_s26, 0  ;;  %p30_p1 = scmp.ne.s32.totalorder %s1394_s22, %s1390_s21 }
   0x5   : > { %p31_p2 = scmp.eq.s32.totalorder %s1398_s23, 0  ;;  %p170_p3 = scmp.eq.s32.totalorder %s1090_s24, 1 }
   0x6   : > { %s1464_s28 = scalar_select %p21_p0, %s1394_s22, %s23_s27  }
   0x7   : > { %p1466_p4 = por %p31_p2, %p30_p1  ;;  %p1470_p5 = por %p170_p3, %p30_p1 }
   0x8   : > { %p1093_p6 = scmp.ge.s32.totalorder %s1398_s23, 2 }
   0xa   : > { %204 = sbr.rel (%p1093_p6) target bundleno = 59 (0x3b), region = 32 }
   0xf   : > { %207 = sbr.rel (!%p1466_p4) target bundleno = 37 (0x25), region = 36  ;;  %s209_s7 = sand.u32 (%p1466_p4), 1, %s1394_s22  }
  0x10   : > { %s1289_s8 = sshll.u32 (%p1466_p4), %s1398_s23, 3  ;;  %s1345_s9 = smul.u32 (%p1466_p4), 144, %s209_s7 }
  0x11   : > { %s1482_s12 = scalar_lea.vmem (%p1466_p4), %s1773_s0, %s1289_s8 }
  0x12   : > { %v277_v0 = vld [vmem:[%s1482_s12] sm:$0xff] (%p1466_p4)  ;;  %v279_v1 = vld [vmem:[%s1482_s12 + $0x10] sm:$0xff] (%p1466_p4)  ;;  %s1487_s13 = scalar_lea.vmem (%p1466_p4), [#allocation2], %s1345_s9 }
  0x13   : > { %v281_v2 = vld [vmem:[%s1482_s12 + $0x20] sm:$0xff] (%p1466_p4)  ;;  %278 = vst [vmem:[%s1487_s13] sm:$0xff] (%p1466_p4), %v277_v0  ;;  %v283_v3 = vld [vmem:[%s1482_s12 + $0x30] sm:$0xff] (%p1466_p4) }
  0x14   : > { %280 = vst [vmem:[%s1487_s13 + $0x8] sm:$0xff] %v279_v1  ;;  %v285_v4 = vld [vmem:[%s1482_s12 + $0x40] sm:$0xff]  ;;  %v287_v5 = vld [vmem:[%s1482_s12 + $0x50] sm:$0xff] }
  0x15   : > { %282 = vst [vmem:[%s1487_s13 + $0x10] sm:$0xff] %v281_v2  ;;  %v289_v6 = vld [vmem:[%s1482_s12 + $0x60] sm:$0xff]  ;;  %v291_v7 = vld [vmem:[%s1482_s12 + $0x70] sm:$0xff] }
  0x16   : > { %284 = vst [vmem:[%s1487_s13 + $0x18] sm:$0xff] %v283_v3  ;;  %v293_v8 = vld [vmem:[%s1482_s12 + $0x80] sm:$0xff]  ;;  %v295_v9 = vld [vmem:[%s1482_s12 + $0x90] sm:$0xff] }
  0x17   : > { %286 = vst [vmem:[%s1487_s13 + $0x20] sm:$0xff] %v285_v4  ;;  %v297_v10 = vld [vmem:[%s1482_s12 + $0xa0] sm:$0xff]  ;;  %v299_v11 = vld [vmem:[%s1482_s12 + $0xb0] sm:$0xff] }
  0x18   : > { %288 = vst [vmem:[%s1487_s13 + $0x28] sm:$0xff] %v287_v5  ;;  %v301_v12 = vld [vmem:[%s1482_s12 + $0xc0] sm:$0xff]  ;;  %v303_v13 = vld [vmem:[%s1482_s12 + $0xd0] sm:$0xff] }
  0x19   : > { %290 = vst [vmem:[%s1487_s13 + $0x30] sm:$0xff] %v289_v6  ;;  %v305_v14 = vld [vmem:[%s1482_s12 + $0xe0] sm:$0xff]  ;;  %v307_v15 = vld [vmem:[%s1482_s12 + $0xf0] sm:$0xff] }
  0x1a   : > { %292 = vst [vmem:[%s1487_s13 + $0x38] sm:$0xff] %v291_v7  ;;  %v309_v16 = vld [vmem:[%s1482_s12 + $0x100] sm:$0xff]  ;;  %v311_v17 = vld [vmem:[%s1482_s12 + $0x110] sm:$0xff] }
  0x1b   : > { %294 = vst [vmem:[%s1487_s13 + $0x40] sm:$0xff] %v293_v8 }
  0x1c   : > { %296 = vst [vmem:[%s1487_s13 + $0x48] sm:$0xff] %v295_v9 }
  0x1d   : > { %298 = vst [vmem:[%s1487_s13 + $0x50] sm:$0xff] %v297_v10 }
  0x1e   : > { %300 = vst [vmem:[%s1487_s13 + $0x58] sm:$0xff] %v299_v11 }
  0x1f   : > { %302 = vst [vmem:[%s1487_s13 + $0x60] sm:$0xff] %v301_v12 }
  0x20   : > { %304 = vst [vmem:[%s1487_s13 + $0x68] sm:$0xff] %v303_v13 }
  0x21   : > { %306 = vst [vmem:[%s1487_s13 + $0x70] sm:$0xff] %v305_v14 }
  0x22   : > { %308 = vst [vmem:[%s1487_s13 + $0x78] sm:$0xff] %v307_v15 }
  0x23   : > { %310 = vst [vmem:[%s1487_s13 + $0x80] sm:$0xff] %v309_v16 }
  0x24   : > { %312 = vst [vmem:[%s1487_s13 + $0x88] sm:$0xff] %v311_v17 }
  0x25 PF: > { %318 = sbr.rel (!%p1466_p4) target bundleno = 59 (0x3b), region = 74  ;;  %s320_s14 = sand.u32 (%p1466_p4), 1, %s1394_s22  }
  0x26   : > { %s1290_s15 = sshll.u32 (%p1466_p4), %s1398_s23, 3  ;;  %s1346_s16 = smul.u32 (%p1466_p4), 144, %s320_s14 }
  0x27   : > { %s1529_s19 = scalar_lea.vmem (%p1466_p4), %s1774_s1, %s1290_s15 }
  0x28   : > { %v388_v18 = vld [vmem:[%s1529_s19] sm:$0xff] (%p1466_p4)  ;;  %v390_v19 = vld [vmem:[%s1529_s19 + $0x10] sm:$0xff] (%p1466_p4)  ;;  %s1534_s20 = scalar_lea.vmem (%p1466_p4), [#allocation3], %s1346_s16 }
  0x29   : > { %v392_v20 = vld [vmem:[%s1529_s19 + $0x20] sm:$0xff] (%p1466_p4)  ;;  %389 = vst [vmem:[%s1534_s20] sm:$0xff] (%p1466_p4), %v388_v18  ;;  %v394_v21 = vld [vmem:[%s1529_s19 + $0x30] sm:$0xff] (%p1466_p4) }
  0x2a   : > { %391 = vst [vmem:[%s1534_s20 + $0x8] sm:$0xff] %v390_v19  ;;  %v396_v22 = vld [vmem:[%s1529_s19 + $0x40] sm:$0xff]  ;;  %v398_v23 = vld [vmem:[%s1529_s19 + $0x50] sm:$0xff] }
  0x2b   : > { %393 = vst [vmem:[%s1534_s20 + $0x10] sm:$0xff] %v392_v20  ;;  %v400_v24 = vld [vmem:[%s1529_s19 + $0x60] sm:$0xff]  ;;  %v402_v25 = vld [vmem:[%s1529_s19 + $0x70] sm:$0xff] }
  0x2c   : > { %395 = vst [vmem:[%s1534_s20 + $0x18] sm:$0xff] %v394_v21  ;;  %v404_v26 = vld [vmem:[%s1529_s19 + $0x80] sm:$0xff]  ;;  %v406_v27 = vld [vmem:[%s1529_s19 + $0x90] sm:$0xff] }
  0x2d   : > { %397 = vst [vmem:[%s1534_s20 + $0x20] sm:$0xff] %v396_v22  ;;  %v408_v28 = vld [vmem:[%s1529_s19 + $0xa0] sm:$0xff]  ;;  %v410_v29 = vld [vmem:[%s1529_s19 + $0xb0] sm:$0xff] }
  0x2e   : > { %399 = vst [vmem:[%s1534_s20 + $0x28] sm:$0xff] %v398_v23  ;;  %v412_v30 = vld [vmem:[%s1529_s19 + $0xc0] sm:$0xff]  ;;  %v414_v31 = vld [vmem:[%s1529_s19 + $0xd0] sm:$0xff] }
  0x2f   : > { %401 = vst [vmem:[%s1534_s20 + $0x30] sm:$0xff] %v400_v24  ;;  %v416_v32 = vld [vmem:[%s1529_s19 + $0xe0] sm:$0xff]  ;;  %v418_v33 = vld [vmem:[%s1529_s19 + $0xf0] sm:$0xff] }
  0x30   : > { %403 = vst [vmem:[%s1534_s20 + $0x38] sm:$0xff] %v402_v25  ;;  %v420_v34 = vld [vmem:[%s1529_s19 + $0x100] sm:$0xff]  ;;  %v422_v35 = vld [vmem:[%s1529_s19 + $0x110] sm:$0xff] }
  0x31   : > { %405 = vst [vmem:[%s1534_s20 + $0x40] sm:$0xff] %v404_v26 }
  0x32   : > { %407 = vst [vmem:[%s1534_s20 + $0x48] sm:$0xff] %v406_v27 }
  0x33   : > { %409 = vst [vmem:[%s1534_s20 + $0x50] sm:$0xff] %v408_v28 }
  0x34   : > { %411 = vst [vmem:[%s1534_s20 + $0x58] sm:$0xff] %v410_v29 }
  0x35   : > { %413 = vst [vmem:[%s1534_s20 + $0x60] sm:$0xff] %v412_v30 }
  0x36   : > { %415 = vst [vmem:[%s1534_s20 + $0x68] sm:$0xff] %v414_v31 }
  0x37   : > { %417 = vst [vmem:[%s1534_s20 + $0x70] sm:$0xff] %v416_v32 }
  0x38   : > { %419 = vst [vmem:[%s1534_s20 + $0x78] sm:$0xff] %v418_v33 }
  0x39   : > { %421 = vst [vmem:[%s1534_s20 + $0x80] sm:$0xff] %v420_v34 }
  0x3a   : > { %423 = vst [vmem:[%s1534_s20 + $0x88] sm:$0xff] %v422_v35 }
  0x3b PF: > { %p1098_p7 = scmp.ge.s32.totalorder %s1398_s23, 1  ;;  %p428_p8 = scmp.lt.s32.totalorder %s1398_s23, 3 }
  0x3d   : > { %p429_p9 = pnand %p1098_p7, %p428_p8 }
  0x3e   : > { %s435_s26 = sand.u32 (!%p429_p9), 1, %s1390_s21  }
  0x3f   : > { %432 = sbr.rel (%p429_p9) target bundleno = 296 (0x128), region = 112 }
  0x40   : > { %s1347_s27 = smul.u32 (!%p429_p9), 144, %s435_s26 }
  0x42   : > { %s1580_s10 = scalar_lea.vmem (!%p429_p9), [#allocation3], %s1347_s27  ;;  %s1590_s11 = scalar_lea.vmem (!%p429_p9), [#allocation2], %s1347_s27 }
  0x44   : > { %v1313_v36 = vld [vmem:[%s1776_s3 + $0x4] sm:$0xf]  ;;  %v1104_v37 = vld [vmem:[%s1776_s3 + $0x8] sm:$0xf0]  ;;  %vm630_vm0 = vcmask 130048   ;;  %s1335_s21 = sshll.u32 (%p1470_p5), %s1090_s24, 4 }
  0x45   : > { %v1174_v38 = vld [vmem:[%s1580_s10 + $0x70] sm:$0xf]  ;;  %v1332_v39 = vld [vmem:[%s1580_s10 + $0x74] sm:$0xf0]  ;;  %v1182_v40 = vld [vmem:[%s1580_s10 + $0x80] sm:$0xf]  ;;  %v1107_v51 = vor.u32 %v1313_v36, %v1104_v37  ;;  %s984_s13 = scalar_lea.vmem (%p1470_p5), %s1779_s6, %s1335_s21 }
  0x46   : > { %v1175_v41 = vor.u32 %v1332_v39, %v1174_v38  ;;  %v1334_v42 = vld [vmem:[%s1580_s10 + $0x84] sm:$0xf0]  ;;  %v1331_v43 = vld [vmem:[%s1580_s10 + $0x74] sm:$0xf]  ;;  %v1176_v44 = vld [vmem:[%s1580_s10 + $0x78] sm:$0xf0] }
  0x47   : > { %v1183_v45 = vor.u32 %v1334_v42, %v1182_v40  ;;  %v1179_v46 = vor.u32 %v1331_v43, %v1176_v44  ;;  %v1333_v47 = vld [vmem:[%s1580_s10 + $0x84] sm:$0xf]  ;;  %v1184_v48 = vld [vmem:[%s1580_s10 + $0x88] sm:$0xf0]  ;;  %v1274_v49 = vld [vmem:[%s1590_s11 + $0x80] sm:$0xf] }
  0x48   : > { %637 = vmatpush.bf16.msra.mxu0 %v1175_v41  ;;  %v1187_v50 = vor.u32 %v1333_v47, %v1184_v48  ;;  %v1312_v52 = vld [vmem:[%s1590_s11 + $0x84] sm:$0xf0]  ;;  %v1166_v53 = vld [vmem:[%s1580_s10 + $0x60] sm:$0xf]  ;;  %v1329_v57 = vld [vmem:[%s1580_s10 + $0x64] sm:$0xf] }
  0x49   : > { %v1330_v54 = vld [vmem:[%s1580_s10 + $0x64] sm:$0xf0]  ;;  %663 = vmatpush.bf16.msra.mxu1 %v1183_v45  ;;  %675 = vmatpush.bf16.msra.mxu2 %v1179_v46  ;;  %v1275_v55 = vor.u32 %v1312_v52, %v1274_v49  ;;  %v1168_v58 = vld [vmem:[%s1580_s10 + $0x68] sm:$0xf0]  ;;  %v1266_v59 = vld [vmem:[%s1590_s11 + $0x70] sm:$0xf] }
  0x4a   : > { %v1167_v56 = vor.u32 %v1330_v54, %v1166_v53  ;;  %701 = vmatpush.bf16.msra.mxu3 %v1187_v50  ;;  %v1171_v60 = vor.u32 %v1329_v57, %v1168_v58  ;;  %v1310_v61 = vld [vmem:[%s1590_s11 + $0x74] sm:$0xf0]  ;;  %v1158_v62 = vld [vmem:[%s1580_s10 + $0x50] sm:$0xf]  ;;  %v1327_v1 = vld [vmem:[%s1580_s10 + $0x54] sm:$0xf] }
  0x4b   : > { %v1328_v63 = vld [vmem:[%s1580_s10 + $0x54] sm:$0xf0]  ;;  %v1267_v0 = vor.u32 %v1310_v61, %v1266_v59  ;;  %v1160_v2 = vld [vmem:[%s1580_s10 + $0x58] sm:$0xf0]  ;;  %v1258_v3 = vld [vmem:[%s1590_s11 + $0x60] sm:$0xf] }
  0x4c   : > { %1188 = vmatmul.msk.bf16.vlgmr.msra.gmra.mxu1 %vm630_vm0, %v1107_v51  ;;  %638 = vmatpush.bf16.msra.mxu0 %v1167_v56  ;;  %v1159_v4 = vor.u32 %v1328_v63, %v1158_v62  ;;  %v1308_v5 = vld [vmem:[%s1590_s11 + $0x64] sm:$0xf0]  ;;  %v1163_v6 = vor.u32 %v1327_v1, %v1160_v2  ;;  %v1150_v7 = vld [vmem:[%s1580_s10 + $0x40] sm:$0xf]  ;;  %v1325_v10 = vld [vmem:[%s1580_s10 + $0x44] sm:$0xf] }
  0x4d   : > { %1190 = vmatmul.msk.bf16.vlgmr.msra.gmra.mxu3 %vm630_vm0, %v1107_v51  ;;  %676 = vmatpush.bf16.msra.mxu2 %v1171_v60  ;;  %v1326_v8 = vld [vmem:[%s1580_s10 + $0x44] sm:$0xf0]  ;;  %v1259_v9 = vor.u32 %v1308_v5, %v1258_v3  ;;  %v1152_v11 = vld [vmem:[%s1580_s10 + $0x48] sm:$0xf0]  ;;  %v1250_v12 = vld [vmem:[%s1590_s11 + $0x50] sm:$0xf] }
  0x4e   : > { %853 = vmatpush.bf16.msrb.mxu3 %v1275_v55  ;;  %827 = vmatpush.bf16.msrb.mxu1 %v1267_v0  ;;  %v1306_v13 = vld [vmem:[%s1590_s11 + $0x54] sm:$0xf0]  ;;  %v1151_v14 = vor.u32 %v1326_v8, %v1150_v7  ;;  %v1155_v15 = vor.u32 %v1325_v10, %v1152_v11  ;;  %v1142_v16 = vld [vmem:[%s1580_s10 + $0x30] sm:$0xf]  ;;  %v1323_v19 = vld [vmem:[%s1580_s10 + $0x34] sm:$0xf] }
  0x4f   : > { %v1324_v17 = vld [vmem:[%s1580_s10 + $0x34] sm:$0xf0]  ;;  %v1251_v18 = vor.u32 %v1306_v13, %v1250_v12  ;;  %v1144_v20 = vld [vmem:[%s1580_s10 + $0x38] sm:$0xf0]  ;;  %v1242_v21 = vld [vmem:[%s1590_s11 + $0x40] sm:$0xf] }
  0x50   : > { %639 = vmatpush.bf16.msra.mxu0 %v1159_v4  ;;  %v1304_v22 = vld [vmem:[%s1590_s11 + $0x44] sm:$0xf0]  ;;  %v1143_v23 = vor.u32 %v1324_v17, %v1142_v16  ;;  %v1315_v24 = vld [vmem:[%s1776_s3 + $0x14] sm:$0xf]  ;;  %v1147_v25 = vor.u32 %v1323_v19, %v1144_v20  ;;  %v1112_v26 = vld [vmem:[%s1776_s3 + $0x18] sm:$0xf0] }
  0x51   : > { %677 = vmatpush.bf16.msra.mxu2 %v1163_v6  ;;  %v1134_v27 = vld [vmem:[%s1580_s10 + $0x20] sm:$0xf]  ;;  %v1322_v28 = vld [vmem:[%s1580_s10 + $0x24] sm:$0xf0]  ;;  %v1243_v29 = vor.u32 %v1304_v22, %v1242_v21  ;;  %v1321_v30 = vld [vmem:[%s1580_s10 + $0x24] sm:$0xf]  ;;  %v1115_v34 = vor.u32 %v1315_v24, %v1112_v26 }
  0x52   : > { %828 = vmatpush.bf16.msrb.mxu1 %v1259_v9  ;;  %v1136_v31 = vld [vmem:[%s1580_s10 + $0x28] sm:$0xf0]  ;;  %v1234_v32 = vld [vmem:[%s1590_s11 + $0x30] sm:$0xf]  ;;  %v1302_v33 = vld [vmem:[%s1590_s11 + $0x34] sm:$0xf0]  ;;  %v1135_v35 = vor.u32 %v1322_v28, %v1134_v27 }
  0x53   : > { %v1139_v36 = vor.u32 %v1321_v30, %v1136_v31  ;;  %v1126_v37 = vld [vmem:[%s1580_s10 + $0x10] sm:$0xf]  ;;  %v1320_v38 = vld [vmem:[%s1580_s10 + $0x14] sm:$0xf0]  ;;  %v1311_v39 = vld [vmem:[%s1590_s11 + $0x84] sm:$0xf]  ;;  %v1235_v40 = vor.u32 %v1302_v33, %v1234_v32 }
  0x54   : > { %640 = vmatpush.bf16.msra.mxu0 %v1151_v14  ;;  %v1319_v41 = vld [vmem:[%s1580_s10 + $0x14] sm:$0xf]  ;;  %v1128_v42 = vld [vmem:[%s1580_s10 + $0x18] sm:$0xf0]  ;;  %v1276_v43 = vld [vmem:[%s1590_s11 + $0x88] sm:$0xf0]  ;;  %v1127_v46 = vor.u32 %v1320_v38, %v1126_v37 }
  0x55   : > { %678 = vmatpush.bf16.msra.mxu2 %v1155_v15  ;;  %v1226_v44 = vld [vmem:[%s1590_s11 + $0x20] sm:$0xf]  ;;  %v1300_v45 = vld [vmem:[%s1590_s11 + $0x24] sm:$0xf0]  ;;  %v1279_v47 = vor.u32 %v1311_v39, %v1276_v43  ;;  %v1131_v48 = vor.u32 %v1319_v41, %v1128_v42  ;;  %v1317_v51 = vld [vmem:[%s1580_s10 + $0x4] sm:$0xf] }
  0x56   : > { %829 = vmatpush.bf16.msrb.mxu1 %v1251_v18  ;;  %v1118_v49 = vld [vmem:[%s1580_s10] sm:$0xf]  ;;  %v1318_v50 = vld [vmem:[%s1580_s10 + $0x4] sm:$0xf0]  ;;  %v1227_v52 = vor.u32 %v1300_v45, %v1226_v44  ;;  %v1120_v53 = vld [vmem:[%s1580_s10 + $0x8] sm:$0xf0] }
  0x57   : > { %v1309_v54 = vld [vmem:[%s1590_s11 + $0x74] sm:$0xf]  ;;  %v1268_v55 = vld [vmem:[%s1590_s11 + $0x78] sm:$0xf0]  ;;  %1344 = vmatpush.bf16.msra.mxu3 %v1279_v47  ;;  %v1218_v56 = vld [vmem:[%s1590_s11 + $0x10] sm:$0xf]  ;;  %v1119_v59 = vor.u32 %v1318_v50, %v1118_v49  ;;  %v1123_v63 = vor.u32 %v1317_v51, %v1120_v53 }
  0x58   : > { %641 = vmatpush.bf16.msra.mxu0 %v1143_v23  ;;  %v1298_v57 = vld [vmem:[%s1590_s11 + $0x14] sm:$0xf0]  ;;  %v903_v58 = vld [vmem:[%s1777_s4] sm:$0xff]  ;;  %v1400_v62 = vmov 0   ;;  %v1271_v0 = vor.u32 %v1309_v54, %v1268_v55  ;;  %v1260_v3 = vld [vmem:[%s1590_s11 + $0x68] sm:$0xf0] }
  0x59   : > { %679 = vmatpush.bf16.msra.mxu2 %v1147_v25  ;;  %v1102_v60 = vld [vmem:[%s1776_s3] sm:$0xf]  ;;  %v1314_v61 = vld [vmem:[%s1776_s3 + $0x4] sm:$0xf0]  ;;  %1373 = vset.pattern.permute.xlu0 %v1400_v62  ;;  %v1219_v1 = vor.u32 %v1298_v57, %v1218_v56  ;;  %v1307_v2 = vld [vmem:[%s1590_s11 + $0x64] sm:$0xf] }
  0x5a   : > { %830 = vmatpush.bf16.msrb.mxu1 %v1243_v29  ;;  %909 = vperm.xlu0 %1373, %v903_v58   ;;  %v1103_v4 = vor.u32 %v1314_v61, %v1102_v60  ;;  %v1210_v5 = vld [vmem:[%s1590_s11] sm:$0xf]  ;;  %v1296_v6 = vld [vmem:[%s1590_s11 + $0x4] sm:$0xf0]  ;;  %v1263_v9 = vor.u32 %v1307_v2, %v1260_v3  ;;  %v1291_v11 = vld [vmem:[%s1775_s2 + $0x4] sm:$0xf] }
  0x5b   : > { %1374 = vset.pattern.permute.xlu1 %v1400_v62  ;;  %1375 = vset.pattern.permute.xlu2 %v1400_v62  ;;  %v1194_v7 = vld [vmem:[%s1775_s2] sm:$0xf]  ;;  %v1292_v8 = vld [vmem:[%s1775_s2 + $0x4] sm:$0xf0]  ;;  %v1211_v10 = vor.u32 %v1296_v6, %v1210_v5  ;;  %v1196_v12 = vld [vmem:[%s1775_s2 + $0x8] sm:$0xf0] }
  0x5c   : > { %1189 = vmatmul.msk.bf16.gmra.mxu1 %vm630_vm0, %v1115_v34  ;;  %642 = vmatpush.bf16.msra.mxu0 %v1135_v35  ;;  %v904_v13 = vld [vmem:[%s1777_s4 + $0x8] sm:$0xff]  ;;  %v1305_v14 = vld [vmem:[%s1590_s11 + $0x54] sm:$0xf]  ;;  %v1195_v17 = vor.u32 %v1292_v8, %v1194_v7  ;;  %v1199_v18 = vor.u32 %v1291_v11, %v1196_v12  ;;  %v1303_v20 = vld [vmem:[%s1590_s11 + $0x44] sm:$0xf] }
  0x5d   : > { %1191 = vmatmul.msk.bf16.gmra.mxu3 %vm630_vm0, %v1115_v34  ;;  %680 = vmatpush.bf16.msra.mxu2 %v1139_v36  ;;  %v1252_v15 = vld [vmem:[%s1590_s11 + $0x58] sm:$0xf0]  ;;  %v905_v16 = vld [vmem:[%s1777_s4 + $0x10] sm:$0xff]  ;;  %v1244_v21 = vld [vmem:[%s1590_s11 + $0x48] sm:$0xf0] }
  0x5e   : > { %831 = vmatpush.bf16.msrb.mxu1 %v1235_v40  ;;  %v1255_v19 = vor.u32 %v1305_v14, %v1252_v15  ;;  %919 = vperm.xlu1 %1374, %v905_v16   ;;  %v935_v22 = vld [vmem:[%s1778_s5] sm:$0xff]  ;;  %v1247_v23 = vor.u32 %v1303_v20, %v1244_v21  ;;  %v937_v24 = vld [vmem:[%s1778_s5 + $0x10] sm:$0xff]  ;;  %v1236_v26 = vld [vmem:[%s1590_s11 + $0x38] sm:$0xf0] }
  0x5f   : > { %941 = vperm.xlu2 %1375, %v935_v22   ;;  %v1301_v25 = vld [vmem:[%s1590_s11 + $0x34] sm:$0xf]  ;;  %v906_v27 = vld [vmem:[%s1777_s4 + $0x18] sm:$0xff]  ;;  %v1110_v28 = vld [vmem:[%s1776_s3 + $0x10] sm:$0xf] }
  0x60   : > { %643 = vmatpush.bf16.msra.mxu0 %v1127_v46  ;;  %v1316_v29 = vld [vmem:[%s1776_s3 + $0x14] sm:$0xf0]  ;;  %v1239_v30 = vor.u32 %v1301_v25, %v1236_v26  ;;  %v1299_v32 = vld [vmem:[%s1590_s11 + $0x24] sm:$0xf]  ;;  %v1228_v33 = vld [vmem:[%s1590_s11 + $0x28] sm:$0xf0] }
  0x61   : > { %681 = vmatpush.bf16.msra.mxu2 %v1131_v48  ;;  %v1111_v31 = vor.u32 %v1316_v29, %v1110_v28  ;;  %v936_v34 = vld [vmem:[%s1778_s5 + $0x8] sm:$0xff]  ;;  %v1202_v35 = vld [vmem:[%s1775_s2 + $0x10] sm:$0xf]  ;;  %v1294_v36 = vld [vmem:[%s1775_s2 + $0x14] sm:$0xf0]  ;;  %v1231_v39 = vor.u32 %v1299_v32, %v1228_v33 }
  0x62   : > { %832 = vmatpush.bf16.msrb.mxu1 %v1227_v52  ;;  %914 = vperm.xlu0 %1373, %v904_v13   ;;  %v1293_v37 = vld [vmem:[%s1775_s2 + $0x14] sm:$0xf]  ;;  %v1204_v38 = vld [vmem:[%s1775_s2 + $0x18] sm:$0xf0]  ;;  %v1203_v43 = vor.u32 %v1294_v36, %v1202_v35 }
  0x63   : > { %v1297_v40 = vld [vmem:[%s1590_s11 + $0x14] sm:$0xf]  ;;  %v1220_v41 = vld [vmem:[%s1590_s11 + $0x18] sm:$0xf0]  ;;  %v1207_v44 = vor.u32 %v1293_v37, %v1204_v38  ;;  %v1295_v46 = vld [vmem:[%s1590_s11 + $0x4] sm:$0xf] }
  0x64   : > { %644 = vmatpush.bf16.msra.mxu0 %v1119_v59  ;;  %v938_v42 = vld [vmem:[%s1778_s5 + $0x18] sm:$0xff]  ;;  %v1223_v45 = vor.u32 %v1297_v40, %v1220_v41 }
  0x65   : > { %682 = vmatpush.bf16.msra.mxu2 %v1123_v63 }
  0x66   : > { %833 = vmatpush.bf16.msrb.mxu1 %v1219_v1  ;;  %924 = vperm.xlu1 %1374, %v906_v27  }
  0x67   : > { %645 = vmatmul.bf16.vlgmr.msra.gmra.mxu0 %v1103_v4  ;;  %946 = vperm.xlu2 %1375, %v936_v34  }
  0x68   : > { %865 = vmatpush.bf16.msrb.mxu0 %v1271_v0  ;;  %683 = vmatmul.bf16.vlgmr.msra.gmra.mxu2 %v1103_v4 }
  0x69   : > { %891 = vmatpush.bf16.msrb.mxu2 %v1279_v47  ;;  %v1212_v47 = vld [vmem:[%s1590_s11 + $0x8] sm:$0xf0]  ;;  %s1099_s11 = sshll.u32 %s435_s26, 6 }
  0x6a   : > { %834 = vmatpush.bf16.msrb.mxu1 %v1211_v10  ;;  %951 = vperm.xlu0 %1373, %v937_v24   ;;  %v1215_v48 = vor.u32 %v1295_v46, %v1212_v47  ;;  %s1736_s10 = scalar_lea.vmem [#allocation4], %s1099_s11 }
  0x6c   : > { %866 = vmatpush.bf16.msrb.mxu0 %v1263_v9 }
  0x6d   : > { %835 = vmatmul.bf16.vlgmr.msrb.gmra.mxu1 %v1195_v17  ;;  %1280 = vmatmul.msk.bf16.vlgmr.msrb.gmra.mxu3 %vm630_vm0, %v1199_v18 }
  0x6e   : > { %1336 = vmatpush.bf16.msra.mxu1 %v1271_v0  ;;  %956 = vperm.xlu1 %1374, %v938_v42  }
  0x70   : > { %867 = vmatpush.bf16.msrb.mxu0 %v1255_v19 }
  0x72   : > { %1337 = vmatpush.bf16.msra.mxu1 %v1263_v9 }
  0x74   : > { %868 = vmatpush.bf16.msrb.mxu0 %v1247_v23 }
  0x76   : > { %1338 = vmatpush.bf16.msra.mxu1 %v1255_v19 }
  0x77   : > { %650 = vmatmul.bf16.gmra.mxu0 %v1111_v31 }
  0x78   : > { %869 = vmatpush.bf16.msrb.mxu0 %v1239_v30  ;;  %688 = vmatmul.bf16.gmra.mxu2 %v1111_v31 }
  0x7a   : > { %1339 = vmatpush.bf16.msra.mxu1 %v1247_v23 }
  0x7c   : > { %870 = vmatpush.bf16.msrb.mxu0 %v1231_v39 }
  0x7d   : > { %840 = vmatmul.bf16.gmra.mxu1 %v1203_v43  ;;  %1281 = vmatmul.msk.bf16.gmra.mxu3 %vm630_vm0, %v1207_v44 }
  0x7e   : > { %1340 = vmatpush.bf16.msra.mxu1 %v1239_v30 }
  0x80   : > { %871 = vmatpush.bf16.msrb.mxu0 %v1223_v45 }
  0x82   : > { %1341 = vmatpush.bf16.msra.mxu1 %v1231_v39 }
  0x84   : > { %872 = vmatpush.bf16.msrb.mxu0 %v1215_v48 }
  0x86   : > { %1342 = vmatpush.bf16.msra.mxu1 %v1223_v45 }
  0x87   : > { %873 = vmatmul.bf16.vlgmr.msrb.gmra.mxu0 %v1195_v17 }
  0x88   : > { %1282 = vmatmul.msk.bf16.vlgmr.msrb.gmra.mxu2 %vm630_vm0, %v1199_v18 }
  0x8a   : > { %1343 = vmatpush.bf16.msra.mxu1 %v1215_v48 }
  0x8d   : > { %878 = vmatmul.bf16.vlgmr.msra.gmra.mxu1 %v1203_v43  ;;  %1283 = vmatmul.msk.bf16.vlgmr.msra.gmra.mxu3 %vm630_vm0, %v1207_v44 }
  0xb9   : > { %v942_v1 = vpop.permute.xlu2 %941 }
  0xc1   : > { %v947_v15 = vpop.permute.xlu2 %946 }
  0xc9   : > { %v665_v49 = vpop.f32.mrf.mxu1 }
  0xcc   : > { %v910_v62 = vpop.permute.xlu0 %909 }
  0xd0   : > { %v703_v50 = vpop.f32.mrf.mxu3  ;;  %v920_v9 = vpop.permute.xlu1 %919 }
  0xd1   : > { %v667_v51 = vpop.f32.mrf.mxu1 }
  0xd4   : > { %v915_v12 = vpop.permute.xlu0 %914 }
  0xd8   : > { %v1730_v52 = vpop.f32.mrf.mxu3  ;;  %v925_v23 = vpop.permute.xlu1 %924 }
  0xd9   : > { %v670_v53 = vpop.f32.mrf.mxu1 }
  0xdc   : > { %v952_v26 = vpop.permute.xlu0 %951 }
  0xe0   : > { %v708_v54 = vpop.f32.mrf.mxu3  ;;  %v957_v38 = vpop.permute.xlu1 %956 }
  0xe1   : > { %v672_v55 = vpop.f32.mrf.mxu1 }
  0xe4   : > { %v646_v56 = vpop.f32.mrf.mxu0 }
  0xe5   : > { %v666_v61 = vadd.f32 %v665_v49, %v646_v56 }
  0xe8   : > { %v1732_v57 = vpop.f32.mrf.mxu3 }
  0xea   : > { %v836_v58 = vpop.f32.mrf.mxu1 }
  0xeb   : > { %v684_v59 = vpop.f32.mrf.mxu2  ;;  %v837_v63 = vadd.f32 %v836_v58, %v666_v61 }
  0xec   : > { %v648_v60 = vpop.f32.mrf.mxu0  ;;  %v704_v33 = vadd.f32 %v703_v50, %v684_v59 }
  0xed   : > { %v668_v7 = vadd.f32 %v667_v51, %v648_v60 }
  0xf0   : > { %v855_v0 = vpop.f32.mrf.mxu3 }
  0xf1   : > { %v856_v2 = vadd.f32 %v855_v0, %v837_v63 }
  0xf2   : > { %v838_v3 = vpop.f32.mrf.mxu1 }
  0xf3   : > { %v927_v4 = vmul.f32 %v910_v62, %v856_v2  ;;  %v686_v5 = vpop.f32.mrf.mxu2  ;;  %v839_v10 = vadd.f32 %v838_v3, %v668_v7 }
  0xf4   : > { %v651_v6 = vpop.f32.mrf.mxu0  ;;  %v706_v47 = vadd.f32 %v1730_v52, %v686_v5 }
  0xf5   : > { %v959_v8 = vadd.f32 %v942_v1, %v927_v4  ;;  %v671_v19 = vadd.f32 %v670_v53, %v651_v6 }
  0xf7   : > { %967 = vst [vmem:[%s1736_s10] sm:$0xff] %v959_v8 }
  0xf8   : > { %v857_v11 = vpop.f32.mrf.mxu3 }
  0xf9   : > { %v858_v13 = vadd.f32 %v857_v11, %v839_v10 }
  0xfa   : > { %v841_v14 = vpop.f32.mrf.mxu1 }
  0xfb   : > { %v929_v16 = vmul.f32 %v915_v12, %v858_v13  ;;  %v689_v17 = vpop.f32.mrf.mxu2  ;;  %v842_v21 = vadd.f32 %v841_v14, %v671_v19 }
  0xfc   : > { %v653_v18 = vpop.f32.mrf.mxu0  ;;  %v709_v42 = vadd.f32 %v708_v54, %v689_v17 }
  0xfd   : > { %v961_v20 = vadd.f32 %v947_v15, %v929_v16  ;;  %v673_v29 = vadd.f32 %v672_v55, %v653_v18 }
  0xff   : > { %969 = vst [vmem:[%s1736_s10 + $0x10] sm:$0xff] %v961_v20 }
 0x100   : > { %v860_v22 = vpop.f32.mrf.mxu3 }
 0x101   : > { %v861_v24 = vadd.f32 %v860_v22, %v842_v21 }
 0x102   : > { %v843_v25 = vpop.f32.mrf.mxu1 }
 0x103   : > { %v931_v27 = vmul.f32 %v920_v9, %v861_v24  ;;  %v691_v28 = vpop.f32.mrf.mxu2  ;;  %v844_v32 = vadd.f32 %v843_v25, %v673_v29 }
 0x104   : > { %v874_v31 = vpop.f32.mrf.mxu0  ;;  %v711_v54 = vadd.f32 %v1732_v57, %v691_v28  ;;  %v997_v57 = vld [vmem:[%s1736_s10] sm:$0xff] (%p1470_p5) }
 0x105   : > { %v963_v30 = vadd.f32 %v952_v26, %v931_v27  ;;  %v875_v36 = vadd.f32 %v874_v31, %v704_v33  ;;  %998 = vst [vmem:[%s984_s13] sm:$0xff] (%p1470_p5), %v997_v57 }
 0x106   : > { %v1001_v3 = vld [vmem:[%s1736_s10 + $0x10] sm:$0xff] (%p1470_p5) }
 0x107   : > { %971 = vst [vmem:[%s1736_s10 + $0x20] sm:$0xff] %v963_v30 }
 0x108   : > { %v862_v34 = vpop.f32.mrf.mxu3  ;;  %1002 = vst [vmem:[%s984_s13 + $0x20] sm:$0xff] (%p1470_p5), %v1001_v3 }
 0x109   : > { %v863_v35 = vadd.f32 %v862_v34, %v844_v32 }
 0x10a   : > { %v879_v37 = vpop.f32.mrf.mxu1 }
 0x10b   : > { %v933_v39 = vmul.f32 %v925_v23, %v863_v35  ;;  %v893_v40 = vpop.f32.mrf.mxu2  ;;  %v880_v45 = vadd.f32 %v879_v37, %v709_v42 }
 0x10c   : > { %v894_v41 = vadd.f32 %v893_v40, %v875_v36  ;;  %v876_v46 = vpop.f32.mrf.mxu0 }
 0x10d   : > { %v965_v43 = vadd.f32 %v957_v38, %v933_v39  ;;  %v877_v51 = vadd.f32 %v876_v46, %v706_v47 }
 0x10e   : > { %v928_v44 = vmul.f32 %v910_v62, %v894_v41  ;;  %v1005_v5 = vld [vmem:[%s1736_s10 + $0x20] sm:$0xff] (%p1470_p5) }
 0x10f   : > { %973 = vst [vmem:[%s1736_s10 + $0x30] sm:$0xff] %v965_v43 }
 0x110   : > { %v960_v48 = vadd.f32 %v942_v1, %v928_v44  ;;  %v898_v49 = vpop.f32.mrf.mxu3  ;;  %1006 = vst [vmem:[%s984_s13 + $0x40] sm:$0xff] (%p1470_p5), %v1005_v5 }
 0x111   : > { %v899_v50 = vadd.f32 %v898_v49, %v880_v45 }
 0x112   : > { %968 = vst [vmem:[%s1736_s10 + $0x8] sm:$0xff] %v960_v48  ;;  %v881_v56 = vpop.f32.mrf.mxu1 }
 0x113   : > { %v932_v53 = vmul.f32 %v920_v9, %v899_v50  ;;  %v895_v55 = vpop.f32.mrf.mxu2  ;;  %v882_v61 = vadd.f32 %v881_v56, %v711_v54 }
 0x114   : > { %v896_v58 = vadd.f32 %v895_v55, %v877_v51 }
 0x115   : > { %v964_v59 = vadd.f32 %v952_v26, %v932_v53 }
 0x116   : > { %v930_v60 = vmul.f32 %v915_v12, %v896_v58  ;;  %v1009_v7 = vld [vmem:[%s1736_s10 + $0x30] sm:$0xff] (%p1470_p5) }
 0x117   : > { %972 = vst [vmem:[%s1736_s10 + $0x28] sm:$0xff] %v964_v59 }
 0x118   : > { %v962_v62 = vadd.f32 %v947_v15, %v930_v60  ;;  %v900_v63 = vpop.f32.mrf.mxu3  ;;  %1010 = vst [vmem:[%s984_s13 + $0x60] sm:$0xff] (%p1470_p5), %v1009_v7 }
 0x119   : > { %v901_v52 = vadd.f32 %v900_v63, %v882_v61  ;;  %v999_v2 = vld [vmem:[%s1736_s10 + $0x8] sm:$0xff] (%p1470_p5) }
 0x11a   : > { %970 = vst [vmem:[%s1736_s10 + $0x18] sm:$0xff] %v962_v62 }
 0x11b   : > { %v934_v0 = vmul.f32 %v925_v23, %v901_v52  ;;  %981 = sbr.rel (!%p1470_p5) target bundleno = 296 (0x128), region = 124  ;;  %1000 = vst [vmem:[%s984_s13 + $0x8] sm:$0xff] (%p1470_p5), %v999_v2 }
 0x11d   : > { %v966_v1 = vadd.f32 %v957_v38, %v934_v0 }
 0x11e   : > { %v1007_v6 = vld [vmem:[%s1736_s10 + $0x28] sm:$0xff] (%p1470_p5) }
 0x11f   : > { %974 = vst [vmem:[%s1736_s10 + $0x38] sm:$0xff] %v966_v1 }
 0x120   : > { %1008 = vst [vmem:[%s984_s13 + $0x48] sm:$0xff] %v1007_v6 }
 0x121   : > { %v1003_v4 = vld [vmem:[%s1736_s10 + $0x18] sm:$0xff] }
 0x122   : > { %1004 = vst [vmem:[%s984_s13 + $0x28] sm:$0xff] %v1003_v4 }
 0x126   : > { %v1011_v8 = vld [vmem:[%s1736_s10 + $0x38] sm:$0xff] }
 0x127   : > { %1012 = vst [vmem:[%s984_s13 + $0x68] sm:$0xff] %v1011_v8 }
 0x128 PF: > { %p13_p10 = scmp.ge.s32.totalorder %s1453_s25, 4   ;;  %s1782_s21 = smov %s1394_s22 }
 0x129   : > { %s1783_s22 = smov %s1464_s28  ;;  %s1784_s23 = smov %s1453_s25 }
 0x12a   :  { %15 = sbr.rel (!%p13_p10) target bundleno = 2 (0x2), region = 186 }

// kernel: cfm_forward.11
= control target key start
LH: loop header
LB: loop body
LE: loop exit
PB: predicated region body
PF: predicated region fallthrough
CT: control target
= control target key end

     0   :  { %s1142_s21 = smov 0   ;;  %s1144_s22 = smov 0   ;;  %s1394_s0 = inlined_call_operand.vmem [shape: bf16[144,512], index: 0, kind: input, shape index: {}]   ;;  %s1395_s1 = inlined_call_operand.vmem [shape: bf16[32,144], index: 1, kind: input, shape index: {}]   ;;  %s1396_s2 = inlined_call_operand.vmem [shape: f32[32,1], index: 2, kind: input, shape index: {}]   ;;  %s1397_s3 = inlined_call_operand.vmem [shape: f32[32,1], index: 3, kind: input, shape index: {}]   ;;  %s1398_s4 = inlined_call_operand.vmem [shape: f32[32,512], index: 4, kind: input, shape index: {}]   ;;  %s1399_s5 = inlined_call_operand.vmem [shape: f32[32,512], index: 5, kind: input, shape index: {}]   ;;  %s1400_s6 = inlined_call_operand.vmem [shape: f32[32,512], index: 6, kind: output, shape index: {}]  }
   0x1   :  { %s1146_s23 = smov 0  }
   0x2 LB: > { %s913_s24 = sadd.s32 4294967295, %s1104_s23   ;;  %s1159_s25 = sadd.s32 1, %s1104_s23   ;;  %s1104_s23 = sphi %s1146_s23, %s1405_s23   ;;  %s1100_s22 = sphi %s1144_s22, %s1404_s22   ;;  %s1096_s21 = sphi %s1142_s21, %s1403_s21  }
   0x3   : > { %s20_s26 = ssub.s32 %s1104_s23, %s1159_s25  ;;  %s23_s27 = sadd.s32 1, %s1100_s22 }
   0x4   : > { %p21_p0 = scmp.eq.s32.totalorder %s20_s26, 0  ;;  %p30_p1 = scmp.ne.s32.totalorder %s1100_s22, %s1096_s21 }
   0x5   : > { %p31_p2 = scmp.eq.s32.totalorder %s1104_s23, 0  ;;  %p175_p3 = scmp.eq.s32.totalorder %s913_s24, 1 }
   0x6   : > { %s1170_s28 = scalar_select %p21_p0, %s1100_s22, %s23_s27  }
   0x7   : > { %p1172_p4 = por %p31_p2, %p30_p1  ;;  %p1176_p5 = por %p175_p3, %p30_p1 }
   0x8   : > { %p916_p6 = scmp.ge.s32.totalorder %s1104_s23, 2 }
   0xa   : > { %206 = sbr.rel (%p916_p6) target bundleno = 61 (0x3d), region = 28 }
   0xf   : > { %209 = sbr.rel (!%p1172_p4) target bundleno = 37 (0x25), region = 32  ;;  %s211_s7 = sand.u32 (%p1172_p4), 1, %s1100_s22  }
  0x10   : > { %s1026_s8 = sshll.u32 (%p1172_p4), %s1104_s23, 3  ;;  %s1052_s9 = smul.u32 (%p1172_p4), 144, %s211_s7 }
  0x11   : > { %s1188_s12 = scalar_lea.vmem (%p1172_p4), %s1394_s0, %s1026_s8 }
  0x12   : > { %v279_v0 = vld [vmem:[%s1188_s12] sm:$0xff] (%p1172_p4)  ;;  %v281_v1 = vld [vmem:[%s1188_s12 + $0x10] sm:$0xff] (%p1172_p4)  ;;  %s1193_s13 = scalar_lea.vmem (%p1172_p4), [#allocation2], %s1052_s9 }
  0x13   : > { %v283_v2 = vld [vmem:[%s1188_s12 + $0x20] sm:$0xff] (%p1172_p4)  ;;  %280 = vst [vmem:[%s1193_s13] sm:$0xff] (%p1172_p4), %v279_v0  ;;  %v285_v3 = vld [vmem:[%s1188_s12 + $0x30] sm:$0xff] (%p1172_p4) }
  0x14   : > { %282 = vst [vmem:[%s1193_s13 + $0x8] sm:$0xff] %v281_v1  ;;  %v287_v4 = vld [vmem:[%s1188_s12 + $0x40] sm:$0xff]  ;;  %v289_v5 = vld [vmem:[%s1188_s12 + $0x50] sm:$0xff] }
  0x15   : > { %284 = vst [vmem:[%s1193_s13 + $0x10] sm:$0xff] %v283_v2  ;;  %v291_v6 = vld [vmem:[%s1188_s12 + $0x60] sm:$0xff]  ;;  %v293_v7 = vld [vmem:[%s1188_s12 + $0x70] sm:$0xff] }
  0x16   : > { %286 = vst [vmem:[%s1193_s13 + $0x18] sm:$0xff] %v285_v3  ;;  %v295_v8 = vld [vmem:[%s1188_s12 + $0x80] sm:$0xff]  ;;  %v297_v9 = vld [vmem:[%s1188_s12 + $0x90] sm:$0xff] }
  0x17   : > { %288 = vst [vmem:[%s1193_s13 + $0x20] sm:$0xff] %v287_v4  ;;  %v299_v10 = vld [vmem:[%s1188_s12 + $0xa0] sm:$0xff]  ;;  %v301_v11 = vld [vmem:[%s1188_s12 + $0xb0] sm:$0xff] }
  0x18   : > { %290 = vst [vmem:[%s1193_s13 + $0x28] sm:$0xff] %v289_v5  ;;  %v303_v12 = vld [vmem:[%s1188_s12 + $0xc0] sm:$0xff]  ;;  %v305_v13 = vld [vmem:[%s1188_s12 + $0xd0] sm:$0xff] }
  0x19   : > { %292 = vst [vmem:[%s1193_s13 + $0x30] sm:$0xff] %v291_v6  ;;  %v307_v14 = vld [vmem:[%s1188_s12 + $0xe0] sm:$0xff]  ;;  %v309_v15 = vld [vmem:[%s1188_s12 + $0xf0] sm:$0xff] }
  0x1a   : > { %294 = vst [vmem:[%s1193_s13 + $0x38] sm:$0xff] %v293_v7  ;;  %v311_v16 = vld [vmem:[%s1188_s12 + $0x100] sm:$0xff]  ;;  %v313_v17 = vld [vmem:[%s1188_s12 + $0x110] sm:$0xff] }
  0x1b   : > { %296 = vst [vmem:[%s1193_s13 + $0x40] sm:$0xff] %v295_v8 }
  0x1c   : > { %298 = vst [vmem:[%s1193_s13 + $0x48] sm:$0xff] %v297_v9 }
  0x1d   : > { %300 = vst [vmem:[%s1193_s13 + $0x50] sm:$0xff] %v299_v10 }
  0x1e   : > { %302 = vst [vmem:[%s1193_s13 + $0x58] sm:$0xff] %v301_v11 }
  0x1f   : > { %304 = vst [vmem:[%s1193_s13 + $0x60] sm:$0xff] %v303_v12 }
  0x20   : > { %306 = vst [vmem:[%s1193_s13 + $0x68] sm:$0xff] %v305_v13 }
  0x21   : > { %308 = vst [vmem:[%s1193_s13 + $0x70] sm:$0xff] %v307_v14 }
  0x22   : > { %310 = vst [vmem:[%s1193_s13 + $0x78] sm:$0xff] %v309_v15 }
  0x23   : > { %312 = vst [vmem:[%s1193_s13 + $0x80] sm:$0xff] %v311_v16 }
  0x24   : > { %314 = vst [vmem:[%s1193_s13 + $0x88] sm:$0xff] %v313_v17 }
  0x25 PF: > { %320 = sbr.rel (!%p1172_p4) target bundleno = 49 (0x31), region = 70  ;;  %s322_s14 = sand.u32 (%p1172_p4), 1, %s1100_s22  }
  0x26   : > { %s1027_s15 = sshll.u32 (%p1172_p4), %s1104_s23, 4  ;;  %s919_s16 = sshll.u32 (%p1172_p4), %s322_s14, 6 }
  0x27   : > { %s327_s19 = scalar_lea.vmem (%p1172_p4), %s1398_s4, %s1027_s15  ;;  %s324_s20 = scalar_lea.vmem (%p1172_p4), [#allocation3], %s919_s16 }
  0x28   : > { %v340_v18 = vld [vmem:[%s327_s19] sm:$0xff] (%p1172_p4)  ;;  %v342_v19 = vld [vmem:[%s327_s19 + $0x8] sm:$0xff] (%p1172_p4) }
  0x29   : > { %v344_v20 = vld [vmem:[%s327_s19 + $0x20] sm:$0xff] (%p1172_p4)  ;;  %341 = vst [vmem:[%s324_s20] sm:$0xff] (%p1172_p4), %v340_v18  ;;  %v346_v21 = vld [vmem:[%s327_s19 + $0x28] sm:$0xff] (%p1172_p4) }
  0x2a   : > { %343 = vst [vmem:[%s324_s20 + $0x8] sm:$0xff] %v342_v19  ;;  %v348_v22 = vld [vmem:[%s327_s19 + $0x40] sm:$0xff]  ;;  %v350_v23 = vld [vmem:[%s327_s19 + $0x48] sm:$0xff] }
  0x2b   : > { %345 = vst [vmem:[%s324_s20 + $0x10] sm:$0xff] %v344_v20  ;;  %v352_v24 = vld [vmem:[%s327_s19 + $0x60] sm:$0xff]  ;;  %v354_v25 = vld [vmem:[%s327_s19 + $0x68] sm:$0xff] }
  0x2c   : > { %347 = vst [vmem:[%s324_s20 + $0x18] sm:$0xff] %v346_v21 }
  0x2d   : > { %349 = vst [vmem:[%s324_s20 + $0x20] sm:$0xff] %v348_v22 }
  0x2e   : > { %351 = vst [vmem:[%s324_s20 + $0x28] sm:$0xff] %v350_v23 }
  0x2f   : > { %353 = vst [vmem:[%s324_s20 + $0x30] sm:$0xff] %v352_v24 }
  0x30   : > { %355 = vst [vmem:[%s324_s20 + $0x38] sm:$0xff] %v354_v25 }
  0x31 PF: > { %361 = sbr.rel (!%p1172_p4) target bundleno = 61 (0x3d), region = 93  ;;  %s363_s26 = sand.u32 (%p1172_p4), 1, %s1100_s22  }
  0x32   : > { %s1028_s27 = sshll.u32 (%p1172_p4), %s1104_s23, 4  ;;  %s922_s7 = sshll.u32 (%p1172_p4), %s363_s26, 6 }
  0x33   : > { %s368_s10 = scalar_lea.vmem (%p1172_p4), %s1399_s5, %s1028_s27  ;;  %s365_s11 = scalar_lea.vmem (%p1172_p4), [#allocation4], %s922_s7 }
  0x34   : > { %v381_v26 = vld [vmem:[%s368_s10] sm:$0xff] (%p1172_p4)  ;;  %v383_v27 = vld [vmem:[%s368_s10 + $0x8] sm:$0xff] (%p1172_p4) }
  0x35   : > { %v385_v28 = vld [vmem:[%s368_s10 + $0x20] sm:$0xff] (%p1172_p4)  ;;  %382 = vst [vmem:[%s365_s11] sm:$0xff] (%p1172_p4), %v381_v26  ;;  %v387_v29 = vld [vmem:[%s368_s10 + $0x28] sm:$0xff] (%p1172_p4) }
  0x36   : > { %384 = vst [vmem:[%s365_s11 + $0x8] sm:$0xff] %v383_v27  ;;  %v389_v30 = vld [vmem:[%s368_s10 + $0x40] sm:$0xff]  ;;  %v391_v31 = vld [vmem:[%s368_s10 + $0x48] sm:$0xff] }
  0x37   : > { %386 = vst [vmem:[%s365_s11 + $0x10] sm:$0xff] %v385_v28  ;;  %v393_v32 = vld [vmem:[%s368_s10 + $0x60] sm:$0xff]  ;;  %v395_v33 = vld [vmem:[%s368_s10 + $0x68] sm:$0xff] }
  0x38   : > { %388 = vst [vmem:[%s365_s11 + $0x18] sm:$0xff] %v387_v29 }
  0x39   : > { %390 = vst [vmem:[%s365_s11 + $0x20] sm:$0xff] %v389_v30 }
  0x3a   : > { %392 = vst [vmem:[%s365_s11 + $0x28] sm:$0xff] %v391_v31 }
  0x3b   : > { %394 = vst [vmem:[%s365_s11 + $0x30] sm:$0xff] %v393_v32 }
  0x3c   : > { %396 = vst [vmem:[%s365_s11 + $0x38] sm:$0xff] %v395_v33 }
  0x3d PF: > { %p925_p7 = scmp.ge.s32.totalorder %s1104_s23, 1  ;;  %p401_p8 = scmp.lt.s32.totalorder %s1104_s23, 3 }
  0x3f   : > { %p402_p9 = pnand %p925_p7, %p401_p8 }
  0x40   : > { %s408_s29 = sand.u32 (!%p402_p9), 1, %s1096_s21  }
  0x41   : > { %405 = sbr.rel (%p402_p9) target bundleno = 280 (0x118), region = 116  ;;  %s926_s15 = sshll.u32 (!%p402_p9), %s408_s29, 6 }
  0x42   : > { %s1053_s12 = smul.u32 (!%p402_p9), 144, %s408_s29  ;;  %s1339_s16 = scalar_lea.vmem (!%p402_p9), [#allocation3], %s926_s15 }
  0x43   : > { %s1342_s17 = scalar_lea.vmem (!%p402_p9), [#allocation4], %s926_s15  ;;  %s1345_s21 = scalar_lea.vmem (!%p402_p9), [#allocation5], %s926_s15 }
  0x44   : > { %s1247_s13 = scalar_lea.vmem (!%p402_p9), [#allocation2], %s1053_s12 }
  0x46   : > { %v1003_v34 = vld [vmem:[%s1247_s13 + $0x70] sm:$0xf]  ;;  %v1048_v35 = vld [vmem:[%s1247_s13 + $0x74] sm:$0xf0]  ;;  %v1047_v36 = vld [vmem:[%s1247_s13 + $0x74] sm:$0xf] }
  0x47   : > { %v1004_v37 = vor.u32 %v1048_v35, %v1003_v34  ;;  %v1005_v38 = vld [vmem:[%s1247_s13 + $0x78] sm:$0xf0]  ;;  %v995_v39 = vld [vmem:[%s1247_s13 + $0x60] sm:$0xf]  ;;  %v1046_v40 = vld [vmem:[%s1247_s13 + $0x64] sm:$0xf0] }
  0x48   : > { %v1008_v41 = vor.u32 %v1047_v36, %v1005_v38  ;;  %v1045_v42 = vld [vmem:[%s1247_s13 + $0x64] sm:$0xf]  ;;  %v997_v43 = vld [vmem:[%s1247_s13 + $0x68] sm:$0xf0]  ;;  %v996_v44 = vor.u32 %v1046_v40, %v995_v39  ;;  %v987_v46 = vld [vmem:[%s1247_s13 + $0x50] sm:$0xf] }
  0x49   : > { %600 = vmatpush.bf16.msra.mxu0 %v1004_v37  ;;  %v1000_v45 = vor.u32 %v1045_v42, %v997_v43  ;;  %v1044_v47 = vld [vmem:[%s1247_s13 + $0x54] sm:$0xf0]  ;;  %v1043_v48 = vld [vmem:[%s1247_s13 + $0x54] sm:$0xf]  ;;  %v989_v49 = vld [vmem:[%s1247_s13 + $0x58] sm:$0xf0] }
  0x4a   : > { %638 = vmatpush.bf16.msra.mxu2 %v1008_v41  ;;  %v988_v50 = vor.u32 %v1044_v47, %v987_v46  ;;  %v979_v51 = vld [vmem:[%s1247_s13 + $0x40] sm:$0xf]  ;;  %v1029_v52 = vld [vmem:[%s1395_s1 + $0x4] sm:$0xf]  ;;  %v933_v53 = vld [vmem:[%s1395_s1 + $0x8] sm:$0xf0]  ;;  %v992_v54 = vor.u32 %v1043_v48, %v989_v49 }
  0x4b   : > { %v1042_v55 = vld [vmem:[%s1247_s13 + $0x44] sm:$0xf0]  ;;  %v1049_v56 = vld [vmem:[%s1247_s13 + $0x84] sm:$0xf]  ;;  %v1013_v57 = vld [vmem:[%s1247_s13 + $0x88] sm:$0xf0]  ;;  %v936_v61 = vor.u32 %v1029_v52, %v933_v53 }
  0x4c   : > { %v1041_v58 = vld [vmem:[%s1247_s13 + $0x44] sm:$0xf]  ;;  %v981_v59 = vld [vmem:[%s1247_s13 + $0x48] sm:$0xf0]  ;;  %v1016_v60 = vor.u32 %v1049_v56, %v1013_v57  ;;  %v1011_v62 = vld [vmem:[%s1247_s13 + $0x80] sm:$0xf]  ;;  %v980_v0 = vor.u32 %v1042_v55, %v979_v51 }
  0x4d   : > { %601 = vmatpush.bf16.msra.mxu0 %v996_v44  ;;  %v1050_v63 = vld [vmem:[%s1247_s13 + $0x84] sm:$0xf0]  ;;  %vm593_vm0 = vcmask 130048   ;;  %v984_v2 = vor.u32 %v1041_v58, %v981_v59  ;;  %v971_v3 = vld [vmem:[%s1247_s13 + $0x30] sm:$0xf]  ;;  %v1106_v7 = vmov 0  }
  0x4e   : > { %639 = vmatpush.bf16.msra.mxu2 %v1000_v45  ;;  %664 = vmatpush.bf16.msra.mxu3 %v1016_v60  ;;  %v1012_v1 = vor.u32 %v1050_v63, %v1011_v62  ;;  %v1040_v4 = vld [vmem:[%s1247_s13 + $0x34] sm:$0xf0]  ;;  %v1039_v5 = vld [vmem:[%s1247_s13 + $0x34] sm:$0xf]  ;;  %v973_v6 = vld [vmem:[%s1247_s13 + $0x38] sm:$0xf0] }
  0x4f   : > { %1080 = vset.pattern.permute.xlu1 %v1106_v7  ;;  %v678_v8 = vld [vmem:[%s1396_s2 + $0x10] sm:$0xff]  ;;  %v676_v9 = vld [vmem:[%s1396_s2] sm:$0xff]  ;;  %v972_v10 = vor.u32 %v1040_v4, %v971_v3  ;;  %1079 = vset.pattern.permute.xlu0 %v1106_v7  ;;  %v976_v11 = vor.u32 %v1039_v5, %v973_v6  ;;  %v1038_v13 = vld [vmem:[%s1247_s13 + $0x24] sm:$0xf0]  ;;  %s1051_s29 = sshll.u32 (%p1176_p5), %s913_s24, 4 }
  0x50   : > { %626 = vmatpush.bf16.msra.mxu1 %v1012_v1  ;;  %v963_v12 = vld [vmem:[%s1247_s13 + $0x20] sm:$0xf]  ;;  %v1037_v14 = vld [vmem:[%s1247_s13 + $0x24] sm:$0xf]  ;;  %v965_v15 = vld [vmem:[%s1247_s13 + $0x28] sm:$0xf0]  ;;  %692 = vperm.xlu1 %1080, %v678_v8   ;;  %s789_s20 = scalar_lea.vmem (%p1176_p5), %s1400_s6, %s1051_s29 }
  0x51   : > { %602 = vmatpush.bf16.msra.mxu0 %v988_v50  ;;  %1019 = vmatmul.msk.bf16.vlgmr.msra.gmra.mxu3 %vm593_vm0, %v936_v61  ;;  %v964_v16 = vor.u32 %v1038_v13, %v963_v12  ;;  %v968_v17 = vor.u32 %v1037_v14, %v965_v15  ;;  %v955_v18 = vld [vmem:[%s1247_s13 + $0x10] sm:$0xf]  ;;  %v1036_v19 = vld [vmem:[%s1247_s13 + $0x14] sm:$0xf0]  ;;  %v1035_v21 = vld [vmem:[%s1247_s13 + $0x14] sm:$0xf] }
  0x52   : > { %640 = vmatpush.bf16.msra.mxu2 %v992_v54  ;;  %682 = vperm.xlu0 %1079, %v676_v9   ;;  %v708_v20 = vld [vmem:[%s1397_s3] sm:$0xff]  ;;  %v957_v22 = vld [vmem:[%s1247_s13 + $0x18] sm:$0xf0]  ;;  %v956_v25 = vor.u32 %v1036_v19, %v955_v18  ;;  %v1031_v26 = vld [vmem:[%s1395_s1 + $0x14] sm:$0xf] }
  0x53   : > { %1017 = vmatmul.msk.bf16.vlgmr.msra.gmra.mxu1 %vm593_vm0, %v936_v61  ;;  %1081 = vset.pattern.permute.xlu2 %v1106_v7  ;;  %v679_v23 = vld [vmem:[%s1396_s2 + $0x18] sm:$0xff]  ;;  %v677_v24 = vld [vmem:[%s1396_s2 + $0x8] sm:$0xff]  ;;  %v960_v28 = vor.u32 %v1035_v21, %v957_v22  ;;  %v947_v29 = vld [vmem:[%s1247_s13] sm:$0xf] }
  0x54   : > { %714 = vperm.xlu2 %1081, %v708_v20   ;;  %v941_v27 = vld [vmem:[%s1395_s1 + $0x18] sm:$0xf0]  ;;  %v1034_v30 = vld [vmem:[%s1247_s13 + $0x4] sm:$0xf0]  ;;  %v1033_v31 = vld [vmem:[%s1247_s13 + $0x4] sm:$0xf] }
  0x55   : > { %603 = vmatpush.bf16.msra.mxu0 %v980_v0  ;;  %v949_v32 = vld [vmem:[%s1247_s13 + $0x8] sm:$0xf0]  ;;  %v944_v33 = vor.u32 %v1031_v26, %v941_v27  ;;  %v948_v35 = vor.u32 %v1034_v30, %v947_v29  ;;  %v931_v36 = vld [vmem:[%s1395_s1] sm:$0xf]  ;;  %v1030_v37 = vld [vmem:[%s1395_s1 + $0x4] sm:$0xf0] }
  0x56   : > { %641 = vmatpush.bf16.msra.mxu2 %v984_v2  ;;  %v709_v34 = vld [vmem:[%s1397_s3 + $0x8] sm:$0xff]  ;;  %v952_v38 = vor.u32 %v1033_v31, %v949_v32  ;;  %v932_v39 = vor.u32 %v1030_v37, %v931_v36  ;;  %v711_v40 = vld [vmem:[%s1397_s3 + $0x18] sm:$0xff]  ;;  %v710_v41 = vld [vmem:[%s1397_s3 + $0x10] sm:$0xff] }
  0x57   : > { %v939_v42 = vld [vmem:[%s1395_s1 + $0x10] sm:$0xf]  ;;  %v1032_v43 = vld [vmem:[%s1395_s1 + $0x14] sm:$0xf0]  ;;  %v740_v52 = vld [vmem:[%s1339_s16] sm:$0xff] }
  0x58   : > { %697 = vperm.xlu1 %1080, %v679_v23   ;;  %v940_v44 = vor.u32 %v1032_v43, %v939_v42  ;;  %v756_v55 = vld [vmem:[%s1342_s17] sm:$0xff]  ;;  %v741_v2 = vld [vmem:[%s1339_s16 + $0x8] sm:$0xff]  ;;  %v742_v6 = vld [vmem:[%s1339_s16 + $0x10] sm:$0xff] }
  0x59   : > { %604 = vmatpush.bf16.msra.mxu0 %v972_v10  ;;  %v757_v7 = vld [vmem:[%s1342_s17 + $0x8] sm:$0xff]  ;;  %v758_v10 = vld [vmem:[%s1342_s17 + $0x10] sm:$0xff]  ;;  %v743_v21 = vld [vmem:[%s1339_s16 + $0x18] sm:$0xff] }
  0x5a   : > { %642 = vmatpush.bf16.msra.mxu2 %v976_v11  ;;  %687 = vperm.xlu0 %1079, %v677_v24   ;;  %v759_v26 = vld [vmem:[%s1342_s17 + $0x18] sm:$0xff]  ;;  %v760_v30 = vld [vmem:[%s1342_s17 + $0x20] sm:$0xff] }
  0x5c   : > { %719 = vperm.xlu2 %1081, %v709_v34  }
  0x5d   : > { %605 = vmatpush.bf16.msra.mxu0 %v964_v16 }
  0x5e   : > { %643 = vmatpush.bf16.msra.mxu2 %v968_v17 }
  0x60   : > { %729 = vperm.xlu1 %1080, %v711_v40   ;;  %v745_v40 = vld [vmem:[%s1339_s16 + $0x28] sm:$0xff] }
  0x61   : > { %606 = vmatpush.bf16.msra.mxu0 %v956_v25  ;;  %1020 = vmatmul.msk.bf16.gmra.mxu3 %vm593_vm0, %v944_v33  ;;  %v744_v25 = vld [vmem:[%s1339_s16 + $0x20] sm:$0xff] }
  0x62   : > { %644 = vmatpush.bf16.msra.mxu2 %v960_v28  ;;  %724 = vperm.xlu0 %1079, %v710_v41  }
  0x63   : > { %1018 = vmatmul.msk.bf16.gmra.mxu1 %vm593_vm0, %v944_v33 }
  0x65   : > { %607 = vmatpush.bf16.msra.mxu0 %v948_v35 }
  0x66   : > { %645 = vmatpush.bf16.msra.mxu2 %v952_v38 }
  0x68   : > { %608 = vmatmul.bf16.vlgmr.msra.gmra.mxu0 %v932_v39 }
  0x69   : > { %646 = vmatmul.bf16.vlgmr.msra.gmra.mxu2 %v932_v39 }
  0x78   : > { %613 = vmatmul.bf16.gmra.mxu0 %v940_v44 }
  0x79   : > { %651 = vmatmul.bf16.gmra.mxu2 %v940_v44  ;;  %v746_v44 = vld [vmem:[%s1339_s16 + $0x30] sm:$0xff] }
  0xae   : > { %v715_v48 = vpop.permute.xlu2 %714 }
  0xb6   : > { %v720_v1 = vpop.permute.xlu2 %719 }
  0xc2   : > { %v693_v56 = vpop.permute.xlu1 %692 }
  0xc4   : > { %v683_v46 = vpop.permute.xlu0 %682 }
  0xca   : > { %v698_v19 = vpop.permute.xlu1 %697 }
  0xcc   : > { %v688_v61 = vpop.permute.xlu0 %687 }
  0xd0   : > { %v628_v45 = vpop.f32.mrf.mxu1 }
  0xd2   : > { %v730_v42 = vpop.permute.xlu1 %729 }
  0xd4   : > { %v666_v49 = vpop.f32.mrf.mxu3  ;;  %v725_v24 = vpop.permute.xlu0 %724 }
  0xd8   : > { %v630_v53 = vpop.f32.mrf.mxu1 }
  0xdc   : > { %v668_v3 = vpop.f32.mrf.mxu3 }
  0xe0   : > { %v633_v11 = vpop.f32.mrf.mxu1 }
  0xe4   : > { %v671_v27 = vpop.f32.mrf.mxu3 }
  0xe5   : > { %v609_v47 = vpop.f32.mrf.mxu0 }
  0xe6   : > { %v629_v50 = vadd.f32 %v628_v45, %v609_v47  ;;  %v761_v45 = vld [vmem:[%s1342_s17 + $0x28] sm:$0xff] }
  0xe8   : > { %v700_v51 = vmul.f32 %v683_v46, %v629_v50  ;;  %v635_v34 = vpop.f32.mrf.mxu1 }
  0xea   : > { %v732_v54 = vadd.f32 %v715_v48, %v700_v51 }
  0xec   : > { %v748_v57 = vmul.f32 %v740_v52, %v732_v54  ;;  %v647_v58 = vpop.f32.mrf.mxu2 }
  0xed   : > { %v667_v59 = vadd.f32 %v666_v49, %v647_v58  ;;  %v611_v60 = vpop.f32.mrf.mxu0  ;;  %v673_v49 = vpop.f32.mrf.mxu3  ;;  %v763_v58 = vld [vmem:[%s1342_s17 + $0x38] sm:$0xff] }
  0xee   : > { %v764_v62 = vmul.f32 %v756_v55, %v748_v57  ;;  %v631_v63 = vadd.f32 %v630_v53, %v611_v60 }
  0xef   : > { %v701_v0 = vmul.f32 %v683_v46, %v667_v59 }
  0xf0   : > { %772 = vst [vmem:[%s1345_s21] sm:$0xff] %v764_v62  ;;  %v702_v4 = vmul.f32 %v688_v61, %v631_v63 }
  0xf1   : > { %v733_v5 = vadd.f32 %v715_v48, %v701_v0  ;;  %v762_v48 = vld [vmem:[%s1342_s17 + $0x30] sm:$0xff] }
  0xf2   : > { %v734_v8 = vadd.f32 %v720_v1, %v702_v4 }
  0xf3   : > { %v749_v9 = vmul.f32 %v741_v2, %v733_v5 }
  0xf4   : > { %v750_v12 = vmul.f32 %v742_v6, %v734_v8  ;;  %v649_v13 = vpop.f32.mrf.mxu2 }
  0xf5   : > { %v765_v14 = vmul.f32 %v757_v7, %v749_v9  ;;  %v669_v15 = vadd.f32 %v668_v3, %v649_v13  ;;  %v614_v16 = vpop.f32.mrf.mxu0 }
  0xf6   : > { %v766_v17 = vmul.f32 %v758_v10, %v750_v12  ;;  %v634_v18 = vadd.f32 %v633_v11, %v614_v16 }
  0xf7   : > { %773 = vst [vmem:[%s1345_s21 + $0x8] sm:$0xff] %v765_v14  ;;  %v703_v20 = vmul.f32 %v688_v61, %v669_v15  ;;  %v802_v61 = vld [vmem:[%s1345_s21] sm:$0xff] (%p1176_p5) }
  0xf8   : > { %774 = vst [vmem:[%s1345_s21 + $0x10] sm:$0xff] %v766_v17  ;;  %v704_v22 = vmul.f32 %v693_v56, %v634_v18 }
  0xf9   : > { %v735_v23 = vadd.f32 %v720_v1, %v703_v20  ;;  %803 = vst [vmem:[%s789_s20] sm:$0xff] (%p1176_p5), %v802_v61 }
  0xfa   : > { %v736_v28 = vadd.f32 %v725_v24, %v704_v22 }
  0xfb   : > { %v751_v29 = vmul.f32 %v743_v21, %v735_v23 }
  0xfc   : > { %v752_v31 = vmul.f32 %v744_v25, %v736_v28  ;;  %v652_v32 = vpop.f32.mrf.mxu2 }
  0xfd   : > { %v767_v33 = vmul.f32 %v759_v26, %v751_v29  ;;  %v672_v35 = vadd.f32 %v671_v27, %v652_v32  ;;  %v616_v36 = vpop.f32.mrf.mxu0 }
  0xfe   : > { %v768_v37 = vmul.f32 %v760_v30, %v752_v31  ;;  %v636_v38 = vadd.f32 %v635_v34, %v616_v36  ;;  %v804_v62 = vld [vmem:[%s1345_s21 + $0x8] sm:$0xff] (%p1176_p5) }
  0xff   : > { %775 = vst [vmem:[%s1345_s21 + $0x18] sm:$0xff] %v767_v33  ;;  %v705_v39 = vmul.f32 %v693_v56, %v672_v35  ;;  %v747_v56 = vld [vmem:[%s1339_s16 + $0x38] sm:$0xff]  ;;  %v806_v63 = vld [vmem:[%s1345_s21 + $0x10] sm:$0xff] (%p1176_p5) }
 0x100   : > { %776 = vst [vmem:[%s1345_s21 + $0x20] sm:$0xff] %v768_v37  ;;  %v706_v41 = vmul.f32 %v698_v19, %v636_v38 }
 0x101   : > { %v737_v43 = vadd.f32 %v725_v24, %v705_v39  ;;  %805 = vst [vmem:[%s789_s20 + $0x8] sm:$0xff] (%p1176_p5), %v804_v62 }
 0x102   : > { %v738_v46 = vadd.f32 %v730_v42, %v706_v41  ;;  %807 = vst [vmem:[%s789_s20 + $0x20] sm:$0xff] (%p1176_p5), %v806_v63 }
 0x103   : > { %v753_v47 = vmul.f32 %v745_v40, %v737_v43 }
 0x104   : > { %v754_v50 = vmul.f32 %v746_v44, %v738_v46  ;;  %v654_v51 = vpop.f32.mrf.mxu2 }
 0x105   : > { %v769_v52 = vmul.f32 %v761_v45, %v753_v47  ;;  %v674_v53 = vadd.f32 %v673_v49, %v654_v51 }
 0x106   : > { %v770_v54 = vmul.f32 %v762_v48, %v754_v50  ;;  %v808_v0 = vld [vmem:[%s1345_s21 + $0x18] sm:$0xff] (%p1176_p5) }
 0x107   : > { %777 = vst [vmem:[%s1345_s21 + $0x28] sm:$0xff] %v769_v52  ;;  %v707_v55 = vmul.f32 %v698_v19, %v674_v53  ;;  %v810_v1 = vld [vmem:[%s1345_s21 + $0x20] sm:$0xff] (%p1176_p5) }
 0x108   : > { %778 = vst [vmem:[%s1345_s21 + $0x30] sm:$0xff] %v770_v54 }
 0x109   : > { %v739_v57 = vadd.f32 %v730_v42, %v707_v55  ;;  %809 = vst [vmem:[%s789_s20 + $0x28] sm:$0xff] (%p1176_p5), %v808_v0 }
 0x10a   : > { %811 = vst [vmem:[%s789_s20 + $0x40] sm:$0xff] (%p1176_p5), %v810_v1 }
 0x10b   : > { %v755_v59 = vmul.f32 %v747_v56, %v739_v57  ;;  %786 = sbr.rel (!%p1176_p5) target bundleno = 280 (0x118), region = 132 }
 0x10d   : > { %v771_v60 = vmul.f32 %v763_v58, %v755_v59 }
 0x10e   : > { %v812_v2 = vld [vmem:[%s1345_s21 + $0x28] sm:$0xff] (%p1176_p5) }
 0x10f   : > { %779 = vst [vmem:[%s1345_s21 + $0x38] sm:$0xff] %v771_v60  ;;  %v814_v3 = vld [vmem:[%s1345_s21 + $0x30] sm:$0xff] (%p1176_p5) }
 0x110   : > { %813 = vst [vmem:[%s789_s20 + $0x48] sm:$0xff] %v812_v2 }
 0x111   : > { %815 = vst [vmem:[%s789_s20 + $0x60] sm:$0xff] %v814_v3 }
 0x116   : > { %v816_v4 = vld [vmem:[%s1345_s21 + $0x38] sm:$0xff] }
 0x117   : > { %817 = vst [vmem:[%s789_s20 + $0x68] sm:$0xff] %v816_v4 }
 0x118 PF: > { %p13_p10 = scmp.ge.s32.totalorder %s1159_s25, 4   ;;  %s1403_s21 = smov %s1100_s22 }
 0x119   : > { %s1404_s22 = smov %s1170_s28  ;;  %s1405_s23 = smov %s1159_s25 }
 0x11a   :  { %15 = sbr.rel (!%p13_p10) target bundleno = 2 (0x2), region = 202 }

// kernel: cfm_forward.12
= control target key start
LH: loop header
LB: loop body
LE: loop exit
PB: predicated region body
PF: predicated region fallthrough
CT: control target
= control target key end

     0   :  { %s2459_s21 = smov 0   ;;  %s2461_s22 = smov 0   ;;  %s3271_s0 = inlined_call_operand.vmem [shape: bf16[288,512], index: 0, kind: input, shape index: {}]   ;;  %s3272_s1 = inlined_call_operand.vmem [shape: bf16[288,512], index: 1, kind: input, shape index: {}]   ;;  %s3273_s2 = inlined_call_operand.vmem [shape: bf16[64,288], index: 2, kind: input, shape index: {}]   ;;  %s3274_s3 = inlined_call_operand.vmem [shape: bf16[64,288], index: 3, kind: input, shape index: {}]   ;;  %s3275_s4 = inlined_call_operand.vmem [shape: f32[64,1], index: 4, kind: input, shape index: {}]   ;;  %s3276_s5 = inlined_call_operand.vmem [shape: f32[64,1], index: 5, kind: input, shape index: {}]   ;;  %s3277_s6 = inlined_call_operand.vmem [shape: f32[64,512], index: 6, kind: output, shape index: {}]  }
   0x1   :  { %s2463_s23 = smov 0  }
   0x2 LB: > { %s1854_s24 = sadd.s32 4294967295, %s2421_s23   ;;  %s2476_s25 = sadd.s32 1, %s2421_s23   ;;  %s2421_s23 = sphi %s2463_s23, %s3282_s23   ;;  %s2417_s22 = sphi %s2461_s22, %s3281_s22   ;;  %s2413_s21 = sphi %s2459_s21, %s3280_s21  }
   0x3   : > { %s20_s26 = ssub.s32 %s2421_s23, %s2476_s25  ;;  %s23_s27 = sadd.s32 1, %s2417_s22 }
   0x4   : > { %p21_p0 = scmp.eq.s32.totalorder %s20_s26, 0  ;;  %p30_p1 = scmp.ne.s32.totalorder %s2417_s22, %s2413_s21 }
   0x5   : > { %p31_p2 = scmp.eq.s32.totalorder %s2421_s23, 0  ;;  %p170_p3 = scmp.eq.s32.totalorder %s1854_s24, 1 }
   0x6   : > { %s2487_s28 = scalar_select %p21_p0, %s2417_s22, %s23_s27  }
   0x7   : > { %p2489_p4 = por %p31_p2, %p30_p1  ;;  %p2493_p5 = por %p170_p3, %p30_p1 }
   0x8   : > { %p1857_p6 = scmp.ge.s32.totalorder %s2421_s23, 2 }
   0xa   : > { %204 = sbr.rel (%p1857_p6) target bundleno = 95 (0x5f), region = 32 }
   0xf   : > { %207 = sbr.rel (!%p2489_p4) target bundleno = 55 (0x37), region = 36  ;;  %s209_s7 = sand.u32 (%p2489_p4), 1, %s2417_s22  }
  0x10   : > { %s2269_s8 = sshll.u32 (%p2489_p4), %s2421_s23, 3  ;;  %s2368_s9 = smul.u32 (%p2489_p4), 288, %s209_s7 }
  0x11   : > { %s2505_s12 = scalar_lea.vmem (%p2489_p4), %s3271_s0, %s2269_s8 }
  0x12   : > { %v313_v0 = vld [vmem:[%s2505_s12] sm:$0xff] (%p2489_p4)  ;;  %v315_v1 = vld [vmem:[%s2505_s12 + $0x10] sm:$0xff] (%p2489_p4)  ;;  %s2510_s13 = scalar_lea.vmem (%p2489_p4), [#allocation2], %s2368_s9 }
  0x13   : > { %v317_v2 = vld [vmem:[%s2505_s12 + $0x20] sm:$0xff] (%p2489_p4)  ;;  %314 = vst [vmem:[%s2510_s13] sm:$0xff] (%p2489_p4), %v313_v0  ;;  %v319_v3 = vld [vmem:[%s2505_s12 + $0x30] sm:$0xff] (%p2489_p4) }
  0x14   : > { %316 = vst [vmem:[%s2510_s13 + $0x8] sm:$0xff] %v315_v1  ;;  %v321_v4 = vld [vmem:[%s2505_s12 + $0x40] sm:$0xff]  ;;  %v323_v5 = vld [vmem:[%s2505_s12 + $0x50] sm:$0xff] }
  0x15   : > { %318 = vst [vmem:[%s2510_s13 + $0x10] sm:$0xff] %v317_v2  ;;  %v325_v6 = vld [vmem:[%s2505_s12 + $0x60] sm:$0xff]  ;;  %v327_v7 = vld [vmem:[%s2505_s12 + $0x70] sm:$0xff] }
  0x16   : > { %320 = vst [vmem:[%s2510_s13 + $0x18] sm:$0xff] %v319_v3  ;;  %v329_v8 = vld [vmem:[%s2505_s12 + $0x80] sm:$0xff]  ;;  %v331_v9 = vld [vmem:[%s2505_s12 + $0x90] sm:$0xff] }
  0x17   : > { %322 = vst [vmem:[%s2510_s13 + $0x20] sm:$0xff] %v321_v4  ;;  %v333_v10 = vld [vmem:[%s2505_s12 + $0xa0] sm:$0xff]  ;;  %v335_v11 = vld [vmem:[%s2505_s12 + $0xb0] sm:$0xff] }
  0x18   : > { %324 = vst [vmem:[%s2510_s13 + $0x28] sm:$0xff] %v323_v5  ;;  %v337_v12 = vld [vmem:[%s2505_s12 + $0xc0] sm:$0xff]  ;;  %v339_v13 = vld [vmem:[%s2505_s12 + $0xd0] sm:$0xff] }
  0x19   : > { %326 = vst [vmem:[%s2510_s13 + $0x30] sm:$0xff] %v325_v6  ;;  %v341_v14 = vld [vmem:[%s2505_s12 + $0xe0] sm:$0xff]  ;;  %v343_v15 = vld [vmem:[%s2505_s12 + $0xf0] sm:$0xff] }
  0x1a   : > { %328 = vst [vmem:[%s2510_s13 + $0x38] sm:$0xff] %v327_v7  ;;  %v345_v16 = vld [vmem:[%s2505_s12 + $0x100] sm:$0xff]  ;;  %v347_v17 = vld [vmem:[%s2505_s12 + $0x110] sm:$0xff] }
  0x1b   : > { %330 = vst [vmem:[%s2510_s13 + $0x40] sm:$0xff] %v329_v8  ;;  %v349_v18 = vld [vmem:[%s2505_s12 + $0x120] sm:$0xff]  ;;  %v351_v19 = vld [vmem:[%s2505_s12 + $0x130] sm:$0xff] }
  0x1c   : > { %332 = vst [vmem:[%s2510_s13 + $0x48] sm:$0xff] %v331_v9  ;;  %v353_v20 = vld [vmem:[%s2505_s12 + $0x140] sm:$0xff]  ;;  %v355_v21 = vld [vmem:[%s2505_s12 + $0x150] sm:$0xff] }
  0x1d   : > { %334 = vst [vmem:[%s2510_s13 + $0x50] sm:$0xff] %v333_v10  ;;  %v357_v22 = vld [vmem:[%s2505_s12 + $0x160] sm:$0xff]  ;;  %v359_v23 = vld [vmem:[%s2505_s12 + $0x170] sm:$0xff] }
  0x1e   : > { %336 = vst [vmem:[%s2510_s13 + $0x58] sm:$0xff] %v335_v11  ;;  %v361_v24 = vld [vmem:[%s2505_s12 + $0x180] sm:$0xff]  ;;  %v363_v25 = vld [vmem:[%s2505_s12 + $0x190] sm:$0xff] }
  0x1f   : > { %338 = vst [vmem:[%s2510_s13 + $0x60] sm:$0xff] %v337_v12  ;;  %v365_v26 = vld [vmem:[%s2505_s12 + $0x1a0] sm:$0xff]  ;;  %v367_v27 = vld [vmem:[%s2505_s12 + $0x1b0] sm:$0xff] }
  0x20   : > { %340 = vst [vmem:[%s2510_s13 + $0x68] sm:$0xff] %v339_v13  ;;  %v369_v28 = vld [vmem:[%s2505_s12 + $0x1c0] sm:$0xff]  ;;  %v371_v29 = vld [vmem:[%s2505_s12 + $0x1d0] sm:$0xff] }
  0x21   : > { %342 = vst [vmem:[%s2510_s13 + $0x70] sm:$0xff] %v341_v14  ;;  %v373_v30 = vld [vmem:[%s2505_s12 + $0x1e0] sm:$0xff]  ;;  %v375_v31 = vld [vmem:[%s2505_s12 + $0x1f0] sm:$0xff] }
  0x22   : > { %344 = vst [vmem:[%s2510_s13 + $0x78] sm:$0xff] %v343_v15  ;;  %v377_v32 = vld [vmem:[%s2505_s12 + $0x200] sm:$0xff]  ;;  %v379_v33 = vld [vmem:[%s2505_s12 + $0x210] sm:$0xff] }
  0x23   : > { %346 = vst [vmem:[%s2510_s13 + $0x80] sm:$0xff] %v345_v16  ;;  %v381_v34 = vld [vmem:[%s2505_s12 + $0x220] sm:$0xff]  ;;  %v383_v35 = vld [vmem:[%s2505_s12 + $0x230] sm:$0xff] }
  0x24   : > { %348 = vst [vmem:[%s2510_s13 + $0x88] sm:$0xff] %v347_v17 }
  0x25   : > { %350 = vst [vmem:[%s2510_s13 + $0x90] sm:$0xff] %v349_v18 }
  0x26   : > { %352 = vst [vmem:[%s2510_s13 + $0x98] sm:$0xff] %v351_v19 }
  0x27   : > { %354 = vst [vmem:[%s2510_s13 + $0xa0] sm:$0xff] %v353_v20 }
  0x28   : > { %356 = vst [vmem:[%s2510_s13 + $0xa8] sm:$0xff] %v355_v21 }
  0x29   : > { %358 = vst [vmem:[%s2510_s13 + $0xb0] sm:$0xff] %v357_v22 }
  0x2a   : > { %360 = vst [vmem:[%s2510_s13 + $0xb8] sm:$0xff] %v359_v23 }
  0x2b   : > { %362 = vst [vmem:[%s2510_s13 + $0xc0] sm:$0xff] %v361_v24 }
  0x2c   : > { %364 = vst [vmem:[%s2510_s13 + $0xc8] sm:$0xff] %v363_v25 }
  0x2d   : > { %366 = vst [vmem:[%s2510_s13 + $0xd0] sm:$0xff] %v365_v26 }
  0x2e   : > { %368 = vst [vmem:[%s2510_s13 + $0xd8] sm:$0xff] %v367_v27 }
  0x2f   : > { %370 = vst [vmem:[%s2510_s13 + $0xe0] sm:$0xff] %v369_v28 }
  0x30   : > { %372 = vst [vmem:[%s2510_s13 + $0xe8] sm:$0xff] %v371_v29 }
  0x31   : > { %374 = vst [vmem:[%s2510_s13 + $0xf0] sm:$0xff] %v373_v30 }
  0x32   : > { %376 = vst [vmem:[%s2510_s13 + $0xf8] sm:$0xff] %v375_v31 }
  0x33   : > { %378 = vst [vmem:[%s2510_s13 + $0x100] sm:$0xff] %v377_v32 }
  0x34   : > { %380 = vst [vmem:[%s2510_s13 + $0x108] sm:$0xff] %v379_v33 }
  0x35   : > { %382 = vst [vmem:[%s2510_s13 + $0x110] sm:$0xff] %v381_v34 }
  0x36   : > { %384 = vst [vmem:[%s2510_s13 + $0x118] sm:$0xff] %v383_v35 }
  0x37 PF: > { %390 = sbr.rel (!%p2489_p4) target bundleno = 95 (0x5f), region = 74  ;;  %s392_s14 = sand.u32 (%p2489_p4), 1, %s2417_s22  }
  0x38   : > { %s2270_s15 = sshll.u32 (%p2489_p4), %s2421_s23, 3  ;;  %s2369_s16 = smul.u32 (%p2489_p4), 288, %s392_s14 }
  0x39   : > { %s2588_s19 = scalar_lea.vmem (%p2489_p4), %s3272_s1, %s2270_s15 }
  0x3a   : > { %v496_v36 = vld [vmem:[%s2588_s19] sm:$0xff] (%p2489_p4)  ;;  %v498_v37 = vld [vmem:[%s2588_s19 + $0x10] sm:$0xff] (%p2489_p4)  ;;  %s2593_s20 = scalar_lea.vmem (%p2489_p4), [#allocation3], %s2369_s16 }
  0x3b   : > { %v500_v38 = vld [vmem:[%s2588_s19 + $0x20] sm:$0xff] (%p2489_p4)  ;;  %497 = vst [vmem:[%s2593_s20] sm:$0xff] (%p2489_p4), %v496_v36  ;;  %v502_v39 = vld [vmem:[%s2588_s19 + $0x30] sm:$0xff] (%p2489_p4) }
  0x3c   : > { %499 = vst [vmem:[%s2593_s20 + $0x8] sm:$0xff] %v498_v37  ;;  %v504_v40 = vld [vmem:[%s2588_s19 + $0x40] sm:$0xff]  ;;  %v506_v41 = vld [vmem:[%s2588_s19 + $0x50] sm:$0xff] }
  0x3d   : > { %501 = vst [vmem:[%s2593_s20 + $0x10] sm:$0xff] %v500_v38  ;;  %v508_v42 = vld [vmem:[%s2588_s19 + $0x60] sm:$0xff]  ;;  %v510_v43 = vld [vmem:[%s2588_s19 + $0x70] sm:$0xff] }
  0x3e   : > { %503 = vst [vmem:[%s2593_s20 + $0x18] sm:$0xff] %v502_v39  ;;  %v512_v44 = vld [vmem:[%s2588_s19 + $0x80] sm:$0xff]  ;;  %v514_v45 = vld [vmem:[%s2588_s19 + $0x90] sm:$0xff] }
  0x3f   : > { %505 = vst [vmem:[%s2593_s20 + $0x20] sm:$0xff] %v504_v40  ;;  %v516_v46 = vld [vmem:[%s2588_s19 + $0xa0] sm:$0xff]  ;;  %v518_v47 = vld [vmem:[%s2588_s19 + $0xb0] sm:$0xff] }
  0x40   : > { %507 = vst [vmem:[%s2593_s20 + $0x28] sm:$0xff] %v506_v41  ;;  %v520_v48 = vld [vmem:[%s2588_s19 + $0xc0] sm:$0xff]  ;;  %v522_v49 = vld [vmem:[%s2588_s19 + $0xd0] sm:$0xff] }
  0x41   : > { %509 = vst [vmem:[%s2593_s20 + $0x30] sm:$0xff] %v508_v42  ;;  %v524_v50 = vld [vmem:[%s2588_s19 + $0xe0] sm:$0xff]  ;;  %v526_v51 = vld [vmem:[%s2588_s19 + $0xf0] sm:$0xff] }
  0x42   : > { %511 = vst [vmem:[%s2593_s20 + $0x38] sm:$0xff] %v510_v43  ;;  %v528_v52 = vld [vmem:[%s2588_s19 + $0x100] sm:$0xff]  ;;  %v530_v53 = vld [vmem:[%s2588_s19 + $0x110] sm:$0xff] }
  0x43   : > { %513 = vst [vmem:[%s2593_s20 + $0x40] sm:$0xff] %v512_v44  ;;  %v532_v54 = vld [vmem:[%s2588_s19 + $0x120] sm:$0xff]  ;;  %v534_v55 = vld [vmem:[%s2588_s19 + $0x130] sm:$0xff] }
  0x44   : > { %515 = vst [vmem:[%s2593_s20 + $0x48] sm:$0xff] %v514_v45  ;;  %v536_v56 = vld [vmem:[%s2588_s19 + $0x140] sm:$0xff]  ;;  %v538_v57 = vld [vmem:[%s2588_s19 + $0x150] sm:$0xff] }
  0x45   : > { %517 = vst [vmem:[%s2593_s20 + $0x50] sm:$0xff] %v516_v46  ;;  %v540_v58 = vld [vmem:[%s2588_s19 + $0x160] sm:$0xff]  ;;  %v542_v59 = vld [vmem:[%s2588_s19 + $0x170] sm:$0xff] }
  0x46   : > { %519 = vst [vmem:[%s2593_s20 + $0x58] sm:$0xff] %v518_v47  ;;  %v544_v60 = vld [vmem:[%s2588_s19 + $0x180] sm:$0xff]  ;;  %v546_v61 = vld [vmem:[%s2588_s19 + $0x190] sm:$0xff] }
  0x47   : > { %521 = vst [vmem:[%s2593_s20 + $0x60] sm:$0xff] %v520_v48  ;;  %v548_v62 = vld [vmem:[%s2588_s19 + $0x1a0] sm:$0xff]  ;;  %v550_v63 = vld [vmem:[%s2588_s19 + $0x1b0] sm:$0xff] }
  0x48   : > { %523 = vst [vmem:[%s2593_s20 + $0x68] sm:$0xff] %v522_v49  ;;  %v552_v0 = vld [vmem:[%s2588_s19 + $0x1c0] sm:$0xff]  ;;  %v554_v1 = vld [vmem:[%s2588_s19 + $0x1d0] sm:$0xff] }
  0x49   : > { %525 = vst [vmem:[%s2593_s20 + $0x70] sm:$0xff] %v524_v50  ;;  %v556_v2 = vld [vmem:[%s2588_s19 + $0x1e0] sm:$0xff]  ;;  %v558_v3 = vld [vmem:[%s2588_s19 + $0x1f0] sm:$0xff] }
  0x4a   : > { %527 = vst [vmem:[%s2593_s20 + $0x78] sm:$0xff] %v526_v51  ;;  %v560_v4 = vld [vmem:[%s2588_s19 + $0x200] sm:$0xff]  ;;  %v562_v5 = vld [vmem:[%s2588_s19 + $0x210] sm:$0xff] }
  0x4b   : > { %529 = vst [vmem:[%s2593_s20 + $0x80] sm:$0xff] %v528_v52  ;;  %v564_v6 = vld [vmem:[%s2588_s19 + $0x220] sm:$0xff]  ;;  %v566_v7 = vld [vmem:[%s2588_s19 + $0x230] sm:$0xff] }
  0x4c   : > { %531 = vst [vmem:[%s2593_s20 + $0x88] sm:$0xff] %v530_v53 }
  0x4d   : > { %533 = vst [vmem:[%s2593_s20 + $0x90] sm:$0xff] %v532_v54 }
  0x4e   : > { %535 = vst [vmem:[%s2593_s20 + $0x98] sm:$0xff] %v534_v55 }
  0x4f   : > { %537 = vst [vmem:[%s2593_s20 + $0xa0] sm:$0xff] %v536_v56 }
  0x50   : > { %539 = vst [vmem:[%s2593_s20 + $0xa8] sm:$0xff] %v538_v57 }
  0x51   : > { %541 = vst [vmem:[%s2593_s20 + $0xb0] sm:$0xff] %v540_v58 }
  0x52   : > { %543 = vst [vmem:[%s2593_s20 + $0xb8] sm:$0xff] %v542_v59 }
  0x53   : > { %545 = vst [vmem:[%s2593_s20 + $0xc0] sm:$0xff] %v544_v60 }
  0x54   : > { %547 = vst [vmem:[%s2593_s20 + $0xc8] sm:$0xff] %v546_v61 }
  0x55   : > { %549 = vst [vmem:[%s2593_s20 + $0xd0] sm:$0xff] %v548_v62 }
  0x56   : > { %551 = vst [vmem:[%s2593_s20 + $0xd8] sm:$0xff] %v550_v63 }
  0x57   : > { %553 = vst [vmem:[%s2593_s20 + $0xe0] sm:$0xff] %v552_v0 }
  0x58   : > { %555 = vst [vmem:[%s2593_s20 + $0xe8] sm:$0xff] %v554_v1 }
  0x59   : > { %557 = vst [vmem:[%s2593_s20 + $0xf0] sm:$0xff] %v556_v2 }
  0x5a   : > { %559 = vst [vmem:[%s2593_s20 + $0xf8] sm:$0xff] %v558_v3 }
  0x5b   : > { %561 = vst [vmem:[%s2593_s20 + $0x100] sm:$0xff] %v560_v4 }
  0x5c   : > { %563 = vst [vmem:[%s2593_s20 + $0x108] sm:$0xff] %v562_v5 }
  0x5d   : > { %565 = vst [vmem:[%s2593_s20 + $0x110] sm:$0xff] %v564_v6 }
  0x5e   : > { %567 = vst [vmem:[%s2593_s20 + $0x118] sm:$0xff] %v566_v7 }
  0x5f PF: > { %p1862_p7 = scmp.ge.s32.totalorder %s2421_s23, 1  ;;  %p572_p8 = scmp.lt.s32.totalorder %s2421_s23, 3 }
  0x61   : > { %p573_p9 = pnand %p1862_p7, %p572_p8 }
  0x62   : > { %s579_s26 = sand.u32 (!%p573_p9), 1, %s2413_s21  }
  0x63   : > { %576 = sbr.rel (%p573_p9) target bundleno = 471 (0x1d7), region = 112  ;;  %s1863_s13 = sshll.u32 (!%p573_p9), %s579_s26, 7 }
  0x64   : > { %s2669_s27 = smul.u32 (!%p573_p9), 288, %s579_s26  ;;  %s3166_s14 = scalar_lea.vmem (!%p573_p9), [#allocation4], %s1863_s13 }
  0x66   : > { %s2672_s29 = scalar_lea.vmem (!%p573_p9), [#allocation3], %s2669_s27  ;;  %s2759_s19 = scalar_lea.vmem (!%p573_p9), [#allocation2], %s2669_s27 }
  0x68   : > { %v1970_v8 = vld [vmem:[%s2672_s29 + $0x70] sm:$0xf]  ;;  %v2346_v9 = vld [vmem:[%s2672_s29 + $0x74] sm:$0xf0]  ;;  %v2345_v17 = vld [vmem:[%s2672_s29 + $0x74] sm:$0xf] }
  0x69   : > { %v2034_v10 = vld [vmem:[%s2672_s29 + $0xf0] sm:$0xf]  ;;  %v1971_v11 = vor.u32 %v2346_v9, %v1970_v8  ;;  %v2362_v12 = vld [vmem:[%s2672_s29 + $0xf4] sm:$0xf0]  ;;  %v1972_v18 = vld [vmem:[%s2672_s29 + $0x78] sm:$0xf0] }
  0x6a   : > { %v2050_v13 = vld [vmem:[%s2672_s29 + $0x110] sm:$0xf]  ;;  %v2366_v14 = vld [vmem:[%s2672_s29 + $0x114] sm:$0xf0]  ;;  %v2035_v15 = vor.u32 %v2362_v12, %v2034_v10  ;;  %v1962_v19 = vld [vmem:[%s2672_s29 + $0x60] sm:$0xf]  ;;  %v1975_v22 = vor.u32 %v2345_v17, %v1972_v18 }
  0x6b   : > { %v2051_v16 = vor.u32 %v2366_v14, %v2050_v13  ;;  %v1874_v20 = vld [vmem:[%s3274_s3 + $0x8] sm:$0xf]  ;;  %v2321_v21 = vld [vmem:[%s3274_s3 + $0x10] sm:$0xf0]  ;;  %979 = vmatpush.bf16.msra.mxu0 %v1971_v11  ;;  %v2026_v24 = vld [vmem:[%s2672_s29 + $0xe0] sm:$0xf] }
  0x6c   : > { %v2344_v23 = vld [vmem:[%s2672_s29 + $0x64] sm:$0xf0]  ;;  %1008 = vmatpush.bf16.msra.mxu1 %v2035_v15  ;;  %v2042_v28 = vld [vmem:[%s2672_s29 + $0x100] sm:$0xf]  ;;  %v2343_v30 = vld [vmem:[%s2672_s29 + $0x64] sm:$0xf]  ;;  %1066 = vmatpush.bf16.msra.mxu3 %v1975_v22  ;;  %v2701_v39 = vor.u32 %v2321_v21, %v1874_v20 }
  0x6d   : > { %v2360_v25 = vld [vmem:[%s2672_s29 + $0xe4] sm:$0xf0]  ;;  %1043 = vmatpush.bf16.msra.mxu2 %v2051_v16  ;;  %v1963_v26 = vor.u32 %v2344_v23, %v1962_v19  ;;  %v1964_v32 = vld [vmem:[%s2672_s29 + $0x68] sm:$0xf0]  ;;  %v1954_v33 = vld [vmem:[%s2672_s29 + $0x50] sm:$0xf] }
  0x6e   : > { %v2027_v27 = vor.u32 %v2360_v25, %v2026_v24  ;;  %v2364_v29 = vld [vmem:[%s2672_s29 + $0x104] sm:$0xf0]  ;;  %v2342_v34 = vld [vmem:[%s2672_s29 + $0x54] sm:$0xf0]  ;;  %v1967_v35 = vor.u32 %v2343_v30, %v1964_v32  ;;  %v2018_v36 = vld [vmem:[%s2672_s29 + $0xd0] sm:$0xf] }
  0x6f   : > { %v2043_v31 = vor.u32 %v2364_v29, %v2042_v28  ;;  %v2358_v37 = vld [vmem:[%s2672_s29 + $0xd4] sm:$0xf0]  ;;  %v2341_v38 = vld [vmem:[%s2672_s29 + $0x54] sm:$0xf]  ;;  %980 = vmatpush.bf16.msra.mxu0 %v1963_v26  ;;  %v1955_v40 = vor.u32 %v2342_v34, %v1954_v33  ;;  %v1956_v41 = vld [vmem:[%s2672_s29 + $0x58] sm:$0xf0] }
  0x70   : > { %1009 = vmatpush.bf16.msra.mxu1 %v2027_v27  ;;  %vm966_vm0 = vcmask 261120   ;;  %v2019_v42 = vor.u32 %v2358_v37, %v2018_v36  ;;  %v1946_v43 = vld [vmem:[%s2672_s29 + $0x40] sm:$0xf]  ;;  %v2340_v44 = vld [vmem:[%s2672_s29 + $0x44] sm:$0xf0]  ;;  %1067 = vmatpush.bf16.msra.mxu3 %v1967_v35  ;;  %v1959_v45 = vor.u32 %v2341_v38, %v1956_v41  ;;  %s2367_s21 = sshll.u32 (%p2493_p5), %s1854_s24, 4 }
  0x71   : > { %1044 = vmatpush.bf16.msra.mxu2 %v2043_v31  ;;  %v2010_v46 = vld [vmem:[%s2672_s29 + $0xc0] sm:$0xf]  ;;  %v2356_v47 = vld [vmem:[%s2672_s29 + $0xc4] sm:$0xf0]  ;;  %v2339_v48 = vld [vmem:[%s2672_s29 + $0x44] sm:$0xf]  ;;  %v1947_v50 = vor.u32 %v2340_v44, %v1946_v43  ;;  %s1732_s30 = scalar_lea.vmem (%p2493_p5), %s3277_s6, %s2367_s21 }
  0x72   : > { %v1948_v49 = vld [vmem:[%s2672_s29 + $0x48] sm:$0xf0]  ;;  %v2011_v51 = vor.u32 %v2356_v47, %v2010_v46  ;;  %v1938_v52 = vld [vmem:[%s2672_s29 + $0x30] sm:$0xf]  ;;  %v2338_v53 = vld [vmem:[%s2672_s29 + $0x34] sm:$0xf0] }
  0x73   : > { %981 = vmatpush.bf16.msra.mxu0 %v1955_v40  ;;  %v1951_v54 = vor.u32 %v2339_v48, %v1948_v49  ;;  %v2002_v55 = vld [vmem:[%s2672_s29 + $0xb0] sm:$0xf]  ;;  %v2354_v56 = vld [vmem:[%s2672_s29 + $0xb4] sm:$0xf0]  ;;  %v2337_v57 = vld [vmem:[%s2672_s29 + $0x34] sm:$0xf]  ;;  %v1939_v59 = vor.u32 %v2338_v53, %v1938_v52 }
  0x74   : > { %2056 = vmatmul.msk.bf16.vlgmr.msra.gmra.mxu2 %vm966_vm0, %v2701_v39  ;;  %1010 = vmatpush.bf16.msra.mxu1 %v2019_v42  ;;  %v1940_v58 = vld [vmem:[%s2672_s29 + $0x38] sm:$0xf0]  ;;  %v2003_v60 = vor.u32 %v2354_v56, %v2002_v55  ;;  %v1930_v61 = vld [vmem:[%s2672_s29 + $0x20] sm:$0xf]  ;;  %v2336_v62 = vld [vmem:[%s2672_s29 + $0x24] sm:$0xf0] }
  0x75   : > { %1068 = vmatpush.bf16.msra.mxu3 %v1959_v45  ;;  %v1943_v63 = vor.u32 %v2337_v57, %v1940_v58  ;;  %v1994_v0 = vld [vmem:[%s2672_s29 + $0xa0] sm:$0xf]  ;;  %v2352_v1 = vld [vmem:[%s2672_s29 + $0xa4] sm:$0xf0]  ;;  %v2335_v2 = vld [vmem:[%s2672_s29 + $0x24] sm:$0xf]  ;;  %v1931_v6 = vor.u32 %v2336_v62, %v1930_v61 }
  0x76   : > { %v1932_v3 = vld [vmem:[%s2672_s29 + $0x28] sm:$0xf0]  ;;  %v1886_v4 = vld [vmem:[%s3274_s3 + $0x20] sm:$0xf]  ;;  %v2361_v5 = vld [vmem:[%s2672_s29 + $0xf4] sm:$0xf]  ;;  %v1995_v9 = vor.u32 %v2352_v1, %v1994_v0 }
  0x77   : > { %982 = vmatpush.bf16.msra.mxu0 %v1947_v50  ;;  %v2324_v7 = vld [vmem:[%s3274_s3 + $0x28] sm:$0xf0]  ;;  %v2036_v8 = vld [vmem:[%s2672_s29 + $0xf8] sm:$0xf0]  ;;  %v1922_v10 = vld [vmem:[%s2672_s29 + $0x10] sm:$0xf]  ;;  %v1935_v14 = vor.u32 %v2335_v2, %v1932_v3 }
  0x78   : > { %1011 = vmatpush.bf16.msra.mxu1 %v2011_v51  ;;  %v2334_v11 = vld [vmem:[%s2672_s29 + $0x14] sm:$0xf0]  ;;  %v1986_v12 = vld [vmem:[%s2672_s29 + $0x90] sm:$0xf]  ;;  %v2039_v13 = vor.u32 %v2361_v5, %v2036_v8  ;;  %v2333_v16 = vld [vmem:[%s2672_s29 + $0x14] sm:$0xf]  ;;  %v2741_v21 = vor.u32 %v2324_v7, %v1886_v4 }
  0x79   : > { %1069 = vmatpush.bf16.msra.mxu3 %v1951_v54  ;;  %v2350_v15 = vld [vmem:[%s2672_s29 + $0x94] sm:$0xf0]  ;;  %v1924_v17 = vld [vmem:[%s2672_s29 + $0x18] sm:$0xf0]  ;;  %v1914_v18 = vld [vmem:[%s2672_s29] sm:$0xf]  ;;  %v1923_v22 = vor.u32 %v2334_v11, %v1922_v10 }
  0x7a   : > { %1095 = vmatpush.bf16.msrb.mxu2 %v2039_v13  ;;  %v2359_v19 = vld [vmem:[%s2672_s29 + $0xe4] sm:$0xf]  ;;  %v2028_v20 = vld [vmem:[%s2672_s29 + $0xe8] sm:$0xf0]  ;;  %v2332_v23 = vld [vmem:[%s2672_s29 + $0x4] sm:$0xf0]  ;;  %v1987_v27 = vor.u32 %v2350_v15, %v1986_v12  ;;  %v1927_v31 = vor.u32 %v2333_v16, %v1924_v17 }
  0x7b   : > { %983 = vmatpush.bf16.msra.mxu0 %v1939_v59  ;;  %v1978_v24 = vld [vmem:[%s2672_s29 + $0x80] sm:$0xf]  ;;  %v2348_v25 = vld [vmem:[%s2672_s29 + $0x84] sm:$0xf0]  ;;  %v2031_v26 = vor.u32 %v2359_v19, %v2028_v20  ;;  %v2331_v28 = vld [vmem:[%s2672_s29 + $0x4] sm:$0xf]  ;;  %v1915_v41 = vor.u32 %v2332_v23, %v1914_v18 }
  0x7c   : > { %1012 = vmatpush.bf16.msra.mxu1 %v2003_v60  ;;  %v1916_v29 = vld [vmem:[%s2672_s29 + $0x8] sm:$0xf0]  ;;  %v2365_v30 = vld [vmem:[%s2672_s29 + $0x114] sm:$0xf]  ;;  %v1866_v32 = vld [vmem:[%s3274_s3] sm:$0xf]  ;;  %v1979_v45 = vor.u32 %v2348_v25, %v1978_v24 }
  0x7d   : > { %1070 = vmatpush.bf16.msra.mxu3 %v1943_v63  ;;  %v2052_v33 = vld [vmem:[%s2672_s29 + $0x118] sm:$0xf0]  ;;  %v2357_v34 = vld [vmem:[%s2672_s29 + $0xd4] sm:$0xf]  ;;  %v2320_v36 = vld [vmem:[%s3274_s3 + $0x8] sm:$0xf0]  ;;  %v1919_v50 = vor.u32 %v2331_v28, %v1916_v29 }
  0x7e   : > { %v2020_v35 = vld [vmem:[%s2672_s29 + $0xd8] sm:$0xf0]  ;;  %v2170_v37 = vld [vmem:[%s2759_s19 + $0x70] sm:$0xf]  ;;  %v2298_v38 = vld [vmem:[%s2759_s19 + $0x74] sm:$0xf0]  ;;  %1096 = vmatpush.bf16.msrb.mxu2 %v2031_v26  ;;  %v2055_v47 = vor.u32 %v2365_v30, %v2052_v33  ;;  %v1867_v52 = vor.u32 %v2320_v36, %v1866_v32 }
  0x7f   : > { %984 = vmatpush.bf16.msra.mxu0 %v1931_v6  ;;  %v2023_v40 = vor.u32 %v2357_v34, %v2020_v35  ;;  %v2319_v42 = vld [vmem:[%s3274_s3 + $0x4] sm:$0xf]  ;;  %v2234_v43 = vld [vmem:[%s2759_s19 + $0xf0] sm:$0xf]  ;;  %v2314_v44 = vld [vmem:[%s2759_s19 + $0xf4] sm:$0xf0]  ;;  %v2171_v51 = vor.u32 %v2298_v38, %v2170_v37 }
  0x80   : > { %1013 = vmatpush.bf16.msra.mxu1 %v1995_v9  ;;  %v1868_v46 = vld [vmem:[%s3274_s3 + $0xc] sm:$0xf0]  ;;  %v2355_v48 = vld [vmem:[%s2672_s29 + $0xc4] sm:$0xf]  ;;  %v2012_v49 = vld [vmem:[%s2672_s29 + $0xc8] sm:$0xf0]  ;;  %v2235_v53 = vor.u32 %v2314_v44, %v2234_v43 }
  0x81   : > { %1071 = vmatpush.bf16.msra.mxu3 %v1935_v14  ;;  %v2162_v54 = vld [vmem:[%s2759_s19 + $0x60] sm:$0xf]  ;;  %v2296_v55 = vld [vmem:[%s2759_s19 + $0x64] sm:$0xf0]  ;;  %v2777_v56 = vor.u32 %v2319_v42, %v1868_v46  ;;  %v2015_v59 = vor.u32 %v2355_v48, %v2012_v49  ;;  %v2353_v60 = vld [vmem:[%s2672_s29 + $0xb4] sm:$0xf] }
  0x82   : > { %1097 = vmatpush.bf16.msrb.mxu2 %v2023_v40  ;;  %v2226_v57 = vld [vmem:[%s2759_s19 + $0xe0] sm:$0xf]  ;;  %v2312_v58 = vld [vmem:[%s2759_s19 + $0xe4] sm:$0xf0]  ;;  %v2004_v61 = vld [vmem:[%s2672_s29 + $0xb8] sm:$0xf0]  ;;  %v2163_v62 = vor.u32 %v2296_v55, %v2162_v54 }
  0x83   : > { %985 = vmatpush.bf16.msra.mxu0 %v1923_v22  ;;  %v2227_v63 = vor.u32 %v2312_v58, %v2226_v57  ;;  %v2154_v0 = vld [vmem:[%s2759_s19 + $0x50] sm:$0xf]  ;;  %v2294_v1 = vld [vmem:[%s2759_s19 + $0x54] sm:$0xf0]  ;;  %v2007_v4 = vor.u32 %v2353_v60, %v2004_v61  ;;  %v2327_v6 = vld [vmem:[%s3274_s3 + $0x40] sm:$0xf0] }
  0x84   : > { %2057 = vmatmul.msk.bf16.gmra.mxu2 %vm966_vm0, %v2741_v21  ;;  %1014 = vmatpush.bf16.msra.mxu1 %v1987_v27  ;;  %v2218_v2 = vld [vmem:[%s2759_s19 + $0xd0] sm:$0xf]  ;;  %v2310_v3 = vld [vmem:[%s2759_s19 + $0xd4] sm:$0xf0]  ;;  %v2363_v7 = vld [vmem:[%s2672_s29 + $0x104] sm:$0xf]  ;;  %v2155_v8 = vor.u32 %v2294_v1, %v2154_v0 }
  0x85   : > { %1072 = vmatpush.bf16.msra.mxu3 %v1927_v31  ;;  %v1898_v5 = vld [vmem:[%s3274_s3 + $0x38] sm:$0xf]  ;;  %v2351_v9 = vld [vmem:[%s2672_s29 + $0xa4] sm:$0xf]  ;;  %v1996_v10 = vld [vmem:[%s2672_s29 + $0xa8] sm:$0xf0]  ;;  %v2219_v12 = vor.u32 %v2310_v3, %v2218_v2 }
  0x86   : > { %1098 = vmatpush.bf16.msrb.mxu2 %v2015_v59  ;;  %v2044_v11 = vld [vmem:[%s2672_s29 + $0x108] sm:$0xf0]  ;;  %v2146_v13 = vld [vmem:[%s2759_s19 + $0x40] sm:$0xf]  ;;  %v2292_v14 = vld [vmem:[%s2759_s19 + $0x44] sm:$0xf0]  ;;  %v2800_v16 = vor.u32 %v2327_v6, %v1898_v5  ;;  %v1999_v19 = vor.u32 %v2351_v9, %v1996_v10 }
  0x87   : > { %986 = vmatpush.bf16.msra.mxu0 %v1915_v41  ;;  %v2047_v15 = vor.u32 %v2363_v7, %v2044_v11  ;;  %v2210_v17 = vld [vmem:[%s2759_s19 + $0xc0] sm:$0xf]  ;;  %v2308_v18 = vld [vmem:[%s2759_s19 + $0xc4] sm:$0xf0]  ;;  %v2147_v20 = vor.u32 %v2292_v14, %v2146_v13  ;;  %v2349_v22 = vld [vmem:[%s2672_s29 + $0x94] sm:$0xf] }
  0x88   : > { %1015 = vmatpush.bf16.msra.mxu1 %v1979_v45  ;;  %v1988_v23 = vld [vmem:[%s2672_s29 + $0x98] sm:$0xf0]  ;;  %v1878_v24 = vld [vmem:[%s3274_s3 + $0x18] sm:$0xf]  ;;  %v2211_v25 = vor.u32 %v2308_v18, %v2210_v17  ;;  %v2138_v26 = vld [vmem:[%s2759_s19 + $0x30] sm:$0xf] }
  0x89   : > { %1073 = vmatpush.bf16.msra.mxu3 %v1919_v50  ;;  %v2290_v27 = vld [vmem:[%s2759_s19 + $0x34] sm:$0xf0]  ;;  %v2323_v28 = vld [vmem:[%s3274_s3 + $0x20] sm:$0xf0]  ;;  %v2202_v29 = vld [vmem:[%s2759_s19 + $0xb0] sm:$0xf]  ;;  %v1991_v33 = vor.u32 %v2349_v22, %v1988_v23 }
  0x8a   : > { %987 = vmatmul.bf16.vlgmr.msra.gmra.mxu0 %v1867_v52  ;;  %1099 = vmatpush.bf16.msrb.mxu2 %v2007_v4  ;;  %v2306_v30 = vld [vmem:[%s2759_s19 + $0xb4] sm:$0xf0]  ;;  %v2322_v31 = vld [vmem:[%s3274_s3 + $0x1c] sm:$0xf]  ;;  %v1880_v32 = vld [vmem:[%s3274_s3 + $0x24] sm:$0xf0]  ;;  %v2139_v34 = vor.u32 %v2290_v27, %v2138_v26  ;;  %v1879_v37 = vor.u32 %v2323_v28, %v1878_v24 }
  0x8b   : > { %1130 = vmatpush.bf16.msrb.mxu0 %v2055_v47  ;;  %1016 = vmatmul.bf16.vlgmr.msra.gmra.mxu1 %v2777_v56  ;;  %v2347_v35 = vld [vmem:[%s2672_s29 + $0x84] sm:$0xf]  ;;  %v1980_v36 = vld [vmem:[%s2672_s29 + $0x88] sm:$0xf0]  ;;  %v2203_v38 = vor.u32 %v2306_v30, %v2202_v29  ;;  %v2130_v40 = vld [vmem:[%s2759_s19 + $0x20] sm:$0xf]  ;;  %v2828_v42 = vor.u32 %v2322_v31, %v1880_v32 }
  0x8c   : > { %1405 = vmatpush.bf16.msrb.mxu1 %v2171_v51  ;;  %1074 = vmatmul.bf16.vlgmr.msra.gmra.mxu3 %v1867_v52  ;;  %v2288_v41 = vld [vmem:[%s2759_s19 + $0x24] sm:$0xf0]  ;;  %v2194_v43 = vld [vmem:[%s2759_s19 + $0xa0] sm:$0xf]  ;;  %v1983_v45 = vor.u32 %v2347_v35, %v1980_v36  ;;  %v1910_v48 = vld [vmem:[%s3274_s3 + $0x50] sm:$0xf] }
  0x8d   : > { %1434 = vmatpush.bf16.msrb.mxu3 %v2235_v53  ;;  %v2304_v44 = vld [vmem:[%s2759_s19 + $0xa4] sm:$0xf0]  ;;  %v2131_v46 = vor.u32 %v2288_v41, %v2130_v40  ;;  %v2330_v49 = vld [vmem:[%s3274_s3 + $0x58] sm:$0xf0]  ;;  %v2186_v50 = vld [vmem:[%s2759_s19 + $0x90] sm:$0xf] }
  0x8e   : > { %1100 = vmatpush.bf16.msrb.mxu2 %v1999_v19  ;;  %v2195_v47 = vor.u32 %v2304_v44, %v2194_v43  ;;  %v2302_v51 = vld [vmem:[%s2759_s19 + $0x94] sm:$0xf0]  ;;  %v2122_v52 = vld [vmem:[%s2759_s19 + $0x10] sm:$0xf]  ;;  %v2843_v57 = vor.u32 %v2330_v49, %v1910_v48  ;;  %v2326_v59 = vld [vmem:[%s3274_s3 + $0x38] sm:$0xf0] }
  0x8f   : > { %1131 = vmatpush.bf16.msrb.mxu0 %v2047_v15  ;;  %v2286_v53 = vld [vmem:[%s2759_s19 + $0x14] sm:$0xf0]  ;;  %v2187_v54 = vor.u32 %v2302_v51, %v2186_v50  ;;  %v1890_v58 = vld [vmem:[%s3274_s3 + $0x30] sm:$0xf]  ;;  %v2178_v60 = vld [vmem:[%s2759_s19 + $0x80] sm:$0xf] }
  0x90   : > { %1406 = vmatpush.bf16.msrb.mxu1 %v2163_v62  ;;  %v2123_v55 = vor.u32 %v2286_v53, %v2122_v52  ;;  %v2300_v61 = vld [vmem:[%s2759_s19 + $0x84] sm:$0xf0]  ;;  %v2114_v62 = vld [vmem:[%s2759_s19] sm:$0xf]  ;;  %v1891_v4 = vor.u32 %v2326_v59, %v1890_v58  ;;  %v2250_v6 = vld [vmem:[%s2759_s19 + $0x110] sm:$0xf] }
  0x91   : > { %1435 = vmatpush.bf16.msrb.mxu3 %v2227_v63  ;;  %v2325_v63 = vld [vmem:[%s3274_s3 + $0x34] sm:$0xf]  ;;  %v1892_v0 = vld [vmem:[%s3274_s3 + $0x3c] sm:$0xf0]  ;;  %v2179_v1 = vor.u32 %v2300_v61, %v2178_v60  ;;  %v2284_v2 = vld [vmem:[%s2759_s19 + $0x4] sm:$0xf0] }
  0x92   : > { %1101 = vmatpush.bf16.msrb.mxu2 %v1991_v33  ;;  %v2115_v3 = vor.u32 %v2284_v2, %v2114_v62  ;;  %v2863_v5 = vor.u32 %v2325_v63, %v1892_v0  ;;  %v2318_v7 = vld [vmem:[%s2759_s19 + $0x114] sm:$0xf0]  ;;  %v2252_v10 = vld [vmem:[%s2759_s19 + $0x118] sm:$0xf0]  ;;  %v2297_v11 = vld [vmem:[%s2759_s19 + $0x74] sm:$0xf] }
  0x93   : > { %v2251_v9 = vor.u32 %v2318_v7, %v2250_v6  ;;  %v2313_v15 = vld [vmem:[%s2759_s19 + $0xf4] sm:$0xf]  ;;  %v2236_v17 = vld [vmem:[%s2759_s19 + $0xf8] sm:$0xf0]  ;;  %v1902_v19 = vld [vmem:[%s3274_s3 + $0x48] sm:$0xf] }
  0x94   : > { %1407 = vmatpush.bf16.msrb.mxu1 %v2155_v8  ;;  %2058 = vmatmul.msk.bf16.gmra.mxu2 %vm966_vm0, %v2800_v16  ;;  %v2317_v8 = vld [vmem:[%s2759_s19 + $0x114] sm:$0xf]  ;;  %v2239_v18 = vor.u32 %v2313_v15, %v2236_v17  ;;  %v2295_v22 = vld [vmem:[%s2759_s19 + $0x64] sm:$0xf]  ;;  %v2164_v23 = vld [vmem:[%s2759_s19 + $0x68] sm:$0xf0] }
  0x95   : > { %1436 = vmatpush.bf16.msrb.mxu3 %v2219_v12  ;;  %v2172_v12 = vld [vmem:[%s2759_s19 + $0x78] sm:$0xf0]  ;;  %v2255_v13 = vor.u32 %v2317_v8, %v2252_v10  ;;  %v2311_v24 = vld [vmem:[%s2759_s19 + $0xe4] sm:$0xf]  ;;  %v1904_v26 = vld [vmem:[%s3274_s3 + $0x54] sm:$0xf0]  ;;  %v2167_v27 = vor.u32 %v2295_v22, %v2164_v23 }
  0x96   : > { %1102 = vmatpush.bf16.msrb.mxu2 %v1983_v45  ;;  %v2175_v14 = vor.u32 %v2297_v11, %v2172_v12  ;;  %v2228_v28 = vld [vmem:[%s2759_s19 + $0xe8] sm:$0xf0]  ;;  %v2293_v31 = vld [vmem:[%s2759_s19 + $0x54] sm:$0xf]  ;;  %v2156_v32 = vld [vmem:[%s2759_s19 + $0x58] sm:$0xf0] }
  0x97   : > { %v2231_v29 = vor.u32 %v2311_v24, %v2228_v28  ;;  %v2309_v33 = vld [vmem:[%s2759_s19 + $0xd4] sm:$0xf]  ;;  %v2220_v35 = vld [vmem:[%s2759_s19 + $0xd8] sm:$0xf0]  ;;  %v2307_v40 = vld [vmem:[%s2759_s19 + $0xc4] sm:$0xf] }
  0x98   : > { %1408 = vmatpush.bf16.msrb.mxu1 %v2147_v20  ;;  %1492 = vmatpush.bf16.msra.mxu0 %v2175_v14  ;;  %v2329_v20 = vld [vmem:[%s3274_s3 + $0x50] sm:$0xf0]  ;;  %v2223_v36 = vor.u32 %v2309_v33, %v2220_v35  ;;  %v2066_v41 = vld [vmem:[%s3273_s2] sm:$0xf]  ;;  %v2272_v43 = vld [vmem:[%s3273_s2 + $0x8] sm:$0xf0] }
  0x99   : > { %1437 = vmatpush.bf16.msrb.mxu3 %v2211_v25  ;;  %v2328_v25 = vld [vmem:[%s3274_s3 + $0x4c] sm:$0xf]  ;;  %v1903_v30 = vor.u32 %v2329_v20, %v1902_v19  ;;  %v2915_v48 = vor.u32 %v2272_v43, %v2066_v41  ;;  %v2242_v50 = vld [vmem:[%s2759_s19 + $0x100] sm:$0xf]  ;;  %v2316_v51 = vld [vmem:[%s2759_s19 + $0x104] sm:$0xf0] }
  0x9a   : > { %992 = vmatmul.bf16.gmra.mxu0 %v1879_v37  ;;  %1469 = vmatpush.bf16.msra.mxu2 %v2251_v9  ;;  %v2212_v45 = vld [vmem:[%s2759_s19 + $0xc8] sm:$0xf0]  ;;  %v2315_v52 = vld [vmem:[%s2759_s19 + $0x104] sm:$0xf]  ;;  %v2243_v53 = vor.u32 %v2316_v51, %v2242_v50  ;;  %v2140_v58 = vld [vmem:[%s2759_s19 + $0x38] sm:$0xf0] }
  0x9b   : > { %1021 = vmatmul.bf16.gmra.mxu1 %v2828_v42  ;;  %v2305_v61 = vld [vmem:[%s2759_s19 + $0xb4] sm:$0xf]  ;;  %v2204_v62 = vld [vmem:[%s2759_s19 + $0xb8] sm:$0xf0]  ;;  %v2287_v63 = vld [vmem:[%s2759_s19 + $0x24] sm:$0xf] }
  0x9c   : > { %1409 = vmatpush.bf16.msrb.mxu1 %v2139_v34  ;;  %1079 = vmatmul.bf16.gmra.mxu3 %v1879_v37  ;;  %v2159_v34 = vor.u32 %v2293_v31, %v2156_v32  ;;  %v2291_v37 = vld [vmem:[%s2759_s19 + $0x44] sm:$0xf]  ;;  %v2132_v0 = vld [vmem:[%s2759_s19 + $0x28] sm:$0xf0]  ;;  %v2080_v6 = vld [vmem:[%s3273_s2 + $0x24] sm:$0xf0] }
  0x9d   : > { %1438 = vmatpush.bf16.msrb.mxu3 %v2203_v38  ;;  %1493 = vmatpush.bf16.msra.mxu0 %v2167_v27  ;;  %v2148_v38 = vld [vmem:[%s2759_s19 + $0x48] sm:$0xf0]  ;;  %v2275_v2 = vld [vmem:[%s3273_s2 + $0x20] sm:$0xf0]  ;;  %v2423_v10 = vmov 0   ;;  %v1581_v19 = vld [vmem:[%s3275_s4 + $0x10] sm:$0xff] }
  0x9e   : > { %v2151_v44 = vor.u32 %v2291_v37, %v2148_v38  ;;  %1470 = vmatpush.bf16.msra.mxu2 %v2243_v53  ;;  %v2196_v7 = vld [vmem:[%s2759_s19 + $0xa8] sm:$0xf0]  ;;  %v1579_v8 = vld [vmem:[%s3275_s4] sm:$0xff]  ;;  %2396 = vset.pattern.permute.xlu0 %v2423_v10  ;;  %v2124_v14 = vld [vmem:[%s2759_s19 + $0x18] sm:$0xf0] }
  0x9f   : > { %2397 = vset.pattern.permute.xlu1 %v2423_v10  ;;  %1589 = vperm.xlu0 %2396, %v1579_v8   ;;  %v2301_v17 = vld [vmem:[%s2759_s19 + $0x94] sm:$0xf]  ;;  %v2283_v22 = vld [vmem:[%s2759_s19 + $0x4] sm:$0xf]  ;;  %v2116_v23 = vld [vmem:[%s2759_s19 + $0x8] sm:$0xf0] }
  0xa0   : > { %1410 = vmatpush.bf16.msrb.mxu1 %v2131_v46  ;;  %v2068_v46 = vld [vmem:[%s3273_s2 + $0xc] sm:$0xf0]  ;;  %2398 = vset.pattern.permute.xlu2 %v2423_v10  ;;  %v2277_v27 = vld [vmem:[%s3273_s2 + $0x34] sm:$0xf]  ;;  %v2092_v28 = vld [vmem:[%s3273_s2 + $0x3c] sm:$0xf0] }
  0xa1   : > { %1439 = vmatpush.bf16.msrb.mxu3 %v2195_v47  ;;  %1494 = vmatpush.bf16.msra.mxu0 %v2159_v34  ;;  %v2215_v47 = vor.u32 %v2307_v40, %v2212_v45  ;;  %v2090_v24 = vld [vmem:[%s3273_s2 + $0x30] sm:$0xf]  ;;  %v2994_v34 = vor.u32 %v2277_v27, %v2092_v28  ;;  %v2074_v35 = vld [vmem:[%s3273_s2 + $0x8] sm:$0xf]  ;;  %v1583_v38 = vld [vmem:[%s3275_s4 + $0x20] sm:$0xff] }
  0xa2   : > { %1599 = vperm.xlu1 %2397, %v1581_v19   ;;  %v1585_v33 = vld [vmem:[%s3275_s4 + $0x30] sm:$0xff]  ;;  %v1644_v40 = vld [vmem:[%s3276_s5 + $0x8] sm:$0xff]  ;;  %1609 = vperm.xlu2 %2398, %v1583_v38   ;;  %v2104_v45 = vld [vmem:[%s3273_s2 + $0x54] sm:$0xf0] }
  0xa3   : > { %v2102_v41 = vld [vmem:[%s3273_s2 + $0x48] sm:$0xf]  ;;  %v2281_v43 = vld [vmem:[%s3273_s2 + $0x50] sm:$0xf0]  ;;  %v2276_v53 = vld [vmem:[%s3273_s2 + $0x28] sm:$0xf0] }
  0xa4   : > { %1411 = vmatpush.bf16.msrb.mxu1 %v2123_v55  ;;  %2059 = vmatmul.msk.bf16.gmra.mxu2 %vm966_vm0, %v2843_v57  ;;  %v2289_v55 = vld [vmem:[%s2759_s19 + $0x34] sm:$0xf]  ;;  %v2282_v19 = vld [vmem:[%s3273_s2 + $0x58] sm:$0xf0] }
  0xa5   : > { %1440 = vmatpush.bf16.msrb.mxu3 %v2187_v54  ;;  %1495 = vmatpush.bf16.msra.mxu0 %v2151_v44  ;;  %v2244_v54 = vld [vmem:[%s2759_s19 + $0x108] sm:$0xf0]  ;;  %v2143_v60 = vor.u32 %v2289_v55, %v2140_v58  ;;  %v1645_v50 = vld [vmem:[%s3276_s5 + $0x10] sm:$0xff]  ;;  %v1643_v58 = vld [vmem:[%s3276_s5] sm:$0xff] }
  0xa6   : > { %v2247_v59 = vor.u32 %v2315_v52, %v2244_v54  ;;  %v2280_v44 = vld [vmem:[%s3273_s2 + $0x4c] sm:$0xf]  ;;  %v2086_v52 = vld [vmem:[%s3273_s2 + $0x20] sm:$0xf] }
  0xa7   : > { %v3036_v51 = vor.u32 %v2280_v44, %v2104_v45  ;;  %v2087_v55 = vor.u32 %v2276_v53, %v2086_v52 }
  0xa8   : > { %1412 = vmatpush.bf16.msrb.mxu1 %v2115_v3  ;;  %v2135_v3 = vor.u32 %v2287_v63, %v2132_v0  ;;  %v2098_v63 = vld [vmem:[%s3273_s2 + $0x38] sm:$0xf]  ;;  %v2279_v0 = vld [vmem:[%s3273_s2 + $0x40] sm:$0xf0] }
  0xa9   : > { %1441 = vmatpush.bf16.msrb.mxu3 %v2179_v1  ;;  %1496 = vmatpush.bf16.msra.mxu0 %v2143_v60  ;;  %v2078_v1 = vld [vmem:[%s3273_s2 + $0x18] sm:$0xf]  ;;  %v1647_v60 = vld [vmem:[%s3276_s5 + $0x20] sm:$0xff] }
  0xaa   : > { %997 = vmatmul.bf16.gmra.mxu0 %v1891_v4  ;;  %v2951_v9 = vor.u32 %v2275_v2, %v2078_v1 }
  0xab   : > { %1026 = vmatmul.bf16.gmra.mxu1 %v2863_v5 }
  0xac   : > { %1084 = vmatmul.bf16.gmra.mxu3 %v1891_v4  ;;  %1521 = vmatpush.bf16.msra.mxu1 %v2239_v18  ;;  %v2274_v4 = vld [vmem:[%s3273_s2 + $0x1c] sm:$0xf] }
  0xad   : > { %1556 = vmatpush.bf16.msra.mxu3 %v2255_v13  ;;  %1497 = vmatpush.bf16.msra.mxu0 %v2135_v3  ;;  %v2953_v12 = vor.u32 %v2274_v4, %v2080_v6  ;;  %v2285_v13 = vld [vmem:[%s2759_s19 + $0x14] sm:$0xf]  ;;  %v2188_v18 = vld [vmem:[%s2759_s19 + $0x98] sm:$0xf0]  ;;  %v2099_v4 = vor.u32 %v2279_v0, %v2098_v63 }
  0xae   : > { %v2127_v15 = vor.u32 %v2285_v13, %v2124_v14  ;;  %v2191_v20 = vor.u32 %v2301_v17, %v2188_v18  ;;  %v1646_v13 = vld [vmem:[%s3276_s5 + $0x18] sm:$0xff]  ;;  %v2110_v18 = vld [vmem:[%s3273_s2 + $0x50] sm:$0xf] }
  0xb0   : > { %1522 = vmatpush.bf16.msra.mxu1 %v2231_v29  ;;  %v2299_v29 = vld [vmem:[%s2759_s19 + $0x84] sm:$0xf] }
  0xb1   : > { %1557 = vmatpush.bf16.msra.mxu3 %v2247_v59  ;;  %1498 = vmatpush.bf16.msra.mxu0 %v2127_v15 }
  0xb4   : > { %1103 = vmatmul.bf16.vlgmr.msrb.gmra.mxu2 %v2777_v56  ;;  %v2891_v56 = vor.u32 %v2328_v25, %v1904_v26  ;;  %1523 = vmatpush.bf16.msra.mxu1 %v2223_v36  ;;  %v2278_v25 = vld [vmem:[%s3273_s2 + $0x38] sm:$0xf0]  ;;  %v2119_v26 = vor.u32 %v2283_v22, %v2116_v23  ;;  %v2273_v36 = vld [vmem:[%s3273_s2 + $0x10] sm:$0xf0]  ;;  %v2111_v23 = vor.u32 %v2282_v19, %v2110_v18 }
  0xb5   : > { %v2989_v31 = vor.u32 %v2278_v25, %v2090_v24  ;;  %v2075_v37 = vor.u32 %v2273_v36, %v2074_v35  ;;  %v1649_v36 = vld [vmem:[%s3276_s5 + $0x30] sm:$0xff] }
  0xb6   : > { %1499 = vmatpush.bf16.msra.mxu0 %v2119_v26 }
  0xb8   : > { %1524 = vmatpush.bf16.msra.mxu1 %v2215_v47  ;;  %v1584_v47 = vld [vmem:[%s3275_s4 + $0x28] sm:$0xff] }
  0xb9   : > { %1614 = vperm.xlu2 %2398, %v1584_v47  }
  0xba   : > { %1002 = vmatmul.bf16.gmra.mxu0 %v1903_v30 }
  0xbb   : > { %1031 = vmatmul.bf16.gmra.mxu1 %v2891_v56 }
  0xbc   : > { %1089 = vmatmul.bf16.gmra.mxu3 %v1903_v30  ;;  %v2180_v30 = vld [vmem:[%s2759_s19 + $0x88] sm:$0xf0] }
  0xbd   : > { %v2183_v32 = vor.u32 %v2299_v29, %v2180_v30 }
  0xc1   : > { %1653 = vperm.xlu2 %2398, %v1643_v58  }
  0xc4   : > { %1108 = vmatmul.bf16.gmra.mxu2 %v2828_v42  ;;  %v2271_v42 = vld [vmem:[%s3273_s2 + $0x4] sm:$0xf] }
  0xc5   : > { %v2917_v49 = vor.u32 %v2271_v42, %v2068_v46  ;;  %v3028_v46 = vor.u32 %v2281_v43, %v2102_v41 }
  0xc9   : > { %1668 = vperm.xlu2 %2398, %v1646_v13  }
  0xca   : > { %2060 = vmatmul.msk.bf16.vlgmr.msrb.gmra.mxu0 %vm966_vm0, %v2701_v39  ;;  %v2207_v39 = vor.u32 %v2305_v61, %v2204_v62 }
  0xcb   : > { %1413 = vmatmul.bf16.vlgmr.msrb.gmra.mxu1 %v2915_v48 }
  0xcc   : > { %1442 = vmatmul.bf16.vlgmr.msrb.gmra.mxu3 %v2917_v49  ;;  %1525 = vmatpush.bf16.msra.mxu1 %v2207_v39 }
  0xd1   : > { %1683 = vperm.xlu2 %2398, %v1649_v36  }
  0xd4   : > { %1113 = vmatmul.bf16.gmra.mxu2 %v2863_v5  ;;  %v2303_v5 = vld [vmem:[%s2759_s19 + $0xa4] sm:$0xf] }
  0xd5   : > { %v2199_v11 = vor.u32 %v2303_v5, %v2196_v7 }
  0xd7   : > { %1526 = vmatpush.bf16.msra.mxu1 %v2199_v11 }
  0xda   : > { %2061 = vmatmul.msk.bf16.gmra.mxu0 %vm966_vm0, %v2741_v21  ;;  %v1580_v21 = vld [vmem:[%s3275_s4 + $0x8] sm:$0xff] }
  0xdb   : > { %1418 = vmatmul.bf16.gmra.mxu1 %v2951_v9  ;;  %1594 = vperm.xlu0 %2396, %v1580_v21  }
  0xdc   : > { %1447 = vmatmul.bf16.gmra.mxu3 %v2953_v12  ;;  %1527 = vmatpush.bf16.msra.mxu1 %v2191_v20 }
  0xe0   : > { %1528 = vmatpush.bf16.msra.mxu1 %v2183_v32 }
  0xe3   : > { %1619 = vperm.xlu0 %2396, %v1585_v33  }
  0xe4   : > { %1118 = vmatmul.bf16.gmra.mxu2 %v2891_v56  ;;  %v1582_v56 = vld [vmem:[%s3275_s4 + $0x18] sm:$0xff] }
  0xe5   : > { %1604 = vperm.xlu1 %2397, %v1582_v56  }
  0xea   : > { %2062 = vmatmul.msk.bf16.gmra.mxu0 %vm966_vm0, %v2800_v16  ;;  %v1586_v16 = vld [vmem:[%s3275_s4 + $0x38] sm:$0xff] }
  0xeb   : > { %1423 = vmatmul.bf16.gmra.mxu1 %v2989_v31  ;;  %1658 = vperm.xlu0 %2396, %v1644_v40  }
  0xec   : > { %1452 = vmatmul.bf16.gmra.mxu3 %v2994_v34 }
  0xed   : > { %1624 = vperm.xlu1 %2397, %v1586_v16  }
  0xf3   : > { %1673 = vperm.xlu0 %2396, %v1647_v60  }
  0xf4   : > { %2256 = vmatmul.msk.bf16.vlgmr.msra.gmra.mxu2 %vm966_vm0, %v2075_v37 }
  0xf5   : > { %1663 = vperm.xlu1 %2397, %v1645_v50  }
  0xf7   : > { %v1046_v42 = vpop.f32.mrf.mxu2 }
  0xfa   : > { %2063 = vmatmul.msk.bf16.gmra.mxu0 %vm966_vm0, %v2843_v57 }
  0xfb   : > { %1428 = vmatmul.bf16.gmra.mxu1 %v3028_v46 }
  0xfc   : > { %1457 = vmatmul.bf16.gmra.mxu3 %v3036_v51 }
  0xff   : > { %v1048_v54 = vpop.f32.mrf.mxu2 }
 0x104   : > { %2257 = vmatmul.msk.bf16.gmra.mxu2 %vm966_vm0, %v2087_v55 }
 0x107   : > { %v1051_v57 = vpop.f32.mrf.mxu2  ;;  %v988_v59 = vpop.f32.mrf.mxu0 }
 0x108   : > { %v1017_v61 = vpop.f32.mrf.mxu1 }
 0x109   : > { %v1018_v62 = vadd.f32 %v1017_v61, %v988_v59 }
 0x10a   : > { %1500 = vmatmul.bf16.vlgmr.msra.gmra.mxu0 %v2915_v48  ;;  %v1648_v48 = vld [vmem:[%s3276_s5 + $0x28] sm:$0xff] }
 0x10b   : > { %1529 = vmatmul.bf16.vlgmr.msra.gmra.mxu1 %v2917_v49  ;;  %v3057_v39 = vadd.f32 %v1046_v42, %v1018_v62  ;;  %v1650_v49 = vld [vmem:[%s3276_s5 + $0x38] sm:$0xff]  ;;  %1678 = vperm.xlu1 %2397, %v1648_v48  }
 0x10c   : > { %2260 = vmatmul.msk.bf16.vlgmr.msra.gmra.mxu3 %vm966_vm0, %v2075_v37  ;;  %1688 = vperm.xlu0 %2396, %v1650_v49  }
 0x10f   : > { %v1053_v1 = vpop.f32.mrf.mxu2  ;;  %v1075_v2 = vpop.f32.mrf.mxu3 }
 0x110   : > { %v990_v3 = vpop.f32.mrf.mxu0  ;;  %v1019_v6 = vpop.f32.mrf.mxu1 }
 0x111   : > { %v1020_v5 = vadd.f32 %v1019_v6, %v990_v3 }
 0x113   : > { %v3073_v7 = vadd.f32 %v1048_v54, %v1020_v5 }
 0x114   : > { %2258 = vmatmul.msk.bf16.gmra.mxu2 %vm966_vm0, %v2099_v4 }
 0x117   : > { %v1056_v8 = vpop.f32.mrf.mxu2  ;;  %v1077_v10 = vpop.f32.mrf.mxu3 }
 0x118   : > { %v993_v11 = vpop.f32.mrf.mxu0  ;;  %v1022_v14 = vpop.f32.mrf.mxu1 }
 0x119   : > { %v1023_v15 = vadd.f32 %v1022_v14, %v993_v11  ;;  %v3131_v11 = vpop.permute.xlu2 %1609 }
 0x11a   : > { %1505 = vmatmul.bf16.gmra.mxu0 %v2951_v9 }
 0x11b   : > { %1534 = vmatmul.bf16.gmra.mxu1 %v2953_v12  ;;  %v3080_v17 = vadd.f32 %v1051_v57, %v1023_v15 }
 0x11c   : > { %2261 = vmatmul.msk.bf16.gmra.mxu3 %vm966_vm0, %v2087_v55 }
 0x11f   : > { %v1058_v20 = vpop.f32.mrf.mxu2  ;;  %v1080_v21 = vpop.f32.mrf.mxu3 }
 0x120   : > { %v995_v22 = vpop.f32.mrf.mxu0  ;;  %v1024_v24 = vpop.f32.mrf.mxu1 }
 0x121   : > { %v1025_v9 = vadd.f32 %v1024_v24, %v995_v22 }
 0x123   : > { %v3090_v12 = vadd.f32 %v1053_v1, %v1025_v9 }
 0x124   : > { %2259 = vmatmul.msk.bf16.gmra.mxu2 %vm966_vm0, %v2111_v23 }
 0x127   : > { %v1061_v25 = vpop.f32.mrf.mxu2  ;;  %v1082_v26 = vpop.f32.mrf.mxu3 }
 0x128   : > { %v998_v27 = vpop.f32.mrf.mxu0  ;;  %v1027_v28 = vpop.f32.mrf.mxu1 }
 0x129   : > { %v1028_v29 = vadd.f32 %v1027_v28, %v998_v27 }
 0x12a   : > { %1510 = vmatmul.bf16.gmra.mxu0 %v2989_v31 }
 0x12b   : > { %1539 = vmatmul.bf16.gmra.mxu1 %v2994_v34  ;;  %v3094_v30 = vadd.f32 %v1056_v8, %v1028_v29 }
 0x12c   : > { %2262 = vmatmul.msk.bf16.gmra.mxu3 %vm966_vm0, %v2099_v4 }
 0x12f   : > { %v1063_v56 = vpop.f32.mrf.mxu2  ;;  %v1085_v32 = vpop.f32.mrf.mxu3 }
 0x130   : > { %v1000_v33 = vpop.f32.mrf.mxu0  ;;  %v1029_v35 = vpop.f32.mrf.mxu1 }
 0x131   : > { %v1030_v37 = vadd.f32 %v1029_v35, %v1000_v33 }
 0x133   : > { %v3100_v38 = vadd.f32 %v1058_v20, %v1030_v37  ;;  %v3139_v20 = vpop.permute.xlu1 %1599 }
 0x137   : > { %v1104_v16 = vpop.f32.mrf.mxu2  ;;  %v1087_v31 = vpop.f32.mrf.mxu3 }
 0x138   : > { %v3102_v40 = vadd.f32 %v1104_v16, %v1075_v2  ;;  %v1003_v34 = vpop.f32.mrf.mxu0  ;;  %v1032_v41 = vpop.f32.mrf.mxu1 }
 0x139   : > { %v1033_v43 = vadd.f32 %v1032_v41, %v1003_v34 }
 0x13a   : > { %1515 = vmatmul.bf16.gmra.mxu0 %v3028_v46 }
 0x13b   : > { %1544 = vmatmul.bf16.gmra.mxu1 %v3036_v51  ;;  %v3106_v44 = vadd.f32 %v1061_v25, %v1033_v43 }
 0x13c   : > { %2263 = vmatmul.msk.bf16.gmra.mxu3 %vm966_vm0, %v2111_v23  ;;  %v3143_v23 = vpop.permute.xlu2 %1614 }
 0x13f   : > { %v1106_v45 = vpop.f32.mrf.mxu2  ;;  %v1090_v42 = vpop.f32.mrf.mxu3 }
 0x140   : > { %v3109_v47 = vadd.f32 %v1106_v45, %v1077_v10  ;;  %v1005_v50 = vpop.f32.mrf.mxu0  ;;  %v1034_v52 = vpop.f32.mrf.mxu1 }
 0x141   : > { %v1035_v53 = vadd.f32 %v1034_v52, %v1005_v50  ;;  %v3129_v10 = vpop.permute.xlu0 %1589 }
 0x143   : > { %v3111_v54 = vadd.f32 %v1063_v56, %v1035_v53 }
 0x144   : > { %v1654_v16 = vpop.permute.xlu2 %1653 }
 0x147   : > { %v1109_v55 = vpop.f32.mrf.mxu2  ;;  %v1092_v58 = vpop.f32.mrf.mxu3 }
 0x148   : > { %v3113_v57 = vadd.f32 %v1109_v55, %v1080_v21  ;;  %v3115_v46 = vpop.f32.mrf.mxu0  ;;  %v1414_v51 = vpop.f32.mrf.mxu1 }
 0x149   : > { %v1415_v27 = vadd.f32 %v1414_v51, %v3057_v39 }
 0x14d   : > { %v3141_v21 = vpop.permute.xlu0 %1594 }
 0x14f   : > { %v1111_v59 = vpop.f32.mrf.mxu2  ;;  %v1443_v61 = vpop.f32.mrf.mxu3 }
 0x150   : > { %v3117_v60 = vadd.f32 %v1111_v59, %v1082_v26  ;;  %v3119_v62 = vpop.f32.mrf.mxu0  ;;  %v1416_v63 = vpop.f32.mrf.mxu1  ;;  %v1444_v29 = vadd.f32 %v1443_v61, %v1415_v27 }
 0x151   : > { %v1417_v39 = vadd.f32 %v1416_v63, %v3073_v7 }
 0x157   : > { %v1114_v0 = vpop.f32.mrf.mxu2  ;;  %v1445_v2 = vpop.f32.mrf.mxu3 }
 0x158   : > { %v3121_v1 = vadd.f32 %v1114_v0, %v1085_v32  ;;  %v3123_v3 = vpop.f32.mrf.mxu0  ;;  %v1419_v4 = vpop.f32.mrf.mxu1  ;;  %v1446_v41 = vadd.f32 %v1445_v2, %v1417_v39 }
 0x159   : > { %v3152_v28 = vpop.permute.xlu1 %1604  ;;  %v3154_v32 = vpop.permute.xlu0 %1619 }
 0x15f   : > { %v1116_v48 = vpop.f32.mrf.mxu2  ;;  %v1448_v6 = vpop.f32.mrf.mxu3 }
 0x160   : > { %v3125_v49 = vadd.f32 %v1116_v48, %v1087_v31  ;;  %v3127_v5 = vpop.f32.mrf.mxu0  ;;  %v1421_v8 = vpop.f32.mrf.mxu1  ;;  %v1134_v48 = vadd.f32 %v3115_v46, %v3102_v40  ;;  %v1136_v40 = vadd.f32 %v3119_v62, %v3109_v47 }
 0x161   : > { %v3169_v45 = vpop.permute.xlu1 %1624  ;;  %v1659_v55 = vpop.permute.xlu0 %1658 }
 0x167   : > { %v1119_v13 = vpop.f32.mrf.mxu2  ;;  %v1450_v15 = vpop.f32.mrf.mxu3 }
 0x168   : > { %v3133_v14 = vadd.f32 %v1119_v13, %v1090_v42  ;;  %v3135_v18 = vpop.f32.mrf.mxu0  ;;  %v3137_v19 = vpop.f32.mrf.mxu1 }
 0x16f   : > { %v1121_v22 = vpop.f32.mrf.mxu2  ;;  %v1453_v9 = vpop.f32.mrf.mxu3 }
 0x170   : > { %v3145_v24 = vadd.f32 %v1121_v22, %v1092_v58  ;;  %v3147_v25 = vpop.f32.mrf.mxu0  ;;  %v3149_v26 = vpop.f32.mrf.mxu1  ;;  %v1420_v58 = vadd.f32 %v1419_v4, %v3080_v17 }
 0x171   : > { %v1664_v22 = vpop.permute.xlu1 %1663 }
 0x172   : > { %v1449_v59 = vadd.f32 %v1448_v6, %v1420_v58 }
 0x177   : > { %v1472_v56 = vpop.f32.mrf.mxu2  ;;  %v3156_v33 = vpop.f32.mrf.mxu3 }
 0x178   : > { %v1473_v35 = vadd.f32 %v1472_v56, %v1444_v29  ;;  %v3158_v36 = vpop.f32.mrf.mxu0  ;;  %v3162_v37 = vpop.f32.mrf.mxu1  ;;  %v1422_v56 = vadd.f32 %v1421_v8, %v3090_v12 }
 0x17a   : > { %v1627_v31 = vmul.f32 %v3129_v10, %v1473_v35  ;;  %v1451_v4 = vadd.f32 %v1450_v15, %v1422_v56  ;;  %v1425_v15 = vadd.f32 %v3137_v19, %v3094_v30 }
 0x17c   : > { %v1691_v34 = vadd.f32 %v1654_v16, %v1627_v31 }
 0x17e   : > { %1707 = vst [vmem:[%s3166_s14] sm:$0xff] %v1691_v34 }
 0x17f   : > { %v1474_v43 = vpop.f32.mrf.mxu2  ;;  %v3171_v42 = vpop.f32.mrf.mxu3 }
 0x180   : > { %v1475_v50 = vadd.f32 %v1474_v43, %v1446_v41  ;;  %v3173_v52 = vpop.f32.mrf.mxu0  ;;  %v3175_v53 = vpop.f32.mrf.mxu1 }
 0x181   : > { %v1669_v43 = vpop.permute.xlu2 %1668 }
 0x182   : > { %v1629_v7 = vmul.f32 %v3141_v21, %v1475_v50 }
 0x184   : > { %v1693_v51 = vadd.f32 %v1659_v55, %v1629_v7 }
 0x186   : > { %1709 = vst [vmem:[%s3166_s14 + $0x10] sm:$0xff] %v1693_v51  ;;  %v1454_v51 = vadd.f32 %v1453_v9, %v1425_v15 }
 0x187   : > { %v1477_v61 = vpop.f32.mrf.mxu2  ;;  %v3180_v63 = vpop.f32.mrf.mxu3 }
 0x188   : > { %v1478_v0 = vadd.f32 %v1477_v61, %v1449_v59  ;;  %v1501_v2 = vpop.f32.mrf.mxu0  ;;  %v1530_v13 = vpop.f32.mrf.mxu1 }
 0x189   : > { %v1502_v29 = vadd.f32 %v1501_v2, %v1134_v48  ;;  %v1139_v2 = vadd.f32 %v3123_v3, %v3113_v57 }
 0x18a   : > { %v1631_v27 = vmul.f32 %v3139_v20, %v1478_v0 }
 0x18b   : > { %v1531_v6 = vadd.f32 %v1530_v13, %v1502_v29  ;;  %v1674_v13 = vpop.permute.xlu0 %1673 }
 0x18c   : > { %v1695_v17 = vadd.f32 %v1664_v22, %v1631_v27 }
 0x18e   : > { %1711 = vst [vmem:[%s3166_s14 + $0x20] sm:$0xff] %v1695_v17 }
 0x18f   : > { %v1479_v35 = vpop.f32.mrf.mxu2  ;;  %v1559_v39 = vpop.f32.mrf.mxu3 }
 0x190   : > { %v1480_v31 = vadd.f32 %v1479_v35, %v1451_v4  ;;  %v1503_v34 = vpop.f32.mrf.mxu0  ;;  %v1560_v46 = vadd.f32 %v1559_v39, %v1531_v6  ;;  %v1532_v41 = vpop.f32.mrf.mxu1 }
 0x191   : > { %v1504_v8 = vadd.f32 %v1503_v34, %v1136_v40  ;;  %v1679_v39 = vpop.permute.xlu1 %1678 }
 0x192   : > { %v1633_v50 = vmul.f32 %v3152_v28, %v1480_v31  ;;  %v1628_v12 = vmul.f32 %v3129_v10, %v1560_v46 }
 0x193   : > { %v1533_v59 = vadd.f32 %v1532_v41, %v1504_v8 }
 0x194   : > { %v1697_v7 = vadd.f32 %v1669_v43, %v1633_v50  ;;  %v1692_v58 = vadd.f32 %v1654_v16, %v1628_v12  ;;  %v1427_v16 = vadd.f32 %v3149_v26, %v3100_v38 }
 0x196   : > { %1713 = vst [vmem:[%s3166_s14 + $0x30] sm:$0xff] %v1697_v7  ;;  %v1456_v56 = vadd.f32 %v3156_v33, %v1427_v16  ;;  %v1684_v7 = vpop.permute.xlu2 %1683  ;;  %v1149_v16 = vadd.f32 %v3158_v36, %v3133_v14 }
 0x197   : > { %1708 = vst [vmem:[%s3166_s14 + $0x8] sm:$0xff] %v1692_v58  ;;  %v1482_v61 = vpop.f32.mrf.mxu2  ;;  %v1561_v62 = vpop.f32.mrf.mxu3 }
 0x198   : > { %v1483_v47 = vadd.f32 %v1482_v61, %v1454_v51  ;;  %v1506_v0 = vpop.f32.mrf.mxu0  ;;  %v1562_v10 = vadd.f32 %v1561_v62, %v1533_v59  ;;  %v1535_v48 = vpop.f32.mrf.mxu1 }
 0x199   : > { %v1507_v9 = vadd.f32 %v1506_v0, %v1139_v2 }
 0x19a   : > { %v1635_v30 = vmul.f32 %v3131_v11, %v1483_v47  ;;  %v1630_v19 = vmul.f32 %v3141_v21, %v1562_v10  ;;  %v1141_v21 = vadd.f32 %v3127_v5, %v3117_v60 }
 0x19b   : > { %v1536_v17 = vadd.f32 %v1535_v48, %v1507_v9 }
 0x19c   : > { %v1699_v27 = vadd.f32 %v1674_v13, %v1635_v30  ;;  %v1694_v29 = vadd.f32 %v1659_v55, %v1630_v19  ;;  %v1430_v55 = vadd.f32 %v3162_v37, %v3106_v44 }
 0x19e   : > { %1715 = vst [vmem:[%s3166_s14 + $0x40] sm:$0xff] %v1699_v27  ;;  %v1459_v46 = vadd.f32 %v3171_v42, %v1430_v55 }
 0x19f   : > { %1710 = vst [vmem:[%s3166_s14 + $0x18] sm:$0xff] %v1694_v29  ;;  %v1484_v57 = vpop.f32.mrf.mxu2  ;;  %v1564_v4 = vpop.f32.mrf.mxu3 }
 0x1a0   : > { %v1485_v3 = vadd.f32 %v1484_v57, %v1456_v56  ;;  %v1508_v6 = vpop.f32.mrf.mxu0  ;;  %v1565_v35 = vadd.f32 %v1564_v4, %v1536_v17  ;;  %v1537_v31 = vpop.f32.mrf.mxu1  ;;  %v1151_v57 = vadd.f32 %v3173_v52, %v3145_v24  ;;  %v1745_v24 = vld [vmem:[%s3166_s14] sm:$0xff] (%p2493_p5) }
 0x1a1   : > { %v1509_v33 = vadd.f32 %v1508_v6, %v1141_v21  ;;  %1746 = vst [vmem:[%s1732_s30] sm:$0xff] (%p2493_p5), %v1745_v24 }
 0x1a2   : > { %v1637_v38 = vmul.f32 %v3143_v23, %v1485_v3  ;;  %v1632_v26 = vmul.f32 %v3139_v20, %v1565_v35  ;;  %v1144_v20 = vadd.f32 %v3135_v18, %v3121_v1 }
 0x1a3   : > { %v1538_v41 = vadd.f32 %v1537_v31, %v1509_v33  ;;  %v1757_v33 = vld [vmem:[%s3166_s14 + $0x30] sm:$0xff] (%p2493_p5) }
 0x1a4   : > { %v1701_v34 = vadd.f32 %v1679_v39, %v1637_v38  ;;  %v1696_v40 = vadd.f32 %v1664_v22, %v1632_v26  ;;  %v1432_v22 = vadd.f32 %v3175_v53, %v3111_v54  ;;  %v1689_v53 = vpop.permute.xlu0 %1688  ;;  %v1753_v38 = vld [vmem:[%s3166_s14 + $0x20] sm:$0xff] (%p2493_p5)  ;;  %1758 = vst [vmem:[%s1732_s30 + $0x60] sm:$0xff] (%p2493_p5), %v1757_v33 }
 0x1a5   : > { %1754 = vst [vmem:[%s1732_s30 + $0x40] sm:$0xff] (%p2493_p5), %v1753_v38 }
 0x1a6   : > { %1717 = vst [vmem:[%s3166_s14 + $0x50] sm:$0xff] %v1701_v34  ;;  %v1461_v59 = vadd.f32 %v3180_v63, %v1432_v22  ;;  %v1751_v52 = vld [vmem:[%s3166_s14 + $0x18] sm:$0xff] (%p2493_p5)  ;;  %v1761_v34 = vld [vmem:[%s3166_s14 + $0x40] sm:$0xff] (%p2493_p5) }
 0x1a7   : > { %1712 = vst [vmem:[%s3166_s14 + $0x28] sm:$0xff] %v1696_v40  ;;  %v1487_v60 = vpop.f32.mrf.mxu2  ;;  %v1566_v50 = vpop.f32.mrf.mxu3 }
 0x1a8   : > { %v1488_v5 = vadd.f32 %v1487_v60, %v1459_v46  ;;  %v1511_v12 = vpop.f32.mrf.mxu0  ;;  %v1567_v8 = vadd.f32 %v1566_v50, %v1538_v41  ;;  %v1540_v15 = vpop.f32.mrf.mxu1  ;;  %1752 = vst [vmem:[%s1732_s30 + $0x28] sm:$0xff] (%p2493_p5), %v1751_v52 }
 0x1a9   : > { %v1512_v42 = vadd.f32 %v1511_v12, %v1144_v20  ;;  %1762 = vst [vmem:[%s1732_s30 + $0x80] sm:$0xff] (%p2493_p5), %v1761_v34 }
 0x1aa   : > { %v1639_v44 = vmul.f32 %v3154_v32, %v1488_v5  ;;  %v1634_v37 = vmul.f32 %v3152_v28, %v1567_v8  ;;  %v1146_v28 = vadd.f32 %v3147_v25, %v3125_v49 }
 0x1ab   : > { %v1541_v1 = vadd.f32 %v1540_v15, %v1512_v42 }
 0x1ac   : > { %v1703_v58 = vadd.f32 %v1684_v7, %v1639_v44  ;;  %v1698_v51 = vadd.f32 %v1669_v43, %v1634_v37 }
 0x1ad   : > { %v1765_v46 = vld [vmem:[%s3166_s14 + $0x50] sm:$0xff] (%p2493_p5) }
 0x1ae   : > { %1719 = vst [vmem:[%s3166_s14 + $0x60] sm:$0xff] %v1703_v58  ;;  %v1755_v26 = vld [vmem:[%s3166_s14 + $0x28] sm:$0xff] (%p2493_p5) }
 0x1af   : > { %1714 = vst [vmem:[%s3166_s14 + $0x38] sm:$0xff] %v1698_v51  ;;  %v1489_v18 = vpop.f32.mrf.mxu2  ;;  %v1569_v47 = vpop.f32.mrf.mxu3 }
 0x1b0   : > { %v1490_v61 = vadd.f32 %v1489_v18, %v1461_v59  ;;  %v1513_v62 = vpop.f32.mrf.mxu0  ;;  %v1570_v0 = vadd.f32 %v1569_v47, %v1541_v1  ;;  %v1542_v54 = vpop.f32.mrf.mxu1  ;;  %1756 = vst [vmem:[%s1732_s30 + $0x48] sm:$0xff] (%p2493_p5), %v1755_v26 }
 0x1b1   : > { %v1514_v43 = vadd.f32 %v1513_v62, %v1146_v28  ;;  %1766 = vst [vmem:[%s1732_s30 + $0xa0] sm:$0xff] (%p2493_p5), %v1765_v46 }
 0x1b2   : > { %v1641_v2 = vmul.f32 %v3169_v45, %v1490_v61  ;;  %v1636_v63 = vmul.f32 %v3131_v11, %v1570_v0 }
 0x1b3   : > { %v1543_v30 = vadd.f32 %v1542_v54, %v1514_v43 }
 0x1b4   : > { %v1705_v10 = vadd.f32 %v1689_v53, %v1641_v2  ;;  %v1700_v48 = vadd.f32 %v1674_v13, %v1636_v63 }
 0x1b5   : > { %v1769_v60 = vld [vmem:[%s3166_s14 + $0x60] sm:$0xff] (%p2493_p5) }
 0x1b6   : > { %1721 = vst [vmem:[%s3166_s14 + $0x70] sm:$0xff] %v1705_v10  ;;  %v1759_v55 = vld [vmem:[%s3166_s14 + $0x38] sm:$0xff] (%p2493_p5) }
 0x1b7   : > { %1716 = vst [vmem:[%s3166_s14 + $0x48] sm:$0xff] %v1700_v48  ;;  %v1571_v19 = vpop.f32.mrf.mxu3 }
 0x1b8   : > { %v1516_v9 = vpop.f32.mrf.mxu0  ;;  %v1572_v49 = vadd.f32 %v1571_v19, %v1543_v30  ;;  %v1545_v29 = vpop.f32.mrf.mxu1  ;;  %1760 = vst [vmem:[%s1732_s30 + $0x68] sm:$0xff] (%p2493_p5), %v1759_v55 }
 0x1b9   : > { %v1517_v27 = vadd.f32 %v1516_v9, %v1149_v16  ;;  %1770 = vst [vmem:[%s1732_s30 + $0xc0] sm:$0xff] (%p2493_p5), %v1769_v60 }
 0x1ba   : > { %v1638_v25 = vmul.f32 %v3143_v23, %v1572_v49 }
 0x1bb   : > { %v1546_v11 = vadd.f32 %v1545_v29, %v1517_v27 }
 0x1bc   : > { %v1702_v56 = vadd.f32 %v1679_v39, %v1638_v25 }
 0x1bd   : > { %v1773_v50 = vld [vmem:[%s3166_s14 + $0x70] sm:$0xff] (%p2493_p5) }
 0x1be   : > { %1718 = vst [vmem:[%s3166_s14 + $0x58] sm:$0xff] %v1702_v56  ;;  %v1763_v40 = vld [vmem:[%s3166_s14 + $0x48] sm:$0xff] (%p2493_p5) }
 0x1bf   : > { %v1574_v17 = vpop.f32.mrf.mxu3  ;;  %1764 = vst [vmem:[%s1732_s30 + $0x88] sm:$0xff] (%p2493_p5), %v1763_v40 }
 0x1c0   : > { %v1518_v13 = vpop.f32.mrf.mxu0  ;;  %v1575_v3 = vadd.f32 %v1574_v17, %v1546_v11  ;;  %v1547_v36 = vpop.f32.mrf.mxu1  ;;  %1774 = vst [vmem:[%s1732_s30 + $0xe0] sm:$0xff] (%p2493_p5), %v1773_v50 }
 0x1c1   : > { %v1519_v6 = vadd.f32 %v1518_v13, %v1151_v57 }
 0x1c2   : > { %v1640_v4 = vmul.f32 %v3154_v32, %v1575_v3  ;;  %v1747_v32 = vld [vmem:[%s3166_s14 + $0x8] sm:$0xff] (%p2493_p5) }
 0x1c3   : > { %v1548_v21 = vadd.f32 %v1547_v36, %v1519_v6  ;;  %1748 = vst [vmem:[%s1732_s30 + $0x8] sm:$0xff] (%p2493_p5), %v1747_v32 }
 0x1c4   : > { %v1704_v14 = vadd.f32 %v1684_v7, %v1640_v4 }
 0x1c5   : > { %v1767_v41 = vld [vmem:[%s3166_s14 + $0x58] sm:$0xff] (%p2493_p5) }
 0x1c6   : > { %1720 = vst [vmem:[%s3166_s14 + $0x68] sm:$0xff] %v1704_v14 }
 0x1c7   : > { %v1576_v23 = vpop.f32.mrf.mxu3  ;;  %1768 = vst [vmem:[%s1732_s30 + $0xa8] sm:$0xff] (%p2493_p5), %v1767_v41 }
 0x1c8   : > { %v1577_v35 = vadd.f32 %v1576_v23, %v1548_v21 }
 0x1ca   : > { %v1642_v31 = vmul.f32 %v3169_v45, %v1577_v35  ;;  %1729 = sbr.rel (!%p2493_p5) target bundleno = 471 (0x1d7), region = 124  ;;  %v1749_v45 = vld [vmem:[%s3166_s14 + $0x10] sm:$0xff] (%p2493_p5) }
 0x1cb   : > { %1750 = vst [vmem:[%s1732_s30 + $0x20] sm:$0xff] (%p2493_p5), %v1749_v45 }
 0x1cc   : > { %v1706_v39 = vadd.f32 %v1689_v53, %v1642_v31 }
 0x1cd   : > { %v1771_v5 = vld [vmem:[%s3166_s14 + $0x68] sm:$0xff] (%p2493_p5) }
 0x1ce   : > { %1722 = vst [vmem:[%s3166_s14 + $0x78] sm:$0xff] %v1706_v39 }
 0x1cf   : > { %1772 = vst [vmem:[%s1732_s30 + $0xc8] sm:$0xff] %v1771_v5 }
 0x1d5   : > { %v1775_v12 = vld [vmem:[%s3166_s14 + $0x78] sm:$0xff] }
 0x1d6   : > { %1776 = vst [vmem:[%s1732_s30 + $0xe8] sm:$0xff] %v1775_v12 }
 0x1d7 PF: > { %p13_p10 = scmp.ge.s32.totalorder %s2476_s25, 4   ;;  %s3280_s21 = smov %s2417_s22 }
 0x1d8   : > { %s3281_s22 = smov %s2487_s28  ;;  %s3282_s23 = smov %s2476_s25 }
 0x1d9   :  { %15 = sbr.rel (!%p13_p10) target bundleno = 2 (0x2), region = 186 }

// kernel: cfm_forward.13
= control target key start
LH: loop header
LB: loop body
LE: loop exit
PB: predicated region body
PF: predicated region fallthrough
CT: control target
= control target key end

     0   :  { %s3037_s21 = smov 0   ;;  %s3039_s22 = smov 0   ;;  %s4240_s0 = inlined_call_operand.vmem [shape: bf16[576,512], index: 0, kind: input, shape index: {}]   ;;  %s4241_s1 = inlined_call_operand.vmem [shape: bf16[144,512], index: 1, kind: input, shape index: {}]   ;;  %s4242_s2 = inlined_call_operand.vmem [shape: bf16[80,576], index: 2, kind: input, shape index: {}]   ;;  %s4243_s3 = inlined_call_operand.vmem [shape: bf16[80,144], index: 3, kind: input, shape index: {}]   ;;  %s4244_s4 = inlined_call_operand.vmem [shape: f32[80,1], index: 4, kind: input, shape index: {}]   ;;  %s4245_s5 = inlined_call_operand.vmem [shape: f32[80,1], index: 5, kind: input, shape index: {}]   ;;  %s4246_s6 = inlined_call_operand.vmem [shape: f32[80,512], index: 6, kind: output, shape index: {}]  }
   0x1   :  { %s3041_s23 = smov 0  }
   0x2 LB: > { %s2271_s24 = sadd.s32 4294967295, %s2999_s23   ;;  %s3054_s25 = sadd.s32 1, %s2999_s23   ;;  %s2999_s23 = sphi %s3041_s23, %s4251_s23   ;;  %s2995_s22 = sphi %s3039_s22, %s4250_s22   ;;  %s2991_s21 = sphi %s3037_s21, %s4249_s21  }
   0x3   : > { %s20_s26 = ssub.s32 %s2999_s23, %s3054_s25  ;;  %s23_s27 = sadd.s32 1, %s2995_s22 }
   0x4   : > { %p21_p0 = scmp.eq.s32.totalorder %s20_s26, 0  ;;  %p30_p1 = scmp.ne.s32.totalorder %s2995_s22, %s2991_s21 }
   0x5   : > { %p31_p2 = scmp.eq.s32.totalorder %s2999_s23, 0  ;;  %p170_p3 = scmp.eq.s32.totalorder %s2271_s24, 1 }
   0x6   : > { %s3065_s28 = scalar_select %p21_p0, %s2995_s22, %s23_s27  }
   0x7   : > { %p3067_p4 = por %p31_p2, %p30_p1  ;;  %p3071_p5 = por %p170_p3, %p30_p1 }
   0x8   : > { %p2274_p6 = scmp.ge.s32.totalorder %s2999_s23, 2 }
   0xa   : > { %204 = sbr.rel (%p2274_p6) target bundleno = 113 (0x71), region = 32 }
   0xf   : > { %207 = sbr.rel (!%p3067_p4) target bundleno = 91 (0x5b), region = 36  ;;  %s209_s7 = sand.u32 (%p3067_p4), 1, %s2995_s22  }
  0x10   : > { %s2804_s8 = sshll.u32 (%p3067_p4), %s2999_s23, 3  ;;  %s2944_s9 = smul.u32 (%p3067_p4), 576, %s209_s7 }
  0x11   : > { %s3083_s12 = scalar_lea.vmem (%p3067_p4), %s4240_s0, %s2804_s8 }
  0x12   : > { %v385_v0 = vld [vmem:[%s3083_s12] sm:$0xff] (%p3067_p4)  ;;  %v387_v1 = vld [vmem:[%s3083_s12 + $0x10] sm:$0xff] (%p3067_p4)  ;;  %s3088_s13 = scalar_lea.vmem (%p3067_p4), [#allocation2], %s2944_s9 }
  0x13   : > { %v389_v2 = vld [vmem:[%s3083_s12 + $0x20] sm:$0xff] (%p3067_p4)  ;;  %386 = vst [vmem:[%s3088_s13] sm:$0xff] (%p3067_p4), %v385_v0  ;;  %v391_v3 = vld [vmem:[%s3083_s12 + $0x30] sm:$0xff] (%p3067_p4) }
  0x14   : > { %388 = vst [vmem:[%s3088_s13 + $0x8] sm:$0xff] %v387_v1  ;;  %v393_v4 = vld [vmem:[%s3083_s12 + $0x40] sm:$0xff]  ;;  %v395_v5 = vld [vmem:[%s3083_s12 + $0x50] sm:$0xff] }
  0x15   : > { %390 = vst [vmem:[%s3088_s13 + $0x10] sm:$0xff] %v389_v2  ;;  %v397_v6 = vld [vmem:[%s3083_s12 + $0x60] sm:$0xff]  ;;  %v399_v7 = vld [vmem:[%s3083_s12 + $0x70] sm:$0xff] }
  0x16   : > { %392 = vst [vmem:[%s3088_s13 + $0x18] sm:$0xff] %v391_v3  ;;  %v401_v8 = vld [vmem:[%s3083_s12 + $0x80] sm:$0xff]  ;;  %v403_v9 = vld [vmem:[%s3083_s12 + $0x90] sm:$0xff] }
  0x17   : > { %394 = vst [vmem:[%s3088_s13 + $0x20] sm:$0xff] %v393_v4  ;;  %v405_v10 = vld [vmem:[%s3083_s12 + $0xa0] sm:$0xff]  ;;  %v407_v11 = vld [vmem:[%s3083_s12 + $0xb0] sm:$0xff] }
  0x18   : > { %396 = vst [vmem:[%s3088_s13 + $0x28] sm:$0xff] %v395_v5  ;;  %v409_v12 = vld [vmem:[%s3083_s12 + $0xc0] sm:$0xff]  ;;  %v411_v13 = vld [vmem:[%s3083_s12 + $0xd0] sm:$0xff] }
  0x19   : > { %398 = vst [vmem:[%s3088_s13 + $0x30] sm:$0xff] %v397_v6  ;;  %v413_v14 = vld [vmem:[%s3083_s12 + $0xe0] sm:$0xff]  ;;  %v415_v15 = vld [vmem:[%s3083_s12 + $0xf0] sm:$0xff] }
  0x1a   : > { %400 = vst [vmem:[%s3088_s13 + $0x38] sm:$0xff] %v399_v7  ;;  %v417_v16 = vld [vmem:[%s3083_s12 + $0x100] sm:$0xff]  ;;  %v419_v17 = vld [vmem:[%s3083_s12 + $0x110] sm:$0xff] }
  0x1b   : > { %402 = vst [vmem:[%s3088_s13 + $0x40] sm:$0xff] %v401_v8  ;;  %v421_v18 = vld [vmem:[%s3083_s12 + $0x120] sm:$0xff]  ;;  %v423_v19 = vld [vmem:[%s3083_s12 + $0x130] sm:$0xff] }
  0x1c   : > { %404 = vst [vmem:[%s3088_s13 + $0x48] sm:$0xff] %v403_v9  ;;  %v425_v20 = vld [vmem:[%s3083_s12 + $0x140] sm:$0xff]  ;;  %v427_v21 = vld [vmem:[%s3083_s12 + $0x150] sm:$0xff] }
  0x1d   : > { %406 = vst [vmem:[%s3088_s13 + $0x50] sm:$0xff] %v405_v10  ;;  %v429_v22 = vld [vmem:[%s3083_s12 + $0x160] sm:$0xff]  ;;  %v431_v23 = vld [vmem:[%s3083_s12 + $0x170] sm:$0xff] }
  0x1e   : > { %408 = vst [vmem:[%s3088_s13 + $0x58] sm:$0xff] %v407_v11  ;;  %v433_v24 = vld [vmem:[%s3083_s12 + $0x180] sm:$0xff]  ;;  %v435_v25 = vld [vmem:[%s3083_s12 + $0x190] sm:$0xff] }
  0x1f   : > { %410 = vst [vmem:[%s3088_s13 + $0x60] sm:$0xff] %v409_v12  ;;  %v437_v26 = vld [vmem:[%s3083_s12 + $0x1a0] sm:$0xff]  ;;  %v439_v27 = vld [vmem:[%s3083_s12 + $0x1b0] sm:$0xff] }
  0x20   : > { %412 = vst [vmem:[%s3088_s13 + $0x68] sm:$0xff] %v411_v13  ;;  %v441_v28 = vld [vmem:[%s3083_s12 + $0x1c0] sm:$0xff]  ;;  %v443_v29 = vld [vmem:[%s3083_s12 + $0x1d0] sm:$0xff] }
  0x21   : > { %414 = vst [vmem:[%s3088_s13 + $0x70] sm:$0xff] %v413_v14  ;;  %v445_v30 = vld [vmem:[%s3083_s12 + $0x1e0] sm:$0xff]  ;;  %v447_v31 = vld [vmem:[%s3083_s12 + $0x1f0] sm:$0xff] }
  0x22   : > { %416 = vst [vmem:[%s3088_s13 + $0x78] sm:$0xff] %v415_v15  ;;  %v449_v32 = vld [vmem:[%s3083_s12 + $0x200] sm:$0xff]  ;;  %v451_v33 = vld [vmem:[%s3083_s12 + $0x210] sm:$0xff] }
  0x23   : > { %418 = vst [vmem:[%s3088_s13 + $0x80] sm:$0xff] %v417_v16  ;;  %v453_v34 = vld [vmem:[%s3083_s12 + $0x220] sm:$0xff]  ;;  %v455_v35 = vld [vmem:[%s3083_s12 + $0x230] sm:$0xff] }
  0x24   : > { %420 = vst [vmem:[%s3088_s13 + $0x88] sm:$0xff] %v419_v17  ;;  %v457_v36 = vld [vmem:[%s3083_s12 + $0x240] sm:$0xff]  ;;  %v459_v37 = vld [vmem:[%s3083_s12 + $0x250] sm:$0xff] }
  0x25   : > { %422 = vst [vmem:[%s3088_s13 + $0x90] sm:$0xff] %v421_v18  ;;  %v461_v38 = vld [vmem:[%s3083_s12 + $0x260] sm:$0xff]  ;;  %v463_v39 = vld [vmem:[%s3083_s12 + $0x270] sm:$0xff] }
  0x26   : > { %424 = vst [vmem:[%s3088_s13 + $0x98] sm:$0xff] %v423_v19  ;;  %v465_v40 = vld [vmem:[%s3083_s12 + $0x280] sm:$0xff]  ;;  %v467_v41 = vld [vmem:[%s3083_s12 + $0x290] sm:$0xff] }
  0x27   : > { %426 = vst [vmem:[%s3088_s13 + $0xa0] sm:$0xff] %v425_v20  ;;  %v469_v42 = vld [vmem:[%s3083_s12 + $0x2a0] sm:$0xff]  ;;  %v471_v43 = vld [vmem:[%s3083_s12 + $0x2b0] sm:$0xff] }
  0x28   : > { %428 = vst [vmem:[%s3088_s13 + $0xa8] sm:$0xff] %v427_v21  ;;  %v473_v44 = vld [vmem:[%s3083_s12 + $0x2c0] sm:$0xff]  ;;  %v475_v45 = vld [vmem:[%s3083_s12 + $0x2d0] sm:$0xff] }
  0x29   : > { %430 = vst [vmem:[%s3088_s13 + $0xb0] sm:$0xff] %v429_v22  ;;  %v477_v46 = vld [vmem:[%s3083_s12 + $0x2e0] sm:$0xff]  ;;  %v479_v47 = vld [vmem:[%s3083_s12 + $0x2f0] sm:$0xff] }
  0x2a   : > { %432 = vst [vmem:[%s3088_s13 + $0xb8] sm:$0xff] %v431_v23  ;;  %v481_v48 = vld [vmem:[%s3083_s12 + $0x300] sm:$0xff]  ;;  %v483_v49 = vld [vmem:[%s3083_s12 + $0x310] sm:$0xff] }
  0x2b   : > { %434 = vst [vmem:[%s3088_s13 + $0xc0] sm:$0xff] %v433_v24  ;;  %v485_v50 = vld [vmem:[%s3083_s12 + $0x320] sm:$0xff]  ;;  %v487_v51 = vld [vmem:[%s3083_s12 + $0x330] sm:$0xff] }
  0x2c   : > { %436 = vst [vmem:[%s3088_s13 + $0xc8] sm:$0xff] %v435_v25  ;;  %v489_v52 = vld [vmem:[%s3083_s12 + $0x340] sm:$0xff]  ;;  %v491_v53 = vld [vmem:[%s3083_s12 + $0x350] sm:$0xff] }
  0x2d   : > { %438 = vst [vmem:[%s3088_s13 + $0xd0] sm:$0xff] %v437_v26  ;;  %v493_v54 = vld [vmem:[%s3083_s12 + $0x360] sm:$0xff]  ;;  %v495_v55 = vld [vmem:[%s3083_s12 + $0x370] sm:$0xff] }
  0x2e   : > { %440 = vst [vmem:[%s3088_s13 + $0xd8] sm:$0xff] %v439_v27  ;;  %v497_v56 = vld [vmem:[%s3083_s12 + $0x380] sm:$0xff]  ;;  %v499_v57 = vld [vmem:[%s3083_s12 + $0x390] sm:$0xff] }
  0x2f   : > { %442 = vst [vmem:[%s3088_s13 + $0xe0] sm:$0xff] %v441_v28  ;;  %v501_v58 = vld [vmem:[%s3083_s12 + $0x3a0] sm:$0xff]  ;;  %v503_v59 = vld [vmem:[%s3083_s12 + $0x3b0] sm:$0xff] }
  0x30   : > { %444 = vst [vmem:[%s3088_s13 + $0xe8] sm:$0xff] %v443_v29  ;;  %v505_v60 = vld [vmem:[%s3083_s12 + $0x3c0] sm:$0xff]  ;;  %v507_v61 = vld [vmem:[%s3083_s12 + $0x3d0] sm:$0xff] }
  0x31   : > { %446 = vst [vmem:[%s3088_s13 + $0xf0] sm:$0xff] %v445_v30  ;;  %v509_v62 = vld [vmem:[%s3083_s12 + $0x3e0] sm:$0xff]  ;;  %v511_v63 = vld [vmem:[%s3083_s12 + $0x3f0] sm:$0xff] }
  0x32   : > { %448 = vst [vmem:[%s3088_s13 + $0xf8] sm:$0xff] %v447_v31  ;;  %v513_v0 = vld [vmem:[%s3083_s12 + $0x400] sm:$0xff]  ;;  %v515_v1 = vld [vmem:[%s3083_s12 + $0x410] sm:$0xff] }
  0x33   : > { %450 = vst [vmem:[%s3088_s13 + $0x100] sm:$0xff] %v449_v32  ;;  %v517_v2 = vld [vmem:[%s3083_s12 + $0x420] sm:$0xff]  ;;  %v519_v3 = vld [vmem:[%s3083_s12 + $0x430] sm:$0xff] }
  0x34   : > { %452 = vst [vmem:[%s3088_s13 + $0x108] sm:$0xff] %v451_v33  ;;  %v521_v4 = vld [vmem:[%s3083_s12 + $0x440] sm:$0xff]  ;;  %v523_v5 = vld [vmem:[%s3083_s12 + $0x450] sm:$0xff] }
  0x35   : > { %454 = vst [vmem:[%s3088_s13 + $0x110] sm:$0xff] %v453_v34  ;;  %v525_v6 = vld [vmem:[%s3083_s12 + $0x460] sm:$0xff]  ;;  %v527_v7 = vld [vmem:[%s3083_s12 + $0x470] sm:$0xff] }
  0x36   : > { %456 = vst [vmem:[%s3088_s13 + $0x118] sm:$0xff] %v455_v35 }
  0x37   : > { %458 = vst [vmem:[%s3088_s13 + $0x120] sm:$0xff] %v457_v36 }
  0x38   : > { %460 = vst [vmem:[%s3088_s13 + $0x128] sm:$0xff] %v459_v37 }
  0x39   : > { %462 = vst [vmem:[%s3088_s13 + $0x130] sm:$0xff] %v461_v38 }
  0x3a   : > { %464 = vst [vmem:[%s3088_s13 + $0x138] sm:$0xff] %v463_v39 }
  0x3b   : > { %466 = vst [vmem:[%s3088_s13 + $0x140] sm:$0xff] %v465_v40 }
  0x3c   : > { %468 = vst [vmem:[%s3088_s13 + $0x148] sm:$0xff] %v467_v41 }
  0x3d   : > { %470 = vst [vmem:[%s3088_s13 + $0x150] sm:$0xff] %v469_v42 }
  0x3e   : > { %472 = vst [vmem:[%s3088_s13 + $0x158] sm:$0xff] %v471_v43 }
  0x3f   : > { %474 = vst [vmem:[%s3088_s13 + $0x160] sm:$0xff] %v473_v44 }
  0x40   : > { %476 = vst [vmem:[%s3088_s13 + $0x168] sm:$0xff] %v475_v45 }
  0x41   : > { %478 = vst [vmem:[%s3088_s13 + $0x170] sm:$0xff] %v477_v46 }
  0x42   : > { %480 = vst [vmem:[%s3088_s13 + $0x178] sm:$0xff] %v479_v47 }
  0x43   : > { %482 = vst [vmem:[%s3088_s13 + $0x180] sm:$0xff] %v481_v48 }
  0x44   : > { %484 = vst [vmem:[%s3088_s13 + $0x188] sm:$0xff] %v483_v49 }
  0x45   : > { %486 = vst [vmem:[%s3088_s13 + $0x190] sm:$0xff] %v485_v50 }
  0x46   : > { %488 = vst [vmem:[%s3088_s13 + $0x198] sm:$0xff] %v487_v51 }
  0x47   : > { %490 = vst [vmem:[%s3088_s13 + $0x1a0] sm:$0xff] %v489_v52 }
  0x48   : > { %492 = vst [vmem:[%s3088_s13 + $0x1a8] sm:$0xff] %v491_v53 }
  0x49   : > { %494 = vst [vmem:[%s3088_s13 + $0x1b0] sm:$0xff] %v493_v54 }
  0x4a   : > { %496 = vst [vmem:[%s3088_s13 + $0x1b8] sm:$0xff] %v495_v55 }
  0x4b   : > { %498 = vst [vmem:[%s3088_s13 + $0x1c0] sm:$0xff] %v497_v56 }
  0x4c   : > { %500 = vst [vmem:[%s3088_s13 + $0x1c8] sm:$0xff] %v499_v57 }
  0x4d   : > { %502 = vst [vmem:[%s3088_s13 + $0x1d0] sm:$0xff] %v501_v58 }
  0x4e   : > { %504 = vst [vmem:[%s3088_s13 + $0x1d8] sm:$0xff] %v503_v59 }
  0x4f   : > { %506 = vst [vmem:[%s3088_s13 + $0x1e0] sm:$0xff] %v505_v60 }
  0x50   : > { %508 = vst [vmem:[%s3088_s13 + $0x1e8] sm:$0xff] %v507_v61 }
  0x51   : > { %510 = vst [vmem:[%s3088_s13 + $0x1f0] sm:$0xff] %v509_v62 }
  0x52   : > { %512 = vst [vmem:[%s3088_s13 + $0x1f8] sm:$0xff] %v511_v63 }
  0x53   : > { %514 = vst [vmem:[%s3088_s13 + $0x200] sm:$0xff] %v513_v0 }
  0x54   : > { %516 = vst [vmem:[%s3088_s13 + $0x208] sm:$0xff] %v515_v1 }
  0x55   : > { %518 = vst [vmem:[%s3088_s13 + $0x210] sm:$0xff] %v517_v2 }
  0x56   : > { %520 = vst [vmem:[%s3088_s13 + $0x218] sm:$0xff] %v519_v3 }
  0x57   : > { %522 = vst [vmem:[%s3088_s13 + $0x220] sm:$0xff] %v521_v4 }
  0x58   : > { %524 = vst [vmem:[%s3088_s13 + $0x228] sm:$0xff] %v523_v5 }
  0x59   : > { %526 = vst [vmem:[%s3088_s13 + $0x230] sm:$0xff] %v525_v6 }
  0x5a   : > { %528 = vst [vmem:[%s3088_s13 + $0x238] sm:$0xff] %v527_v7 }
  0x5b PF: > { %534 = sbr.rel (!%p3067_p4) target bundleno = 113 (0x71), region = 74  ;;  %s536_s14 = sand.u32 (%p3067_p4), 1, %s2995_s22  }
  0x5c   : > { %s2805_s15 = sshll.u32 (%p3067_p4), %s2999_s23, 3  ;;  %s2945_s16 = smul.u32 (%p3067_p4), 144, %s536_s14 }
  0x5d   : > { %s3238_s19 = scalar_lea.vmem (%p3067_p4), %s4241_s1, %s2805_s15 }
  0x5e   : > { %v604_v8 = vld [vmem:[%s3238_s19] sm:$0xff] (%p3067_p4)  ;;  %v606_v9 = vld [vmem:[%s3238_s19 + $0x10] sm:$0xff] (%p3067_p4)  ;;  %s3243_s20 = scalar_lea.vmem (%p3067_p4), [#allocation3], %s2945_s16 }
  0x5f   : > { %v608_v10 = vld [vmem:[%s3238_s19 + $0x20] sm:$0xff] (%p3067_p4)  ;;  %605 = vst [vmem:[%s3243_s20] sm:$0xff] (%p3067_p4), %v604_v8  ;;  %v610_v11 = vld [vmem:[%s3238_s19 + $0x30] sm:$0xff] (%p3067_p4) }
  0x60   : > { %607 = vst [vmem:[%s3243_s20 + $0x8] sm:$0xff] %v606_v9  ;;  %v612_v12 = vld [vmem:[%s3238_s19 + $0x40] sm:$0xff]  ;;  %v614_v13 = vld [vmem:[%s3238_s19 + $0x50] sm:$0xff] }
  0x61   : > { %609 = vst [vmem:[%s3243_s20 + $0x10] sm:$0xff] %v608_v10  ;;  %v616_v14 = vld [vmem:[%s3238_s19 + $0x60] sm:$0xff]  ;;  %v618_v15 = vld [vmem:[%s3238_s19 + $0x70] sm:$0xff] }
  0x62   : > { %611 = vst [vmem:[%s3243_s20 + $0x18] sm:$0xff] %v610_v11  ;;  %v620_v16 = vld [vmem:[%s3238_s19 + $0x80] sm:$0xff]  ;;  %v622_v17 = vld [vmem:[%s3238_s19 + $0x90] sm:$0xff] }
  0x63   : > { %613 = vst [vmem:[%s3243_s20 + $0x20] sm:$0xff] %v612_v12  ;;  %v624_v18 = vld [vmem:[%s3238_s19 + $0xa0] sm:$0xff]  ;;  %v626_v19 = vld [vmem:[%s3238_s19 + $0xb0] sm:$0xff] }
  0x64   : > { %615 = vst [vmem:[%s3243_s20 + $0x28] sm:$0xff] %v614_v13  ;;  %v628_v20 = vld [vmem:[%s3238_s19 + $0xc0] sm:$0xff]  ;;  %v630_v21 = vld [vmem:[%s3238_s19 + $0xd0] sm:$0xff] }
  0x65   : > { %617 = vst [vmem:[%s3243_s20 + $0x30] sm:$0xff] %v616_v14  ;;  %v632_v22 = vld [vmem:[%s3238_s19 + $0xe0] sm:$0xff]  ;;  %v634_v23 = vld [vmem:[%s3238_s19 + $0xf0] sm:$0xff] }
  0x66   : > { %619 = vst [vmem:[%s3243_s20 + $0x38] sm:$0xff] %v618_v15  ;;  %v636_v24 = vld [vmem:[%s3238_s19 + $0x100] sm:$0xff]  ;;  %v638_v25 = vld [vmem:[%s3238_s19 + $0x110] sm:$0xff] }
  0x67   : > { %621 = vst [vmem:[%s3243_s20 + $0x40] sm:$0xff] %v620_v16 }
  0x68   : > { %623 = vst [vmem:[%s3243_s20 + $0x48] sm:$0xff] %v622_v17 }
  0x69   : > { %625 = vst [vmem:[%s3243_s20 + $0x50] sm:$0xff] %v624_v18 }
  0x6a   : > { %627 = vst [vmem:[%s3243_s20 + $0x58] sm:$0xff] %v626_v19 }
  0x6b   : > { %629 = vst [vmem:[%s3243_s20 + $0x60] sm:$0xff] %v628_v20 }
  0x6c   : > { %631 = vst [vmem:[%s3243_s20 + $0x68] sm:$0xff] %v630_v21 }
  0x6d   : > { %633 = vst [vmem:[%s3243_s20 + $0x70] sm:$0xff] %v632_v22 }
  0x6e   : > { %635 = vst [vmem:[%s3243_s20 + $0x78] sm:$0xff] %v634_v23 }
  0x6f   : > { %637 = vst [vmem:[%s3243_s20 + $0x80] sm:$0xff] %v636_v24 }
  0x70   : > { %639 = vst [vmem:[%s3243_s20 + $0x88] sm:$0xff] %v638_v25 }
  0x71 PF: > { %p2279_p7 = scmp.ge.s32.totalorder %s2999_s23, 1  ;;  %p644_p8 = scmp.lt.s32.totalorder %s2999_s23, 3 }
  0x73   : > { %p645_p9 = pnand %p2279_p7, %p644_p8 }
  0x74   : > { %s3281_s26 = sand.u32 (!%p645_p9), 1, %s2991_s21  }
  0x75   : > { %648 = sbr.rel (%p645_p9) target bundleno = 575 (0x23f), region = 112 }
  0x76   : > { %s2946_s27 = smul.u32 (!%p645_p9), 576, %s3281_s26 }
  0x77   : > { %s2947_s29 = smul.u32 (!%p645_p9), 144, %s3281_s26 }
  0x78   : > { %s3291_s11 = scalar_lea.vmem (!%p645_p9), [#allocation2], %s2946_s27 }
  0x79   : > { %s3295_s21 = scalar_lea.vmem (!%p645_p9), [#allocation3], %s2947_s29 }
  0x7a   : > { %v2903_v26 = vld [vmem:[%s4243_s3 + $0x4] sm:$0xf]  ;;  %v2284_v27 = vld [vmem:[%s4243_s3 + $0x8] sm:$0xf0]  ;;  %vm959_vm0 = vcmask 130048   ;;  %vm1596_vm1 = vcmask 523264  }
  0x7b   : > { %v2624_v28 = vld [vmem:[%s3291_s11 + $0xf0] sm:$0xf]  ;;  %v2862_v29 = vld [vmem:[%s3291_s11 + $0xf4] sm:$0xf0]  ;;  %v2927_v35 = vld [vmem:[%s3295_s21 + $0x74] sm:$0xf]  ;;  %v2287_v44 = vor.u32 %v2903_v26, %v2284_v27 }
  0x7c   : > { %v2378_v30 = vld [vmem:[%s3295_s21 + $0x70] sm:$0xf]  ;;  %v2928_v31 = vld [vmem:[%s3295_s21 + $0x74] sm:$0xf0]  ;;  %v2386_v32 = vld [vmem:[%s3295_s21 + $0x80] sm:$0xf]  ;;  %v2625_v41 = vor.u32 %v2862_v29, %v2624_v28 }
  0x7d   : > { %v2379_v33 = vor.u32 %v2928_v31, %v2378_v30  ;;  %v2930_v34 = vld [vmem:[%s3295_s21 + $0x84] sm:$0xf0]  ;;  %v2380_v36 = vld [vmem:[%s3295_s21 + $0x78] sm:$0xf0]  ;;  %v2929_v39 = vld [vmem:[%s3295_s21 + $0x84] sm:$0xf] }
  0x7e   : > { %v2387_v37 = vor.u32 %v2930_v34, %v2386_v32  ;;  %v2383_v38 = vor.u32 %v2927_v35, %v2380_v36  ;;  %v2388_v40 = vld [vmem:[%s3295_s21 + $0x88] sm:$0xf0]  ;;  %v2370_v42 = vld [vmem:[%s3295_s21 + $0x60] sm:$0xf]  ;;  %v2926_v45 = vld [vmem:[%s3295_s21 + $0x64] sm:$0xf0] }
  0x7f   : > { %975 = vmatpush.bf16.msra.mxu0 %v2379_v33  ;;  %v2391_v43 = vor.u32 %v2929_v39, %v2388_v40  ;;  %v2925_v46 = vld [vmem:[%s3295_s21 + $0x64] sm:$0xf]  ;;  %v2372_v47 = vld [vmem:[%s3295_s21 + $0x68] sm:$0xf0]  ;;  %v2371_v48 = vor.u32 %v2926_v45, %v2370_v42  ;;  %v2560_v50 = vld [vmem:[%s3291_s11 + $0x70] sm:$0xf] }
  0x80   : > { %1016 = vmatpush.bf16.msra.mxu1 %v2387_v37  ;;  %1043 = vmatpush.bf16.msra.mxu2 %v2383_v38  ;;  %v2375_v49 = vor.u32 %v2925_v46, %v2372_v47  ;;  %v2846_v51 = vld [vmem:[%s3291_s11 + $0x74] sm:$0xf0]  ;;  %v2362_v52 = vld [vmem:[%s3295_s21 + $0x50] sm:$0xf]  ;;  %v2923_v55 = vld [vmem:[%s3295_s21 + $0x54] sm:$0xf] }
  0x81   : > { %1084 = vmatpush.bf16.msra.mxu3 %v2391_v43  ;;  %v2561_v53 = vor.u32 %v2846_v51, %v2560_v50  ;;  %v2924_v54 = vld [vmem:[%s3295_s21 + $0x54] sm:$0xf0]  ;;  %v2364_v56 = vld [vmem:[%s3295_s21 + $0x58] sm:$0xf0]  ;;  %v2616_v58 = vld [vmem:[%s3291_s11 + $0xe0] sm:$0xf] }
  0x82   : > { %v2363_v57 = vor.u32 %v2924_v54, %v2362_v52  ;;  %v2860_v59 = vld [vmem:[%s3291_s11 + $0xe4] sm:$0xf0]  ;;  %v2367_v60 = vor.u32 %v2923_v55, %v2364_v56  ;;  %v2354_v61 = vld [vmem:[%s3295_s21 + $0x40] sm:$0xf]  ;;  %v2921_v63 = vld [vmem:[%s3295_s21 + $0x44] sm:$0xf] }
  0x83   : > { %2392 = vmatmul.msk.bf16.vlgmr.msra.gmra.mxu1 %vm959_vm0, %v2287_v44  ;;  %976 = vmatpush.bf16.msra.mxu0 %v2371_v48  ;;  %v2922_v62 = vld [vmem:[%s3295_s21 + $0x44] sm:$0xf0]  ;;  %v2617_v0 = vor.u32 %v2860_v59, %v2616_v58  ;;  %v2356_v1 = vld [vmem:[%s3295_s21 + $0x48] sm:$0xf0]  ;;  %v2552_v2 = vld [vmem:[%s3291_s11 + $0x60] sm:$0xf] }
  0x84   : > { %2397 = vmatmul.msk.bf16.vlgmr.msra.gmra.mxu3 %vm959_vm0, %v2287_v44  ;;  %1044 = vmatpush.bf16.msra.mxu2 %v2375_v49  ;;  %v2844_v3 = vld [vmem:[%s3291_s11 + $0x64] sm:$0xf0]  ;;  %v2355_v5 = vor.u32 %v2922_v62, %v2354_v61  ;;  %v2608_v6 = vld [vmem:[%s3291_s11 + $0xd0] sm:$0xf]  ;;  %v2858_v7 = vld [vmem:[%s3291_s11 + $0xd4] sm:$0xf0]  ;;  %v2359_v8 = vor.u32 %v2921_v63, %v2356_v1 }
  0x85   : > { %1646 = vmatpush.bf16.msrb.mxu3 %v2625_v41  ;;  %1612 = vmatpush.bf16.msrb.mxu1 %v2561_v53  ;;  %v2553_v4 = vor.u32 %v2844_v3, %v2552_v2  ;;  %v2346_v9 = vld [vmem:[%s3295_s21 + $0x30] sm:$0xf]  ;;  %v2920_v10 = vld [vmem:[%s3295_s21 + $0x34] sm:$0xf0]  ;;  %v2919_v11 = vld [vmem:[%s3295_s21 + $0x34] sm:$0xf]  ;;  %v2609_v12 = vor.u32 %v2858_v7, %v2608_v6 }
  0x86   : > { %v2348_v13 = vld [vmem:[%s3295_s21 + $0x38] sm:$0xf0]  ;;  %v2544_v14 = vld [vmem:[%s3291_s11 + $0x50] sm:$0xf]  ;;  %v2842_v15 = vld [vmem:[%s3291_s11 + $0x54] sm:$0xf0]  ;;  %v2347_v18 = vor.u32 %v2920_v10, %v2346_v9 }
  0x87   : > { %977 = vmatpush.bf16.msra.mxu0 %v2363_v57  ;;  %v2905_v16 = vld [vmem:[%s4243_s3 + $0x14] sm:$0xf]  ;;  %v2545_v17 = vor.u32 %v2842_v15, %v2544_v14  ;;  %v2292_v19 = vld [vmem:[%s4243_s3 + $0x18] sm:$0xf0]  ;;  %v2338_v20 = vld [vmem:[%s3295_s21 + $0x20] sm:$0xf]  ;;  %v2351_v22 = vor.u32 %v2919_v11, %v2348_v13 }
  0x88   : > { %1045 = vmatpush.bf16.msra.mxu2 %v2367_v60  ;;  %v2918_v21 = vld [vmem:[%s3295_s21 + $0x24] sm:$0xf0]  ;;  %v2917_v23 = vld [vmem:[%s3295_s21 + $0x24] sm:$0xf]  ;;  %v2600_v24 = vld [vmem:[%s3291_s11 + $0xc0] sm:$0xf]  ;;  %v2295_v33 = vor.u32 %v2905_v16, %v2292_v19 }
  0x89   : > { %1647 = vmatpush.bf16.msrb.mxu3 %v2617_v0  ;;  %1613 = vmatpush.bf16.msrb.mxu1 %v2553_v4  ;;  %v2856_v25 = vld [vmem:[%s3291_s11 + $0xc4] sm:$0xf0]  ;;  %v2340_v26 = vld [vmem:[%s3295_s21 + $0x28] sm:$0xf0]  ;;  %v2536_v28 = vld [vmem:[%s3291_s11 + $0x40] sm:$0xf]  ;;  %v2339_v34 = vor.u32 %v2918_v21, %v2338_v20 }
  0x8a   : > { %v2601_v27 = vor.u32 %v2856_v25, %v2600_v24  ;;  %v2840_v29 = vld [vmem:[%s3291_s11 + $0x44] sm:$0xf0]  ;;  %v2592_v31 = vld [vmem:[%s3291_s11 + $0xb0] sm:$0xf]  ;;  %v2854_v32 = vld [vmem:[%s3291_s11 + $0xb4] sm:$0xf0]  ;;  %v2343_v37 = vor.u32 %v2917_v23, %v2340_v26 }
  0x8b   : > { %978 = vmatpush.bf16.msra.mxu0 %v2355_v5  ;;  %v2537_v30 = vor.u32 %v2840_v29, %v2536_v28  ;;  %v2528_v35 = vld [vmem:[%s3291_s11 + $0x30] sm:$0xf]  ;;  %v2838_v36 = vld [vmem:[%s3291_s11 + $0x34] sm:$0xf0]  ;;  %v2915_v40 = vld [vmem:[%s3295_s21 + $0x14] sm:$0xf]  ;;  %v2593_v42 = vor.u32 %v2854_v32, %v2592_v31 }
  0x8c   : > { %1046 = vmatpush.bf16.msra.mxu2 %v2359_v8  ;;  %v2330_v38 = vld [vmem:[%s3295_s21 + $0x10] sm:$0xf]  ;;  %v2916_v39 = vld [vmem:[%s3295_s21 + $0x14] sm:$0xf0]  ;;  %v2332_v41 = vld [vmem:[%s3295_s21 + $0x18] sm:$0xf0]  ;;  %v2529_v43 = vor.u32 %v2838_v36, %v2528_v35 }
  0x8d   : > { %1648 = vmatpush.bf16.msrb.mxu3 %v2609_v12  ;;  %1614 = vmatpush.bf16.msrb.mxu1 %v2545_v17  ;;  %v2331_v44 = vor.u32 %v2916_v39, %v2330_v38  ;;  %v2322_v45 = vld [vmem:[%s3295_s21] sm:$0xf]  ;;  %v2914_v46 = vld [vmem:[%s3295_s21 + $0x4] sm:$0xf0]  ;;  %v2913_v47 = vld [vmem:[%s3295_s21 + $0x4] sm:$0xf]  ;;  %v2335_v48 = vor.u32 %v2915_v40, %v2332_v41 }
  0x8e   : > { %v2324_v49 = vld [vmem:[%s3295_s21 + $0x8] sm:$0xf0]  ;;  %v2752_v50 = vld [vmem:[%s3291_s11 + $0x1f0] sm:$0xf]  ;;  %v2584_v51 = vld [vmem:[%s3291_s11 + $0xa0] sm:$0xf]  ;;  %v2323_v59 = vor.u32 %v2914_v46, %v2322_v45 }
  0x8f   : > { %979 = vmatpush.bf16.msra.mxu0 %v2347_v18  ;;  %v2852_v52 = vld [vmem:[%s3291_s11 + $0xa4] sm:$0xf0]  ;;  %v2688_v53 = vld [vmem:[%s3291_s11 + $0x170] sm:$0xf]  ;;  %v2878_v54 = vld [vmem:[%s3291_s11 + $0x174] sm:$0xf0]  ;;  %v2327_v63 = vor.u32 %v2913_v47, %v2324_v49 }
  0x90   : > { %1047 = vmatpush.bf16.msra.mxu2 %v2351_v22  ;;  %v2894_v55 = vld [vmem:[%s3291_s11 + $0x1f4] sm:$0xf0]  ;;  %v2585_v56 = vor.u32 %v2852_v52, %v2584_v51  ;;  %v2520_v57 = vld [vmem:[%s3291_s11 + $0x20] sm:$0xf]  ;;  %v2836_v58 = vld [vmem:[%s3291_s11 + $0x24] sm:$0xf0]  ;;  %v2689_v0 = vor.u32 %v2878_v54, %v2688_v53 }
  0x91   : > { %1649 = vmatpush.bf16.msrb.mxu3 %v2601_v27  ;;  %1615 = vmatpush.bf16.msrb.mxu1 %v2537_v30  ;;  %v2282_v60 = vld [vmem:[%s4243_s3] sm:$0xf]  ;;  %v2904_v61 = vld [vmem:[%s4243_s3 + $0x4] sm:$0xf0]  ;;  %v2521_v62 = vor.u32 %v2836_v58, %v2520_v57  ;;  %v2753_v1 = vor.u32 %v2894_v55, %v2752_v50  ;;  %v2907_v5 = vld [vmem:[%s4243_s3 + $0x24] sm:$0xf] }
  0x92   : > { %v2283_v2 = vor.u32 %v2904_v61, %v2282_v60  ;;  %v2744_v3 = vld [vmem:[%s3291_s11 + $0x1e0] sm:$0xf]  ;;  %v2892_v4 = vld [vmem:[%s3291_s11 + $0x1e4] sm:$0xf0]  ;;  %v2300_v6 = vld [vmem:[%s4243_s3 + $0x28] sm:$0xf0] }
  0x93   : > { %2393 = vmatmul.msk.bf16.gmra.mxu1 %vm959_vm0, %v2295_v33  ;;  %980 = vmatpush.bf16.msra.mxu0 %v2339_v34  ;;  %v2745_v7 = vor.u32 %v2892_v4, %v2744_v3  ;;  %v2303_v8 = vor.u32 %v2907_v5, %v2300_v6  ;;  %v2576_v9 = vld [vmem:[%s3291_s11 + $0x90] sm:$0xf]  ;;  %v2850_v10 = vld [vmem:[%s3291_s11 + $0x94] sm:$0xf0]  ;;  %v2680_v11 = vld [vmem:[%s3291_s11 + $0x160] sm:$0xf] }
  0x94   : > { %2398 = vmatmul.msk.bf16.gmra.mxu3 %vm959_vm0, %v2295_v33  ;;  %1048 = vmatpush.bf16.msra.mxu2 %v2343_v37  ;;  %v2577_v12 = vor.u32 %v2850_v10, %v2576_v9  ;;  %v2876_v13 = vld [vmem:[%s3291_s11 + $0x164] sm:$0xf0]  ;;  %v2512_v15 = vld [vmem:[%s3291_s11 + $0x10] sm:$0xf]  ;;  %v2834_v16 = vld [vmem:[%s3291_s11 + $0x14] sm:$0xf0] }
  0x95   : > { %1650 = vmatpush.bf16.msrb.mxu3 %v2593_v42  ;;  %1616 = vmatpush.bf16.msrb.mxu1 %v2529_v43  ;;  %v2681_v14 = vor.u32 %v2876_v13, %v2680_v11  ;;  %v2736_v17 = vld [vmem:[%s3291_s11 + $0x1d0] sm:$0xf]  ;;  %v2513_v18 = vor.u32 %v2834_v16, %v2512_v15  ;;  %v2890_v19 = vld [vmem:[%s3291_s11 + $0x1d4] sm:$0xf0]  ;;  %v2568_v20 = vld [vmem:[%s3291_s11 + $0x80] sm:$0xf] }
  0x96   : > { %v2848_v21 = vld [vmem:[%s3291_s11 + $0x84] sm:$0xf0]  ;;  %v2737_v22 = vor.u32 %v2890_v19, %v2736_v17  ;;  %v2672_v24 = vld [vmem:[%s3291_s11 + $0x150] sm:$0xf]  ;;  %v2874_v25 = vld [vmem:[%s3291_s11 + $0x154] sm:$0xf0] }
  0x97   : > { %981 = vmatpush.bf16.msra.mxu0 %v2331_v44  ;;  %v2569_v23 = vor.u32 %v2848_v21, %v2568_v20  ;;  %v2504_v26 = vld [vmem:[%s3291_s11] sm:$0xf]  ;;  %v2290_v27 = vld [vmem:[%s4243_s3 + $0x10] sm:$0xf]  ;;  %v2906_v28 = vld [vmem:[%s4243_s3 + $0x14] sm:$0xf0]  ;;  %v2673_v29 = vor.u32 %v2874_v25, %v2672_v24 }
  0x98   : > { %1049 = vmatpush.bf16.msra.mxu2 %v2335_v48  ;;  %v2832_v30 = vld [vmem:[%s3291_s11 + $0x4] sm:$0xf0]  ;;  %v2291_v32 = vor.u32 %v2906_v28, %v2290_v27  ;;  %v2909_v33 = vld [vmem:[%s4243_s3 + $0x34] sm:$0xf]  ;;  %v2308_v34 = vld [vmem:[%s4243_s3 + $0x38] sm:$0xf0] }
  0x99   : > { %1651 = vmatpush.bf16.msrb.mxu3 %v2585_v56  ;;  %1617 = vmatpush.bf16.msrb.mxu1 %v2521_v62  ;;  %v2505_v31 = vor.u32 %v2832_v30, %v2504_v26  ;;  %v2311_v35 = vor.u32 %v2909_v33, %v2308_v34  ;;  %v2728_v36 = vld [vmem:[%s3291_s11 + $0x1c0] sm:$0xf]  ;;  %v2888_v37 = vld [vmem:[%s3291_s11 + $0x1c4] sm:$0xf0]  ;;  %v2845_v39 = vld [vmem:[%s3291_s11 + $0x74] sm:$0xf] }
  0x9a   : > { %v2729_v38 = vor.u32 %v2888_v37, %v2728_v36  ;;  %v2562_v40 = vld [vmem:[%s3291_s11 + $0x78] sm:$0xf0]  ;;  %v2664_v41 = vld [vmem:[%s3291_s11 + $0x140] sm:$0xf]  ;;  %v2872_v43 = vld [vmem:[%s3291_s11 + $0x144] sm:$0xf0] }
  0x9b   : > { %982 = vmatpush.bf16.msra.mxu0 %v2323_v59  ;;  %v2565_v42 = vor.u32 %v2845_v39, %v2562_v40  ;;  %v2784_v44 = vld [vmem:[%s3291_s11 + $0x230] sm:$0xf]  ;;  %v2902_v45 = vld [vmem:[%s3291_s11 + $0x234] sm:$0xf0]  ;;  %v2665_v46 = vor.u32 %v2872_v43, %v2664_v41  ;;  %v2843_v50 = vld [vmem:[%s3291_s11 + $0x64] sm:$0xf] }
  0x9c   : > { %1050 = vmatpush.bf16.msra.mxu2 %v2327_v63  ;;  %v2785_v47 = vor.u32 %v2902_v45, %v2784_v44  ;;  %v2720_v48 = vld [vmem:[%s3291_s11 + $0x1b0] sm:$0xf]  ;;  %v2886_v49 = vld [vmem:[%s3291_s11 + $0x1b4] sm:$0xf0]  ;;  %v2298_v51 = vld [vmem:[%s4243_s3 + $0x20] sm:$0xf] }
  0x9d   : > { %1652 = vmatpush.bf16.msrb.mxu3 %v2577_v12  ;;  %1618 = vmatpush.bf16.msrb.mxu1 %v2513_v18  ;;  %v2908_v52 = vld [vmem:[%s4243_s3 + $0x24] sm:$0xf0]  ;;  %v2721_v53 = vor.u32 %v2886_v49, %v2720_v48  ;;  %v2554_v54 = vld [vmem:[%s3291_s11 + $0x68] sm:$0xf0]  ;;  %v2911_v57 = vld [vmem:[%s4243_s3 + $0x44] sm:$0xf] }
  0x9e   : > { %983 = vmatmul.bf16.vlgmr.msra.gmra.mxu0 %v2283_v2  ;;  %v2557_v55 = vor.u32 %v2843_v50, %v2554_v54  ;;  %v2299_v56 = vor.u32 %v2908_v52, %v2298_v51  ;;  %v2316_v58 = vld [vmem:[%s4243_s3 + $0x48] sm:$0xf0]  ;;  %v2656_v59 = vld [vmem:[%s3291_s11 + $0x130] sm:$0xf]  ;;  %v2870_v60 = vld [vmem:[%s3291_s11 + $0x134] sm:$0xf0] }
  0x9f   : > { %1680 = vmatpush.bf16.msrb.mxu0 %v2689_v0  ;;  %1051 = vmatmul.bf16.vlgmr.msra.gmra.mxu2 %v2283_v2  ;;  %v2319_v61 = vor.u32 %v2911_v57, %v2316_v58  ;;  %v2657_v62 = vor.u32 %v2870_v60, %v2656_v59  ;;  %v2648_v63 = vld [vmem:[%s3291_s11 + $0x120] sm:$0xf]  ;;  %v2868_v0 = vld [vmem:[%s3291_s11 + $0x124] sm:$0xf0]  ;;  %v2841_v5 = vld [vmem:[%s3291_s11 + $0x54] sm:$0xf] }
  0xa0   : > { %1714 = vmatpush.bf16.msrb.mxu2 %v2753_v1  ;;  %v2712_v1 = vld [vmem:[%s3291_s11 + $0x1a0] sm:$0xf]  ;;  %v2649_v2 = vor.u32 %v2868_v0, %v2648_v63  ;;  %v2884_v3 = vld [vmem:[%s3291_s11 + $0x1a4] sm:$0xf0]  ;;  %v2546_v6 = vld [vmem:[%s3291_s11 + $0x58] sm:$0xf0] }
  0xa1   : > { %1653 = vmatpush.bf16.msrb.mxu3 %v2569_v23  ;;  %1619 = vmatpush.bf16.msrb.mxu1 %v2505_v31  ;;  %v2713_v4 = vor.u32 %v2884_v3, %v2712_v1  ;;  %v2910_v9 = vld [vmem:[%s4243_s3 + $0x34] sm:$0xf0]  ;;  %v2549_v10 = vor.u32 %v2841_v5, %v2546_v6  ;;  %v2704_v12 = vld [vmem:[%s3291_s11 + $0x190] sm:$0xf]  ;;  %v2776_v16 = vld [vmem:[%s3291_s11 + $0x220] sm:$0xf] }
  0xa2   : > { %v2866_v11 = vld [vmem:[%s3291_s11 + $0x114] sm:$0xf0]  ;;  %v2900_v17 = vld [vmem:[%s3291_s11 + $0x224] sm:$0xf0]  ;;  %v2632_v18 = vld [vmem:[%s3291_s11 + $0x100] sm:$0xf] }
  0xa3   : > { %2394 = vmatmul.msk.bf16.gmra.mxu1 %vm959_vm0, %v2303_v8  ;;  %1681 = vmatpush.bf16.msrb.mxu0 %v2681_v14  ;;  %v2882_v13 = vld [vmem:[%s3291_s11 + $0x194] sm:$0xf0]  ;;  %v2777_v19 = vor.u32 %v2900_v17, %v2776_v16  ;;  %v2864_v20 = vld [vmem:[%s3291_s11 + $0x104] sm:$0xf0]  ;;  %v2696_v21 = vld [vmem:[%s3291_s11 + $0x180] sm:$0xf] }
  0xa4   : > { %1715 = vmatpush.bf16.msrb.mxu2 %v2745_v7  ;;  %2399 = vmatmul.msk.bf16.gmra.mxu3 %vm959_vm0, %v2303_v8  ;;  %v2640_v7 = vld [vmem:[%s3291_s11 + $0x110] sm:$0xf]  ;;  %v2705_v15 = vor.u32 %v2882_v13, %v2704_v12  ;;  %v2633_v23 = vor.u32 %v2864_v20, %v2632_v18  ;;  %v2404_v26 = vld [vmem:[%s4242_s2] sm:$0xf]  ;;  %v2808_v27 = vld [vmem:[%s4242_s2 + $0x10] sm:$0xf0] }
  0xa5   : > { %1782 = vmatpush.bf16.msra.mxu3 %v2565_v42  ;;  %1752 = vmatpush.bf16.msra.mxu1 %v2785_v47  ;;  %v2306_v8 = vld [vmem:[%s4243_s3 + $0x30] sm:$0xf]  ;;  %v2641_v14 = vor.u32 %v2866_v11, %v2640_v7  ;;  %v2806_v28 = vld [vmem:[%s4242_s2 + $0x4] sm:$0xf]  ;;  %v3475_v30 = vor.u32 %v2808_v27, %v2404_v26  ;;  %v2530_v36 = vld [vmem:[%s3291_s11 + $0x38] sm:$0xf0] }
  0xa6   : > { %v2307_v24 = vor.u32 %v2910_v9, %v2306_v8  ;;  %v2839_v31 = vld [vmem:[%s3291_s11 + $0x44] sm:$0xf]  ;;  %v2912_v39 = vld [vmem:[%s4243_s3 + $0x44] sm:$0xf0]  ;;  %v2813_v42 = vld [vmem:[%s4242_s2 + $0x38] sm:$0xf0] }
  0xa7   : > { %1682 = vmatpush.bf16.msrb.mxu0 %v2673_v29  ;;  %v2406_v29 = vld [vmem:[%s4242_s2 + $0x14] sm:$0xf0]  ;;  %v2424_v41 = vld [vmem:[%s4242_s2 + $0x28] sm:$0xf]  ;;  %v2811_v43 = vld [vmem:[%s4242_s2 + $0x2c] sm:$0xf] }
  0xa8   : > { %1716 = vmatpush.bf16.msrb.mxu2 %v2737_v22  ;;  %v2880_v22 = vld [vmem:[%s3291_s11 + $0x184] sm:$0xf0]  ;;  %v3479_v33 = vor.u32 %v2806_v28, %v2406_v29  ;;  %v2426_v44 = vld [vmem:[%s4242_s2 + $0x3c] sm:$0xf0]  ;;  %v3503_v45 = vor.u32 %v2813_v42, %v2424_v41  ;;  %v2898_v47 = vld [vmem:[%s3291_s11 + $0x214] sm:$0xf0] }
  0xa9   : > { %1783 = vmatpush.bf16.msra.mxu3 %v2557_v55  ;;  %1753 = vmatpush.bf16.msra.mxu1 %v2777_v19  ;;  %v2697_v25 = vor.u32 %v2880_v22, %v2696_v21  ;;  %v3507_v48 = vor.u32 %v2811_v43, %v2426_v44  ;;  %v2877_v50 = vld [vmem:[%s3291_s11 + $0x174] sm:$0xf]  ;;  %v2690_v51 = vld [vmem:[%s3291_s11 + $0x178] sm:$0xf0]  ;;  %v2835_v52 = vld [vmem:[%s3291_s11 + $0x24] sm:$0xf] }
  0xaa   : > { %v2522_v54 = vld [vmem:[%s3291_s11 + $0x28] sm:$0xf0]  ;;  %v2412_v55 = vld [vmem:[%s4242_s2 + $0x8] sm:$0xf]  ;;  %v2861_v59 = vld [vmem:[%s3291_s11 + $0xf4] sm:$0xf] }
  0xab   : > { %1683 = vmatpush.bf16.msrb.mxu0 %v2665_v46  ;;  %v2768_v46 = vld [vmem:[%s3291_s11 + $0x210] sm:$0xf]  ;;  %v2525_v57 = vor.u32 %v2835_v52, %v2522_v54  ;;  %v2807_v58 = vld [vmem:[%s4242_s2 + $0xc] sm:$0xf]  ;;  %v2626_v60 = vld [vmem:[%s3291_s11 + $0xf8] sm:$0xf0] }
  0xac   : > { %1717 = vmatpush.bf16.msrb.mxu2 %v2729_v38  ;;  %v2314_v38 = vld [vmem:[%s4243_s3 + $0x40] sm:$0xf]  ;;  %v2769_v49 = vor.u32 %v2898_v47, %v2768_v46  ;;  %v2875_v63 = vld [vmem:[%s3291_s11 + $0x164] sm:$0xf]  ;;  %v2682_v0 = vld [vmem:[%s3291_s11 + $0x168] sm:$0xf0] }
  0xad   : > { %1784 = vmatpush.bf16.msra.mxu3 %v2549_v10  ;;  %v2315_v40 = vor.u32 %v2912_v39, %v2314_v38  ;;  %v2685_v1 = vor.u32 %v2875_v63, %v2682_v0  ;;  %v2818_v5 = vld [vmem:[%s4242_s2 + $0x60] sm:$0xf0]  ;;  %v2816_v6 = vld [vmem:[%s4242_s2 + $0x54] sm:$0xf]  ;;  %v2446_v7 = vld [vmem:[%s4242_s2 + $0x64] sm:$0xf0] }
  0xae   : > { %988 = vmatmul.bf16.gmra.mxu0 %v2291_v32  ;;  %1754 = vmatpush.bf16.msra.mxu1 %v2769_v49  ;;  %v2833_v9 = vld [vmem:[%s3291_s11 + $0x14] sm:$0xf]  ;;  %v2514_v10 = vld [vmem:[%s3291_s11 + $0x18] sm:$0xf0]  ;;  %v3553_v11 = vor.u32 %v2816_v6, %v2446_v7  ;;  %v2859_v13 = vld [vmem:[%s3291_s11 + $0xe4] sm:$0xf] }
  0xaf   : > { %1056 = vmatmul.bf16.gmra.mxu2 %v2291_v32  ;;  %1684 = vmatpush.bf16.msrb.mxu0 %v2657_v62  ;;  %v2538_v32 = vld [vmem:[%s3291_s11 + $0x48] sm:$0xf0]  ;;  %v2629_v62 = vor.u32 %v2861_v59, %v2626_v60  ;;  %v2517_v12 = vor.u32 %v2833_v9, %v2514_v10  ;;  %v2760_v16 = vld [vmem:[%s3291_s11 + $0x200] sm:$0xf]  ;;  %v2896_v17 = vld [vmem:[%s3291_s11 + $0x204] sm:$0xf0] }
  0xb0   : > { %1718 = vmatpush.bf16.msrb.mxu2 %v2721_v53  ;;  %v2541_v34 = vor.u32 %v2839_v31, %v2538_v32  ;;  %v2693_v53 = vor.u32 %v2877_v50, %v2690_v51  ;;  %v2761_v18 = vor.u32 %v2896_v17, %v2760_v16  ;;  %v2432_v19 = vld [vmem:[%s4242_s2 + $0x30] sm:$0xf]  ;;  %v2814_v20 = vld [vmem:[%s4242_s2 + $0x40] sm:$0xf0]  ;;  %v2812_v21 = vld [vmem:[%s4242_s2 + $0x34] sm:$0xf] }
  0xb1   : > { %v2434_v22 = vld [vmem:[%s4242_s2 + $0x44] sm:$0xf0]  ;;  %v2831_v26 = vld [vmem:[%s3291_s11 + $0x4] sm:$0xf]  ;;  %v2506_v27 = vld [vmem:[%s3291_s11 + $0x8] sm:$0xf0] }
  0xb2   : > { %1785 = vmatpush.bf16.msra.mxu3 %v2541_v34  ;;  %1755 = vmatpush.bf16.msra.mxu1 %v2761_v18  ;;  %v1954_v28 = vld [vmem:[%s4244_s4 + $0x10] sm:$0xff]  ;;  %v3001_v29 = vmov 0   ;;  %v2509_v31 = vor.u32 %v2831_v26, %v2506_v27  ;;  %v2610_v34 = vld [vmem:[%s3291_s11 + $0xd8] sm:$0xf0]  ;;  %v2464_v38 = vld [vmem:[%s4242_s2 + $0x78] sm:$0xf] }
  0xb3   : > { %2395 = vmatmul.msk.bf16.gmra.mxu1 %vm959_vm0, %v2311_v35  ;;  %1685 = vmatpush.bf16.msrb.mxu0 %v2649_v2  ;;  %v2857_v32 = vld [vmem:[%s3291_s11 + $0xd4] sm:$0xf]  ;;  %v2823_v39 = vld [vmem:[%s4242_s2 + $0x88] sm:$0xf0]  ;;  %v2466_v41 = vld [vmem:[%s4242_s2 + $0x8c] sm:$0xf0] }
  0xb4   : > { %2400 = vmatmul.msk.bf16.gmra.mxu3 %vm959_vm0, %v2311_v35  ;;  %1719 = vmatpush.bf16.msrb.mxu2 %v2713_v4  ;;  %v2837_v35 = vld [vmem:[%s3291_s11 + $0x34] sm:$0xf]  ;;  %v2444_v4 = vld [vmem:[%s4242_s2 + $0x50] sm:$0xf]  ;;  %v3600_v42 = vor.u32 %v2823_v39, %v2464_v38  ;;  %v2871_v46 = vld [vmem:[%s3291_s11 + $0x144] sm:$0xf] }
  0xb5   : > { %v2533_v37 = vor.u32 %v2837_v35, %v2530_v36  ;;  %v3549_v8 = vor.u32 %v2818_v5, %v2444_v4  ;;  %2975 = vset.pattern.permute.xlu1 %v3001_v29  ;;  %2974 = vset.pattern.permute.xlu0 %v3001_v29  ;;  %v3582_v35 = vor.u32 %v2814_v20, %v2432_v19  ;;  %v2666_v47 = vld [vmem:[%s3291_s11 + $0x148] sm:$0xf0]  ;;  %v1955_v49 = vld [vmem:[%s4244_s4 + $0x18] sm:$0xff]  ;;  %v1952_v51 = vld [vmem:[%s4244_s4] sm:$0xff]  ;;  %s2948_s21 = smul.u32 160, %s3281_s26  ;;  %s2931_s12 = sshll.u32 (%p3071_p5), %s2271_s24, 4 }
  0xb6   : > { %1974 = vperm.xlu1 %2975, %v1954_v28   ;;  %v2613_v36 = vor.u32 %v2857_v32, %v2610_v34  ;;  %2976 = vset.pattern.permute.xlu2 %v3001_v29  ;;  %v2669_v50 = vor.u32 %v2871_v46, %v2666_v47  ;;  %v2901_v52 = vld [vmem:[%s3291_s11 + $0x234] sm:$0xf]  ;;  %v2855_v54 = vld [vmem:[%s3291_s11 + $0xc4] sm:$0xf]  ;;  %v2754_v63 = vld [vmem:[%s3291_s11 + $0x1f8] sm:$0xf0]  ;;  %s4190_s30 = scalar_lea.vmem (%p3071_p5), %s4246_s6, %s2931_s12 }
  0xb7   : > { %1686 = vmatpush.bf16.msrb.mxu0 %v2641_v14  ;;  %1786 = vmatpush.bf16.msra.mxu3 %v2533_v37  ;;  %v2618_v14 = vld [vmem:[%s3291_s11 + $0xe8] sm:$0xf0]  ;;  %v3584_v37 = vor.u32 %v2812_v21, %v2434_v22  ;;  %v1959_v5 = vld [vmem:[%s4244_s4 + $0x38] sm:$0xff]  ;;  %v2869_v10 = vld [vmem:[%s3291_s11 + $0x134] sm:$0xf]  ;;  %s4021_s26 = scalar_lea.vmem [#allocation4], %s2948_s21 }
  0xb8   : > { %1720 = vmatpush.bf16.msrb.mxu2 %v2705_v15  ;;  %v2621_v15 = vor.u32 %v2859_v13, %v2618_v14  ;;  %1964 = vperm.xlu0 %2974, %v1952_v51   ;;  %v1953_v6 = vld [vmem:[%s4244_s4 + $0x8] sm:$0xff]  ;;  %v2484_v13 = vld [vmem:[%s4242_s2 + $0xa0] sm:$0xf]  ;;  %v2828_v14 = vld [vmem:[%s4242_s2 + $0xb0] sm:$0xf0] }
  0xb9   : > { %v2826_v16 = vld [vmem:[%s4242_s2 + $0xa4] sm:$0xf]  ;;  %v2486_v17 = vld [vmem:[%s4242_s2 + $0xb4] sm:$0xf0]  ;;  %v2853_v18 = vld [vmem:[%s3291_s11 + $0xb4] sm:$0xf]  ;;  %v3674_v21 = vor.u32 %v2828_v14, %v2484_v13 }
  0xba   : > { %v2594_v19 = vld [vmem:[%s3291_s11 + $0xb8] sm:$0xf0]  ;;  %v2746_v26 = vld [vmem:[%s3291_s11 + $0x1e8] sm:$0xf0]  ;;  %v2032_v27 = vld [vmem:[%s4245_s5] sm:$0xff] }
  0xbb   : > { %1687 = vmatpush.bf16.msrb.mxu0 %v2633_v23  ;;  %1787 = vmatpush.bf16.msra.mxu3 %v2525_v57  ;;  %v2873_v23 = vld [vmem:[%s3291_s11 + $0x154] sm:$0xf]  ;;  %v2452_v57 = vld [vmem:[%s4242_s2 + $0x58] sm:$0xf]  ;;  %v2597_v22 = vor.u32 %v2853_v18, %v2594_v19  ;;  %v2586_v32 = vld [vmem:[%s3291_s11 + $0xa8] sm:$0xf0] }
  0xbc   : > { %1721 = vmatpush.bf16.msrb.mxu2 %v2697_v25  ;;  %v1958_v29 = vld [vmem:[%s4244_s4 + $0x30] sm:$0xff]  ;;  %v2867_v34 = vld [vmem:[%s3291_s11 + $0x124] sm:$0xf]  ;;  %v2650_v38 = vld [vmem:[%s3291_s11 + $0x128] sm:$0xf0] }
  0xbd   : > { %v2653_v39 = vor.u32 %v2867_v34, %v2650_v38  ;;  %v2822_v46 = vld [vmem:[%s4242_s2 + $0x84] sm:$0xf]  ;;  %v2849_v47 = vld [vmem:[%s3291_s11 + $0x94] sm:$0xf]  ;;  %v2420_v19 = vld [vmem:[%s4242_s2 + $0x10] sm:$0xf] }
  0xbe   : > { %993 = vmatmul.bf16.gmra.mxu0 %v2299_v56  ;;  %1979 = vperm.xlu1 %2975, %v1955_v49   ;;  %v2578_v49 = vld [vmem:[%s3291_s11 + $0x98] sm:$0xf0]  ;;  %v2889_v14 = vld [vmem:[%s3291_s11 + $0x1d4] sm:$0xf] }
  0xbf   : > { %1061 = vmatmul.bf16.gmra.mxu2 %v2299_v56  ;;  %v2809_v56 = vld [vmem:[%s4242_s2 + $0x18] sm:$0xf0]  ;;  %1816 = vmatpush.bf16.msra.mxu0 %v2629_v62  ;;  %v2893_v62 = vld [vmem:[%s3291_s11 + $0x1f4] sm:$0xf] }
  0xc0   : > { %1850 = vmatpush.bf16.msra.mxu2 %v2693_v53  ;;  %v3531_v2 = vor.u32 %v2809_v56, %v2412_v55  ;;  %1788 = vmatpush.bf16.msra.mxu3 %v2517_v12  ;;  %v2786_v53 = vld [vmem:[%s3291_s11 + $0x238] sm:$0xf0]  ;;  %v2602_v56 = vld [vmem:[%s3291_s11 + $0xc8] sm:$0xf0]  ;;  %v3641_v4 = vor.u32 %v2893_v62, %v2754_v63  ;;  %v1956_v62 = vld [vmem:[%s4244_s4 + $0x20] sm:$0xff] }
  0xc1   : > { %v3619_v55 = vor.u32 %v2901_v52, %v2786_v53  ;;  %v2605_v59 = vor.u32 %v2855_v54, %v2602_v56  ;;  %1969 = vperm.xlu0 %2974, %v1953_v6   ;;  %v2658_v12 = vld [vmem:[%s3291_s11 + $0x138] sm:$0xf0]  ;;  %v2899_v52 = vld [vmem:[%s3291_s11 + $0x224] sm:$0xf]  ;;  %v2778_v53 = vld [vmem:[%s3291_s11 + $0x228] sm:$0xf0]  ;;  %v2581_v54 = vor.u32 %v2849_v47, %v2578_v49  ;;  %1984 = vperm.xlu2 %2976, %v1956_v62  }
  0xc2   : > { %v2642_v56 = vld [vmem:[%s3291_s11 + $0x118] sm:$0xf0]  ;;  %v1961_v63 = vld [vmem:[%s4244_s4 + $0x48] sm:$0xff]  ;;  %v1960_v47 = vld [vmem:[%s4244_s4 + $0x40] sm:$0xff] }
  0xc3   : > { %2396 = vmatmul.msk.bf16.gmra.mxu1 %vm959_vm0, %v2319_v61  ;;  %1817 = vmatpush.bf16.msra.mxu0 %v2621_v15  ;;  %v2661_v15 = vor.u32 %v2869_v10, %v2658_v12  ;;  %v2570_v6 = vld [vmem:[%s3291_s11 + $0x88] sm:$0xf0]  ;;  %v2863_v10 = vld [vmem:[%s3291_s11 + $0x104] sm:$0xf]  ;;  %v2035_v49 = vld [vmem:[%s4245_s5 + $0x18] sm:$0xff] }
  0xc4   : > { %2401 = vmatmul.msk.bf16.gmra.mxu3 %vm959_vm0, %v2319_v61  ;;  %v2414_v61 = vld [vmem:[%s4242_s2 + $0x1c] sm:$0xf0]  ;;  %1851 = vmatpush.bf16.msra.mxu2 %v2685_v1  ;;  %v2454_v1 = vld [vmem:[%s4242_s2 + $0x6c] sm:$0xf0]  ;;  %v2440_v62 = vld [vmem:[%s4242_s2 + $0x38] sm:$0xf] }
  0xc5   : > { %v3533_v3 = vor.u32 %v2807_v58, %v2414_v61  ;;  %1789 = vmatpush.bf16.msra.mxu3 %v2509_v31  ;;  %v2819_v58 = vld [vmem:[%s4242_s2 + $0x68] sm:$0xf0]  ;;  %v2817_v61 = vld [vmem:[%s4242_s2 + $0x5c] sm:$0xf]  ;;  %v2851_v31 = vld [vmem:[%s3291_s11 + $0xa4] sm:$0xf] }
  0xc6   : > { %v3649_v7 = vor.u32 %v2819_v58, %v2452_v57  ;;  %1999 = vperm.xlu1 %2975, %v1959_v5   ;;  %v3652_v9 = vor.u32 %v2817_v61, %v2454_v1  ;;  %v2474_v58 = vld [vmem:[%s4242_s2 + $0x94] sm:$0xf0]  ;;  %v2847_v5 = vld [vmem:[%s3291_s11 + $0x84] sm:$0xf] }
  0xc7   : > { %1818 = vmatpush.bf16.msra.mxu0 %v2613_v36  ;;  %v2589_v36 = vor.u32 %v2851_v31, %v2586_v32  ;;  %v3730_v13 = vor.u32 %v2822_v46, %v2474_v58  ;;  %v1957_v31 = vld [vmem:[%s4244_s4 + $0x28] sm:$0xff]  ;;  %v2034_v32 = vld [vmem:[%s4245_s5 + $0x10] sm:$0xff]  ;;  %v2494_v46 = vld [vmem:[%s4242_s2 + $0xbc] sm:$0xf0] }
  0xc8   : > { %v2897_v58 = vld [vmem:[%s3291_s11 + $0x214] sm:$0xf] }
  0xc9   : > { %1994 = vperm.xlu0 %2974, %v1958_v29   ;;  %1989 = vperm.xlu2 %2976, %v1957_v31   ;;  %v2883_v31 = vld [vmem:[%s3291_s11 + $0x1a4] sm:$0xf] }
  0xcb   : > { %1819 = vmatpush.bf16.msra.mxu0 %v2605_v59  ;;  %v2781_v59 = vor.u32 %v2899_v52, %v2778_v53 }
  0xce   : > { %998 = vmatmul.bf16.gmra.mxu0 %v2307_v24  ;;  %2044 = vperm.xlu1 %2975, %v2032_v27  }
  0xcf   : > { %1066 = vmatmul.bf16.gmra.mxu2 %v2307_v24  ;;  %v2674_v24 = vld [vmem:[%s3291_s11 + $0x158] sm:$0xf0]  ;;  %1820 = vmatpush.bf16.msra.mxu0 %v2597_v22  ;;  %v2810_v22 = vld [vmem:[%s4242_s2 + $0x20] sm:$0xf0] }
  0xd0   : > { %v2677_v25 = vor.u32 %v2873_v23, %v2674_v24  ;;  %v3678_v24 = vor.u32 %v2826_v16, %v2486_v17  ;;  %v2573_v16 = vor.u32 %v2847_v5, %v2570_v6  ;;  %v2634_v17 = vld [vmem:[%s3291_s11 + $0x108] sm:$0xf0] }
  0xd1   : > { %2009 = vperm.xlu0 %2974, %v1961_v63   ;;  %2004 = vperm.xlu2 %2976, %v1960_v47   ;;  %v2815_v63 = vld [vmem:[%s4242_s2 + $0x48] sm:$0xf0]  ;;  %v2038_v47 = vld [vmem:[%s4245_s5 + $0x30] sm:$0xff] }
  0xd2   : > { %1852 = vmatpush.bf16.msra.mxu2 %v2677_v25  ;;  %v2891_v25 = vld [vmem:[%s3291_s11 + $0x1e4] sm:$0xf]  ;;  %v3814_v6 = vor.u32 %v2815_v63, %v2440_v62 }
  0xd3   : > { %1620 = vmatmul.bf16.vlgmr.msrb.gmra.mxu1 %v3475_v30  ;;  %v3685_v28 = vor.u32 %v2891_v25, %v2746_v26  ;;  %1821 = vmatpush.bf16.msra.mxu0 %v2589_v36  ;;  %v2637_v26 = vor.u32 %v2863_v10, %v2634_v17  ;;  %v2722_v10 = vld [vmem:[%s3291_s11 + $0x1b8] sm:$0xf0]  ;;  %v2036_v63 = vld [vmem:[%s4245_s5 + $0x20] sm:$0xff] }
  0xd4   : > { %1654 = vmatmul.bf16.vlgmr.msrb.gmra.mxu3 %v3479_v33  ;;  %2932 = vmatpush.bf16.msrb.mxu1 %v3641_v4 }
  0xd5   : > { %2940 = vmatpush.bf16.msrb.mxu3 %v3619_v55 }
  0xd6   : > { %1853 = vmatpush.bf16.msra.mxu2 %v2669_v50  ;;  %v2865_v50 = vld [vmem:[%s3291_s11 + $0x114] sm:$0xf]  ;;  %2059 = vperm.xlu1 %2975, %v2035_v49  }
  0xd7   : > { %v2645_v61 = vor.u32 %v2865_v50, %v2642_v56  ;;  %1822 = vmatpush.bf16.msra.mxu0 %v2581_v54 }
  0xd8   : > { %2933 = vmatpush.bf16.msrb.mxu1 %v3685_v28 }
  0xd9   : > { %2941 = vmatpush.bf16.msrb.mxu3 %v2781_v59  ;;  %2054 = vperm.xlu0 %2974, %v2034_v32   ;;  %v2714_v32 = vld [vmem:[%s3291_s11 + $0x1a8] sm:$0xf0] }
  0xda   : > { %1854 = vmatpush.bf16.msra.mxu2 %v2661_v15  ;;  %v2738_v15 = vld [vmem:[%s3291_s11 + $0x1d8] sm:$0xf0] }
  0xdb   : > { %v2741_v25 = vor.u32 %v2889_v14, %v2738_v15  ;;  %1823 = vmatpush.bf16.msra.mxu0 %v2573_v16  ;;  %v2033_v15 = vld [vmem:[%s4245_s5 + $0x8] sm:$0xff] }
  0xdc   : > { %2049 = vperm.xlu2 %2976, %v2033_v15   ;;  %v2879_v15 = vld [vmem:[%s3291_s11 + $0x184] sm:$0xf] }
  0xdd   : > { %2934 = vmatpush.bf16.msrb.mxu1 %v2741_v25 }
  0xde   : > { %1003 = vmatmul.bf16.gmra.mxu0 %v2315_v40  ;;  %1855 = vmatpush.bf16.msra.mxu2 %v2653_v39  ;;  %v2887_v39 = vld [vmem:[%s3291_s11 + $0x1c4] sm:$0xf] }
  0xdf   : > { %1071 = vmatmul.bf16.gmra.mxu2 %v2315_v40  ;;  %v2821_v40 = vld [vmem:[%s4242_s2 + $0x7c] sm:$0xf]  ;;  %2074 = vperm.xlu1 %2975, %v2038_v47  }
  0xe0   : > { %v3604_v44 = vor.u32 %v2821_v40, %v2466_v41  ;;  %v2472_v40 = vld [vmem:[%s4242_s2 + $0x80] sm:$0xf]  ;;  %v2824_v41 = vld [vmem:[%s4242_s2 + $0x90] sm:$0xf0] }
  0xe1   : > { %v3725_v1 = vor.u32 %v2824_v41, %v2472_v40  ;;  %v2730_v40 = vld [vmem:[%s3291_s11 + $0x1c8] sm:$0xf0] }
  0xe2   : > { %1856 = vmatpush.bf16.msra.mxu2 %v2645_v61  ;;  %v2733_v41 = vor.u32 %v2887_v39, %v2730_v40  ;;  %v2460_v40 = vld [vmem:[%s4242_s2 + $0x60] sm:$0xf] }
  0xe3   : > { %1625 = vmatmul.bf16.gmra.mxu1 %v3503_v45 }
  0xe4   : > { %1659 = vmatmul.bf16.gmra.mxu3 %v3507_v48  ;;  %2935 = vmatpush.bf16.msrb.mxu1 %v2733_v41 }
  0xe5   : > { %2064 = vperm.xlu2 %2976, %v2036_v63  }
  0xe6   : > { %1857 = vmatpush.bf16.msra.mxu2 %v2637_v26 }
  0xee   : > { %1688 = vmatmul.bf16.vlgmr.msrb.gmra.mxu0 %v3531_v2 }
  0xef   : > { %1722 = vmatmul.bf16.vlgmr.msrb.gmra.mxu2 %v3533_v3  ;;  %1884 = vmatpush.bf16.msrb.mxu0 %v3641_v4 }
  0xf0   : > { %1922 = vmatpush.bf16.msrb.mxu2 %v3619_v55 }
  0xf3   : > { %1630 = vmatmul.bf16.gmra.mxu1 %v3549_v8  ;;  %1885 = vmatpush.bf16.msrb.mxu0 %v3685_v28 }
  0xf4   : > { %1664 = vmatmul.bf16.gmra.mxu3 %v3553_v11  ;;  %1923 = vmatpush.bf16.msrb.mxu2 %v2781_v59  ;;  %v2770_v59 = vld [vmem:[%s3291_s11 + $0x218] sm:$0xf0] }
  0xf5   : > { %v2773_v5 = vor.u32 %v2897_v58, %v2770_v59  ;;  %v2706_v58 = vld [vmem:[%s3291_s11 + $0x198] sm:$0xf0] }
  0xf7   : > { %1886 = vmatpush.bf16.msrb.mxu0 %v2741_v25  ;;  %2942 = vmatpush.bf16.msrb.mxu3 %v2773_v5 }
  0xf8   : > { %1924 = vmatpush.bf16.msrb.mxu2 %v2773_v5 }
  0xfb   : > { %1887 = vmatpush.bf16.msrb.mxu0 %v2733_v41  ;;  %v2820_v41 = vld [vmem:[%s4242_s2 + $0x70] sm:$0xf0] }
  0xfe   : > { %1693 = vmatmul.bf16.gmra.mxu0 %v3582_v35 }
  0xff   : > { %1727 = vmatmul.bf16.gmra.mxu2 %v3584_v37 }
 0x100   : > { %v3602_v43 = vpop.f32.mrf.mxu1 }
 0x103   : > { %1635 = vmatmul.bf16.gmra.mxu1 %v3600_v42 }
 0x104   : > { %1669 = vmatmul.bf16.gmra.mxu3 %v3604_v44 }
 0x107   : > { %v3628_v60 = vpop.f32.mrf.mxu3 }
 0x108   : > { %v3636_v0 = vpop.f32.mrf.mxu1 }
 0x10e   : > { %1698 = vmatmul.bf16.gmra.mxu0 %v3649_v7 }
 0x10f   : > { %v3671_v20 = vpop.f32.mrf.mxu3  ;;  %1732 = vmatmul.bf16.gmra.mxu2 %v3652_v9 }
 0x110   : > { %v3676_v23 = vpop.f32.mrf.mxu1 }
 0x113   : > { %1640 = vmatmul.bf16.gmra.mxu1 %v3674_v21 }
 0x114   : > { %1674 = vmatmul.bf16.gmra.mxu3 %v3678_v24 }
 0x117   : > { %v3709_v51 = vpop.f32.mrf.mxu3 }
 0x118   : > { %v3714_v57 = vpop.f32.mrf.mxu1 }
 0x11b   : > { %v984_v12 = vpop.f32.mrf.mxu0 }
 0x11c   : > { %v3736_v18 = vadd.f32 %v3602_v43, %v984_v12  ;;  %v3748_v43 = vor.u32 %v2810_v22, %v2420_v19 }
 0x11e   : > { %1703 = vmatmul.bf16.gmra.mxu0 %v3725_v1 }
 0x11f   : > { %v3745_v27 = vpop.f32.mrf.mxu3  ;;  %1737 = vmatmul.bf16.gmra.mxu2 %v3730_v13 }
 0x120   : > { %v3751_v29 = vpop.f32.mrf.mxu1 }
 0x122   : > { %v1052_v34 = vpop.f32.mrf.mxu2 }
 0x123   : > { %v3761_v36 = vadd.f32 %v3628_v60, %v1052_v34  ;;  %2790 = vmatmul.msk.bf16.vlgmr.msra.gmra.mxu1 %vm1596_vm1, %v3748_v43  ;;  %v986_v4 = vpop.f32.mrf.mxu0  ;;  %v2492_v60 = vld [vmem:[%s4242_s2 + $0xa8] sm:$0xf] }
 0x124   : > { %1790 = vmatmul.bf16.vlgmr.msra.gmra.mxu3 %v3475_v30  ;;  %v3767_v38 = vadd.f32 %v3636_v0, %v986_v4  ;;  %v2829_v30 = vld [vmem:[%s4242_s2 + $0xb8] sm:$0xf0]  ;;  %v2827_v0 = vld [vmem:[%s4242_s2 + $0xac] sm:$0xf]  ;;  %v2717_v4 = vor.u32 %v2883_v31, %v2714_v32 }
 0x125   : > { %v3794_v52 = vor.u32 %v2829_v30, %v2492_v60  ;;  %v3799_v56 = vor.u32 %v2827_v0, %v2494_v46  ;;  %v2895_v30 = vld [vmem:[%s3291_s11 + $0x204] sm:$0xf]  ;;  %v2762_v0 = vld [vmem:[%s3291_s11 + $0x208] sm:$0xf0] }
 0x126   : > { %v2765_v46 = vor.u32 %v2895_v30, %v2762_v0 }
 0x127   : > { %v3772_v55 = vpop.f32.mrf.mxu3 }
 0x128   : > { %v3783_v28 = vpop.f32.mrf.mxu1  ;;  %2943 = vmatpush.bf16.msrb.mxu3 %v2765_v46  ;;  %1925 = vmatpush.bf16.msrb.mxu2 %v2765_v46 }
 0x12a   : > { %v1054_v50 = vpop.f32.mrf.mxu2 }
 0x12b   : > { %v3797_v53 = vadd.f32 %v3671_v20, %v1054_v50  ;;  %v989_v54 = vpop.f32.mrf.mxu0 }
 0x12c   : > { %v3804_v61 = vadd.f32 %v3676_v23, %v989_v54  ;;  %v2885_v23 = vld [vmem:[%s3291_s11 + $0x1b4] sm:$0xf] }
 0x12d   : > { %v2725_v14 = vor.u32 %v2885_v23, %v2722_v10  ;;  %v2881_v54 = vld [vmem:[%s3291_s11 + $0x194] sm:$0xf]  ;;  %v2480_v23 = vld [vmem:[%s4242_s2 + $0x88] sm:$0xf] }
 0x12e   : > { %1708 = vmatmul.bf16.gmra.mxu0 %v3794_v52  ;;  %v2709_v59 = vor.u32 %v2881_v54, %v2706_v58  ;;  %v2039_v54 = vld [vmem:[%s4245_s5 + $0x38] sm:$0xff] }
 0x12f   : > { %v1098_v20 = vpop.f32.mrf.mxu3  ;;  %1742 = vmatmul.bf16.gmra.mxu2 %v3799_v56  ;;  %2936 = vmatpush.bf16.msrb.mxu1 %v2725_v14 }
 0x130   : > { %v1033_v12 = vpop.f32.mrf.mxu1  ;;  %1888 = vmatpush.bf16.msrb.mxu0 %v2725_v14  ;;  %v2825_v14 = vld [vmem:[%s4242_s2 + $0x98] sm:$0xf0]  ;;  %2079 = vperm.xlu2 %2976, %v2039_v54  }
 0x132   : > { %v1057_v16 = vpop.f32.mrf.mxu2 }
 0x133   : > { %v3822_v17 = vadd.f32 %v3709_v51, %v1057_v16  ;;  %2791 = vmatmul.msk.bf16.gmra.mxu1 %vm1596_vm1, %v3814_v6  ;;  %v991_v19 = vpop.f32.mrf.mxu0  ;;  %v2037_v51 = vld [vmem:[%s4245_s5 + $0x28] sm:$0xff] }
 0x134   : > { %1795 = vmatmul.bf16.gmra.mxu3 %v3503_v45  ;;  %v3828_v22 = vadd.f32 %v3714_v57, %v991_v19  ;;  %2069 = vperm.xlu0 %2974, %v2037_v51   ;;  %v2698_v16 = vld [vmem:[%s3291_s11 + $0x188] sm:$0xf0]  ;;  %v2040_v51 = vld [vmem:[%s4245_s5 + $0x40] sm:$0xff] }
 0x135   : > { %2937 = vmatpush.bf16.msrb.mxu1 %v2717_v4  ;;  %1889 = vmatpush.bf16.msrb.mxu0 %v2717_v4  ;;  %v2701_v19 = vor.u32 %v2879_v15, %v2698_v16 }
 0x137   : > { %v1101_v25 = vpop.f32.mrf.mxu3 }
 0x138   : > { %v3830_v26 = vpop.f32.mrf.mxu1 }
 0x139   : > { %2938 = vmatpush.bf16.msrb.mxu1 %v2709_v59  ;;  %1890 = vmatpush.bf16.msrb.mxu0 %v2709_v59 }
 0x13a   : > { %v1059_v34 = vpop.f32.mrf.mxu2 }
 0x13b   : > { %v3838_v39 = vadd.f32 %v3745_v27, %v1059_v34  ;;  %v994_v45 = vpop.f32.mrf.mxu0  ;;  %v3851_v27 = vor.u32 %v2820_v41, %v2460_v40 }
 0x13c   : > { %v3841_v57 = vadd.f32 %v3751_v29, %v994_v45  ;;  %2084 = vperm.xlu0 %2974, %v2040_v51  }
 0x13d   : > { %2939 = vmatpush.bf16.msrb.mxu1 %v2701_v19  ;;  %1891 = vmatpush.bf16.msrb.mxu0 %v2701_v19 }
 0x13e   : > { %1824 = vmatmul.bf16.vlgmr.msra.gmra.mxu0 %v3479_v33 }
 0x13f   : > { %v1103_v60 = vpop.f32.mrf.mxu3  ;;  %1858 = vmatmul.bf16.vlgmr.msra.gmra.mxu2 %v3531_v2 }
 0x140   : > { %v1038_v29 = vpop.f32.mrf.mxu1 }
 0x142   : > { %v1062_v49 = vpop.f32.mrf.mxu2 }
 0x143   : > { %v3859_v50 = vadd.f32 %v3772_v55, %v1062_v49  ;;  %2792 = vmatmul.msk.bf16.gmra.mxu1 %vm1596_vm1, %v3851_v27  ;;  %v996_v33 = vpop.f32.mrf.mxu0 }
 0x144   : > { %1800 = vmatmul.bf16.gmra.mxu3 %v3549_v8  ;;  %v3865_v2 = vadd.f32 %v3783_v28, %v996_v33 }
 0x147   : > { %v1106_v62 = vpop.f32.mrf.mxu3 }
 0x148   : > { %v1040_v55 = vpop.f32.mrf.mxu1 }
 0x14a   : > { %v1064_v5 = vpop.f32.mrf.mxu2 }
 0x14b   : > { %v3872_v8 = vadd.f32 %v1098_v20, %v1064_v5  ;;  %v999_v28 = vpop.f32.mrf.mxu0  ;;  %v3886_v20 = vor.u32 %v2825_v14, %v2480_v23 }
 0x14c   : > { %v3877_v10 = vadd.f32 %v1033_v12, %v999_v28 }
 0x14e   : > { %1829 = vmatmul.bf16.gmra.mxu0 %v3507_v48 }
 0x14f   : > { %v1108_v31 = vpop.f32.mrf.mxu3  ;;  %1863 = vmatmul.bf16.gmra.mxu2 %v3582_v35 }
 0x150   : > { %v1621_v32 = vpop.f32.mrf.mxu1 }
 0x151   : > { %v1622_v12 = vadd.f32 %v1621_v32, %v3736_v18 }
 0x152   : > { %v1067_v34 = vpop.f32.mrf.mxu2 }
 0x153   : > { %v3892_v4 = vadd.f32 %v1101_v25, %v1067_v34  ;;  %2793 = vmatmul.msk.bf16.gmra.mxu1 %vm1596_vm1, %v3886_v20  ;;  %v1001_v48 = vpop.f32.mrf.mxu0  ;;  %v2041_v25 = vld [vmem:[%s4245_s5 + $0x48] sm:$0xff] }
 0x154   : > { %1805 = vmatmul.bf16.gmra.mxu3 %v3600_v42  ;;  %v3898_v35 = vadd.f32 %v3830_v26, %v1001_v48  ;;  %2089 = vperm.xlu1 %2975, %v2041_v25   ;;  %v2500_v42 = vld [vmem:[%s4242_s2 + $0xb0] sm:$0xf]  ;;  %v2830_v26 = vld [vmem:[%s4242_s2 + $0xc0] sm:$0xf0] }
 0x155   : > { %v3918_v49 = vor.u32 %v2830_v26, %v2500_v42 }
 0x157   : > { %v1655_v45 = vpop.f32.mrf.mxu3 }
 0x158   : > { %v3900_v40 = vadd.f32 %v1655_v45, %v1622_v12  ;;  %v1623_v18 = vpop.f32.mrf.mxu1 }
 0x159   : > { %v1624_v41 = vadd.f32 %v1623_v18, %v3767_v38 }
 0x15a   : > { %v1069_v30 = vpop.f32.mrf.mxu2 }
 0x15b   : > { %v3906_v0 = vadd.f32 %v1103_v60, %v1069_v30  ;;  %v1004_v46 = vpop.f32.mrf.mxu0 }
 0x15c   : > { %v3908_v47 = vadd.f32 %v1038_v29, %v1004_v46 }
 0x15e   : > { %1834 = vmatmul.bf16.gmra.mxu0 %v3553_v11 }
 0x15f   : > { %v1657_v38 = vpop.f32.mrf.mxu3  ;;  %1868 = vmatmul.bf16.gmra.mxu2 %v3649_v7 }
 0x160   : > { %v3920_v60 = vadd.f32 %v1657_v38, %v1624_v41  ;;  %v1626_v33 = vpop.f32.mrf.mxu1 }
 0x161   : > { %v1627_v29 = vadd.f32 %v1626_v33, %v3804_v61 }
 0x162   : > { %v1072_v58 = vpop.f32.mrf.mxu2 }
 0x163   : > { %v3926_v59 = vadd.f32 %v1106_v62, %v1072_v58  ;;  %2794 = vmatmul.msk.bf16.gmra.mxu1 %vm1596_vm1, %v3918_v49  ;;  %v1006_v11 = vpop.f32.mrf.mxu0 }
 0x164   : > { %1810 = vmatmul.bf16.gmra.mxu3 %v3674_v21  ;;  %v1041_v7 = vadd.f32 %v1040_v55, %v1006_v11 }
 0x167   : > { %v1660_v63 = vpop.f32.mrf.mxu3 }
 0x168   : > { %v3931_v5 = vadd.f32 %v1660_v63, %v1627_v29  ;;  %v1628_v28 = vpop.f32.mrf.mxu1 }
 0x169   : > { %v1629_v61 = vadd.f32 %v1628_v28, %v3828_v22 }
 0x16a   : > { %v1074_v23 = vpop.f32.mrf.mxu2 }
 0x16b   : > { %v3934_v14 = vadd.f32 %v1108_v31, %v1074_v23  ;;  %v1689_v15 = vpop.f32.mrf.mxu0 }
 0x16c   : > { %v1690_v28 = vadd.f32 %v1689_v15, %v3900_v40 }
 0x16e   : > { %1839 = vmatmul.bf16.gmra.mxu0 %v3604_v44 }
 0x16f   : > { %v1662_v62 = vpop.f32.mrf.mxu3  ;;  %1873 = vmatmul.bf16.gmra.mxu2 %v3725_v1 }
 0x170   : > { %v3938_v16 = vadd.f32 %v1662_v62, %v1629_v61  ;;  %v1631_v19 = vpop.f32.mrf.mxu1 }
 0x171   : > { %v1632_v21 = vadd.f32 %v1631_v19, %v3841_v57 }
 0x172   : > { %v1723_v55 = vpop.f32.mrf.mxu2 }
 0x173   : > { %1897 = vmatmul.bf16.vlgmr.msrb.gmra.mxu1 %v3584_v37  ;;  %v1691_v32 = vpop.f32.mrf.mxu0 }
 0x174   : > { %2796 = vmatmul.msk.bf16.vlgmr.msrb.gmra.mxu3 %vm1596_vm1, %v3814_v6  ;;  %v1692_v15 = vadd.f32 %v1691_v32, %v3920_v60 }
 0x177   : > { %v1665_v22 = vpop.f32.mrf.mxu3 }
 0x178   : > { %v3944_v31 = vadd.f32 %v1665_v22, %v1632_v21  ;;  %v1633_v12 = vpop.f32.mrf.mxu1 }
 0x179   : > { %v1634_v44 = vadd.f32 %v1633_v12, %v3865_v2  ;;  %v3961_v2 = vpop.permute.xlu1 %1974 }
 0x17a   : > { %v1725_v51 = vpop.f32.mrf.mxu2 }
 0x17b   : > { %v3947_v1 = vpop.f32.mrf.mxu0 }
 0x17e   : > { %1844 = vmatmul.bf16.gmra.mxu0 %v3678_v24 }
 0x17f   : > { %v1667_v34 = vpop.f32.mrf.mxu3  ;;  %1878 = vmatmul.bf16.gmra.mxu2 %v3794_v52 }
 0x180   : > { %v3951_v57 = vadd.f32 %v1667_v34, %v1634_v44  ;;  %v1636_v37 = vpop.f32.mrf.mxu1  ;;  %v1726_v34 = vadd.f32 %v1725_v51, %v1692_v15  ;;  %v1695_v51 = vadd.f32 %v3947_v1, %v3931_v5 }
 0x181   : > { %v1637_v48 = vadd.f32 %v1636_v37, %v3877_v10  ;;  %v3968_v10 = vpop.permute.xlu0 %1964  ;;  %v3975_v46 = vpop.permute.xlu1 %1979 }
 0x182   : > { %v3954_v6 = vpop.f32.mrf.mxu2 }
 0x183   : > { %1902 = vmatmul.bf16.gmra.mxu1 %v3652_v9  ;;  %v3957_v45 = vpop.f32.mrf.mxu0  ;;  %v3972_v9 = vpop.permute.xlu2 %1984 }
 0x184   : > { %2797 = vmatmul.msk.bf16.gmra.mxu3 %vm1596_vm1, %v3851_v27  ;;  %v1697_v5 = vadd.f32 %v3957_v45, %v3938_v16 }
 0x187   : > { %v1670_v24 = vpop.f32.mrf.mxu3 }
 0x188   : > { %v3963_v18 = vadd.f32 %v1670_v24, %v1637_v48  ;;  %v1638_v52 = vpop.f32.mrf.mxu1 }
 0x189   : > { %v1639_v41 = vadd.f32 %v1638_v52, %v3898_v35  ;;  %v3995_v11 = vpop.permute.xlu1 %1999 }
 0x18a   : > { %v3966_v25 = vpop.f32.mrf.mxu2 }
 0x18b   : > { %v3970_v30 = vpop.f32.mrf.mxu0  ;;  %v3991_v29 = vpop.permute.xlu2 %1989 }
 0x18c   : > { %v1700_v16 = vadd.f32 %v3970_v30, %v3944_v31 }
 0x18e   : > { %1892 = vmatmul.bf16.vlgmr.msrb.gmra.mxu0 %v3533_v3  ;;  %v3989_v3 = vpop.permute.xlu0 %1969 }
 0x18f   : > { %v1672_v27 = vpop.f32.mrf.mxu3  ;;  %2795 = vmatmul.msk.bf16.vlgmr.msrb.gmra.mxu2 %vm1596_vm1, %v3748_v43 }
 0x190   : > { %v3979_v42 = vadd.f32 %v1672_v27, %v1639_v41  ;;  %v1641_v26 = vpop.f32.mrf.mxu1 }
 0x191   : > { %v1642_v35 = vadd.f32 %v1641_v26, %v3908_v47 }
 0x192   : > { %v3982_v38 = vpop.f32.mrf.mxu2 }
 0x193   : > { %1907 = vmatmul.bf16.gmra.mxu1 %v3730_v13  ;;  %v3985_v33 = vpop.f32.mrf.mxu0  ;;  %v4006_v21 = vpop.permute.xlu2 %2004 }
 0x194   : > { %2798 = vmatmul.msk.bf16.gmra.mxu3 %vm1596_vm1, %v3886_v20  ;;  %v1724_v20 = vadd.f32 %v1723_v55, %v1690_v28  ;;  %v1702_v31 = vadd.f32 %v3985_v33, %v3951_v57 }
 0x196   : > { %v4002_v61 = vpop.permute.xlu0 %1994 }
 0x197   : > { %v1675_v43 = vpop.f32.mrf.mxu3 }
 0x198   : > { %v3993_v54 = vadd.f32 %v1675_v43, %v1642_v35  ;;  %v1643_v58 = vpop.f32.mrf.mxu1 }
 0x199   : > { %v1644_v47 = vadd.f32 %v1643_v58, %v1041_v7  ;;  %v4011_v7 = vpop.permute.xlu1 %2044 }
 0x19a   : > { %v3997_v63 = vpop.f32.mrf.mxu2 }
 0x19b   : > { %v3999_v13 = vpop.f32.mrf.mxu0 }
 0x19c   : > { %v1705_v57 = vadd.f32 %v3999_v13, %v3963_v18 }
 0x19f   : > { %v1677_v23 = vpop.f32.mrf.mxu3 }
 0x1a0   : > { %v4004_v62 = vadd.f32 %v1677_v23, %v1644_v47  ;;  %v1757_v19 = vpop.f32.mrf.mxu1 }
 0x1a1   : > { %v1758_v22 = vadd.f32 %v1757_v19, %v1724_v20  ;;  %v4056_v15 = vpop.permute.xlu1 %2059 }
 0x1a2   : > { %v4009_v12 = vpop.f32.mrf.mxu2 }
 0x1a3   : > { %v2012_v44 = vmul.f32 %v3968_v10, %v1758_v22  ;;  %1912 = vmatmul.bf16.gmra.mxu1 %v3799_v56  ;;  %v4015_v40 = vpop.f32.mrf.mxu0  ;;  %v4025_v56 = vpop.permute.xlu0 %2009 }
 0x1a4   : > { %2799 = vmatmul.msk.bf16.gmra.mxu3 %vm1596_vm1, %v3918_v49  ;;  %v4029_v49 = vpop.permute.xlu2 %2049 }
 0x1a5   : > { %v2092_v55 = vadd.f32 %v4011_v7, %v2012_v44 }
 0x1a7   : > { %2112 = vst [vmem:[%s4021_s26] sm:$0xff] %v2092_v55  ;;  %v1791_v37 = vpop.f32.mrf.mxu3 }
 0x1a8   : > { %v1792_v48 = vadd.f32 %v1791_v37, %v3761_v36  ;;  %v1759_v24 = vpop.f32.mrf.mxu1  ;;  %v1729_v36 = vadd.f32 %v3954_v6, %v1695_v51  ;;  %v1731_v6 = vadd.f32 %v3966_v25, %v1697_v5  ;;  %v1734_v25 = vadd.f32 %v3982_v38, %v1700_v16 }
 0x1a9   : > { %v1760_v52 = vadd.f32 %v1759_v24, %v1726_v34  ;;  %v1736_v38 = vadd.f32 %v3997_v63, %v1702_v31  ;;  %v1739_v63 = vadd.f32 %v4009_v12, %v1705_v57 }
 0x1aa   : > { %v4027_v41 = vpop.f32.mrf.mxu2 }
 0x1ab   : > { %v2014_v60 = vmul.f32 %v3989_v3, %v1760_v52  ;;  %v4032_v32 = vpop.f32.mrf.mxu0  ;;  %v4042_v28 = vpop.permute.xlu0 %2054 }
 0x1ad   : > { %v2094_v27 = vadd.f32 %v4029_v49, %v2014_v60 }
 0x1af   : > { %2114 = vst [vmem:[%s4021_s26 + $0x10] sm:$0xff] %v2094_v27  ;;  %v1793_v26 = vpop.f32.mrf.mxu3  ;;  %v4066_v27 = vpop.permute.xlu2 %2064 }
 0x1b0   : > { %v1794_v35 = vadd.f32 %v1793_v26, %v3797_v53  ;;  %v1762_v43 = vpop.f32.mrf.mxu1 }
 0x1b1   : > { %v1763_v58 = vadd.f32 %v1762_v43, %v1729_v36 }
 0x1b2   : > { %v4040_v47 = vpop.f32.mrf.mxu2 }
 0x1b3   : > { %v2016_v20 = vmul.f32 %v3961_v2, %v1763_v58  ;;  %v4045_v23 = vpop.f32.mrf.mxu0 }
 0x1b5   : > { %v2096_v1 = vadd.f32 %v4042_v28, %v2016_v20 }
 0x1b7   : > { %2116 = vst [vmem:[%s4021_s26 + $0x20] sm:$0xff] %v2096_v1  ;;  %v4052_v53 = vpop.f32.mrf.mxu3 }
 0x1b8   : > { %v1764_v19 = vpop.f32.mrf.mxu1 }
 0x1b9   : > { %v1765_v22 = vadd.f32 %v1764_v19, %v1731_v6  ;;  %v4078_v6 = vpop.permute.xlu0 %2069 }
 0x1ba   : > { %v4054_v44 = vpop.f32.mrf.mxu2 }
 0x1bb   : > { %v2018_v55 = vmul.f32 %v3975_v46, %v1765_v22  ;;  %v1825_v34 = vpop.f32.mrf.mxu0 }
 0x1bc   : > { %v1826_v37 = vadd.f32 %v1825_v34, %v1792_v48 }
 0x1bd   : > { %v2098_v45 = vadd.f32 %v4056_v15, %v2018_v55 }
 0x1bf   : > { %2118 = vst [vmem:[%s4021_s26 + $0x30] sm:$0xff] %v2098_v45  ;;  %v4064_v24 = vpop.f32.mrf.mxu3  ;;  %v4090_v45 = vpop.permute.xlu1 %2074 }
 0x1c0   : > { %v1767_v52 = vpop.f32.mrf.mxu1 }
 0x1c1   : > { %v1768_v60 = vadd.f32 %v1767_v52, %v1734_v25 }
 0x1c2   : > { %v1859_v51 = vpop.f32.mrf.mxu2 }
 0x1c3   : > { %v2020_v36 = vmul.f32 %v3972_v9, %v1768_v60  ;;  %v4069_v26 = vadd.f32 %v1859_v51, %v1826_v37  ;;  %v1827_v48 = vpop.f32.mrf.mxu0  ;;  %v1707_v60 = vadd.f32 %v4015_v40, %v3979_v42 }
 0x1c4   : > { %v1828_v43 = vadd.f32 %v1827_v48, %v1794_v35 }
 0x1c5   : > { %v2100_v30 = vadd.f32 %v4066_v27, %v2020_v36  ;;  %v1741_v13 = vadd.f32 %v4027_v41, %v1707_v60 }
 0x1c7   : > { %2120 = vst [vmem:[%s4021_s26 + $0x40] sm:$0xff] %v2100_v30  ;;  %v4076_v58 = vpop.f32.mrf.mxu3  ;;  %v4120_v60 = vpop.permute.xlu1 %2089 }
 0x1c8   : > { %v1769_v20 = vpop.f32.mrf.mxu1 }
 0x1c9   : > { %v1770_v5 = vadd.f32 %v1769_v20, %v1736_v38  ;;  %v1710_v38 = vadd.f32 %v4032_v32, %v3993_v54 }
 0x1ca   : > { %v1861_v1 = vpop.f32.mrf.mxu2 }
 0x1cb   : > { %v2022_v19 = vmul.f32 %v3991_v29, %v1770_v5  ;;  %v4081_v22 = vadd.f32 %v1861_v1, %v1828_v43  ;;  %v1830_v35 = vpop.f32.mrf.mxu0  ;;  %v4100_v43 = vpop.permute.xlu2 %2079  ;;  %v1744_v40 = vadd.f32 %v4040_v47, %v1710_v38 }
 0x1cd   : > { %v2102_v33 = vadd.f32 %v4078_v6, %v2022_v19  ;;  %v4110_v19 = vpop.permute.xlu0 %2084 }
 0x1cf   : > { %2122 = vst [vmem:[%s4021_s26 + $0x50] sm:$0xff] %v2102_v33  ;;  %v4088_v55 = vpop.f32.mrf.mxu3 }
 0x1d0   : > { %v1772_v34 = vpop.f32.mrf.mxu1 }
 0x1d1   : > { %v1773_v37 = vadd.f32 %v1772_v34, %v1739_v63  ;;  %v1712_v63 = vadd.f32 %v4045_v23, %v4004_v62  ;;  %v1797_v62 = vadd.f32 %v4052_v53, %v3822_v17 }
 0x1d2   : > { %v1864_v16 = vpop.f32.mrf.mxu2 }
 0x1d3   : > { %v2024_v25 = vmul.f32 %v4002_v61, %v1773_v37  ;;  %v1832_v52 = vpop.f32.mrf.mxu0  ;;  %v1746_v32 = vadd.f32 %v4054_v44, %v1712_v63  ;;  %v1831_v44 = vadd.f32 %v1830_v35, %v1797_v62 }
 0x1d5   : > { %v2104_v18 = vadd.f32 %v4090_v45, %v2024_v25 }
 0x1d7   : > { %2124 = vst [vmem:[%s4021_s26 + $0x60] sm:$0xff] %v2104_v18  ;;  %v4098_v12 = vpop.f32.mrf.mxu3 }
 0x1d8   : > { %v1774_v51 = vpop.f32.mrf.mxu1 }
 0x1d9   : > { %v1775_v36 = vadd.f32 %v1774_v51, %v1741_v13 }
 0x1da   : > { %v1866_v48 = vpop.f32.mrf.mxu2 }
 0x1db   : > { %v2026_v31 = vmul.f32 %v3995_v11, %v1775_v36  ;;  %v1835_v30 = vpop.f32.mrf.mxu0 }
 0x1dd   : > { %v2106_v42 = vadd.f32 %v4100_v43, %v2026_v31 }
 0x1df   : > { %2126 = vst [vmem:[%s4021_s26 + $0x70] sm:$0xff] %v2106_v42  ;;  %v4108_v41 = vpop.f32.mrf.mxu3  ;;  %v1865_v42 = vadd.f32 %v1864_v16, %v1831_v44 }
 0x1e0   : > { %v1777_v20 = vpop.f32.mrf.mxu1 }
 0x1e1   : > { %v1778_v5 = vadd.f32 %v1777_v20, %v1744_v40 }
 0x1e2   : > { %v1869_v1 = vpop.f32.mrf.mxu2 }
 0x1e3   : > { %v2028_v57 = vmul.f32 %v4006_v21, %v1778_v5  ;;  %v1837_v33 = vpop.f32.mrf.mxu0  ;;  %v1799_v5 = vadd.f32 %v4064_v24, %v3838_v39 }
 0x1e5   : > { %v2108_v54 = vadd.f32 %v4110_v19, %v2028_v57 }
 0x1e7   : > { %2128 = vst [vmem:[%s4021_s26 + $0x80] sm:$0xff] %v2108_v54  ;;  %v4118_v47 = vpop.f32.mrf.mxu3  ;;  %v1833_v54 = vadd.f32 %v1832_v52, %v1799_v5 }
 0x1e8   : > { %v1779_v34 = vpop.f32.mrf.mxu1 }
 0x1e9   : > { %v1780_v37 = vadd.f32 %v1779_v34, %v1746_v32  ;;  %v1867_v17 = vadd.f32 %v1866_v48, %v1833_v54 }
 0x1ea   : > { %v1871_v25 = vpop.f32.mrf.mxu2 }
 0x1eb   : > { %v2030_v18 = vmul.f32 %v4025_v56, %v1780_v37  ;;  %v1840_v13 = vpop.f32.mrf.mxu0 }
 0x1ed   : > { %v2110_v51 = vadd.f32 %v4120_v60, %v2030_v18  ;;  %v1802_v18 = vadd.f32 %v4076_v58, %v3859_v50 }
 0x1ef   : > { %2130 = vst [vmem:[%s4021_s26 + $0x90] sm:$0xff] %v2110_v51  ;;  %v4125_v36 = vpop.f32.mrf.mxu3  ;;  %v1836_v24 = vadd.f32 %v1835_v30, %v1802_v18 }
 0x1f0   : > { %v1898_v23 = vpop.f32.mrf.mxu1 }
 0x1f1   : > { %v1899_v40 = vadd.f32 %v1898_v23, %v1865_v42  ;;  %v1870_v23 = vadd.f32 %v1869_v1, %v1836_v24  ;;  %v1804_v42 = vadd.f32 %v4088_v55, %v3872_v8 }
 0x1f2   : > { %v1874_v31 = vpop.f32.mrf.mxu2 }
 0x1f3   : > { %v1842_v38 = vpop.f32.mrf.mxu0  ;;  %v1838_v58 = vadd.f32 %v1837_v33, %v1804_v42 }
 0x1f7   : > { %v1932_v20 = vpop.f32.mrf.mxu3 }
 0x1f8   : > { %v1933_v57 = vadd.f32 %v1932_v20, %v1899_v40  ;;  %v1900_v63 = vpop.f32.mrf.mxu1 }
 0x1f9   : > { %v1901_v35 = vadd.f32 %v1900_v63, %v1867_v17  ;;  %v1807_v63 = vadd.f32 %v4098_v12, %v3892_v4 }
 0x1fa   : > { %v2017_v32 = vmul.f32 %v3961_v2, %v1933_v57  ;;  %v1876_v34 = vpop.f32.mrf.mxu2 }
 0x1fb   : > { %v4132_v37 = vpop.f32.mrf.mxu0  ;;  %v1841_v55 = vadd.f32 %v1840_v13, %v1807_v63  ;;  %v2182_v63 = vld [vmem:[%s4021_s26 + $0x70] sm:$0xff] (%p3071_p5) }
 0x1fc   : > { %v2097_v53 = vadd.f32 %v4042_v28, %v2017_v32  ;;  %2183 = vst [vmem:[%s4190_s30 + $0xe0] sm:$0xff] (%p3071_p5), %v2182_v63 }
 0x1fd   : > { %v1875_v17 = vadd.f32 %v1874_v31, %v1841_v55  ;;  %v2190_v55 = vld [vmem:[%s4021_s26 + $0x90] sm:$0xff] (%p3071_p5) }
 0x1fe   : > { %2117 = vst [vmem:[%s4021_s26 + $0x28] sm:$0xff] %v2097_v53 }
 0x1ff   : > { %v1934_v16 = vpop.f32.mrf.mxu3  ;;  %2191 = vst [vmem:[%s4190_s30 + $0x120] sm:$0xff] (%p3071_p5), %v2190_v55 }
 0x200   : > { %v1935_v51 = vadd.f32 %v1934_v16, %v1901_v35  ;;  %v1903_v39 = vpop.f32.mrf.mxu1 }
 0x201   : > { %v1904_v28 = vadd.f32 %v1903_v39, %v1870_v23  ;;  %v1812_v23 = vadd.f32 %v4118_v47, %v3926_v59 }
 0x202   : > { %v2019_v52 = vmul.f32 %v3975_v46, %v1935_v51  ;;  %v1879_v62 = vpop.f32.mrf.mxu2  ;;  %v1872_v46 = vadd.f32 %v1871_v25, %v1838_v58 }
 0x203   : > { %v4139_v2 = vpop.f32.mrf.mxu0 }
 0x204   : > { %v2099_v48 = vadd.f32 %v4056_v15, %v2019_v52 }
 0x206   : > { %2119 = vst [vmem:[%s4021_s26 + $0x38] sm:$0xff] %v2099_v48 }
 0x207   : > { %v1937_v44 = vpop.f32.mrf.mxu3 }
 0x208   : > { %v1938_v40 = vadd.f32 %v1937_v44, %v1904_v28  ;;  %v1905_v50 = vpop.f32.mrf.mxu1 }
 0x209   : > { %v1906_v1 = vadd.f32 %v1905_v50, %v1872_v46 }
 0x20a   : > { %v2021_v30 = vmul.f32 %v3972_v9, %v1938_v40  ;;  %v1881_v20 = vpop.f32.mrf.mxu2 }
 0x20b   : > { %v1893_v57 = vpop.f32.mrf.mxu0 }
 0x20c   : > { %v2101_v5 = vadd.f32 %v4066_v27, %v2021_v30  ;;  %v1894_v8 = vadd.f32 %v1893_v57, %v4069_v26  ;;  %v1809_v26 = vadd.f32 %v4108_v41, %v3906_v0 }
 0x20d   : > { %v2168_v30 = vld [vmem:[%s4021_s26 + $0x38] sm:$0xff] (%p3071_p5) }
 0x20e   : > { %2121 = vst [vmem:[%s4021_s26 + $0x48] sm:$0xff] %v2101_v5  ;;  %v1843_v31 = vadd.f32 %v1842_v38, %v1809_v26  ;;  %v1846_v38 = vadd.f32 %v4132_v37, %v1812_v23  ;;  %v2174_v5 = vld [vmem:[%s4021_s26 + $0x50] sm:$0xff] (%p3071_p5) }
 0x20f   : > { %v1939_v15 = vpop.f32.mrf.mxu3  ;;  %2169 = vst [vmem:[%s4190_s30 + $0x68] sm:$0xff] (%p3071_p5), %v2168_v30 }
 0x210   : > { %v1940_v54 = vadd.f32 %v1939_v15, %v1906_v1  ;;  %v1908_v32 = vpop.f32.mrf.mxu1  ;;  %v1877_v39 = vadd.f32 %v1876_v34, %v1843_v31  ;;  %v1880_v48 = vadd.f32 %v1879_v62, %v1846_v38  ;;  %v2178_v1 = vld [vmem:[%s4021_s26 + $0x60] sm:$0xff] (%p3071_p5)  ;;  %2175 = vst [vmem:[%s4190_s30 + $0xa0] sm:$0xff] (%p3071_p5), %v2174_v5 }
 0x211   : > { %v1909_v35 = vadd.f32 %v1908_v32, %v1875_v17  ;;  %2179 = vst [vmem:[%s4190_s30 + $0xc0] sm:$0xff] (%p3071_p5), %v2178_v1  ;;  %v2186_v32 = vld [vmem:[%s4021_s26 + $0x80] sm:$0xff] (%p3071_p5) }
 0x212   : > { %v2023_v9 = vmul.f32 %v3991_v29, %v1940_v54  ;;  %v1927_v33 = vpop.f32.mrf.mxu2  ;;  %2187 = vst [vmem:[%s4190_s30 + $0x100] sm:$0xff] (%p3071_p5), %v2186_v32 }
 0x213   : > { %v1928_v25 = vadd.f32 %v1927_v33, %v1894_v8  ;;  %v1895_v16 = vpop.f32.mrf.mxu0 }
 0x214   : > { %v2103_v27 = vadd.f32 %v4078_v6, %v2023_v9  ;;  %v1896_v29 = vadd.f32 %v1895_v16, %v4081_v22 }
 0x215   : > { %v2013_v53 = vmul.f32 %v3968_v10, %v1928_v25  ;;  %v2172_v46 = vld [vmem:[%s4021_s26 + $0x48] sm:$0xff] (%p3071_p5) }
 0x216   : > { %2123 = vst [vmem:[%s4021_s26 + $0x58] sm:$0xff] %v2103_v27 }
 0x217   : > { %v2093_v4 = vadd.f32 %v4011_v7, %v2013_v53  ;;  %v1942_v12 = vpop.f32.mrf.mxu3  ;;  %2173 = vst [vmem:[%s4190_s30 + $0x88] sm:$0xff] (%p3071_p5), %v2172_v46 }
 0x218   : > { %v1943_v13 = vadd.f32 %v1942_v12, %v1909_v35  ;;  %v1910_v18 = vpop.f32.mrf.mxu1 }
 0x219   : > { %2113 = vst [vmem:[%s4021_s26 + $0x8] sm:$0xff] %v2093_v4  ;;  %v1911_v52 = vadd.f32 %v1910_v18, %v1877_v39 }
 0x21a   : > { %v2025_v6 = vmul.f32 %v4002_v61, %v1943_v13  ;;  %v1929_v10 = vpop.f32.mrf.mxu2 }
 0x21b   : > { %v1930_v51 = vadd.f32 %v1929_v10, %v1896_v29 }
 0x21c   : > { %v2105_v24 = vadd.f32 %v4090_v45, %v2025_v6 }
 0x21d   : > { %v2015_v7 = vmul.f32 %v3989_v3, %v1930_v51  ;;  %v2176_v57 = vld [vmem:[%s4021_s26 + $0x58] sm:$0xff] (%p3071_p5) }
 0x21e   : > { %2125 = vst [vmem:[%s4021_s26 + $0x68] sm:$0xff] %v2105_v24 }
 0x21f   : > { %v2095_v0 = vadd.f32 %v4029_v49, %v2015_v7  ;;  %v1944_v41 = vpop.f32.mrf.mxu3  ;;  %v1814_v49 = vadd.f32 %v4125_v36, %v3934_v14  ;;  %v2154_v14 = vld [vmem:[%s4021_s26] sm:$0xff] (%p3071_p5)  ;;  %v2164_v36 = vld [vmem:[%s4021_s26 + $0x28] sm:$0xff] (%p3071_p5)  ;;  %2177 = vst [vmem:[%s4190_s30 + $0xa8] sm:$0xff] (%p3071_p5), %v2176_v57 }
 0x220   : > { %v1945_v22 = vadd.f32 %v1944_v41, %v1911_v52  ;;  %v1913_v61 = vpop.f32.mrf.mxu1  ;;  %2155 = vst [vmem:[%s4190_s30] sm:$0xff] (%p3071_p5), %v2154_v14 }
 0x221   : > { %2115 = vst [vmem:[%s4021_s26 + $0x18] sm:$0xff] %v2095_v0  ;;  %v1914_v3 = vadd.f32 %v1913_v61, %v1880_v48  ;;  %v1848_v59 = vadd.f32 %v4139_v2, %v1814_v49  ;;  %v2166_v2 = vld [vmem:[%s4021_s26 + $0x30] sm:$0xff] (%p3071_p5) }
 0x222   : > { %v2027_v34 = vmul.f32 %v3995_v11, %v1945_v22  ;;  %2165 = vst [vmem:[%s4190_s30 + $0x48] sm:$0xff] (%p3071_p5), %v2164_v36 }
 0x223   : > { %v1882_v40 = vadd.f32 %v1881_v20, %v1848_v59  ;;  %v2170_v20 = vld [vmem:[%s4021_s26 + $0x40] sm:$0xff] (%p3071_p5)  ;;  %2167 = vst [vmem:[%s4190_s30 + $0x60] sm:$0xff] (%p3071_p5), %v2166_v2 }
 0x224   : > { %v2107_v45 = vadd.f32 %v4100_v43, %v2027_v34  ;;  %2171 = vst [vmem:[%s4190_s30 + $0x80] sm:$0xff] (%p3071_p5), %v2170_v20 }
 0x225   : > { %v2180_v15 = vld [vmem:[%s4021_s26 + $0x68] sm:$0xff] (%p3071_p5) }
 0x226   : > { %2127 = vst [vmem:[%s4021_s26 + $0x78] sm:$0xff] %v2107_v45 }
 0x227   : > { %v1947_v28 = vpop.f32.mrf.mxu3  ;;  %2181 = vst [vmem:[%s4190_s30 + $0xc8] sm:$0xff] (%p3071_p5), %v2180_v15 }
 0x228   : > { %v1948_v44 = vadd.f32 %v1947_v28, %v1914_v3  ;;  %v1915_v42 = vpop.f32.mrf.mxu1 }
 0x229   : > { %v1916_v11 = vadd.f32 %v1915_v42, %v1882_v40 }
 0x22a   : > { %v2029_v47 = vmul.f32 %v4006_v21, %v1948_v44  ;;  %v2156_v21 = vld [vmem:[%s4021_s26 + $0x8] sm:$0xff] (%p3071_p5) }
 0x22b   : > { %2157 = vst [vmem:[%s4190_s30 + $0x8] sm:$0xff] (%p3071_p5), %v2156_v21 }
 0x22c   : > { %v2109_v37 = vadd.f32 %v4110_v19, %v2029_v47  ;;  %v2160_v19 = vld [vmem:[%s4021_s26 + $0x18] sm:$0xff] (%p3071_p5) }
 0x22d   : > { %2161 = vst [vmem:[%s4190_s30 + $0x28] sm:$0xff] (%p3071_p5), %v2160_v19  ;;  %v2184_v54 = vld [vmem:[%s4021_s26 + $0x78] sm:$0xff] (%p3071_p5) }
 0x22e   : > { %2129 = vst [vmem:[%s4021_s26 + $0x88] sm:$0xff] %v2109_v37 }
 0x22f   : > { %v1949_v62 = vpop.f32.mrf.mxu3  ;;  %2185 = vst [vmem:[%s4190_s30 + $0xe8] sm:$0xff] (%p3071_p5), %v2184_v54 }
 0x230   : > { %v1950_v43 = vadd.f32 %v1949_v62, %v1916_v11 }
 0x232   : > { %v2031_v50 = vmul.f32 %v4025_v56, %v1950_v43  ;;  %2138 = sbr.rel (!%p3071_p5) target bundleno = 575 (0x23f), region = 124  ;;  %v2158_v56 = vld [vmem:[%s4021_s26 + $0x10] sm:$0xff] (%p3071_p5) }
 0x233   : > { %2159 = vst [vmem:[%s4190_s30 + $0x20] sm:$0xff] (%p3071_p5), %v2158_v56 }
 0x234   : > { %v2111_v58 = vadd.f32 %v4120_v60, %v2031_v50  ;;  %v2162_v60 = vld [vmem:[%s4021_s26 + $0x20] sm:$0xff] (%p3071_p5) }
 0x235   : > { %2163 = vst [vmem:[%s4190_s30 + $0x40] sm:$0xff] (%p3071_p5), %v2162_v60  ;;  %v2188_v8 = vld [vmem:[%s4021_s26 + $0x88] sm:$0xff] (%p3071_p5) }
 0x236   : > { %2131 = vst [vmem:[%s4021_s26 + $0x98] sm:$0xff] %v2111_v58 }
 0x237   : > { %2189 = vst [vmem:[%s4190_s30 + $0x108] sm:$0xff] %v2188_v8 }
 0x23d   : > { %v2192_v9 = vld [vmem:[%s4021_s26 + $0x98] sm:$0xff] }
 0x23e   : > { %2193 = vst [vmem:[%s4190_s30 + $0x128] sm:$0xff] %v2192_v9 }
 0x23f PF: > { %p13_p10 = scmp.ge.s32.totalorder %s3054_s25, 4   ;;  %s4249_s21 = smov %s2995_s22 }
 0x240   : > { %s4250_s22 = smov %s3065_s28  ;;  %s4251_s23 = smov %s3054_s25 }
 0x241   :  { %15 = sbr.rel (!%p13_p10) target bundleno = 2 (0x2), region = 186 }

// kernel: cfm_forward.14
= control target key start
LH: loop header
LB: loop body
LE: loop exit
PB: predicated region body
PF: predicated region fallthrough
CT: control target
= control target key end

     0   :  { %s2035_s15 = smov 0   ;;  %s2037_s16 = smov 0   ;;  %s2549_s0 = inlined_call_operand.vmem [shape: bf16[720,512], index: 0, kind: input, shape index: {}]   ;;  %s2550_s1 = inlined_call_operand.vmem [shape: bf16[16,720], index: 1, kind: input, shape index: {}]   ;;  %s2551_s2 = inlined_call_operand.vmem [shape: f32[16,1], index: 2, kind: input, shape index: {}]   ;;  %s2552_s3 = inlined_call_operand.vmem [shape: f32[16,1], index: 3, kind: input, shape index: {}]   ;;  %s2553_s4 = inlined_call_operand.vmem [shape: f32[16,512], index: 4, kind: output, shape index: {}]  }
   0x1   :  { %s2039_s17 = smov 0  }
   0x2 LB: > { %s1459_s18 = sadd.s32 4294967295, %s2007_s17   ;;  %s2052_s19 = sadd.s32 1, %s2007_s17   ;;  %s2007_s17 = sphi %s2039_s17, %s2557_s17   ;;  %s2003_s16 = sphi %s2037_s16, %s2556_s16   ;;  %s1999_s15 = sphi %s2035_s15, %s2555_s15  }
   0x3   : > { %s18_s20 = ssub.s32 %s2007_s17, %s2052_s19  ;;  %s21_s21 = sadd.s32 1, %s2003_s16 }
   0x4   : > { %p19_p0 = scmp.eq.s32.totalorder %s18_s20, 0  ;;  %p28_p1 = scmp.ne.s32.totalorder %s2003_s16, %s1999_s15 }
   0x5   : > { %p29_p2 = scmp.eq.s32.totalorder %s2007_s17, 0  ;;  %p121_p3 = scmp.eq.s32.totalorder %s1459_s18, 1 }
   0x6   : > { %s2063_s22 = scalar_select %p19_p0, %s2003_s16, %s21_s21  }
   0x7   : > { %p30_p4 = por %p29_p2, %p28_p1  ;;  %p2065_p5 = por %p121_p3, %p28_p1 }
   0x8   : > { %p1462_p6 = scmp.ge.s32.totalorder %s2007_s17, 2 }
   0xa   : > { %152 = sbr.rel (%p1462_p6) target bundleno = 109 (0x6d), region = 28 }
   0xf   : > { %155 = sbr.rel (!%p30_p4) target bundleno = 109 (0x6d), region = 32  ;;  %s157_s24 = sand.u32 (%p30_p4), 1, %s2003_s16  }
  0x10   : > { %s1858_s25 = sshll.u32 (%p30_p4), %s2007_s17, 3  ;;  %s1956_s26 = smul.u32 (%p30_p4), 720, %s157_s24 }
  0x11   : > { %s2075_s29 = scalar_lea.vmem (%p30_p4), %s2549_s0, %s1858_s25 }
  0x12   : > { %v369_v0 = vld [vmem:[%s2075_s29] sm:$0xff] (%p30_p4)  ;;  %v371_v1 = vld [vmem:[%s2075_s29 + $0x10] sm:$0xff] (%p30_p4)  ;;  %s2080_s30 = scalar_lea.vmem (%p30_p4), [#allocation2], %s1956_s26 }
  0x13   : > { %v373_v2 = vld [vmem:[%s2075_s29 + $0x20] sm:$0xff] (%p30_p4)  ;;  %370 = vst [vmem:[%s2080_s30] sm:$0xff] (%p30_p4), %v369_v0  ;;  %v375_v3 = vld [vmem:[%s2075_s29 + $0x30] sm:$0xff] (%p30_p4) }
  0x14   : > { %372 = vst [vmem:[%s2080_s30 + $0x8] sm:$0xff] %v371_v1  ;;  %v377_v4 = vld [vmem:[%s2075_s29 + $0x40] sm:$0xff]  ;;  %v379_v5 = vld [vmem:[%s2075_s29 + $0x50] sm:$0xff] }
  0x15   : > { %374 = vst [vmem:[%s2080_s30 + $0x10] sm:$0xff] %v373_v2  ;;  %v381_v6 = vld [vmem:[%s2075_s29 + $0x60] sm:$0xff]  ;;  %v383_v7 = vld [vmem:[%s2075_s29 + $0x70] sm:$0xff] }
  0x16   : > { %376 = vst [vmem:[%s2080_s30 + $0x18] sm:$0xff] %v375_v3  ;;  %v385_v8 = vld [vmem:[%s2075_s29 + $0x80] sm:$0xff]  ;;  %v387_v9 = vld [vmem:[%s2075_s29 + $0x90] sm:$0xff] }
  0x17   : > { %378 = vst [vmem:[%s2080_s30 + $0x20] sm:$0xff] %v377_v4  ;;  %v389_v10 = vld [vmem:[%s2075_s29 + $0xa0] sm:$0xff]  ;;  %v391_v11 = vld [vmem:[%s2075_s29 + $0xb0] sm:$0xff] }
  0x18   : > { %380 = vst [vmem:[%s2080_s30 + $0x28] sm:$0xff] %v379_v5  ;;  %v393_v12 = vld [vmem:[%s2075_s29 + $0xc0] sm:$0xff]  ;;  %v395_v13 = vld [vmem:[%s2075_s29 + $0xd0] sm:$0xff] }
  0x19   : > { %382 = vst [vmem:[%s2080_s30 + $0x30] sm:$0xff] %v381_v6  ;;  %v397_v14 = vld [vmem:[%s2075_s29 + $0xe0] sm:$0xff]  ;;  %v399_v15 = vld [vmem:[%s2075_s29 + $0xf0] sm:$0xff] }
  0x1a   : > { %384 = vst [vmem:[%s2080_s30 + $0x38] sm:$0xff] %v383_v7  ;;  %v401_v16 = vld [vmem:[%s2075_s29 + $0x100] sm:$0xff]  ;;  %v403_v17 = vld [vmem:[%s2075_s29 + $0x110] sm:$0xff] }
  0x1b   : > { %386 = vst [vmem:[%s2080_s30 + $0x40] sm:$0xff] %v385_v8  ;;  %v405_v18 = vld [vmem:[%s2075_s29 + $0x120] sm:$0xff]  ;;  %v407_v19 = vld [vmem:[%s2075_s29 + $0x130] sm:$0xff] }
  0x1c   : > { %388 = vst [vmem:[%s2080_s30 + $0x48] sm:$0xff] %v387_v9  ;;  %v409_v20 = vld [vmem:[%s2075_s29 + $0x140] sm:$0xff]  ;;  %v411_v21 = vld [vmem:[%s2075_s29 + $0x150] sm:$0xff] }
  0x1d   : > { %390 = vst [vmem:[%s2080_s30 + $0x50] sm:$0xff] %v389_v10  ;;  %v413_v22 = vld [vmem:[%s2075_s29 + $0x160] sm:$0xff]  ;;  %v415_v23 = vld [vmem:[%s2075_s29 + $0x170] sm:$0xff] }
  0x1e   : > { %392 = vst [vmem:[%s2080_s30 + $0x58] sm:$0xff] %v391_v11  ;;  %v417_v24 = vld [vmem:[%s2075_s29 + $0x180] sm:$0xff]  ;;  %v419_v25 = vld [vmem:[%s2075_s29 + $0x190] sm:$0xff] }
  0x1f   : > { %394 = vst [vmem:[%s2080_s30 + $0x60] sm:$0xff] %v393_v12  ;;  %v421_v26 = vld [vmem:[%s2075_s29 + $0x1a0] sm:$0xff]  ;;  %v423_v27 = vld [vmem:[%s2075_s29 + $0x1b0] sm:$0xff] }
  0x20   : > { %396 = vst [vmem:[%s2080_s30 + $0x68] sm:$0xff] %v395_v13  ;;  %v425_v28 = vld [vmem:[%s2075_s29 + $0x1c0] sm:$0xff]  ;;  %v427_v29 = vld [vmem:[%s2075_s29 + $0x1d0] sm:$0xff] }
  0x21   : > { %398 = vst [vmem:[%s2080_s30 + $0x70] sm:$0xff] %v397_v14  ;;  %v429_v30 = vld [vmem:[%s2075_s29 + $0x1e0] sm:$0xff]  ;;  %v431_v31 = vld [vmem:[%s2075_s29 + $0x1f0] sm:$0xff] }
  0x22   : > { %400 = vst [vmem:[%s2080_s30 + $0x78] sm:$0xff] %v399_v15  ;;  %v433_v32 = vld [vmem:[%s2075_s29 + $0x200] sm:$0xff]  ;;  %v435_v33 = vld [vmem:[%s2075_s29 + $0x210] sm:$0xff] }
  0x23   : > { %402 = vst [vmem:[%s2080_s30 + $0x80] sm:$0xff] %v401_v16  ;;  %v437_v34 = vld [vmem:[%s2075_s29 + $0x220] sm:$0xff]  ;;  %v439_v35 = vld [vmem:[%s2075_s29 + $0x230] sm:$0xff] }
  0x24   : > { %404 = vst [vmem:[%s2080_s30 + $0x88] sm:$0xff] %v403_v17  ;;  %v441_v36 = vld [vmem:[%s2075_s29 + $0x240] sm:$0xff]  ;;  %v443_v37 = vld [vmem:[%s2075_s29 + $0x250] sm:$0xff] }
  0x25   : > { %406 = vst [vmem:[%s2080_s30 + $0x90] sm:$0xff] %v405_v18  ;;  %v445_v38 = vld [vmem:[%s2075_s29 + $0x260] sm:$0xff]  ;;  %v447_v39 = vld [vmem:[%s2075_s29 + $0x270] sm:$0xff] }
  0x26   : > { %408 = vst [vmem:[%s2080_s30 + $0x98] sm:$0xff] %v407_v19  ;;  %v449_v40 = vld [vmem:[%s2075_s29 + $0x280] sm:$0xff]  ;;  %v451_v41 = vld [vmem:[%s2075_s29 + $0x290] sm:$0xff] }
  0x27   : > { %410 = vst [vmem:[%s2080_s30 + $0xa0] sm:$0xff] %v409_v20  ;;  %v453_v42 = vld [vmem:[%s2075_s29 + $0x2a0] sm:$0xff]  ;;  %v455_v43 = vld [vmem:[%s2075_s29 + $0x2b0] sm:$0xff] }
  0x28   : > { %412 = vst [vmem:[%s2080_s30 + $0xa8] sm:$0xff] %v411_v21  ;;  %v457_v44 = vld [vmem:[%s2075_s29 + $0x2c0] sm:$0xff]  ;;  %v459_v45 = vld [vmem:[%s2075_s29 + $0x2d0] sm:$0xff] }
  0x29   : > { %414 = vst [vmem:[%s2080_s30 + $0xb0] sm:$0xff] %v413_v22  ;;  %v461_v46 = vld [vmem:[%s2075_s29 + $0x2e0] sm:$0xff]  ;;  %v463_v47 = vld [vmem:[%s2075_s29 + $0x2f0] sm:$0xff] }
  0x2a   : > { %416 = vst [vmem:[%s2080_s30 + $0xb8] sm:$0xff] %v415_v23  ;;  %v465_v48 = vld [vmem:[%s2075_s29 + $0x300] sm:$0xff]  ;;  %v467_v49 = vld [vmem:[%s2075_s29 + $0x310] sm:$0xff] }
  0x2b   : > { %418 = vst [vmem:[%s2080_s30 + $0xc0] sm:$0xff] %v417_v24  ;;  %v469_v50 = vld [vmem:[%s2075_s29 + $0x320] sm:$0xff]  ;;  %v471_v51 = vld [vmem:[%s2075_s29 + $0x330] sm:$0xff] }
  0x2c   : > { %420 = vst [vmem:[%s2080_s30 + $0xc8] sm:$0xff] %v419_v25  ;;  %v473_v52 = vld [vmem:[%s2075_s29 + $0x340] sm:$0xff]  ;;  %v475_v53 = vld [vmem:[%s2075_s29 + $0x350] sm:$0xff] }
  0x2d   : > { %422 = vst [vmem:[%s2080_s30 + $0xd0] sm:$0xff] %v421_v26  ;;  %v477_v54 = vld [vmem:[%s2075_s29 + $0x360] sm:$0xff]  ;;  %v479_v55 = vld [vmem:[%s2075_s29 + $0x370] sm:$0xff] }
  0x2e   : > { %424 = vst [vmem:[%s2080_s30 + $0xd8] sm:$0xff] %v423_v27  ;;  %v481_v56 = vld [vmem:[%s2075_s29 + $0x380] sm:$0xff]  ;;  %v483_v57 = vld [vmem:[%s2075_s29 + $0x390] sm:$0xff] }
  0x2f   : > { %426 = vst [vmem:[%s2080_s30 + $0xe0] sm:$0xff] %v425_v28  ;;  %v485_v58 = vld [vmem:[%s2075_s29 + $0x3a0] sm:$0xff]  ;;  %v487_v59 = vld [vmem:[%s2075_s29 + $0x3b0] sm:$0xff] }
  0x30   : > { %428 = vst [vmem:[%s2080_s30 + $0xe8] sm:$0xff] %v427_v29  ;;  %v489_v60 = vld [vmem:[%s2075_s29 + $0x3c0] sm:$0xff]  ;;  %v491_v61 = vld [vmem:[%s2075_s29 + $0x3d0] sm:$0xff] }
  0x31   : > { %430 = vst [vmem:[%s2080_s30 + $0xf0] sm:$0xff] %v429_v30  ;;  %v493_v62 = vld [vmem:[%s2075_s29 + $0x3e0] sm:$0xff]  ;;  %v495_v63 = vld [vmem:[%s2075_s29 + $0x3f0] sm:$0xff] }
  0x32   : > { %432 = vst [vmem:[%s2080_s30 + $0xf8] sm:$0xff] %v431_v31  ;;  %v497_v0 = vld [vmem:[%s2075_s29 + $0x400] sm:$0xff]  ;;  %v499_v1 = vld [vmem:[%s2075_s29 + $0x410] sm:$0xff] }
  0x33   : > { %434 = vst [vmem:[%s2080_s30 + $0x100] sm:$0xff] %v433_v32  ;;  %v501_v2 = vld [vmem:[%s2075_s29 + $0x420] sm:$0xff]  ;;  %v503_v3 = vld [vmem:[%s2075_s29 + $0x430] sm:$0xff] }
  0x34   : > { %436 = vst [vmem:[%s2080_s30 + $0x108] sm:$0xff] %v435_v33  ;;  %v505_v4 = vld [vmem:[%s2075_s29 + $0x440] sm:$0xff]  ;;  %v507_v5 = vld [vmem:[%s2075_s29 + $0x450] sm:$0xff] }
  0x35   : > { %438 = vst [vmem:[%s2080_s30 + $0x110] sm:$0xff] %v437_v34  ;;  %v509_v6 = vld [vmem:[%s2075_s29 + $0x460] sm:$0xff]  ;;  %v511_v7 = vld [vmem:[%s2075_s29 + $0x470] sm:$0xff] }
  0x36   : > { %440 = vst [vmem:[%s2080_s30 + $0x118] sm:$0xff] %v439_v35  ;;  %v513_v8 = vld [vmem:[%s2075_s29 + $0x480] sm:$0xff]  ;;  %v515_v9 = vld [vmem:[%s2075_s29 + $0x490] sm:$0xff] }
  0x37   : > { %442 = vst [vmem:[%s2080_s30 + $0x120] sm:$0xff] %v441_v36  ;;  %v517_v10 = vld [vmem:[%s2075_s29 + $0x4a0] sm:$0xff]  ;;  %v519_v11 = vld [vmem:[%s2075_s29 + $0x4b0] sm:$0xff] }
  0x38   : > { %444 = vst [vmem:[%s2080_s30 + $0x128] sm:$0xff] %v443_v37  ;;  %v521_v12 = vld [vmem:[%s2075_s29 + $0x4c0] sm:$0xff]  ;;  %v523_v13 = vld [vmem:[%s2075_s29 + $0x4d0] sm:$0xff] }
  0x39   : > { %446 = vst [vmem:[%s2080_s30 + $0x130] sm:$0xff] %v445_v38  ;;  %v525_v14 = vld [vmem:[%s2075_s29 + $0x4e0] sm:$0xff]  ;;  %v527_v15 = vld [vmem:[%s2075_s29 + $0x4f0] sm:$0xff] }
  0x3a   : > { %448 = vst [vmem:[%s2080_s30 + $0x138] sm:$0xff] %v447_v39  ;;  %v529_v16 = vld [vmem:[%s2075_s29 + $0x500] sm:$0xff]  ;;  %v531_v17 = vld [vmem:[%s2075_s29 + $0x510] sm:$0xff] }
  0x3b   : > { %450 = vst [vmem:[%s2080_s30 + $0x140] sm:$0xff] %v449_v40  ;;  %v533_v18 = vld [vmem:[%s2075_s29 + $0x520] sm:$0xff]  ;;  %v535_v19 = vld [vmem:[%s2075_s29 + $0x530] sm:$0xff] }
  0x3c   : > { %452 = vst [vmem:[%s2080_s30 + $0x148] sm:$0xff] %v451_v41  ;;  %v537_v20 = vld [vmem:[%s2075_s29 + $0x540] sm:$0xff]  ;;  %v539_v21 = vld [vmem:[%s2075_s29 + $0x550] sm:$0xff] }
  0x3d   : > { %454 = vst [vmem:[%s2080_s30 + $0x150] sm:$0xff] %v453_v42  ;;  %v541_v22 = vld [vmem:[%s2075_s29 + $0x560] sm:$0xff]  ;;  %v543_v23 = vld [vmem:[%s2075_s29 + $0x570] sm:$0xff] }
  0x3e   : > { %456 = vst [vmem:[%s2080_s30 + $0x158] sm:$0xff] %v455_v43  ;;  %v545_v24 = vld [vmem:[%s2075_s29 + $0x580] sm:$0xff]  ;;  %v547_v25 = vld [vmem:[%s2075_s29 + $0x590] sm:$0xff] }
  0x3f   : > { %458 = vst [vmem:[%s2080_s30 + $0x160] sm:$0xff] %v457_v44 }
  0x40   : > { %460 = vst [vmem:[%s2080_s30 + $0x168] sm:$0xff] %v459_v45 }
  0x41   : > { %462 = vst [vmem:[%s2080_s30 + $0x170] sm:$0xff] %v461_v46 }
  0x42   : > { %464 = vst [vmem:[%s2080_s30 + $0x178] sm:$0xff] %v463_v47 }
  0x43   : > { %466 = vst [vmem:[%s2080_s30 + $0x180] sm:$0xff] %v465_v48 }
  0x44   : > { %468 = vst [vmem:[%s2080_s30 + $0x188] sm:$0xff] %v467_v49 }
  0x45   : > { %470 = vst [vmem:[%s2080_s30 + $0x190] sm:$0xff] %v469_v50 }
  0x46   : > { %472 = vst [vmem:[%s2080_s30 + $0x198] sm:$0xff] %v471_v51 }
  0x47   : > { %474 = vst [vmem:[%s2080_s30 + $0x1a0] sm:$0xff] %v473_v52 }
  0x48   : > { %476 = vst [vmem:[%s2080_s30 + $0x1a8] sm:$0xff] %v475_v53 }
  0x49   : > { %478 = vst [vmem:[%s2080_s30 + $0x1b0] sm:$0xff] %v477_v54 }
  0x4a   : > { %480 = vst [vmem:[%s2080_s30 + $0x1b8] sm:$0xff] %v479_v55 }
  0x4b   : > { %482 = vst [vmem:[%s2080_s30 + $0x1c0] sm:$0xff] %v481_v56 }
  0x4c   : > { %484 = vst [vmem:[%s2080_s30 + $0x1c8] sm:$0xff] %v483_v57 }
  0x4d   : > { %486 = vst [vmem:[%s2080_s30 + $0x1d0] sm:$0xff] %v485_v58 }
  0x4e   : > { %488 = vst [vmem:[%s2080_s30 + $0x1d8] sm:$0xff] %v487_v59 }
  0x4f   : > { %490 = vst [vmem:[%s2080_s30 + $0x1e0] sm:$0xff] %v489_v60 }
  0x50   : > { %492 = vst [vmem:[%s2080_s30 + $0x1e8] sm:$0xff] %v491_v61 }
  0x51   : > { %494 = vst [vmem:[%s2080_s30 + $0x1f0] sm:$0xff] %v493_v62 }
  0x52   : > { %496 = vst [vmem:[%s2080_s30 + $0x1f8] sm:$0xff] %v495_v63 }
  0x53   : > { %498 = vst [vmem:[%s2080_s30 + $0x200] sm:$0xff] %v497_v0 }
  0x54   : > { %500 = vst [vmem:[%s2080_s30 + $0x208] sm:$0xff] %v499_v1 }
  0x55   : > { %502 = vst [vmem:[%s2080_s30 + $0x210] sm:$0xff] %v501_v2 }
  0x56   : > { %504 = vst [vmem:[%s2080_s30 + $0x218] sm:$0xff] %v503_v3 }
  0x57   : > { %506 = vst [vmem:[%s2080_s30 + $0x220] sm:$0xff] %v505_v4 }
  0x58   : > { %508 = vst [vmem:[%s2080_s30 + $0x228] sm:$0xff] %v507_v5 }
  0x59   : > { %510 = vst [vmem:[%s2080_s30 + $0x230] sm:$0xff] %v509_v6 }
  0x5a   : > { %512 = vst [vmem:[%s2080_s30 + $0x238] sm:$0xff] %v511_v7 }
  0x5b   : > { %514 = vst [vmem:[%s2080_s30 + $0x240] sm:$0xff] %v513_v8 }
  0x5c   : > { %516 = vst [vmem:[%s2080_s30 + $0x248] sm:$0xff] %v515_v9 }
  0x5d   : > { %518 = vst [vmem:[%s2080_s30 + $0x250] sm:$0xff] %v517_v10 }
  0x5e   : > { %520 = vst [vmem:[%s2080_s30 + $0x258] sm:$0xff] %v519_v11 }
  0x5f   : > { %522 = vst [vmem:[%s2080_s30 + $0x260] sm:$0xff] %v521_v12 }
  0x60   : > { %524 = vst [vmem:[%s2080_s30 + $0x268] sm:$0xff] %v523_v13 }
  0x61   : > { %526 = vst [vmem:[%s2080_s30 + $0x270] sm:$0xff] %v525_v14 }
  0x62   : > { %528 = vst [vmem:[%s2080_s30 + $0x278] sm:$0xff] %v527_v15 }
  0x63   : > { %530 = vst [vmem:[%s2080_s30 + $0x280] sm:$0xff] %v529_v16 }
  0x64   : > { %532 = vst [vmem:[%s2080_s30 + $0x288] sm:$0xff] %v531_v17 }
  0x65   : > { %534 = vst [vmem:[%s2080_s30 + $0x290] sm:$0xff] %v533_v18 }
  0x66   : > { %536 = vst [vmem:[%s2080_s30 + $0x298] sm:$0xff] %v535_v19 }
  0x67   : > { %538 = vst [vmem:[%s2080_s30 + $0x2a0] sm:$0xff] %v537_v20 }
  0x68   : > { %540 = vst [vmem:[%s2080_s30 + $0x2a8] sm:$0xff] %v539_v21 }
  0x69   : > { %542 = vst [vmem:[%s2080_s30 + $0x2b0] sm:$0xff] %v541_v22 }
  0x6a   : > { %544 = vst [vmem:[%s2080_s30 + $0x2b8] sm:$0xff] %v543_v23 }
  0x6b   : > { %546 = vst [vmem:[%s2080_s30 + $0x2c0] sm:$0xff] %v545_v24 }
  0x6c   : > { %548 = vst [vmem:[%s2080_s30 + $0x2c8] sm:$0xff] %v547_v25 }
  0x6d PF: > { %p1465_p7 = scmp.ge.s32.totalorder %s2007_s17, 1  ;;  %p553_p8 = scmp.lt.s32.totalorder %s2007_s17, 3 }
  0x6f   : > { %p554_p9 = pnand %p1465_p7, %p553_p8 }
  0x70   : > { %s560_s5 = sand.u32 (!%p554_p9), 1, %s1999_s15  }
  0x71   : > { %557 = sbr.rel (%p554_p9) target bundleno = 375 (0x177), region = 70 }
  0x72   : > { %s1957_s6 = smul.u32 (!%p554_p9), 720, %s560_s5 }
  0x74   : > { %s2264_s7 = scalar_lea.vmem (!%p554_p9), [#allocation2], %s1957_s6 }
  0x76   : > { %v1549_v26 = vld [vmem:[%s2264_s7 + $0x70] sm:$0xf]  ;;  %v1880_v27 = vld [vmem:[%s2264_s7 + $0x74] sm:$0xf0]  ;;  %v1541_v35 = vld [vmem:[%s2264_s7 + $0x60] sm:$0xf] }
  0x77   : > { %v1613_v28 = vld [vmem:[%s2264_s7 + $0xf0] sm:$0xf]  ;;  %v1550_v29 = vor.u32 %v1880_v27, %v1549_v26  ;;  %v1896_v30 = vld [vmem:[%s2264_s7 + $0xf4] sm:$0xf0]  ;;  %v1878_v36 = vld [vmem:[%s2264_s7 + $0x64] sm:$0xf0] }
  0x78   : > { %v1677_v31 = vld [vmem:[%s2264_s7 + $0x170] sm:$0xf]  ;;  %v1912_v32 = vld [vmem:[%s2264_s7 + $0x174] sm:$0xf0]  ;;  %v1614_v33 = vor.u32 %v1896_v30, %v1613_v28  ;;  %v1605_v37 = vld [vmem:[%s2264_s7 + $0xe0] sm:$0xf]  ;;  %v1542_v38 = vor.u32 %v1878_v36, %v1541_v35 }
  0x79   : > { %v1678_v34 = vor.u32 %v1912_v32, %v1677_v31  ;;  %1166 = vmatpush.bf16.msra.mxu0 %v1550_v29  ;;  %v1894_v39 = vld [vmem:[%s2264_s7 + $0xe4] sm:$0xf0]  ;;  %v1669_v40 = vld [vmem:[%s2264_s7 + $0x160] sm:$0xf]  ;;  %v1741_v44 = vld [vmem:[%s2264_s7 + $0x1f0] sm:$0xf] }
  0x7a   : > { %v1910_v41 = vld [vmem:[%s2264_s7 + $0x164] sm:$0xf0]  ;;  %1180 = vmatpush.bf16.msra.mxu1 %v1614_v33  ;;  %v1606_v42 = vor.u32 %v1894_v39, %v1605_v37  ;;  %v1928_v45 = vld [vmem:[%s2264_s7 + $0x1f4] sm:$0xf0]  ;;  %v1533_v46 = vld [vmem:[%s2264_s7 + $0x50] sm:$0xf] }
  0x7b   : > { %1194 = vmatpush.bf16.msra.mxu2 %v1678_v34  ;;  %v1670_v43 = vor.u32 %v1910_v41, %v1669_v40  ;;  %v1742_v47 = vor.u32 %v1928_v45, %v1741_v44  ;;  %v1876_v48 = vld [vmem:[%s2264_s7 + $0x54] sm:$0xf0]  ;;  %v1597_v49 = vld [vmem:[%s2264_s7 + $0xd0] sm:$0xf]  ;;  %v1733_v53 = vld [vmem:[%s2264_s7 + $0x1e0] sm:$0xf] }
  0x7c   : > { %v1892_v50 = vld [vmem:[%s2264_s7 + $0xd4] sm:$0xf0]  ;;  %v1661_v51 = vld [vmem:[%s2264_s7 + $0x150] sm:$0xf]  ;;  %v1534_v54 = vor.u32 %v1876_v48, %v1533_v46  ;;  %v1926_v55 = vld [vmem:[%s2264_s7 + $0x1e4] sm:$0xf0] }
  0x7d   : > { %v1908_v52 = vld [vmem:[%s2264_s7 + $0x154] sm:$0xf0]  ;;  %1167 = vmatpush.bf16.msra.mxu0 %v1542_v38  ;;  %1208 = vmatpush.bf16.msra.mxu3 %v1742_v47  ;;  %v1525_v56 = vld [vmem:[%s2264_s7 + $0x40] sm:$0xf]  ;;  %v1874_v57 = vld [vmem:[%s2264_s7 + $0x44] sm:$0xf0]  ;;  %v1598_v58 = vor.u32 %v1892_v50, %v1597_v49  ;;  %v1734_v60 = vor.u32 %v1926_v55, %v1733_v53 }
  0x7e   : > { %1181 = vmatpush.bf16.msra.mxu1 %v1606_v42  ;;  %v1662_v59 = vor.u32 %v1908_v52, %v1661_v51  ;;  %v1589_v61 = vld [vmem:[%s2264_s7 + $0xc0] sm:$0xf]  ;;  %v1890_v62 = vld [vmem:[%s2264_s7 + $0xc4] sm:$0xf0]  ;;  %v1725_v1 = vld [vmem:[%s2264_s7 + $0x1d0] sm:$0xf]  ;;  %v1526_v3 = vor.u32 %v1874_v57, %v1525_v56 }
  0x7f   : > { %1195 = vmatpush.bf16.msra.mxu2 %v1670_v43  ;;  %v1653_v63 = vld [vmem:[%s2264_s7 + $0x140] sm:$0xf]  ;;  %v1906_v0 = vld [vmem:[%s2264_s7 + $0x144] sm:$0xf0]  ;;  %v1924_v2 = vld [vmem:[%s2264_s7 + $0x1d4] sm:$0xf0]  ;;  %v1590_v7 = vor.u32 %v1890_v62, %v1589_v61 }
  0x80   : > { %v1726_v4 = vor.u32 %v1924_v2, %v1725_v1  ;;  %v1517_v5 = vld [vmem:[%s2264_s7 + $0x30] sm:$0xf]  ;;  %v1872_v6 = vld [vmem:[%s2264_s7 + $0x34] sm:$0xf0]  ;;  %v1654_v8 = vor.u32 %v1906_v0, %v1653_v63  ;;  %v1717_v10 = vld [vmem:[%s2264_s7 + $0x1c0] sm:$0xf] }
  0x81   : > { %1168 = vmatpush.bf16.msra.mxu0 %v1534_v54  ;;  %1209 = vmatpush.bf16.msra.mxu3 %v1734_v60  ;;  %v1581_v9 = vld [vmem:[%s2264_s7 + $0xb0] sm:$0xf]  ;;  %v1922_v11 = vld [vmem:[%s2264_s7 + $0x1c4] sm:$0xf0]  ;;  %v1888_v12 = vld [vmem:[%s2264_s7 + $0xb4] sm:$0xf0]  ;;  %v1518_v15 = vor.u32 %v1872_v6, %v1517_v5 }
  0x82   : > { %1182 = vmatpush.bf16.msra.mxu1 %v1598_v58  ;;  %v1645_v13 = vld [vmem:[%s2264_s7 + $0x130] sm:$0xf]  ;;  %v1904_v14 = vld [vmem:[%s2264_s7 + $0x134] sm:$0xf0]  ;;  %v1718_v16 = vor.u32 %v1922_v11, %v1717_v10  ;;  %v1509_v17 = vld [vmem:[%s2264_s7 + $0x20] sm:$0xf]  ;;  %v1582_v19 = vor.u32 %v1888_v12, %v1581_v9 }
  0x83   : > { %1196 = vmatpush.bf16.msra.mxu2 %v1662_v59  ;;  %v1870_v18 = vld [vmem:[%s2264_s7 + $0x24] sm:$0xf0]  ;;  %v1646_v20 = vor.u32 %v1904_v14, %v1645_v13  ;;  %v1573_v21 = vld [vmem:[%s2264_s7 + $0xa0] sm:$0xf]  ;;  %v1709_v22 = vld [vmem:[%s2264_s7 + $0x1b0] sm:$0xf] }
  0x84   : > { %v1920_v23 = vld [vmem:[%s2264_s7 + $0x1b4] sm:$0xf0]  ;;  %v1886_v24 = vld [vmem:[%s2264_s7 + $0xa4] sm:$0xf0]  ;;  %v1637_v25 = vld [vmem:[%s2264_s7 + $0x120] sm:$0xf]  ;;  %v1510_v27 = vor.u32 %v1870_v18, %v1509_v17 }
  0x85   : > { %1169 = vmatpush.bf16.msra.mxu0 %v1526_v3  ;;  %1210 = vmatpush.bf16.msra.mxu3 %v1726_v4  ;;  %v1902_v26 = vld [vmem:[%s2264_s7 + $0x124] sm:$0xf0]  ;;  %v1710_v28 = vor.u32 %v1920_v23, %v1709_v22  ;;  %v1501_v29 = vld [vmem:[%s2264_s7 + $0x10] sm:$0xf]  ;;  %v1868_v30 = vld [vmem:[%s2264_s7 + $0x14] sm:$0xf0]  ;;  %v1574_v31 = vor.u32 %v1886_v24, %v1573_v21 }
  0x86   : > { %1183 = vmatpush.bf16.msra.mxu1 %v1590_v7  ;;  %v1638_v32 = vor.u32 %v1902_v26, %v1637_v25  ;;  %v1565_v33 = vld [vmem:[%s2264_s7 + $0x90] sm:$0xf]  ;;  %v1701_v34 = vld [vmem:[%s2264_s7 + $0x1a0] sm:$0xf]  ;;  %v1918_v35 = vld [vmem:[%s2264_s7 + $0x1a4] sm:$0xf0]  ;;  %v1502_v39 = vor.u32 %v1868_v30, %v1501_v29 }
  0x87   : > { %1197 = vmatpush.bf16.msra.mxu2 %v1654_v8  ;;  %v1884_v36 = vld [vmem:[%s2264_s7 + $0x94] sm:$0xf0]  ;;  %v1629_v37 = vld [vmem:[%s2264_s7 + $0x110] sm:$0xf]  ;;  %v1702_v40 = vor.u32 %v1918_v35, %v1701_v34  ;;  %v1493_v41 = vld [vmem:[%s2264_s7] sm:$0xf] }
  0x88   : > { %v1900_v38 = vld [vmem:[%s2264_s7 + $0x114] sm:$0xf0]  ;;  %v1866_v42 = vld [vmem:[%s2264_s7 + $0x4] sm:$0xf0]  ;;  %v1557_v43 = vld [vmem:[%s2264_s7 + $0x80] sm:$0xf]  ;;  %v1566_v44 = vor.u32 %v1884_v36, %v1565_v33 }
  0x89   : > { %1170 = vmatpush.bf16.msra.mxu0 %v1518_v15  ;;  %1211 = vmatpush.bf16.msra.mxu3 %v1718_v16  ;;  %v1630_v45 = vor.u32 %v1900_v38, %v1629_v37  ;;  %v1882_v46 = vld [vmem:[%s2264_s7 + $0x84] sm:$0xf0]  ;;  %v1693_v47 = vld [vmem:[%s2264_s7 + $0x190] sm:$0xf]  ;;  %v1916_v48 = vld [vmem:[%s2264_s7 + $0x194] sm:$0xf0]  ;;  %v1494_v55 = vor.u32 %v1866_v42, %v1493_v41 }
  0x8a   : > { %1184 = vmatpush.bf16.msra.mxu1 %v1582_v19  ;;  %v1621_v49 = vld [vmem:[%s2264_s7 + $0x100] sm:$0xf]  ;;  %v1898_v50 = vld [vmem:[%s2264_s7 + $0x104] sm:$0xf0]  ;;  %v1805_v51 = vld [vmem:[%s2264_s7 + $0x270] sm:$0xf]  ;;  %v1694_v56 = vor.u32 %v1916_v48, %v1693_v47  ;;  %v1558_v59 = vor.u32 %v1882_v46, %v1557_v43 }
  0x8b   : > { %1198 = vmatpush.bf16.msra.mxu2 %v1646_v20  ;;  %v1944_v52 = vld [vmem:[%s2264_s7 + $0x274] sm:$0xf0]  ;;  %v1845_v53 = vld [vmem:[%s2264_s7 + $0x2c0] sm:$0xf]  ;;  %v1954_v54 = vld [vmem:[%s2264_s7 + $0x2c4] sm:$0xf0]  ;;  %v1622_v60 = vor.u32 %v1898_v50, %v1621_v49 }
  0x8c   : > { %v1879_v57 = vld [vmem:[%s2264_s7 + $0x74] sm:$0xf]  ;;  %v1551_v58 = vld [vmem:[%s2264_s7 + $0x78] sm:$0xf0]  ;;  %v1685_v61 = vld [vmem:[%s2264_s7 + $0x180] sm:$0xf]  ;;  %v1806_v0 = vor.u32 %v1944_v52, %v1805_v51  ;;  %v1846_v1 = vor.u32 %v1954_v54, %v1845_v53 }
  0x8d   : > { %1171 = vmatpush.bf16.msra.mxu0 %v1510_v27  ;;  %1212 = vmatpush.bf16.msra.mxu3 %v1710_v28  ;;  %v1914_v62 = vld [vmem:[%s2264_s7 + $0x184] sm:$0xf0]  ;;  %v1797_v63 = vld [vmem:[%s2264_s7 + $0x260] sm:$0xf]  ;;  %v1895_v3 = vld [vmem:[%s2264_s7 + $0xf4] sm:$0xf]  ;;  %v1554_v5 = vor.u32 %v1879_v57, %v1551_v58 }
  0x8e   : > { %1185 = vmatpush.bf16.msra.mxu1 %v1574_v31  ;;  %v1942_v2 = vld [vmem:[%s2264_s7 + $0x264] sm:$0xf0]  ;;  %v1615_v4 = vld [vmem:[%s2264_s7 + $0xf8] sm:$0xf0]  ;;  %v1837_v6 = vld [vmem:[%s2264_s7 + $0x2b0] sm:$0xf]  ;;  %v1686_v9 = vor.u32 %v1914_v62, %v1685_v61 }
  0x8f   : > { %1199 = vmatpush.bf16.msra.mxu2 %v1638_v32  ;;  %v1952_v7 = vld [vmem:[%s2264_s7 + $0x2b4] sm:$0xf0]  ;;  %v1877_v8 = vld [vmem:[%s2264_s7 + $0x64] sm:$0xf]  ;;  %v1543_v10 = vld [vmem:[%s2264_s7 + $0x68] sm:$0xf0]  ;;  %v1618_v13 = vor.u32 %v1895_v3, %v1615_v4  ;;  %v1798_v17 = vor.u32 %v1942_v2, %v1797_v63 }
  0x90   : > { %v1469_v11 = vld [vmem:[%s2550_s1] sm:$0xf]  ;;  %v1862_v12 = vld [vmem:[%s2550_s1 + $0x14] sm:$0xf0]  ;;  %v1859_v15 = vld [vmem:[%s2550_s1 + $0x4] sm:$0xf]  ;;  %v1838_v18 = vor.u32 %v1952_v7, %v1837_v6  ;;  %v1546_v23 = vor.u32 %v1877_v8, %v1543_v10 }
  0x91   : > { %1172 = vmatpush.bf16.msra.mxu0 %v1502_v39  ;;  %1213 = vmatpush.bf16.msra.mxu3 %v1702_v40  ;;  %v2350_v14 = vor.u32 %v1862_v12, %v1469_v11  ;;  %v1471_v16 = vld [vmem:[%s2550_s1 + $0x18] sm:$0xf0]  ;;  %v1789_v19 = vld [vmem:[%s2264_s7 + $0x250] sm:$0xf]  ;;  %v1893_v20 = vld [vmem:[%s2264_s7 + $0xe4] sm:$0xf] }
  0x92   : > { %1186 = vmatpush.bf16.msra.mxu1 %v1566_v44  ;;  %v1607_v21 = vld [vmem:[%s2264_s7 + $0xe8] sm:$0xf0]  ;;  %v2361_v22 = vor.u32 %v1859_v15, %v1471_v16  ;;  %v1940_v24 = vld [vmem:[%s2264_s7 + $0x254] sm:$0xf0]  ;;  %v1829_v25 = vld [vmem:[%s2264_s7 + $0x2a0] sm:$0xf] }
  0x93   : > { %1200 = vmatpush.bf16.msra.mxu2 %v1630_v45  ;;  %v1950_v26 = vld [vmem:[%s2264_s7 + $0x2a4] sm:$0xf0]  ;;  %v1875_v27 = vld [vmem:[%s2264_s7 + $0x54] sm:$0xf]  ;;  %v1535_v28 = vld [vmem:[%s2264_s7 + $0x58] sm:$0xf0]  ;;  %v1610_v29 = vor.u32 %v1893_v20, %v1607_v21  ;;  %v1790_v34 = vor.u32 %v1940_v24, %v1789_v19 }
  0x94   : > { %v1781_v30 = vld [vmem:[%s2264_s7 + $0x240] sm:$0xf]  ;;  %v1477_v31 = vld [vmem:[%s2550_s1 + $0x8] sm:$0xf]  ;;  %v1860_v33 = vld [vmem:[%s2550_s1 + $0xc] sm:$0xf]  ;;  %v1830_v35 = vor.u32 %v1950_v26, %v1829_v25  ;;  %v1538_v40 = vor.u32 %v1875_v27, %v1535_v28 }
  0x95   : > { %1173 = vmatpush.bf16.msra.mxu0 %v1494_v55  ;;  %1214 = vmatpush.bf16.msra.mxu3 %v1694_v56  ;;  %v1863_v32 = vld [vmem:[%s2550_s1 + $0x1c] sm:$0xf0]  ;;  %v1891_v36 = vld [vmem:[%s2264_s7 + $0xd4] sm:$0xf]  ;;  %v1599_v37 = vld [vmem:[%s2264_s7 + $0xd8] sm:$0xf0] }
  0x96   : > { %1187 = vmatpush.bf16.msra.mxu1 %v1558_v59  ;;  %v2382_v38 = vor.u32 %v1863_v32, %v1477_v31  ;;  %v1479_v39 = vld [vmem:[%s2550_s1 + $0x20] sm:$0xf0]  ;;  %v1938_v41 = vld [vmem:[%s2264_s7 + $0x244] sm:$0xf0]  ;;  %v1821_v42 = vld [vmem:[%s2264_s7 + $0x290] sm:$0xf]  ;;  %v1602_v47 = vor.u32 %v1891_v36, %v1599_v37 }
  0x97   : > { %1201 = vmatpush.bf16.msra.mxu2 %v1622_v60  ;;  %v1948_v43 = vld [vmem:[%s2264_s7 + $0x294] sm:$0xf0]  ;;  %v2390_v44 = vor.u32 %v1860_v33, %v1479_v39  ;;  %v1873_v45 = vld [vmem:[%s2264_s7 + $0x44] sm:$0xf]  ;;  %v1527_v46 = vld [vmem:[%s2264_s7 + $0x48] sm:$0xf0]  ;;  %v1782_v49 = vor.u32 %v1938_v41, %v1781_v30 }
  0x98   : > { %1174 = vmatmul.bf16.vlgmr.msra.gmra.mxu0 %v2350_v14  ;;  %v1773_v48 = vld [vmem:[%s2264_s7 + $0x230] sm:$0xf]  ;;  %v1822_v50 = vor.u32 %v1948_v43, %v1821_v42  ;;  %v1936_v51 = vld [vmem:[%s2264_s7 + $0x234] sm:$0xf0]  ;;  %v1889_v52 = vld [vmem:[%s2264_s7 + $0xc4] sm:$0xf]  ;;  %v1530_v54 = vor.u32 %v1873_v45, %v1527_v46 }
  0x99   : > { %1222 = vmatpush.bf16.msrb.mxu0 %v1806_v0  ;;  %1215 = vmatpush.bf16.msra.mxu3 %v1686_v9  ;;  %v1591_v53 = vld [vmem:[%s2264_s7 + $0xc8] sm:$0xf0]  ;;  %v1813_v55 = vld [vmem:[%s2264_s7 + $0x280] sm:$0xf]  ;;  %v1946_v56 = vld [vmem:[%s2264_s7 + $0x284] sm:$0xf0]  ;;  %v1774_v63 = vor.u32 %v1936_v51, %v1773_v48 }
  0x9a   : > { %1239 = vmatpush.bf16.msrb.mxu1 %v1846_v1  ;;  %1202 = vmatmul.bf16.vlgmr.msra.gmra.mxu2 %v2382_v38  ;;  %v1871_v57 = vld [vmem:[%s2264_s7 + $0x34] sm:$0xf]  ;;  %v1519_v58 = vld [vmem:[%s2264_s7 + $0x38] sm:$0xf0]  ;;  %v1594_v61 = vor.u32 %v1889_v52, %v1591_v53  ;;  %v1765_v62 = vld [vmem:[%s2264_s7 + $0x220] sm:$0xf]  ;;  %v1814_v0 = vor.u32 %v1946_v56, %v1813_v55 }
  0x9b   : > { %1250 = vmatpush.bf16.msrb.mxu2 %v1554_v5  ;;  %1188 = vmatmul.bf16.vlgmr.msra.gmra.mxu1 %v2361_v22  ;;  %v1911_v59 = vld [vmem:[%s2264_s7 + $0x174] sm:$0xf]  ;;  %v1679_v60 = vld [vmem:[%s2264_s7 + $0x178] sm:$0xf0]  ;;  %v1934_v1 = vld [vmem:[%s2264_s7 + $0x224] sm:$0xf0]  ;;  %v1522_v4 = vor.u32 %v1871_v57, %v1519_v58 }
  0x9c   : > { %1216 = vmatmul.bf16.vlgmr.msra.gmra.mxu3 %v2390_v44  ;;  %v1887_v2 = vld [vmem:[%s2264_s7 + $0xb4] sm:$0xf]  ;;  %v1583_v3 = vld [vmem:[%s2264_s7 + $0xb8] sm:$0xf0]  ;;  %v1682_v5 = vor.u32 %v1911_v59, %v1679_v60  ;;  %v1869_v6 = vld [vmem:[%s2264_s7 + $0x24] sm:$0xf]  ;;  %v1766_v15 = vor.u32 %v1934_v1, %v1765_v62 }
  0x9d   : > { %1264 = vmatpush.bf16.msrb.mxu3 %v1618_v13  ;;  %1223 = vmatpush.bf16.msrb.mxu0 %v1798_v17  ;;  %v1511_v7 = vld [vmem:[%s2264_s7 + $0x28] sm:$0xf0]  ;;  %v1909_v8 = vld [vmem:[%s2264_s7 + $0x164] sm:$0xf]  ;;  %v1586_v12 = vor.u32 %v1887_v2, %v1583_v3  ;;  %vm1162_vm0 = vcmask 654336   ;;  %v2009_v27 = vmov 0  }
  0x9e   : > { %1240 = vmatpush.bf16.msrb.mxu1 %v1838_v18  ;;  %v1671_v9 = vld [vmem:[%s2264_s7 + $0x168] sm:$0xf0]  ;;  %v1861_v10 = vld [vmem:[%s2550_s1 + $0x14] sm:$0xf]  ;;  %v1514_v18 = vor.u32 %v1869_v6, %v1511_v7  ;;  %v1757_v20 = vld [vmem:[%s2264_s7 + $0x210] sm:$0xf]  ;;  %1983 = vset.pattern.permute.xlu0 %v2009_v27 }
  0x9f   : > { %1251 = vmatpush.bf16.msrb.mxu2 %v1546_v23  ;;  %v1487_v11 = vld [vmem:[%s2550_s1 + $0x28] sm:$0xf0]  ;;  %v1885_v16 = vld [vmem:[%s2264_s7 + $0xa4] sm:$0xf]  ;;  %v1674_v19 = vor.u32 %v1909_v8, %v1671_v9  ;;  %v1932_v21 = vld [vmem:[%s2264_s7 + $0x214] sm:$0xf0]  ;;  %1984 = vset.pattern.permute.xlu1 %v2009_v27 }
  0xa0   : > { %v2420_v13 = vor.u32 %v1861_v10, %v1487_v11  ;;  %v1575_v17 = vld [vmem:[%s2264_s7 + $0xa8] sm:$0xf0]  ;;  %v1867_v23 = vld [vmem:[%s2264_s7 + $0x14] sm:$0xf]  ;;  %v1503_v24 = vld [vmem:[%s2264_s7 + $0x18] sm:$0xf0]  ;;  %v1758_v31 = vor.u32 %v1932_v21, %v1757_v20 }
  0xa1   : > { %1265 = vmatpush.bf16.msrb.mxu3 %v1610_v29  ;;  %1224 = vmatpush.bf16.msrb.mxu0 %v1790_v34  ;;  %v1907_v25 = vld [vmem:[%s2264_s7 + $0x154] sm:$0xf]  ;;  %v1663_v26 = vld [vmem:[%s2264_s7 + $0x158] sm:$0xf0]  ;;  %v1578_v28 = vor.u32 %v1885_v16, %v1575_v17  ;;  %v1749_v29 = vld [vmem:[%s2264_s7 + $0x200] sm:$0xf] }
  0xa2   : > { %1241 = vmatpush.bf16.msrb.mxu1 %v1830_v35  ;;  %v1930_v30 = vld [vmem:[%s2264_s7 + $0x204] sm:$0xf0]  ;;  %v1865_v32 = vld [vmem:[%s2264_s7 + $0x4] sm:$0xf]  ;;  %v1883_v33 = vld [vmem:[%s2264_s7 + $0x94] sm:$0xf]  ;;  %v1506_v35 = vor.u32 %v1867_v23, %v1503_v24  ;;  %v1666_v36 = vor.u32 %v1907_v25, %v1663_v26 }
  0xa3   : > { %1252 = vmatpush.bf16.msrb.mxu2 %v1538_v40  ;;  %v1567_v34 = vld [vmem:[%s2264_s7 + $0x98] sm:$0xf0]  ;;  %v1495_v37 = vld [vmem:[%s2264_s7 + $0x8] sm:$0xf0]  ;;  %v1905_v39 = vld [vmem:[%s2264_s7 + $0x144] sm:$0xf] }
  0xa4   : > { %v1655_v40 = vld [vmem:[%s2264_s7 + $0x148] sm:$0xf0]  ;;  %v1927_v41 = vld [vmem:[%s2264_s7 + $0x1f4] sm:$0xf]  ;;  %v1743_v42 = vld [vmem:[%s2264_s7 + $0x1f8] sm:$0xf0]  ;;  %v1570_v45 = vor.u32 %v1883_v33, %v1567_v34  ;;  %v1498_v53 = vor.u32 %v1865_v32, %v1495_v37 }
  0xa5   : > { %1266 = vmatpush.bf16.msrb.mxu3 %v1602_v47  ;;  %1225 = vmatpush.bf16.msrb.mxu0 %v1782_v49  ;;  %v1943_v43 = vld [vmem:[%s2264_s7 + $0x274] sm:$0xf]  ;;  %v1807_v46 = vld [vmem:[%s2264_s7 + $0x278] sm:$0xf0]  ;;  %v1485_v47 = vld [vmem:[%s2550_s1 + $0x10] sm:$0xf]  ;;  %v1750_v49 = vor.u32 %v1930_v30, %v1749_v29  ;;  %v1746_v58 = vor.u32 %v1927_v41, %v1743_v42 }
  0xa6   : > { %1242 = vmatpush.bf16.msrb.mxu1 %v1822_v50  ;;  %v1864_v48 = vld [vmem:[%s2550_s1 + $0x24] sm:$0xf0]  ;;  %v1881_v50 = vld [vmem:[%s2264_s7 + $0x84] sm:$0xf]  ;;  %v1559_v51 = vld [vmem:[%s2264_s7 + $0x88] sm:$0xf0]  ;;  %v1810_v59 = vor.u32 %v1943_v43, %v1807_v46 }
  0xa7   : > { %1253 = vmatpush.bf16.msrb.mxu2 %v1530_v54  ;;  %v1903_v52 = vld [vmem:[%s2264_s7 + $0x134] sm:$0xf]  ;;  %v1658_v54 = vor.u32 %v1905_v39, %v1655_v40  ;;  %v1647_v55 = vld [vmem:[%s2264_s7 + $0x138] sm:$0xf0]  ;;  %v1953_v56 = vld [vmem:[%s2264_s7 + $0x2c4] sm:$0xf] }
  0xa8   : > { %v1847_v57 = vld [vmem:[%s2264_s7 + $0x2c8] sm:$0xf0]  ;;  %v1925_v60 = vld [vmem:[%s2264_s7 + $0x1e4] sm:$0xf]  ;;  %v1951_v6 = vld [vmem:[%s2264_s7 + $0x2b4] sm:$0xf] }
  0xa9   : > { %1267 = vmatpush.bf16.msrb.mxu3 %v1594_v61  ;;  %1226 = vmatpush.bf16.msrb.mxu0 %v1774_v63  ;;  %v1735_v61 = vld [vmem:[%s2264_s7 + $0x1e8] sm:$0xf0]  ;;  %v1334_v62 = vld [vmem:[%s2551_s2] sm:$0xff]  ;;  %v2461_v63 = vor.u32 %v1864_v48, %v1485_v47  ;;  %v1839_v7 = vld [vmem:[%s2264_s7 + $0x2b8] sm:$0xf0]  ;;  %s1955_s15 = sshll.u32 (%p2065_p5), %s1459_s18, 4 }
  0xaa   : > { %1243 = vmatpush.bf16.msrb.mxu1 %v1814_v0  ;;  %v1562_v0 = vor.u32 %v1881_v50, %v1559_v51  ;;  %v1941_v1 = vld [vmem:[%s2264_s7 + $0x264] sm:$0xf]  ;;  %v1799_v2 = vld [vmem:[%s2264_s7 + $0x268] sm:$0xf0]  ;;  %1338 = vperm.xlu0 %1983, %v1334_v62   ;;  %v1738_v8 = vor.u32 %v1925_v60, %v1735_v61  ;;  %v1939_v16 = vld [vmem:[%s2264_s7 + $0x254] sm:$0xf]  ;;  %s1379_s8 = scalar_lea.vmem (%p2065_p5), %s2553_s4, %s1955_s15 }
  0xab   : > { %1254 = vmatpush.bf16.msrb.mxu2 %v1522_v4  ;;  %v1350_v3 = vld [vmem:[%s2552_s3] sm:$0xff]  ;;  %v1850_v4 = vor.u32 %v1953_v56, %v1847_v57  ;;  %v1802_v9 = vor.u32 %v1941_v1, %v1799_v2  ;;  %v1639_v11 = vld [vmem:[%s2264_s7 + $0x128] sm:$0xf0]  ;;  %v1791_v17 = vld [vmem:[%s2264_s7 + $0x258] sm:$0xf0] }
  0xac   : > { %1354 = vperm.xlu1 %1984, %v1350_v3   ;;  %v1901_v10 = vld [vmem:[%s2264_s7 + $0x124] sm:$0xf]  ;;  %v1831_v23 = vld [vmem:[%s2264_s7 + $0x2a8] sm:$0xf0]  ;;  %v1794_v25 = vor.u32 %v1939_v16, %v1791_v17  ;;  %v1899_v26 = vld [vmem:[%s2264_s7 + $0x114] sm:$0xf] }
  0xad   : > { %1268 = vmatpush.bf16.msrb.mxu3 %v1586_v12  ;;  %1851 = vmatmul.msk.bf16.vlgmr.msrb.gmra.mxu1 %vm1162_vm0, %v2420_v13  ;;  %v1923_v12 = vld [vmem:[%s2264_s7 + $0x1d4] sm:$0xf]  ;;  %v1642_v20 = vor.u32 %v1901_v10, %v1639_v11  ;;  %v1949_v21 = vld [vmem:[%s2264_s7 + $0x2a4] sm:$0xf]  ;;  %v1351_v24 = vld [vmem:[%s2552_s3 + $0x8] sm:$0xff] }
  0xae   : > { %1278 = vmatpush.bf16.msra.mxu1 %v1682_v5  ;;  %1227 = vmatpush.bf16.msrb.mxu0 %v1766_v15  ;;  %v1650_v5 = vor.u32 %v1903_v52, %v1647_v55  ;;  %v1727_v15 = vld [vmem:[%s2264_s7 + $0x1d8] sm:$0xf0]  ;;  %v1719_v29 = vld [vmem:[%s2264_s7 + $0x1c8] sm:$0xf0]  ;;  %v1937_v30 = vld [vmem:[%s2264_s7 + $0x244] sm:$0xf]  ;;  %v1834_v32 = vor.u32 %v1949_v21, %v1831_v23 }
  0xaf   : > { %1255 = vmatpush.bf16.msrb.mxu2 %v1514_v18  ;;  %v1842_v18 = vor.u32 %v1951_v6, %v1839_v7  ;;  %v1631_v27 = vld [vmem:[%s2264_s7 + $0x118] sm:$0xf0]  ;;  %v1947_v34 = vld [vmem:[%s2264_s7 + $0x294] sm:$0xf]  ;;  %v1897_v37 = vld [vmem:[%s2264_s7 + $0x104] sm:$0xf] }
  0xb0   : > { %v1634_v33 = vor.u32 %v1899_v26, %v1631_v27  ;;  %v1623_v39 = vld [vmem:[%s2264_s7 + $0x108] sm:$0xf0]  ;;  %v1919_v40 = vld [vmem:[%s2264_s7 + $0x1b4] sm:$0xf]  ;;  %v1711_v41 = vld [vmem:[%s2264_s7 + $0x1b8] sm:$0xf0] }
  0xb1   : > { %1269 = vmatpush.bf16.msrb.mxu3 %v1578_v28  ;;  %v1921_v28 = vld [vmem:[%s2264_s7 + $0x1c4] sm:$0xf]  ;;  %v1935_v42 = vld [vmem:[%s2264_s7 + $0x234] sm:$0xf]  ;;  %v1775_v43 = vld [vmem:[%s2264_s7 + $0x238] sm:$0xf0]  ;;  %v1626_v46 = vor.u32 %v1897_v37, %v1623_v39 }
  0xb2   : > { %1279 = vmatpush.bf16.msra.mxu1 %v1674_v19  ;;  %1228 = vmatpush.bf16.msrb.mxu0 %v1758_v31  ;;  %v1335_v19 = vld [vmem:[%s2551_s2 + $0x8] sm:$0xff]  ;;  %v1945_v47 = vld [vmem:[%s2264_s7 + $0x284] sm:$0xf]  ;;  %v1778_v50 = vor.u32 %v1935_v42, %v1775_v43  ;;  %v1931_v60 = vld [vmem:[%s2264_s7 + $0x214] sm:$0xf] }
  0xb3   : > { %1256 = vmatpush.bf16.msrb.mxu2 %v1506_v35  ;;  %v1783_v31 = vld [vmem:[%s2264_s7 + $0x248] sm:$0xf0]  ;;  %1343 = vperm.xlu0 %1983, %v1335_v19   ;;  %v1823_v35 = vld [vmem:[%s2264_s7 + $0x298] sm:$0xf0]  ;;  %v1917_v51 = vld [vmem:[%s2264_s7 + $0x1a4] sm:$0xf] }
  0xb4   : > { %1359 = vperm.xlu1 %1984, %v1351_v24   ;;  %v1815_v48 = vld [vmem:[%s2264_s7 + $0x288] sm:$0xf0]  ;;  %v1759_v61 = vld [vmem:[%s2264_s7 + $0x218] sm:$0xf0]  ;;  %v1913_v1 = vld [vmem:[%s2264_s7 + $0x184] sm:$0xf] }
  0xb5   : > { %1270 = vmatpush.bf16.msrb.mxu3 %v1570_v45  ;;  %v1826_v45 = vor.u32 %v1947_v34, %v1823_v35  ;;  %v1703_v52 = vld [vmem:[%s2264_s7 + $0x1a8] sm:$0xf0]  ;;  %v1818_v55 = vor.u32 %v1945_v47, %v1815_v48  ;;  %v1929_v3 = vld [vmem:[%s2264_s7 + $0x204] sm:$0xf] }
  0xb6   : > { %1280 = vmatpush.bf16.msra.mxu1 %v1666_v36  ;;  %1229 = vmatpush.bf16.msrb.mxu0 %v1750_v49  ;;  %v1786_v36 = vor.u32 %v1937_v30, %v1783_v31  ;;  %v1714_v49 = vor.u32 %v1919_v40, %v1711_v41  ;;  %v1706_v56 = vor.u32 %v1917_v51, %v1703_v52  ;;  %v1687_v2 = vld [vmem:[%s2264_s7 + $0x188] sm:$0xf0] }
  0xb7   : > { %1257 = vmatpush.bf16.msrb.mxu2 %v1498_v53  ;;  %v1933_v53 = vld [vmem:[%s2264_s7 + $0x224] sm:$0xf] }
  0xb9   : > { %1230 = vmatmul.bf16.vlgmr.msrb.gmra.mxu0 %v2461_v63  ;;  %1271 = vmatpush.bf16.msrb.mxu3 %v1562_v0  ;;  %v1762_v0 = vor.u32 %v1931_v60, %v1759_v61 }
  0xba   : > { %1281 = vmatpush.bf16.msra.mxu1 %v1658_v54  ;;  %1292 = vmatpush.bf16.msra.mxu0 %v1746_v58  ;;  %v1767_v54 = vld [vmem:[%s2264_s7 + $0x228] sm:$0xf0]  ;;  %v1915_v58 = vld [vmem:[%s2264_s7 + $0x194] sm:$0xf] }
  0xbb   : > { %1306 = vmatpush.bf16.msra.mxu2 %v1810_v59  ;;  %v1770_v57 = vor.u32 %v1933_v53, %v1767_v54  ;;  %v1695_v59 = vld [vmem:[%s2264_s7 + $0x198] sm:$0xf0] }
  0xbc   : > { %1258 = vmatmul.bf16.vlgmr.msrb.gmra.mxu2 %v2350_v14  ;;  %v1730_v14 = vor.u32 %v1923_v12, %v1727_v15  ;;  %1272 = vmatmul.bf16.vlgmr.msrb.gmra.mxu3 %v2361_v22  ;;  %v1722_v22 = vor.u32 %v1921_v28, %v1719_v29  ;;  %v1698_v62 = vor.u32 %v1915_v58, %v1695_v59 }
  0xbd   : > { %1323 = vmatpush.bf16.msra.mxu3 %v1850_v4  ;;  %v1751_v4 = vld [vmem:[%s2264_s7 + $0x208] sm:$0xf0]  ;;  %s1466_s7 = sshll.u32 %s560_s5, 5 }
  0xbe   : > { %1282 = vmatpush.bf16.msra.mxu1 %v1650_v5  ;;  %1293 = vmatpush.bf16.msra.mxu0 %v1738_v8  ;;  %v1690_v5 = vor.u32 %v1913_v1, %v1687_v2  ;;  %v1754_v6 = vor.u32 %v1929_v3, %v1751_v4  ;;  %s2522_s30 = scalar_lea.vmem [#allocation3], %s1466_s7 }
  0xbf   : > { %1307 = vmatpush.bf16.msra.mxu2 %v1802_v9 }
  0xc1   : > { %1324 = vmatpush.bf16.msra.mxu3 %v1842_v18 }
  0xc2   : > { %1283 = vmatpush.bf16.msra.mxu1 %v1642_v20  ;;  %1294 = vmatpush.bf16.msra.mxu0 %v1730_v14 }
  0xc3   : > { %1308 = vmatpush.bf16.msra.mxu2 %v1794_v25 }
  0xc5   : > { %1325 = vmatpush.bf16.msra.mxu3 %v1834_v32 }
  0xc6   : > { %1284 = vmatpush.bf16.msra.mxu1 %v1634_v33  ;;  %1295 = vmatpush.bf16.msra.mxu0 %v1722_v22 }
  0xc7   : > { %1309 = vmatpush.bf16.msra.mxu2 %v1786_v36 }
  0xc9   : > { %1326 = vmatpush.bf16.msra.mxu3 %v1826_v45 }
  0xca   : > { %1285 = vmatpush.bf16.msra.mxu1 %v1626_v46  ;;  %1296 = vmatpush.bf16.msra.mxu0 %v1714_v49 }
  0xcb   : > { %1310 = vmatpush.bf16.msra.mxu2 %v1778_v50 }
  0xcd   : > { %1286 = vmatmul.bf16.vlgmr.msra.gmra.mxu1 %v2382_v38  ;;  %1327 = vmatpush.bf16.msra.mxu3 %v1818_v55 }
  0xce   : > { %1297 = vmatpush.bf16.msra.mxu0 %v1706_v56 }
  0xcf   : > { %1311 = vmatpush.bf16.msra.mxu2 %v1770_v57 }
  0xd0   : > { %1852 = vmatmul.msk.bf16.vlgmr.msra.gmra.mxu3 %vm1162_vm0, %v2420_v13 }
  0xd2   : > { %1298 = vmatpush.bf16.msra.mxu0 %v1698_v62 }
  0xd3   : > { %1312 = vmatpush.bf16.msra.mxu2 %v1762_v0 }
  0xd6   : > { %1299 = vmatpush.bf16.msra.mxu0 %v1690_v5 }
  0xd7   : > { %1313 = vmatpush.bf16.msra.mxu2 %v1754_v6 }
  0xd9   : > { %1300 = vmatmul.bf16.vlgmr.msra.gmra.mxu0 %v2390_v44 }
  0xda   : > { %1314 = vmatmul.bf16.vlgmr.msra.gmra.mxu2 %v2461_v63 }
 0x115   : > { %v1175_v7 = vpop.f32.mrf.mxu0 }
 0x118   : > { %v1189_v38 = vpop.f32.mrf.mxu1 }
 0x119   : > { %v1190_v9 = vadd.f32 %v1189_v38, %v1175_v7 }
 0x11c   : > { %v1339_v18 = vpop.permute.xlu0 %1338 }
 0x11d   : > { %v1177_v10 = vpop.f32.mrf.mxu0  ;;  %v1203_v13 = vpop.f32.mrf.mxu2 }
 0x11e   : > { %v1204_v11 = vadd.f32 %v1203_v13, %v1190_v9  ;;  %v1355_v23 = vpop.permute.xlu1 %1354 }
 0x11f   : > { %v1217_v12 = vpop.f32.mrf.mxu3 }
 0x120   : > { %v1191_v8 = vpop.f32.mrf.mxu1  ;;  %v1218_v15 = vadd.f32 %v1217_v12, %v1204_v11 }
 0x121   : > { %v1192_v17 = vadd.f32 %v1191_v8, %v1177_v10 }
 0x125   : > { %v1205_v20 = vpop.f32.mrf.mxu2  ;;  %v1344_v30 = vpop.permute.xlu0 %1343 }
 0x126   : > { %v1206_v44 = vadd.f32 %v1205_v20, %v1192_v17  ;;  %v1360_v32 = vpop.permute.xlu1 %1359 }
 0x127   : > { %v1219_v63 = vpop.f32.mrf.mxu3 }
 0x128   : > { %v1220_v25 = vadd.f32 %v1219_v63, %v1206_v44 }
 0x12a   : > { %v1245_v16 = vpop.f32.mrf.mxu1 }
 0x132   : > { %v1247_v28 = vpop.f32.mrf.mxu1 }
 0x136   : > { %v1231_v19 = vpop.f32.mrf.mxu0 }
 0x137   : > { %v1232_v21 = vadd.f32 %v1231_v19, %v1218_v15 }
 0x139   : > { %v1246_v24 = vadd.f32 %v1245_v16, %v1232_v21 }
 0x13b   : > { %v1346_v14 = vmul.f32 %v1339_v18, %v1246_v24 }
 0x13d   : > { %v1362_v26 = vadd.f32 %v1355_v23, %v1346_v14 }
 0x13e   : > { %v1233_v27 = vpop.f32.mrf.mxu0 }
 0x13f   : > { %1366 = vst [vmem:[%s2522_s30] sm:$0xff] %v1362_v26  ;;  %v1234_v29 = vadd.f32 %v1233_v27, %v1220_v25  ;;  %v1259_v35 = vpop.f32.mrf.mxu2  ;;  %v1273_v22 = vpop.f32.mrf.mxu3 }
 0x140   : > { %v1274_v40 = vadd.f32 %v1273_v22, %v1259_v35 }
 0x141   : > { %v1248_v31 = vadd.f32 %v1247_v28, %v1234_v29 }
 0x143   : > { %v1348_v33 = vmul.f32 %v1344_v30, %v1248_v31 }
 0x145   : > { %v1364_v34 = vadd.f32 %v1360_v32, %v1348_v33 }
 0x146   : > { %v1392_v62 = vld [vmem:[%s2522_s30] sm:$0xff] (%p2065_p5) }
 0x147   : > { %1368 = vst [vmem:[%s2522_s30 + $0x10] sm:$0xff] %v1364_v34  ;;  %v1261_v36 = vpop.f32.mrf.mxu2  ;;  %v1275_v39 = vpop.f32.mrf.mxu3 }
 0x148   : > { %v1276_v49 = vadd.f32 %v1275_v39, %v1261_v36  ;;  %1393 = vst [vmem:[%s1379_s8] sm:$0xff] (%p2065_p5), %v1392_v62 }
 0x14a   : > { %v1287_v37 = vpop.f32.mrf.mxu1 }
 0x14b   : > { %v1288_v42 = vadd.f32 %v1287_v37, %v1274_v40 }
 0x14e   : > { %v1396_v1 = vld [vmem:[%s2522_s30 + $0x10] sm:$0xff] (%p2065_p5) }
 0x14f   : > { %1397 = vst [vmem:[%s1379_s8 + $0x20] sm:$0xff] (%p2065_p5), %v1396_v1 }
 0x152   : > { %v1289_v48 = vpop.f32.mrf.mxu1 }
 0x153   : > { %v1329_v45 = vpop.f32.mrf.mxu3  ;;  %v1290_v52 = vadd.f32 %v1289_v48, %v1276_v49 }
 0x156   : > { %v1301_v41 = vpop.f32.mrf.mxu0 }
 0x157   : > { %v1302_v43 = vadd.f32 %v1301_v41, %v1288_v42 }
 0x15b   : > { %v1331_v58 = vpop.f32.mrf.mxu3 }
 0x15d   : > { %v1315_v46 = vpop.f32.mrf.mxu2 }
 0x15e   : > { %v1316_v47 = vadd.f32 %v1315_v46, %v1302_v43  ;;  %v1303_v51 = vpop.f32.mrf.mxu0 }
 0x15f   : > { %v1304_v55 = vadd.f32 %v1303_v51, %v1290_v52 }
 0x160   : > { %v1330_v50 = vadd.f32 %v1329_v45, %v1316_v47 }
 0x162   : > { %v1347_v53 = vmul.f32 %v1339_v18, %v1330_v50 }
 0x164   : > { %v1363_v54 = vadd.f32 %v1355_v23, %v1347_v53 }
 0x165   : > { %v1317_v56 = vpop.f32.mrf.mxu2 }
 0x166   : > { %1367 = vst [vmem:[%s2522_s30 + $0x8] sm:$0xff] %v1363_v54  ;;  %v1318_v57 = vadd.f32 %v1317_v56, %v1304_v55 }
 0x168   : > { %v1332_v59 = vadd.f32 %v1331_v58, %v1318_v57 }
 0x16a   : > { %v1349_v60 = vmul.f32 %v1344_v30, %v1332_v59  ;;  %1376 = sbr.rel (!%p2065_p5) target bundleno = 375 (0x177), region = 78 }
 0x16c   : > { %v1365_v61 = vadd.f32 %v1360_v32, %v1349_v60 }
 0x16d   : > { %v1394_v0 = vld [vmem:[%s2522_s30 + $0x8] sm:$0xff] (%p2065_p5) }
 0x16e   : > { %1369 = vst [vmem:[%s2522_s30 + $0x18] sm:$0xff] %v1365_v61 }
 0x16f   : > { %1395 = vst [vmem:[%s1379_s8 + $0x8] sm:$0xff] %v1394_v0 }
 0x175   : > { %v1398_v2 = vld [vmem:[%s2522_s30 + $0x18] sm:$0xff] }
 0x176   : > { %1399 = vst [vmem:[%s1379_s8 + $0x28] sm:$0xff] %v1398_v2 }
 0x177 PF: > { %p11_p10 = scmp.ge.s32.totalorder %s2052_s19, 4   ;;  %s2555_s15 = smov %s2003_s16 }
 0x178   : > { %s2556_s16 = smov %s2063_s22  ;;  %s2557_s17 = smov %s2052_s19 }
 0x179   :  { %13 = sbr.rel (!%p11_p10) target bundleno = 2 (0x2), region = 132 }

</bundles_post_ra>
